<compile_context>
chip_gen: v5e
topology: v5e:2x2
jax: 0.10.0
libtpu: 0.0.40
codegen_flags: <defaults>
</compile_context>

<pallas_src>
import numpy as np
import jax
import jax.numpy as jnp
from jax import lax
from jax.experimental import pallas as pl
from jax.experimental.pallas import tpu as pltpu


def _upsample_conv_kernel(af_ref, b2_ref, wt_ref, b1_ref, x_ref, o_ref, y_ref):
    """One (batch, frame-block) step of fused x2-upsample + Conv2Plus1d.

    af_ref : (2*2*C*C*3,) SMEM   row-parity collapsed conv2d weights [s, dr, cm, ci, kw]
    b2_ref : (C,)         SMEM   conv2d bias
    wt_ref : (2*2*C*C,)   SMEM   frame-parity collapsed conv1d weights [p, dt, co, cm]
    b1_ref : (C,)         SMEM   conv1d bias
    x_ref  : (C, T+2, H+2, Wd+2) VMEM  width-doubled input, edge-padded along T,
                                       zero-padded along H/W; whole slab of batch n
    o_ref  : (C, 2*Jt, H, 2*Wd)  VMEM  output frames [2*j0, 2*j0 + 2*Jt); lane halves
                                       [0,Wd) / [Wd,2Wd) hold output rows 2m / 2m+1
    y_ref  : (Jt+2, 2, C, H, Wd) VMEM  scratch: conv2d result (both row parities)
                                       for input frames j0-1 .. j0+Jt
    """
    C, Tp, Hp, Wp = x_ref.shape
    H, Wd = Hp - 2, Wp - 2
    Jt = o_ref.shape[1] // 2
    F = y_ref.shape[0]                              # = Jt + 2

    j0 = pl.program_id(1) * Jt                      # first input frame of this block

    # ---- stage 1: spatial 3x3 conv, H/W-upsample folded by output-row parity ----
    # y[f, s, cm] = b2[cm] + sum_{dr,kw,ci} af[s,dr,cm,ci,kw] * xpad[ci, j0+f, s+dr:, kw:]
    def stage1(f, carry):
        acc = [[None] * C for _ in range(2)]        # [s][cm], each (H, Wd)
        for ci in range(C):
            fr = x_ref[ci, pl.ds(j0 + f, 1), :, :]  # (1, Hp, Wp) padded input frame
            for rr in range(3):                     # padded row offset (= s + dr)
                pairs = ([(0, 0)], [(0, 1), (1, 0)], [(1, 1)])[rr]
                for kw in range(3):
                    tap = fr[0, rr:rr + H, kw:kw + Wd]          # (H, Wd)
                    for (s, dr) in pairs:
                        for cm in range(C):
                            idx = (((s * 2 + dr) * C + cm) * C + ci) * 3 + kw
                            term = af_ref[idx] * tap
                            acc[s][cm] = term if acc[s][cm] is None else acc[s][cm] + term
        for s in range(2):
            for cm in range(C):
                y_ref[f, s, cm] = acc[s][cm] + b2_ref[cm]
        return carry

    lax.fori_loop(0, F, stage1, 0)

    # ---- stage 2: temporal conv, T-upsample + replicate pad folded by parity ----
    # output frame 2j+p uses y frames (j-1, j) for p=0 and (j, j+1) for p=1
    # (local y index o = 0/1/2 corresponds to original frame j-1/j/j+1).
    def stage2(jr, carry):
        acc = [[[None] * C for _ in range(2)] for _ in range(2)]    # [p][s][co]
        for s in range(2):
            for o in range(3):
                pairs = ([(0, 0)], [(0, 1), (1, 0)], [(1, 1)])[o]   # (p, dt) using this tap
                for cm in range(C):
                    tap = y_ref[jr + o, s, cm]                      # (H, Wd)
                    for (p, dt) in pairs:
                        for co in range(C):
                            widx = ((p * 2 + dt) * C + co) * C + cm
                            term = wt_ref[widx] * tap
                            acc[p][s][co] = term if acc[p][s][co] is None else acc[p][s][co] + term
        for p in range(2):
            lt = 2 * jr + p                         # frame index inside the output block
            for s in range(2):
                for co in range(C):
                    o_ref[co, lt, :, s * Wd:(s + 1) * Wd] = acc[p][s][co] + b1_ref[co]
        return carry

    lax.fori_loop(0, Jt, stage2, 0)


def _pick_frame_block(t):
    """Largest divisor of t that is <= 8 (frames of input processed per grid step)."""
    jt = 1
    for d in range(1, min(t, 8) + 1):
        if t % d == 0:
            jt = d
    return jt


def upsample_forward(x, w2d, b2d, w1d, b1d, with_conv=True):
    """x: (N, C, T, H, W) -> (N, C, 2T, 2H, 2W). Matches Upsample.forward."""
    N, C, T, H, W = x.shape
    x = x.astype(jnp.float32)

    if not with_conv:
        # Pure nearest upsample: bandwidth-only op, no Pallas kernel needed.
        return jnp.repeat(jnp.repeat(jnp.repeat(x, 2, axis=2), 2, axis=3), 2, axis=4)

    Wd = 2 * W
    # Width doubling of the (small) input done once in XLA.
    # TODO(synk): fold into the kernel via a column-parity weight collapse (v5e win).
    xw = jnp.repeat(x, 2, axis=-1)                                   # (N, C, T, H, Wd)
    # Replicate-pad T (conv1d padding_mode='replicate' + nearest-T clamp) and
    # zero-pad H/W (conv2d padding=1) ONCE here: the kernel then needs no scratch
    # gather / per-step zeroing -- every tap is a direct slice of the slab.
    xp = jnp.pad(xw, ((0, 0), (0, 0), (1, 1), (0, 0), (0, 0)), mode="edge")
    xp = jnp.pad(xp, ((0, 0), (0, 0), (0, 0), (1, 1), (1, 1)))       # (N,C,T+2,H+2,Wd+2)

    # ---- fold the upsample parities into the conv weights (tiny arrays) ----------
    w2 = w2d.reshape(C, C, 3, 3).astype(jnp.float32)                 # (cm, ci, kh, kw)
    # Row-parity collapse: output rows 2m / 2m+1 of the H-doubled image see original
    # rows (m-1, m) / (m, m+1) with the kh taps merged pairwise.
    a_fold = jnp.stack([
        jnp.stack([w2[:, :, 0, :], w2[:, :, 1, :] + w2[:, :, 2, :]], axis=0),   # s=0
        jnp.stack([w2[:, :, 0, :] + w2[:, :, 1, :], w2[:, :, 2, :]], axis=0),   # s=1
    ], axis=0)                                                       # (s, dr, cm, ci, kw)
    w1 = w1d.reshape(C, C, 3).astype(jnp.float32)                    # (co, cm, kt)
    # Frame-parity collapse: output frames 2j / 2j+1 see conv2d frames (j-1, j) /
    # (j, j+1) with the kt taps merged pairwise (replicate pad == edge-padded input).
    w1_fold = jnp.stack([
        jnp.stack([w1[:, :, 0], w1[:, :, 1] + w1[:, :, 2]], axis=0),             # p=0
        jnp.stack([w1[:, :, 0] + w1[:, :, 1], w1[:, :, 2]], axis=0),             # p=1
    ], axis=0)                                                       # (p, dt, co, cm)

    a_flat = a_fold.reshape(-1)
    wt_flat = w1_fold.reshape(-1)
    b2 = b2d.astype(jnp.float32).reshape(-1)
    b1 = b1d.astype(jnp.float32).reshape(-1)

    T_out = 2 * T
    Jt = _pick_frame_block(T)
    F = Jt + 2
    n_blocks = T // Jt
    Hp, Wp = H + 2, Wd + 2

    # Explicit VMEM budget (lanes pad to 128, sublanes to 8); raise the scoped limit.
    def _tiles(*shape):
        *lead, sub, lane = shape
        return int(np.prod(lead, dtype=np.int64)) * (-(-sub // 8)) * (-(-lane // 128))
    need = 4 * 1024 * (2 * _tiles(C, T + 2, Hp, Wp)          # double-buffered input slab
                       + 2 * _tiles(C, 2 * Jt, H, 2 * Wd)    # double-buffered output block
                       + _tiles(F, 2, C, H, Wd))             # stage-1 scratch
    vmem_limit = int(min(100 * 2 ** 20, max(32 * 2 ** 20, 2 * need)))
    # TODO(synk): if `need` exceeds per-core VMEM (64 MiB on v7x) tile H / stream T.

    out = pl.pallas_call(
        _upsample_conv_kernel,
        out_shape=jax.ShapeDtypeStruct((N, C, T_out, H, 2 * Wd), jnp.float32),
        grid_spec=pltpu.PrefetchScalarGridSpec(
            num_scalar_prefetch=0,
            grid=(N, n_blocks),
            in_specs=[
                pl.BlockSpec(memory_space=pltpu.MemorySpace.SMEM),   # a_flat
                pl.BlockSpec(memory_space=pltpu.MemorySpace.SMEM),   # b2
                pl.BlockSpec(memory_space=pltpu.MemorySpace.SMEM),   # wt_flat
                pl.BlockSpec(memory_space=pltpu.MemorySpace.SMEM),   # b1
                # Whole padded (C, T+2, Hp, Wp) slab per batch element; the block
                # index ignores the frame-block axis, so it is DMA'd once per n.
                pl.BlockSpec((None, C, T + 2, Hp, Wp), lambda n, b: (n, 0, 0, 0, 0)),
            ],
            out_specs=pl.BlockSpec((None, C, 2 * Jt, H, 2 * Wd),
                                   lambda n, b: (n, 0, b, 0, 0)),
            scratch_shapes=[pltpu.VMEM((F, 2, C, H, Wd), jnp.float32)],
        ),
        compiler_params=pltpu.CompilerParams(
            dimension_semantics=("parallel", "parallel"),
            vmem_limit_bytes=vmem_limit),
    )(a_flat, b2, wt_flat, b1, xp)

    # (N, C, 2T, H, 4W) -> (N, C, 2T, 2H, 2W): free row-major metadata reshape
    # (lane half [0,2W) of slab row m is output row 2m, half [2W,4W) is row 2m+1).
    return out.reshape(N, C, T_out, 2 * H, Wd)


upsample_forward = jax.jit(upsample_forward, static_argnames=("with_conv",))


def reference_forward(x, w2d, b2d, w1d, b1d, with_conv=True):
    """Pure-JAX reference (nearest x2 + lax.conv) for correctness checking."""
    u = jnp.repeat(jnp.repeat(jnp.repeat(x, 2, axis=2), 2, axis=3), 2, axis=4)
    if not with_conv:
        return u
    dn = ("NCDHW", "OIDHW", "NCDHW")
    y = jax.lax.conv_general_dilated(u, w2d, (1, 1, 1),
                                     [(0, 0), (1, 1), (1, 1)],
                                     dimension_numbers=dn)
    y = y + b2d.reshape(1, -1, 1, 1, 1)
    # conv1d uses padding_mode='replicate' along T
    y = jnp.pad(y, ((0, 0), (0, 0), (1, 1), (0, 0), (0, 0)), mode="edge")
    z = jax.lax.conv_general_dilated(y, w1d, (1, 1, 1), "VALID",
                                     dimension_numbers=dn)
    z = z + b1d.reshape(1, -1, 1, 1, 1)
    return z


if __name__ == "__main__":
    # Small 5-D video tensor (N, C, T, H, W).
    N, C, T, H, W = 2, 4, 8, 16, 16

    key = jax.random.PRNGKey(0)
    kx, k1, k2, k3, k4 = jax.random.split(key, 5)

    x = jax.random.normal(kx, (N, C, T, H, W), dtype=jnp.float32)

    # Parameter shapes match Conv2Plus1d(C, C, kernel_size=3, stride=1, padding=1):
    #   conv2d: weight (C, C, 1, 3, 3), bias (C,)
    #   conv1d: weight (C, C, 3, 1, 1), bias (C,)
    fan2d = C * 3 * 3
    fan1d = C * 3
    w2d = jax.random.uniform(k1, (C, C, 1, 3, 3), jnp.float32, -1.0, 1.0) / np.sqrt(fan2d)
    b2d = jax.random.uniform(k2, (C,), jnp.float32, -1.0, 1.0) / np.sqrt(fan2d)
    w1d = jax.random.uniform(k3, (C, C, 3, 1, 1), jnp.float32, -1.0, 1.0) / np.sqrt(fan1d)
    b1d = jax.random.uniform(k4, (C,), jnp.float32, -1.0, 1.0) / np.sqrt(fan1d)

    out = jax.block_until_ready(upsample_forward(x, w2d, b2d, w1d, b1d))

    ref = reference_forward(x, w2d, b2d, w1d, b1d)
    assert out.shape == (N, C, 2 * T, 2 * H, 2 * W), out.shape
    np.testing.assert_allclose(np.asarray(out), np.asarray(ref), rtol=1e-4, atol=1e-4)

    print("KERNEL_OK")
</pallas_src>

<mosaic_0001>
module attributes {stable_mosaic.version = 11 : i64} {
  func.func @_upsample_conv_kernel(%arg0: i32, %arg1: i32, %arg2: memref<192xf32, #tpu.memory_space<smem>>, %arg3: memref<4xf32, #tpu.memory_space<smem>>, %arg4: memref<64xf32, #tpu.memory_space<smem>>, %arg5: memref<4xf32, #tpu.memory_space<smem>>, %arg6: memref<1x4x10x18x34xf32, #tpu.memory_space<vmem>>, %arg7: memref<1x4x16x16x64xf32, #tpu.memory_space<vmem>>, %arg8: memref<10x2x4x16x32xf32, #tpu.memory_space<vmem>>) attributes {dimension_semantics = [#tpu.dimension_semantics<parallel>, #tpu.dimension_semantics<parallel>], iteration_bounds = array<i64: 2, 1>, scalar_prefetch = 0 : i64, scratch_operands = 1 : i64, tpu.core_type = #tpu.core_type<tc>, window_params = [{transform_indices = @transform_0, window_bounds = array<i64: 192>}, {transform_indices = @transform_1, window_bounds = array<i64: 4>}, {transform_indices = @transform_2, window_bounds = array<i64: 64>}, {transform_indices = @transform_3, window_bounds = array<i64: 4>}, {transform_indices = @transform_4, window_bounds = array<i64: 1, 4, 10, 18, 34>}, {transform_indices = @transform_5, window_bounds = array<i64: 1, 4, 16, 16, 64>}]} {
    %c8_i32 = arith.constant 8 : i32
    %0 = arith.muli %arg1, %c8_i32 : i32
    %c0_i32 = arith.constant 0 : i32
    %c10_i32 = arith.constant 10 : i32
    %1 = arith.addi %c0_i32, %c10_i32 : i32
    %c1_i32 = arith.constant 1 : i32
    scf.for %arg9 = %c0_i32 to %1 step %c1_i32  : i32 {
      %3 = arith.addi %0, %arg9 : i32
      %c0 = arith.constant 0 : index
      %c0_5 = arith.constant 0 : index
      %4 = arith.index_cast %3 : i32 to index
      %c0_6 = arith.constant 0 : index
      %c0_7 = arith.constant 0 : index
      %5 = vector.load %arg6[%c0, %c0_5, %4, %c0_6, %c0_7] : memref<1x4x10x18x34xf32, #tpu.memory_space<vmem>>, vector<1x1x1x18x34xf32>
      %6 = vector.shape_cast %5 : vector<1x1x1x18x34xf32> to vector<1x18x34xf32>
      %7 = vector.extract_strided_slice %6 {offsets = [0, 0, 0], sizes = [1, 16, 32], strides = [1, 1, 1]} : vector<1x18x34xf32> to vector<1x16x32xf32>
      %8 = vector.shape_cast %7 : vector<1x16x32xf32> to vector<16x32xf32>
      %c0_8 = arith.constant 0 : index
      %9 = memref.load %arg2[%c0_8] : memref<192xf32, #tpu.memory_space<smem>>
      %10 = vector.broadcast %9 : f32 to vector<16x32xf32>
      %11 = arith.mulf %10, %8 : vector<16x32xf32>
      %c12 = arith.constant 12 : index
      %12 = memref.load %arg2[%c12] : memref<192xf32, #tpu.memory_space<smem>>
      %13 = vector.broadcast %12 : f32 to vector<16x32xf32>
      %14 = arith.mulf %13, %8 : vector<16x32xf32>
      %c24 = arith.constant 24 : index
      %15 = memref.load %arg2[%c24] : memref<192xf32, #tpu.memory_space<smem>>
      %16 = vector.broadcast %15 : f32 to vector<16x32xf32>
      %17 = arith.mulf %16, %8 : vector<16x32xf32>
      %c36 = arith.constant 36 : index
      %18 = memref.load %arg2[%c36] : memref<192xf32, #tpu.memory_space<smem>>
      %19 = vector.broadcast %18 : f32 to vector<16x32xf32>
      %20 = arith.mulf %19, %8 : vector<16x32xf32>
      %21 = vector.extract_strided_slice %6 {offsets = [0, 0, 1], sizes = [1, 16, 32], strides = [1, 1, 1]} : vector<1x18x34xf32> to vector<1x16x32xf32>
      %22 = vector.shape_cast %21 : vector<1x16x32xf32> to vector<16x32xf32>
      %c1 = arith.constant 1 : index
      %23 = memref.load %arg2[%c1] : memref<192xf32, #tpu.memory_space<smem>>
      %24 = vector.broadcast %23 : f32 to vector<16x32xf32>
      %25 = arith.mulf %24, %22 : vector<16x32xf32>
      %26 = arith.addf %11, %25 : vector<16x32xf32>
      %c13 = arith.constant 13 : index
      %27 = memref.load %arg2[%c13] : memref<192xf32, #tpu.memory_space<smem>>
      %28 = vector.broadcast %27 : f32 to vector<16x32xf32>
      %29 = arith.mulf %28, %22 : vector<16x32xf32>
      %30 = arith.addf %14, %29 : vector<16x32xf32>
      %c25 = arith.constant 25 : index
      %31 = memref.load %arg2[%c25] : memref<192xf32, #tpu.memory_space<smem>>
      %32 = vector.broadcast %31 : f32 to vector<16x32xf32>
      %33 = arith.mulf %32, %22 : vector<16x32xf32>
      %34 = arith.addf %17, %33 : vector<16x32xf32>
      %c37 = arith.constant 37 : index
      %35 = memref.load %arg2[%c37] : memref<192xf32, #tpu.memory_space<smem>>
      %36 = vector.broadcast %35 : f32 to vector<16x32xf32>
      %37 = arith.mulf %36, %22 : vector<16x32xf32>
      %38 = arith.addf %20, %37 : vector<16x32xf32>
      %39 = vector.extract_strided_slice %6 {offsets = [0, 0, 2], sizes = [1, 16, 32], strides = [1, 1, 1]} : vector<1x18x34xf32> to vector<1x16x32xf32>
      %40 = vector.shape_cast %39 : vector<1x16x32xf32> to vector<16x32xf32>
      %c2 = arith.constant 2 : index
      %41 = memref.load %arg2[%c2] : memref<192xf32, #tpu.memory_space<smem>>
      %42 = vector.broadcast %41 : f32 to vector<16x32xf32>
      %43 = arith.mulf %42, %40 : vector<16x32xf32>
      %44 = arith.addf %26, %43 : vector<16x32xf32>
      %c14 = arith.constant 14 : index
      %45 = memref.load %arg2[%c14] : memref<192xf32, #tpu.memory_space<smem>>
      %46 = vector.broadcast %45 : f32 to vector<16x32xf32>
      %47 = arith.mulf %46, %40 : vector<16x32xf32>
      %48 = arith.addf %30, %47 : vector<16x32xf32>
      %c26 = arith.constant 26 : index
      %49 = memref.load %arg2[%c26] : memref<192xf32, #tpu.memory_space<smem>>
      %50 = vector.broadcast %49 : f32 to vector<16x32xf32>
      %51 = arith.mulf %50, %40 : vector<16x32xf32>
      %52 = arith.addf %34, %51 : vector<16x32xf32>
      %c38 = arith.constant 38 : index
      %53 = memref.load %arg2[%c38] : memref<192xf32, #tpu.memory_space<smem>>
      %54 = vector.broadcast %53 : f32 to vector<16x32xf32>
      %55 = arith.mulf %54, %40 : vector<16x32xf32>
      %56 = arith.addf %38, %55 : vector<16x32xf32>
      %57 = vector.extract_strided_slice %6 {offsets = [0, 1, 0], sizes = [1, 16, 32], strides = [1, 1, 1]} : vector<1x18x34xf32> to vector<1x16x32xf32>
      %58 = vector.shape_cast %57 : vector<1x16x32xf32> to vector<16x32xf32>
      %c48 = arith.constant 48 : index
      %59 = memref.load %arg2[%c48] : memref<192xf32, #tpu.memory_space<smem>>
      %60 = vector.broadcast %59 : f32 to vector<16x32xf32>
      %61 = arith.mulf %60, %58 : vector<16x32xf32>
      %62 = arith.addf %44, %61 : vector<16x32xf32>
      %c60 = arith.constant 60 : index
      %63 = memref.load %arg2[%c60] : memref<192xf32, #tpu.memory_space<smem>>
      %64 = vector.broadcast %63 : f32 to vector<16x32xf32>
      %65 = arith.mulf %64, %58 : vector<16x32xf32>
      %66 = arith.addf %48, %65 : vector<16x32xf32>
      %c72 = arith.constant 72 : index
      %67 = memref.load %arg2[%c72] : memref<192xf32, #tpu.memory_space<smem>>
      %68 = vector.broadcast %67 : f32 to vector<16x32xf32>
      %69 = arith.mulf %68, %58 : vector<16x32xf32>
      %70 = arith.addf %52, %69 : vector<16x32xf32>
      %c84 = arith.constant 84 : index
      %71 = memref.load %arg2[%c84] : memref<192xf32, #tpu.memory_space<smem>>
      %72 = vector.broadcast %71 : f32 to vector<16x32xf32>
      %73 = arith.mulf %72, %58 : vector<16x32xf32>
      %74 = arith.addf %56, %73 : vector<16x32xf32>
      %c96 = arith.constant 96 : index
      %75 = memref.load %arg2[%c96] : memref<192xf32, #tpu.memory_space<smem>>
      %76 = vector.broadcast %75 : f32 to vector<16x32xf32>
      %77 = arith.mulf %76, %58 : vector<16x32xf32>
      %c108 = arith.constant 108 : index
      %78 = memref.load %arg2[%c108] : memref<192xf32, #tpu.memory_space<smem>>
      %79 = vector.broadcast %78 : f32 to vector<16x32xf32>
      %80 = arith.mulf %79, %58 : vector<16x32xf32>
      %c120 = arith.constant 120 : index
      %81 = memref.load %arg2[%c120] : memref<192xf32, #tpu.memory_space<smem>>
      %82 = vector.broadcast %81 : f32 to vector<16x32xf32>
      %83 = arith.mulf %82, %58 : vector<16x32xf32>
      %c132 = arith.constant 132 : index
      %84 = memref.load %arg2[%c132] : memref<192xf32, #tpu.memory_space<smem>>
      %85 = vector.broadcast %84 : f32 to vector<16x32xf32>
      %86 = arith.mulf %85, %58 : vector<16x32xf32>
      %87 = vector.extract_strided_slice %6 {offsets = [0, 1, 1], sizes = [1, 16, 32], strides = [1, 1, 1]} : vector<1x18x34xf32> to vector<1x16x32xf32>
      %88 = vector.shape_cast %87 : vector<1x16x32xf32> to vector<16x32xf32>
      %c49 = arith.constant 49 : index
      %89 = memref.load %arg2[%c49] : memref<192xf32, #tpu.memory_space<smem>>
      %90 = vector.broadcast %89 : f32 to vector<16x32xf32>
      %91 = arith.mulf %90, %88 : vector<16x32xf32>
      %92 = arith.addf %62, %91 : vector<16x32xf32>
      %c61 = arith.constant 61 : index
      %93 = memref.load %arg2[%c61] : memref<192xf32, #tpu.memory_space<smem>>
      %94 = vector.broadcast %93 : f32 to vector<16x32xf32>
      %95 = arith.mulf %94, %88 : vector<16x32xf32>
      %96 = arith.addf %66, %95 : vector<16x32xf32>
      %c73 = arith.constant 73 : index
      %97 = memref.load %arg2[%c73] : memref<192xf32, #tpu.memory_space<smem>>
      %98 = vector.broadcast %97 : f32 to vector<16x32xf32>
      %99 = arith.mulf %98, %88 : vector<16x32xf32>
      %100 = arith.addf %70, %99 : vector<16x32xf32>
      %c85 = arith.constant 85 : index
      %101 = memref.load %arg2[%c85] : memref<192xf32, #tpu.memory_space<smem>>
      %102 = vector.broadcast %101 : f32 to vector<16x32xf32>
      %103 = arith.mulf %102, %88 : vector<16x32xf32>
      %104 = arith.addf %74, %103 : vector<16x32xf32>
      %c97 = arith.constant 97 : index
      %105 = memref.load %arg2[%c97] : memref<192xf32, #tpu.memory_space<smem>>
      %106 = vector.broadcast %105 : f32 to vector<16x32xf32>
      %107 = arith.mulf %106, %88 : vector<16x32xf32>
      %108 = arith.addf %77, %107 : vector<16x32xf32>
      %c109 = arith.constant 109 : index
      %109 = memref.load %arg2[%c109] : memref<192xf32, #tpu.memory_space<smem>>
      %110 = vector.broadcast %109 : f32 to vector<16x32xf32>
      %111 = arith.mulf %110, %88 : vector<16x32xf32>
      %112 = arith.addf %80, %111 : vector<16x32xf32>
      %c121 = arith.constant 121 : index
      %113 = memref.load %arg2[%c121] : memref<192xf32, #tpu.memory_space<smem>>
      %114 = vector.broadcast %113 : f32 to vector<16x32xf32>
      %115 = arith.mulf %114, %88 : vector<16x32xf32>
      %116 = arith.addf %83, %115 : vector<16x32xf32>
      %c133 = arith.constant 133 : index
      %117 = memref.load %arg2[%c133] : memref<192xf32, #tpu.memory_space<smem>>
      %118 = vector.broadcast %117 : f32 to vector<16x32xf32>
      %119 = arith.mulf %118, %88 : vector<16x32xf32>
      %120 = arith.addf %86, %119 : vector<16x32xf32>
      %121 = vector.extract_strided_slice %6 {offsets = [0, 1, 2], sizes = [1, 16, 32], strides = [1, 1, 1]} : vector<1x18x34xf32> to vector<1x16x32xf32>
      %122 = vector.shape_cast %121 : vector<1x16x32xf32> to vector<16x32xf32>
      %c50 = arith.constant 50 : index
      %123 = memref.load %arg2[%c50] : memref<192xf32, #tpu.memory_space<smem>>
      %124 = vector.broadcast %123 : f32 to vector<16x32xf32>
      %125 = arith.mulf %124, %122 : vector<16x32xf32>
      %126 = arith.addf %92, %125 : vector<16x32xf32>
      %c62 = arith.constant 62 : index
      %127 = memref.load %arg2[%c62] : memref<192xf32, #tpu.memory_space<smem>>
      %128 = vector.broadcast %127 : f32 to vector<16x32xf32>
      %129 = arith.mulf %128, %122 : vector<16x32xf32>
      %130 = arith.addf %96, %129 : vector<16x32xf32>
      %c74 = arith.constant 74 : index
      %131 = memref.load %arg2[%c74] : memref<192xf32, #tpu.memory_space<smem>>
      %132 = vector.broadcast %131 : f32 to vector<16x32xf32>
      %133 = arith.mulf %132, %122 : vector<16x32xf32>
      %134 = arith.addf %100, %133 : vector<16x32xf32>
      %c86 = arith.constant 86 : index
      %135 = memref.load %arg2[%c86] : memref<192xf32, #tpu.memory_space<smem>>
      %136 = vector.broadcast %135 : f32 to vector<16x32xf32>
      %137 = arith.mulf %136, %122 : vector<16x32xf32>
      %138 = arith.addf %104, %137 : vector<16x32xf32>
      %c98 = arith.constant 98 : index
      %139 = memref.load %arg2[%c98] : memref<192xf32, #tpu.memory_space<smem>>
      %140 = vector.broadcast %139 : f32 to vector<16x32xf32>
      %141 = arith.mulf %140, %122 : vector<16x32xf32>
      %142 = arith.addf %108, %141 : vector<16x32xf32>
      %c110 = arith.constant 110 : index
      %143 = memref.load %arg2[%c110] : memref<192xf32, #tpu.memory_space<smem>>
      %144 = vector.broadcast %143 : f32 to vector<16x32xf32>
      %145 = arith.mulf %144, %122 : vector<16x32xf32>
      %146 = arith.addf %112, %145 : vector<16x32xf32>
      %c122 = arith.constant 122 : index
      %147 = memref.load %arg2[%c122] : memref<192xf32, #tpu.memory_space<smem>>
      %148 = vector.broadcast %147 : f32 to vector<16x32xf32>
      %149 = arith.mulf %148, %122 : vector<16x32xf32>
      %150 = arith.addf %116, %149 : vector<16x32xf32>
      %c134 = arith.constant 134 : index
      %151 = memref.load %arg2[%c134] : memref<192xf32, #tpu.memory_space<smem>>
      %152 = vector.broadcast %151 : f32 to vector<16x32xf32>
      %153 = arith.mulf %152, %122 : vector<16x32xf32>
      %154 = arith.addf %120, %153 : vector<16x32xf32>
      %155 = vector.extract_strided_slice %6 {offsets = [0, 2, 0], sizes = [1, 16, 32], strides = [1, 1, 1]} : vector<1x18x34xf32> to vector<1x16x32xf32>
      %156 = vector.shape_cast %155 : vector<1x16x32xf32> to vector<16x32xf32>
      %c144 = arith.constant 144 : index
      %157 = memref.load %arg2[%c144] : memref<192xf32, #tpu.memory_space<smem>>
      %158 = vector.broadcast %157 : f32 to vector<16x32xf32>
      %159 = arith.mulf %158, %156 : vector<16x32xf32>
      %160 = arith.addf %142, %159 : vector<16x32xf32>
      %c156 = arith.constant 156 : index
      %161 = memref.load %arg2[%c156] : memref<192xf32, #tpu.memory_space<smem>>
      %162 = vector.broadcast %161 : f32 to vector<16x32xf32>
      %163 = arith.mulf %162, %156 : vector<16x32xf32>
      %164 = arith.addf %146, %163 : vector<16x32xf32>
      %c168 = arith.constant 168 : index
      %165 = memref.load %arg2[%c168] : memref<192xf32, #tpu.memory_space<smem>>
      %166 = vector.broadcast %165 : f32 to vector<16x32xf32>
      %167 = arith.mulf %166, %156 : vector<16x32xf32>
      %168 = arith.addf %150, %167 : vector<16x32xf32>
      %c180 = arith.constant 180 : index
      %169 = memref.load %arg2[%c180] : memref<192xf32, #tpu.memory_space<smem>>
      %170 = vector.broadcast %169 : f32 to vector<16x32xf32>
      %171 = arith.mulf %170, %156 : vector<16x32xf32>
      %172 = arith.addf %154, %171 : vector<16x32xf32>
      %173 = vector.extract_strided_slice %6 {offsets = [0, 2, 1], sizes = [1, 16, 32], strides = [1, 1, 1]} : vector<1x18x34xf32> to vector<1x16x32xf32>
      %174 = vector.shape_cast %173 : vector<1x16x32xf32> to vector<16x32xf32>
      %c145 = arith.constant 145 : index
      %175 = memref.load %arg2[%c145] : memref<192xf32, #tpu.memory_space<smem>>
      %176 = vector.broadcast %175 : f32 to vector<16x32xf32>
      %177 = arith.mulf %176, %174 : vector<16x32xf32>
      %178 = arith.addf %160, %177 : vector<16x32xf32>
      %c157 = arith.constant 157 : index
      %179 = memref.load %arg2[%c157] : memref<192xf32, #tpu.memory_space<smem>>
      %180 = vector.broadcast %179 : f32 to vector<16x32xf32>
      %181 = arith.mulf %180, %174 : vector<16x32xf32>
      %182 = arith.addf %164, %181 : vector<16x32xf32>
      %c169 = arith.constant 169 : index
      %183 = memref.load %arg2[%c169] : memref<192xf32, #tpu.memory_space<smem>>
      %184 = vector.broadcast %183 : f32 to vector<16x32xf32>
      %185 = arith.mulf %184, %174 : vector<16x32xf32>
      %186 = arith.addf %168, %185 : vector<16x32xf32>
      %c181 = arith.constant 181 : index
      %187 = memref.load %arg2[%c181] : memref<192xf32, #tpu.memory_space<smem>>
      %188 = vector.broadcast %187 : f32 to vector<16x32xf32>
      %189 = arith.mulf %188, %174 : vector<16x32xf32>
      %190 = arith.addf %172, %189 : vector<16x32xf32>
      %191 = vector.extract_strided_slice %6 {offsets = [0, 2, 2], sizes = [1, 16, 32], strides = [1, 1, 1]} : vector<1x18x34xf32> to vector<1x16x32xf32>
      %192 = vector.shape_cast %191 : vector<1x16x32xf32> to vector<16x32xf32>
      %c146 = arith.constant 146 : index
      %193 = memref.load %arg2[%c146] : memref<192xf32, #tpu.memory_space<smem>>
      %194 = vector.broadcast %193 : f32 to vector<16x32xf32>
      %195 = arith.mulf %194, %192 : vector<16x32xf32>
      %196 = arith.addf %178, %195 : vector<16x32xf32>
      %c158 = arith.constant 158 : index
      %197 = memref.load %arg2[%c158] : memref<192xf32, #tpu.memory_space<smem>>
      %198 = vector.broadcast %197 : f32 to vector<16x32xf32>
      %199 = arith.mulf %198, %192 : vector<16x32xf32>
      %200 = arith.addf %182, %199 : vector<16x32xf32>
      %c170 = arith.constant 170 : index
      %201 = memref.load %arg2[%c170] : memref<192xf32, #tpu.memory_space<smem>>
      %202 = vector.broadcast %201 : f32 to vector<16x32xf32>
      %203 = arith.mulf %202, %192 : vector<16x32xf32>
      %204 = arith.addf %186, %203 : vector<16x32xf32>
      %c182 = arith.constant 182 : index
      %205 = memref.load %arg2[%c182] : memref<192xf32, #tpu.memory_space<smem>>
      %206 = vector.broadcast %205 : f32 to vector<16x32xf32>
      %207 = arith.mulf %206, %192 : vector<16x32xf32>
      %208 = arith.addf %190, %207 : vector<16x32xf32>
      %209 = arith.addi %0, %arg9 : i32
      %c0_9 = arith.constant 0 : index
      %c1_10 = arith.constant 1 : index
      %210 = arith.index_cast %209 : i32 to index
      %c0_11 = arith.constant 0 : index
      %c0_12 = arith.constant 0 : index
      %211 = vector.load %arg6[%c0_9, %c1_10, %210, %c0_11, %c0_12] : memref<1x4x10x18x34xf32, #tpu.memory_space<vmem>>, vector<1x1x1x18x34xf32>
      %212 = vector.shape_cast %211 : vector<1x1x1x18x34xf32> to vector<1x18x34xf32>
      %213 = vector.extract_strided_slice %212 {offsets = [0, 0, 0], sizes = [1, 16, 32], strides = [1, 1, 1]} : vector<1x18x34xf32> to vector<1x16x32xf32>
      %214 = vector.shape_cast %213 : vector<1x16x32xf32> to vector<16x32xf32>
      %c3 = arith.constant 3 : index
      %215 = memref.load %arg2[%c3] : memref<192xf32, #tpu.memory_space<smem>>
      %216 = vector.broadcast %215 : f32 to vector<16x32xf32>
      %217 = arith.mulf %216, %214 : vector<16x32xf32>
      %218 = arith.addf %126, %217 : vector<16x32xf32>
      %c15 = arith.constant 15 : index
      %219 = memref.load %arg2[%c15] : memref<192xf32, #tpu.memory_space<smem>>
      %220 = vector.broadcast %219 : f32 to vector<16x32xf32>
      %221 = arith.mulf %220, %214 : vector<16x32xf32>
      %222 = arith.addf %130, %221 : vector<16x32xf32>
      %c27 = arith.constant 27 : index
      %223 = memref.load %arg2[%c27] : memref<192xf32, #tpu.memory_space<smem>>
      %224 = vector.broadcast %223 : f32 to vector<16x32xf32>
      %225 = arith.mulf %224, %214 : vector<16x32xf32>
      %226 = arith.addf %134, %225 : vector<16x32xf32>
      %c39 = arith.constant 39 : index
      %227 = memref.load %arg2[%c39] : memref<192xf32, #tpu.memory_space<smem>>
      %228 = vector.broadcast %227 : f32 to vector<16x32xf32>
      %229 = arith.mulf %228, %214 : vector<16x32xf32>
      %230 = arith.addf %138, %229 : vector<16x32xf32>
      %231 = vector.extract_strided_slice %212 {offsets = [0, 0, 1], sizes = [1, 16, 32], strides = [1, 1, 1]} : vector<1x18x34xf32> to vector<1x16x32xf32>
      %232 = vector.shape_cast %231 : vector<1x16x32xf32> to vector<16x32xf32>
      %c4 = arith.constant 4 : index
      %233 = memref.load %arg2[%c4] : memref<192xf32, #tpu.memory_space<smem>>
      %234 = vector.broadcast %233 : f32 to vector<16x32xf32>
      %235 = arith.mulf %234, %232 : vector<16x32xf32>
      %236 = arith.addf %218, %235 : vector<16x32xf32>
      %c16 = arith.constant 16 : index
      %237 = memref.load %arg2[%c16] : memref<192xf32, #tpu.memory_space<smem>>
      %238 = vector.broadcast %237 : f32 to vector<16x32xf32>
      %239 = arith.mulf %238, %232 : vector<16x32xf32>
      %240 = arith.addf %222, %239 : vector<16x32xf32>
      %c28 = arith.constant 28 : index
      %241 = memref.load %arg2[%c28] : memref<192xf32, #tpu.memory_space<smem>>
      %242 = vector.broadcast %241 : f32 to vector<16x32xf32>
      %243 = arith.mulf %242, %232 : vector<16x32xf32>
      %244 = arith.addf %226, %243 : vector<16x32xf32>
      %c40 = arith.constant 40 : index
      %245 = memref.load %arg2[%c40] : memref<192xf32, #tpu.memory_space<smem>>
      %246 = vector.broadcast %245 : f32 to vector<16x32xf32>
      %247 = arith.mulf %246, %232 : vector<16x32xf32>
      %248 = arith.addf %230, %247 : vector<16x32xf32>
      %249 = vector.extract_strided_slice %212 {offsets = [0, 0, 2], sizes = [1, 16, 32], strides = [1, 1, 1]} : vector<1x18x34xf32> to vector<1x16x32xf32>
      %250 = vector.shape_cast %249 : vector<1x16x32xf32> to vector<16x32xf32>
      %c5 = arith.constant 5 : index
      %251 = memref.load %arg2[%c5] : memref<192xf32, #tpu.memory_space<smem>>
      %252 = vector.broadcast %251 : f32 to vector<16x32xf32>
      %253 = arith.mulf %252, %250 : vector<16x32xf32>
      %254 = arith.addf %236, %253 : vector<16x32xf32>
      %c17 = arith.constant 17 : index
      %255 = memref.load %arg2[%c17] : memref<192xf32, #tpu.memory_space<smem>>
      %256 = vector.broadcast %255 : f32 to vector<16x32xf32>
      %257 = arith.mulf %256, %250 : vector<16x32xf32>
      %258 = arith.addf %240, %257 : vector<16x32xf32>
      %c29 = arith.constant 29 : index
      %259 = memref.load %arg2[%c29] : memref<192xf32, #tpu.memory_space<smem>>
      %260 = vector.broadcast %259 : f32 to vector<16x32xf32>
      %261 = arith.mulf %260, %250 : vector<16x32xf32>
      %262 = arith.addf %244, %261 : vector<16x32xf32>
      %c41 = arith.constant 41 : index
      %263 = memref.load %arg2[%c41] : memref<192xf32, #tpu.memory_space<smem>>
      %264 = vector.broadcast %263 : f32 to vector<16x32xf32>
      %265 = arith.mulf %264, %250 : vector<16x32xf32>
      %266 = arith.addf %248, %265 : vector<16x32xf32>
      %267 = vector.extract_strided_slice %212 {offsets = [0, 1, 0], sizes = [1, 16, 32], strides = [1, 1, 1]} : vector<1x18x34xf32> to vector<1x16x32xf32>
      %268 = vector.shape_cast %267 : vector<1x16x32xf32> to vector<16x32xf32>
      %c51 = arith.constant 51 : index
      %269 = memref.load %arg2[%c51] : memref<192xf32, #tpu.memory_space<smem>>
      %270 = vector.broadcast %269 : f32 to vector<16x32xf32>
      %271 = arith.mulf %270, %268 : vector<16x32xf32>
      %272 = arith.addf %254, %271 : vector<16x32xf32>
      %c63 = arith.constant 63 : index
      %273 = memref.load %arg2[%c63] : memref<192xf32, #tpu.memory_space<smem>>
      %274 = vector.broadcast %273 : f32 to vector<16x32xf32>
      %275 = arith.mulf %274, %268 : vector<16x32xf32>
      %276 = arith.addf %258, %275 : vector<16x32xf32>
      %c75 = arith.constant 75 : index
      %277 = memref.load %arg2[%c75] : memref<192xf32, #tpu.memory_space<smem>>
      %278 = vector.broadcast %277 : f32 to vector<16x32xf32>
      %279 = arith.mulf %278, %268 : vector<16x32xf32>
      %280 = arith.addf %262, %279 : vector<16x32xf32>
      %c87 = arith.constant 87 : index
      %281 = memref.load %arg2[%c87] : memref<192xf32, #tpu.memory_space<smem>>
      %282 = vector.broadcast %281 : f32 to vector<16x32xf32>
      %283 = arith.mulf %282, %268 : vector<16x32xf32>
      %284 = arith.addf %266, %283 : vector<16x32xf32>
      %c99 = arith.constant 99 : index
      %285 = memref.load %arg2[%c99] : memref<192xf32, #tpu.memory_space<smem>>
      %286 = vector.broadcast %285 : f32 to vector<16x32xf32>
      %287 = arith.mulf %286, %268 : vector<16x32xf32>
      %288 = arith.addf %196, %287 : vector<16x32xf32>
      %c111 = arith.constant 111 : index
      %289 = memref.load %arg2[%c111] : memref<192xf32, #tpu.memory_space<smem>>
      %290 = vector.broadcast %289 : f32 to vector<16x32xf32>
      %291 = arith.mulf %290, %268 : vector<16x32xf32>
      %292 = arith.addf %200, %291 : vector<16x32xf32>
      %c123 = arith.constant 123 : index
      %293 = memref.load %arg2[%c123] : memref<192xf32, #tpu.memory_space<smem>>
      %294 = vector.broadcast %293 : f32 to vector<16x32xf32>
      %295 = arith.mulf %294, %268 : vector<16x32xf32>
      %296 = arith.addf %204, %295 : vector<16x32xf32>
      %c135 = arith.constant 135 : index
      %297 = memref.load %arg2[%c135] : memref<192xf32, #tpu.memory_space<smem>>
      %298 = vector.broadcast %297 : f32 to vector<16x32xf32>
      %299 = arith.mulf %298, %268 : vector<16x32xf32>
      %300 = arith.addf %208, %299 : vector<16x32xf32>
      %301 = vector.extract_strided_slice %212 {offsets = [0, 1, 1], sizes = [1, 16, 32], strides = [1, 1, 1]} : vector<1x18x34xf32> to vector<1x16x32xf32>
      %302 = vector.shape_cast %301 : vector<1x16x32xf32> to vector<16x32xf32>
      %c52 = arith.constant 52 : index
      %303 = memref.load %arg2[%c52] : memref<192xf32, #tpu.memory_space<smem>>
      %304 = vector.broadcast %303 : f32 to vector<16x32xf32>
      %305 = arith.mulf %304, %302 : vector<16x32xf32>
      %306 = arith.addf %272, %305 : vector<16x32xf32>
      %c64 = arith.constant 64 : index
      %307 = memref.load %arg2[%c64] : memref<192xf32, #tpu.memory_space<smem>>
      %308 = vector.broadcast %307 : f32 to vector<16x32xf32>
      %309 = arith.mulf %308, %302 : vector<16x32xf32>
      %310 = arith.addf %276, %309 : vector<16x32xf32>
      %c76 = arith.constant 76 : index
      %311 = memref.load %arg2[%c76] : memref<192xf32, #tpu.memory_space<smem>>
      %312 = vector.broadcast %311 : f32 to vector<16x32xf32>
      %313 = arith.mulf %312, %302 : vector<16x32xf32>
      %314 = arith.addf %280, %313 : vector<16x32xf32>
      %c88 = arith.constant 88 : index
      %315 = memref.load %arg2[%c88] : memref<192xf32, #tpu.memory_space<smem>>
      %316 = vector.broadcast %315 : f32 to vector<16x32xf32>
      %317 = arith.mulf %316, %302 : vector<16x32xf32>
      %318 = arith.addf %284, %317 : vector<16x32xf32>
      %c100 = arith.constant 100 : index
      %319 = memref.load %arg2[%c100] : memref<192xf32, #tpu.memory_space<smem>>
      %320 = vector.broadcast %319 : f32 to vector<16x32xf32>
      %321 = arith.mulf %320, %302 : vector<16x32xf32>
      %322 = arith.addf %288, %321 : vector<16x32xf32>
      %c112 = arith.constant 112 : index
      %323 = memref.load %arg2[%c112] : memref<192xf32, #tpu.memory_space<smem>>
      %324 = vector.broadcast %323 : f32 to vector<16x32xf32>
      %325 = arith.mulf %324, %302 : vector<16x32xf32>
      %326 = arith.addf %292, %325 : vector<16x32xf32>
      %c124 = arith.constant 124 : index
      %327 = memref.load %arg2[%c124] : memref<192xf32, #tpu.memory_space<smem>>
      %328 = vector.broadcast %327 : f32 to vector<16x32xf32>
      %329 = arith.mulf %328, %302 : vector<16x32xf32>
      %330 = arith.addf %296, %329 : vector<16x32xf32>
      %c136 = arith.constant 136 : index
      %331 = memref.load %arg2[%c136] : memref<192xf32, #tpu.memory_space<smem>>
      %332 = vector.broadcast %331 : f32 to vector<16x32xf32>
      %333 = arith.mulf %332, %302 : vector<16x32xf32>
      %334 = arith.addf %300, %333 : vector<16x32xf32>
      %335 = vector.extract_strided_slice %212 {offsets = [0, 1, 2], sizes = [1, 16, 32], strides = [1, 1, 1]} : vector<1x18x34xf32> to vector<1x16x32xf32>
      %336 = vector.shape_cast %335 : vector<1x16x32xf32> to vector<16x32xf32>
      %c53 = arith.constant 53 : index
      %337 = memref.load %arg2[%c53] : memref<192xf32, #tpu.memory_space<smem>>
      %338 = vector.broadcast %337 : f32 to vector<16x32xf32>
      %339 = arith.mulf %338, %336 : vector<16x32xf32>
      %340 = arith.addf %306, %339 : vector<16x32xf32>
      %c65 = arith.constant 65 : index
      %341 = memref.load %arg2[%c65] : memref<192xf32, #tpu.memory_space<smem>>
      %342 = vector.broadcast %341 : f32 to vector<16x32xf32>
      %343 = arith.mulf %342, %336 : vector<16x32xf32>
      %344 = arith.addf %310, %343 : vector<16x32xf32>
      %c77 = arith.constant 77 : index
      %345 = memref.load %arg2[%c77] : memref<192xf32, #tpu.memory_space<smem>>
      %346 = vector.broadcast %345 : f32 to vector<16x32xf32>
      %347 = arith.mulf %346, %336 : vector<16x32xf32>
      %348 = arith.addf %314, %347 : vector<16x32xf32>
      %c89 = arith.constant 89 : index
      %349 = memref.load %arg2[%c89] : memref<192xf32, #tpu.memory_space<smem>>
      %350 = vector.broadcast %349 : f32 to vector<16x32xf32>
      %351 = arith.mulf %350, %336 : vector<16x32xf32>
      %352 = arith.addf %318, %351 : vector<16x32xf32>
      %c101 = arith.constant 101 : index
      %353 = memref.load %arg2[%c101] : memref<192xf32, #tpu.memory_space<smem>>
      %354 = vector.broadcast %353 : f32 to vector<16x32xf32>
      %355 = arith.mulf %354, %336 : vector<16x32xf32>
      %356 = arith.addf %322, %355 : vector<16x32xf32>
      %c113 = arith.constant 113 : index
      %357 = memref.load %arg2[%c113] : memref<192xf32, #tpu.memory_space<smem>>
      %358 = vector.broadcast %357 : f32 to vector<16x32xf32>
      %359 = arith.mulf %358, %336 : vector<16x32xf32>
      %360 = arith.addf %326, %359 : vector<16x32xf32>
      %c125 = arith.constant 125 : index
      %361 = memref.load %arg2[%c125] : memref<192xf32, #tpu.memory_space<smem>>
      %362 = vector.broadcast %361 : f32 to vector<16x32xf32>
      %363 = arith.mulf %362, %336 : vector<16x32xf32>
      %364 = arith.addf %330, %363 : vector<16x32xf32>
      %c137 = arith.constant 137 : index
      %365 = memref.load %arg2[%c137] : memref<192xf32, #tpu.memory_space<smem>>
      %366 = vector.broadcast %365 : f32 to vector<16x32xf32>
      %367 = arith.mulf %366, %336 : vector<16x32xf32>
      %368 = arith.addf %334, %367 : vector<16x32xf32>
      %369 = vector.extract_strided_slice %212 {offsets = [0, 2, 0], sizes = [1, 16, 32], strides = [1, 1, 1]} : vector<1x18x34xf32> to vector<1x16x32xf32>
      %370 = vector.shape_cast %369 : vector<1x16x32xf32> to vector<16x32xf32>
      %c147 = arith.constant 147 : index
      %371 = memref.load %arg2[%c147] : memref<192xf32, #tpu.memory_space<smem>>
      %372 = vector.broadcast %371 : f32 to vector<16x32xf32>
      %373 = arith.mulf %372, %370 : vector<16x32xf32>
      %374 = arith.addf %356, %373 : vector<16x32xf32>
      %c159 = arith.constant 159 : index
      %375 = memref.load %arg2[%c159] : memref<192xf32, #tpu.memory_space<smem>>
      %376 = vector.broadcast %375 : f32 to vector<16x32xf32>
      %377 = arith.mulf %376, %370 : vector<16x32xf32>
      %378 = arith.addf %360, %377 : vector<16x32xf32>
      %c171 = arith.constant 171 : index
      %379 = memref.load %arg2[%c171] : memref<192xf32, #tpu.memory_space<smem>>
      %380 = vector.broadcast %379 : f32 to vector<16x32xf32>
      %381 = arith.mulf %380, %370 : vector<16x32xf32>
      %382 = arith.addf %364, %381 : vector<16x32xf32>
      %c183 = arith.constant 183 : index
      %383 = memref.load %arg2[%c183] : memref<192xf32, #tpu.memory_space<smem>>
      %384 = vector.broadcast %383 : f32 to vector<16x32xf32>
      %385 = arith.mulf %384, %370 : vector<16x32xf32>
      %386 = arith.addf %368, %385 : vector<16x32xf32>
      %387 = vector.extract_strided_slice %212 {offsets = [0, 2, 1], sizes = [1, 16, 32], strides = [1, 1, 1]} : vector<1x18x34xf32> to vector<1x16x32xf32>
      %388 = vector.shape_cast %387 : vector<1x16x32xf32> to vector<16x32xf32>
      %c148 = arith.constant 148 : index
      %389 = memref.load %arg2[%c148] : memref<192xf32, #tpu.memory_space<smem>>
      %390 = vector.broadcast %389 : f32 to vector<16x32xf32>
      %391 = arith.mulf %390, %388 : vector<16x32xf32>
      %392 = arith.addf %374, %391 : vector<16x32xf32>
      %c160 = arith.constant 160 : index
      %393 = memref.load %arg2[%c160] : memref<192xf32, #tpu.memory_space<smem>>
      %394 = vector.broadcast %393 : f32 to vector<16x32xf32>
      %395 = arith.mulf %394, %388 : vector<16x32xf32>
      %396 = arith.addf %378, %395 : vector<16x32xf32>
      %c172 = arith.constant 172 : index
      %397 = memref.load %arg2[%c172] : memref<192xf32, #tpu.memory_space<smem>>
      %398 = vector.broadcast %397 : f32 to vector<16x32xf32>
      %399 = arith.mulf %398, %388 : vector<16x32xf32>
      %400 = arith.addf %382, %399 : vector<16x32xf32>
      %c184 = arith.constant 184 : index
      %401 = memref.load %arg2[%c184] : memref<192xf32, #tpu.memory_space<smem>>
      %402 = vector.broadcast %401 : f32 to vector<16x32xf32>
      %403 = arith.mulf %402, %388 : vector<16x32xf32>
      %404 = arith.addf %386, %403 : vector<16x32xf32>
      %405 = vector.extract_strided_slice %212 {offsets = [0, 2, 2], sizes = [1, 16, 32], strides = [1, 1, 1]} : vector<1x18x34xf32> to vector<1x16x32xf32>
      %406 = vector.shape_cast %405 : vector<1x16x32xf32> to vector<16x32xf32>
      %c149 = arith.constant 149 : index
      %407 = memref.load %arg2[%c149] : memref<192xf32, #tpu.memory_space<smem>>
      %408 = vector.broadcast %407 : f32 to vector<16x32xf32>
      %409 = arith.mulf %408, %406 : vector<16x32xf32>
      %410 = arith.addf %392, %409 : vector<16x32xf32>
      %c161 = arith.constant 161 : index
      %411 = memref.load %arg2[%c161] : memref<192xf32, #tpu.memory_space<smem>>
      %412 = vector.broadcast %411 : f32 to vector<16x32xf32>
      %413 = arith.mulf %412, %406 : vector<16x32xf32>
      %414 = arith.addf %396, %413 : vector<16x32xf32>
      %c173 = arith.constant 173 : index
      %415 = memref.load %arg2[%c173] : memref<192xf32, #tpu.memory_space<smem>>
      %416 = vector.broadcast %415 : f32 to vector<16x32xf32>
      %417 = arith.mulf %416, %406 : vector<16x32xf32>
      %418 = arith.addf %400, %417 : vector<16x32xf32>
      %c185 = arith.constant 185 : index
      %419 = memref.load %arg2[%c185] : memref<192xf32, #tpu.memory_space<smem>>
      %420 = vector.broadcast %419 : f32 to vector<16x32xf32>
      %421 = arith.mulf %420, %406 : vector<16x32xf32>
      %422 = arith.addf %404, %421 : vector<16x32xf32>
      %423 = arith.addi %0, %arg9 : i32
      %c0_13 = arith.constant 0 : index
      %c2_14 = arith.constant 2 : index
      %424 = arith.index_cast %423 : i32 to index
      %c0_15 = arith.constant 0 : index
      %c0_16 = arith.constant 0 : index
      %425 = vector.load %arg6[%c0_13, %c2_14, %424, %c0_15, %c0_16] : memref<1x4x10x18x34xf32, #tpu.memory_space<vmem>>, vector<1x1x1x18x34xf32>
      %426 = vector.shape_cast %425 : vector<1x1x1x18x34xf32> to vector<1x18x34xf32>
      %427 = vector.extract_strided_slice %426 {offsets = [0, 0, 0], sizes = [1, 16, 32], strides = [1, 1, 1]} : vector<1x18x34xf32> to vector<1x16x32xf32>
      %428 = vector.shape_cast %427 : vector<1x16x32xf32> to vector<16x32xf32>
      %c6 = arith.constant 6 : index
      %429 = memref.load %arg2[%c6] : memref<192xf32, #tpu.memory_space<smem>>
      %430 = vector.broadcast %429 : f32 to vector<16x32xf32>
      %431 = arith.mulf %430, %428 : vector<16x32xf32>
      %432 = arith.addf %340, %431 : vector<16x32xf32>
      %c18 = arith.constant 18 : index
      %433 = memref.load %arg2[%c18] : memref<192xf32, #tpu.memory_space<smem>>
      %434 = vector.broadcast %433 : f32 to vector<16x32xf32>
      %435 = arith.mulf %434, %428 : vector<16x32xf32>
      %436 = arith.addf %344, %435 : vector<16x32xf32>
      %c30 = arith.constant 30 : index
      %437 = memref.load %arg2[%c30] : memref<192xf32, #tpu.memory_space<smem>>
      %438 = vector.broadcast %437 : f32 to vector<16x32xf32>
      %439 = arith.mulf %438, %428 : vector<16x32xf32>
      %440 = arith.addf %348, %439 : vector<16x32xf32>
      %c42 = arith.constant 42 : index
      %441 = memref.load %arg2[%c42] : memref<192xf32, #tpu.memory_space<smem>>
      %442 = vector.broadcast %441 : f32 to vector<16x32xf32>
      %443 = arith.mulf %442, %428 : vector<16x32xf32>
      %444 = arith.addf %352, %443 : vector<16x32xf32>
      %445 = vector.extract_strided_slice %426 {offsets = [0, 0, 1], sizes = [1, 16, 32], strides = [1, 1, 1]} : vector<1x18x34xf32> to vector<1x16x32xf32>
      %446 = vector.shape_cast %445 : vector<1x16x32xf32> to vector<16x32xf32>
      %c7 = arith.constant 7 : index
      %447 = memref.load %arg2[%c7] : memref<192xf32, #tpu.memory_space<smem>>
      %448 = vector.broadcast %447 : f32 to vector<16x32xf32>
      %449 = arith.mulf %448, %446 : vector<16x32xf32>
      %450 = arith.addf %432, %449 : vector<16x32xf32>
      %c19 = arith.constant 19 : index
      %451 = memref.load %arg2[%c19] : memref<192xf32, #tpu.memory_space<smem>>
      %452 = vector.broadcast %451 : f32 to vector<16x32xf32>
      %453 = arith.mulf %452, %446 : vector<16x32xf32>
      %454 = arith.addf %436, %453 : vector<16x32xf32>
      %c31 = arith.constant 31 : index
      %455 = memref.load %arg2[%c31] : memref<192xf32, #tpu.memory_space<smem>>
      %456 = vector.broadcast %455 : f32 to vector<16x32xf32>
      %457 = arith.mulf %456, %446 : vector<16x32xf32>
      %458 = arith.addf %440, %457 : vector<16x32xf32>
      %c43 = arith.constant 43 : index
      %459 = memref.load %arg2[%c43] : memref<192xf32, #tpu.memory_space<smem>>
      %460 = vector.broadcast %459 : f32 to vector<16x32xf32>
      %461 = arith.mulf %460, %446 : vector<16x32xf32>
      %462 = arith.addf %444, %461 : vector<16x32xf32>
      %463 = vector.extract_strided_slice %426 {offsets = [0, 0, 2], sizes = [1, 16, 32], strides = [1, 1, 1]} : vector<1x18x34xf32> to vector<1x16x32xf32>
      %464 = vector.shape_cast %463 : vector<1x16x32xf32> to vector<16x32xf32>
      %c8 = arith.constant 8 : index
      %465 = memref.load %arg2[%c8] : memref<192xf32, #tpu.memory_space<smem>>
      %466 = vector.broadcast %465 : f32 to vector<16x32xf32>
      %467 = arith.mulf %466, %464 : vector<16x32xf32>
      %468 = arith.addf %450, %467 : vector<16x32xf32>
      %c20 = arith.constant 20 : index
      %469 = memref.load %arg2[%c20] : memref<192xf32, #tpu.memory_space<smem>>
      %470 = vector.broadcast %469 : f32 to vector<16x32xf32>
      %471 = arith.mulf %470, %464 : vector<16x32xf32>
      %472 = arith.addf %454, %471 : vector<16x32xf32>
      %c32 = arith.constant 32 : index
      %473 = memref.load %arg2[%c32] : memref<192xf32, #tpu.memory_space<smem>>
      %474 = vector.broadcast %473 : f32 to vector<16x32xf32>
      %475 = arith.mulf %474, %464 : vector<16x32xf32>
      %476 = arith.addf %458, %475 : vector<16x32xf32>
      %c44 = arith.constant 44 : index
      %477 = memref.load %arg2[%c44] : memref<192xf32, #tpu.memory_space<smem>>
      %478 = vector.broadcast %477 : f32 to vector<16x32xf32>
      %479 = arith.mulf %478, %464 : vector<16x32xf32>
      %480 = arith.addf %462, %479 : vector<16x32xf32>
      %481 = vector.extract_strided_slice %426 {offsets = [0, 1, 0], sizes = [1, 16, 32], strides = [1, 1, 1]} : vector<1x18x34xf32> to vector<1x16x32xf32>
      %482 = vector.shape_cast %481 : vector<1x16x32xf32> to vector<16x32xf32>
      %c54 = arith.constant 54 : index
      %483 = memref.load %arg2[%c54] : memref<192xf32, #tpu.memory_space<smem>>
      %484 = vector.broadcast %483 : f32 to vector<16x32xf32>
      %485 = arith.mulf %484, %482 : vector<16x32xf32>
      %486 = arith.addf %468, %485 : vector<16x32xf32>
      %c66 = arith.constant 66 : index
      %487 = memref.load %arg2[%c66] : memref<192xf32, #tpu.memory_space<smem>>
      %488 = vector.broadcast %487 : f32 to vector<16x32xf32>
      %489 = arith.mulf %488, %482 : vector<16x32xf32>
      %490 = arith.addf %472, %489 : vector<16x32xf32>
      %c78 = arith.constant 78 : index
      %491 = memref.load %arg2[%c78] : memref<192xf32, #tpu.memory_space<smem>>
      %492 = vector.broadcast %491 : f32 to vector<16x32xf32>
      %493 = arith.mulf %492, %482 : vector<16x32xf32>
      %494 = arith.addf %476, %493 : vector<16x32xf32>
      %c90 = arith.constant 90 : index
      %495 = memref.load %arg2[%c90] : memref<192xf32, #tpu.memory_space<smem>>
      %496 = vector.broadcast %495 : f32 to vector<16x32xf32>
      %497 = arith.mulf %496, %482 : vector<16x32xf32>
      %498 = arith.addf %480, %497 : vector<16x32xf32>
      %c102 = arith.constant 102 : index
      %499 = memref.load %arg2[%c102] : memref<192xf32, #tpu.memory_space<smem>>
      %500 = vector.broadcast %499 : f32 to vector<16x32xf32>
      %501 = arith.mulf %500, %482 : vector<16x32xf32>
      %502 = arith.addf %410, %501 : vector<16x32xf32>
      %c114 = arith.constant 114 : index
      %503 = memref.load %arg2[%c114] : memref<192xf32, #tpu.memory_space<smem>>
      %504 = vector.broadcast %503 : f32 to vector<16x32xf32>
      %505 = arith.mulf %504, %482 : vector<16x32xf32>
      %506 = arith.addf %414, %505 : vector<16x32xf32>
      %c126 = arith.constant 126 : index
      %507 = memref.load %arg2[%c126] : memref<192xf32, #tpu.memory_space<smem>>
      %508 = vector.broadcast %507 : f32 to vector<16x32xf32>
      %509 = arith.mulf %508, %482 : vector<16x32xf32>
      %510 = arith.addf %418, %509 : vector<16x32xf32>
      %c138 = arith.constant 138 : index
      %511 = memref.load %arg2[%c138] : memref<192xf32, #tpu.memory_space<smem>>
      %512 = vector.broadcast %511 : f32 to vector<16x32xf32>
      %513 = arith.mulf %512, %482 : vector<16x32xf32>
      %514 = arith.addf %422, %513 : vector<16x32xf32>
      %515 = vector.extract_strided_slice %426 {offsets = [0, 1, 1], sizes = [1, 16, 32], strides = [1, 1, 1]} : vector<1x18x34xf32> to vector<1x16x32xf32>
      %516 = vector.shape_cast %515 : vector<1x16x32xf32> to vector<16x32xf32>
      %c55 = arith.constant 55 : index
      %517 = memref.load %arg2[%c55] : memref<192xf32, #tpu.memory_space<smem>>
      %518 = vector.broadcast %517 : f32 to vector<16x32xf32>
      %519 = arith.mulf %518, %516 : vector<16x32xf32>
      %520 = arith.addf %486, %519 : vector<16x32xf32>
      %c67 = arith.constant 67 : index
      %521 = memref.load %arg2[%c67] : memref<192xf32, #tpu.memory_space<smem>>
      %522 = vector.broadcast %521 : f32 to vector<16x32xf32>
      %523 = arith.mulf %522, %516 : vector<16x32xf32>
      %524 = arith.addf %490, %523 : vector<16x32xf32>
      %c79 = arith.constant 79 : index
      %525 = memref.load %arg2[%c79] : memref<192xf32, #tpu.memory_space<smem>>
      %526 = vector.broadcast %525 : f32 to vector<16x32xf32>
      %527 = arith.mulf %526, %516 : vector<16x32xf32>
      %528 = arith.addf %494, %527 : vector<16x32xf32>
      %c91 = arith.constant 91 : index
      %529 = memref.load %arg2[%c91] : memref<192xf32, #tpu.memory_space<smem>>
      %530 = vector.broadcast %529 : f32 to vector<16x32xf32>
      %531 = arith.mulf %530, %516 : vector<16x32xf32>
      %532 = arith.addf %498, %531 : vector<16x32xf32>
      %c103 = arith.constant 103 : index
      %533 = memref.load %arg2[%c103] : memref<192xf32, #tpu.memory_space<smem>>
      %534 = vector.broadcast %533 : f32 to vector<16x32xf32>
      %535 = arith.mulf %534, %516 : vector<16x32xf32>
      %536 = arith.addf %502, %535 : vector<16x32xf32>
      %c115 = arith.constant 115 : index
      %537 = memref.load %arg2[%c115] : memref<192xf32, #tpu.memory_space<smem>>
      %538 = vector.broadcast %537 : f32 to vector<16x32xf32>
      %539 = arith.mulf %538, %516 : vector<16x32xf32>
      %540 = arith.addf %506, %539 : vector<16x32xf32>
      %c127 = arith.constant 127 : index
      %541 = memref.load %arg2[%c127] : memref<192xf32, #tpu.memory_space<smem>>
      %542 = vector.broadcast %541 : f32 to vector<16x32xf32>
      %543 = arith.mulf %542, %516 : vector<16x32xf32>
      %544 = arith.addf %510, %543 : vector<16x32xf32>
      %c139 = arith.constant 139 : index
      %545 = memref.load %arg2[%c139] : memref<192xf32, #tpu.memory_space<smem>>
      %546 = vector.broadcast %545 : f32 to vector<16x32xf32>
      %547 = arith.mulf %546, %516 : vector<16x32xf32>
      %548 = arith.addf %514, %547 : vector<16x32xf32>
      %549 = vector.extract_strided_slice %426 {offsets = [0, 1, 2], sizes = [1, 16, 32], strides = [1, 1, 1]} : vector<1x18x34xf32> to vector<1x16x32xf32>
      %550 = vector.shape_cast %549 : vector<1x16x32xf32> to vector<16x32xf32>
      %c56 = arith.constant 56 : index
      %551 = memref.load %arg2[%c56] : memref<192xf32, #tpu.memory_space<smem>>
      %552 = vector.broadcast %551 : f32 to vector<16x32xf32>
      %553 = arith.mulf %552, %550 : vector<16x32xf32>
      %554 = arith.addf %520, %553 : vector<16x32xf32>
      %c68 = arith.constant 68 : index
      %555 = memref.load %arg2[%c68] : memref<192xf32, #tpu.memory_space<smem>>
      %556 = vector.broadcast %555 : f32 to vector<16x32xf32>
      %557 = arith.mulf %556, %550 : vector<16x32xf32>
      %558 = arith.addf %524, %557 : vector<16x32xf32>
      %c80 = arith.constant 80 : index
      %559 = memref.load %arg2[%c80] : memref<192xf32, #tpu.memory_space<smem>>
      %560 = vector.broadcast %559 : f32 to vector<16x32xf32>
      %561 = arith.mulf %560, %550 : vector<16x32xf32>
      %562 = arith.addf %528, %561 : vector<16x32xf32>
      %c92 = arith.constant 92 : index
      %563 = memref.load %arg2[%c92] : memref<192xf32, #tpu.memory_space<smem>>
      %564 = vector.broadcast %563 : f32 to vector<16x32xf32>
      %565 = arith.mulf %564, %550 : vector<16x32xf32>
      %566 = arith.addf %532, %565 : vector<16x32xf32>
      %c104 = arith.constant 104 : index
      %567 = memref.load %arg2[%c104] : memref<192xf32, #tpu.memory_space<smem>>
      %568 = vector.broadcast %567 : f32 to vector<16x32xf32>
      %569 = arith.mulf %568, %550 : vector<16x32xf32>
      %570 = arith.addf %536, %569 : vector<16x32xf32>
      %c116 = arith.constant 116 : index
      %571 = memref.load %arg2[%c116] : memref<192xf32, #tpu.memory_space<smem>>
      %572 = vector.broadcast %571 : f32 to vector<16x32xf32>
      %573 = arith.mulf %572, %550 : vector<16x32xf32>
      %574 = arith.addf %540, %573 : vector<16x32xf32>
      %c128 = arith.constant 128 : index
      %575 = memref.load %arg2[%c128] : memref<192xf32, #tpu.memory_space<smem>>
      %576 = vector.broadcast %575 : f32 to vector<16x32xf32>
      %577 = arith.mulf %576, %550 : vector<16x32xf32>
      %578 = arith.addf %544, %577 : vector<16x32xf32>
      %c140 = arith.constant 140 : index
      %579 = memref.load %arg2[%c140] : memref<192xf32, #tpu.memory_space<smem>>
      %580 = vector.broadcast %579 : f32 to vector<16x32xf32>
      %581 = arith.mulf %580, %550 : vector<16x32xf32>
      %582 = arith.addf %548, %581 : vector<16x32xf32>
      %583 = vector.extract_strided_slice %426 {offsets = [0, 2, 0], sizes = [1, 16, 32], strides = [1, 1, 1]} : vector<1x18x34xf32> to vector<1x16x32xf32>
      %584 = vector.shape_cast %583 : vector<1x16x32xf32> to vector<16x32xf32>
      %c150 = arith.constant 150 : index
      %585 = memref.load %arg2[%c150] : memref<192xf32, #tpu.memory_space<smem>>
      %586 = vector.broadcast %585 : f32 to vector<16x32xf32>
      %587 = arith.mulf %586, %584 : vector<16x32xf32>
      %588 = arith.addf %570, %587 : vector<16x32xf32>
      %c162 = arith.constant 162 : index
      %589 = memref.load %arg2[%c162] : memref<192xf32, #tpu.memory_space<smem>>
      %590 = vector.broadcast %589 : f32 to vector<16x32xf32>
      %591 = arith.mulf %590, %584 : vector<16x32xf32>
      %592 = arith.addf %574, %591 : vector<16x32xf32>
      %c174 = arith.constant 174 : index
      %593 = memref.load %arg2[%c174] : memref<192xf32, #tpu.memory_space<smem>>
      %594 = vector.broadcast %593 : f32 to vector<16x32xf32>
      %595 = arith.mulf %594, %584 : vector<16x32xf32>
      %596 = arith.addf %578, %595 : vector<16x32xf32>
      %c186 = arith.constant 186 : index
      %597 = memref.load %arg2[%c186] : memref<192xf32, #tpu.memory_space<smem>>
      %598 = vector.broadcast %597 : f32 to vector<16x32xf32>
      %599 = arith.mulf %598, %584 : vector<16x32xf32>
      %600 = arith.addf %582, %599 : vector<16x32xf32>
      %601 = vector.extract_strided_slice %426 {offsets = [0, 2, 1], sizes = [1, 16, 32], strides = [1, 1, 1]} : vector<1x18x34xf32> to vector<1x16x32xf32>
      %602 = vector.shape_cast %601 : vector<1x16x32xf32> to vector<16x32xf32>
      %c151 = arith.constant 151 : index
      %603 = memref.load %arg2[%c151] : memref<192xf32, #tpu.memory_space<smem>>
      %604 = vector.broadcast %603 : f32 to vector<16x32xf32>
      %605 = arith.mulf %604, %602 : vector<16x32xf32>
      %606 = arith.addf %588, %605 : vector<16x32xf32>
      %c163 = arith.constant 163 : index
      %607 = memref.load %arg2[%c163] : memref<192xf32, #tpu.memory_space<smem>>
      %608 = vector.broadcast %607 : f32 to vector<16x32xf32>
      %609 = arith.mulf %608, %602 : vector<16x32xf32>
      %610 = arith.addf %592, %609 : vector<16x32xf32>
      %c175 = arith.constant 175 : index
      %611 = memref.load %arg2[%c175] : memref<192xf32, #tpu.memory_space<smem>>
      %612 = vector.broadcast %611 : f32 to vector<16x32xf32>
      %613 = arith.mulf %612, %602 : vector<16x32xf32>
      %614 = arith.addf %596, %613 : vector<16x32xf32>
      %c187 = arith.constant 187 : index
      %615 = memref.load %arg2[%c187] : memref<192xf32, #tpu.memory_space<smem>>
      %616 = vector.broadcast %615 : f32 to vector<16x32xf32>
      %617 = arith.mulf %616, %602 : vector<16x32xf32>
      %618 = arith.addf %600, %617 : vector<16x32xf32>
      %619 = vector.extract_strided_slice %426 {offsets = [0, 2, 2], sizes = [1, 16, 32], strides = [1, 1, 1]} : vector<1x18x34xf32> to vector<1x16x32xf32>
      %620 = vector.shape_cast %619 : vector<1x16x32xf32> to vector<16x32xf32>
      %c152 = arith.constant 152 : index
      %621 = memref.load %arg2[%c152] : memref<192xf32, #tpu.memory_space<smem>>
      %622 = vector.broadcast %621 : f32 to vector<16x32xf32>
      %623 = arith.mulf %622, %620 : vector<16x32xf32>
      %624 = arith.addf %606, %623 : vector<16x32xf32>
      %c164 = arith.constant 164 : index
      %625 = memref.load %arg2[%c164] : memref<192xf32, #tpu.memory_space<smem>>
      %626 = vector.broadcast %625 : f32 to vector<16x32xf32>
      %627 = arith.mulf %626, %620 : vector<16x32xf32>
      %628 = arith.addf %610, %627 : vector<16x32xf32>
      %c176 = arith.constant 176 : index
      %629 = memref.load %arg2[%c176] : memref<192xf32, #tpu.memory_space<smem>>
      %630 = vector.broadcast %629 : f32 to vector<16x32xf32>
      %631 = arith.mulf %630, %620 : vector<16x32xf32>
      %632 = arith.addf %614, %631 : vector<16x32xf32>
      %c188 = arith.constant 188 : index
      %633 = memref.load %arg2[%c188] : memref<192xf32, #tpu.memory_space<smem>>
      %634 = vector.broadcast %633 : f32 to vector<16x32xf32>
      %635 = arith.mulf %634, %620 : vector<16x32xf32>
      %636 = arith.addf %618, %635 : vector<16x32xf32>
      %637 = arith.addi %0, %arg9 : i32
      %c0_17 = arith.constant 0 : index
      %c3_18 = arith.constant 3 : index
      %638 = arith.index_cast %637 : i32 to index
      %c0_19 = arith.constant 0 : index
      %c0_20 = arith.constant 0 : index
      %639 = vector.load %arg6[%c0_17, %c3_18, %638, %c0_19, %c0_20] : memref<1x4x10x18x34xf32, #tpu.memory_space<vmem>>, vector<1x1x1x18x34xf32>
      %640 = vector.shape_cast %639 : vector<1x1x1x18x34xf32> to vector<1x18x34xf32>
      %641 = vector.extract_strided_slice %640 {offsets = [0, 0, 0], sizes = [1, 16, 32], strides = [1, 1, 1]} : vector<1x18x34xf32> to vector<1x16x32xf32>
      %642 = vector.shape_cast %641 : vector<1x16x32xf32> to vector<16x32xf32>
      %c9 = arith.constant 9 : index
      %643 = memref.load %arg2[%c9] : memref<192xf32, #tpu.memory_space<smem>>
      %644 = vector.broadcast %643 : f32 to vector<16x32xf32>
      %645 = arith.mulf %644, %642 : vector<16x32xf32>
      %646 = arith.addf %554, %645 : vector<16x32xf32>
      %c21 = arith.constant 21 : index
      %647 = memref.load %arg2[%c21] : memref<192xf32, #tpu.memory_space<smem>>
      %648 = vector.broadcast %647 : f32 to vector<16x32xf32>
      %649 = arith.mulf %648, %642 : vector<16x32xf32>
      %650 = arith.addf %558, %649 : vector<16x32xf32>
      %c33 = arith.constant 33 : index
      %651 = memref.load %arg2[%c33] : memref<192xf32, #tpu.memory_space<smem>>
      %652 = vector.broadcast %651 : f32 to vector<16x32xf32>
      %653 = arith.mulf %652, %642 : vector<16x32xf32>
      %654 = arith.addf %562, %653 : vector<16x32xf32>
      %c45 = arith.constant 45 : index
      %655 = memref.load %arg2[%c45] : memref<192xf32, #tpu.memory_space<smem>>
      %656 = vector.broadcast %655 : f32 to vector<16x32xf32>
      %657 = arith.mulf %656, %642 : vector<16x32xf32>
      %658 = arith.addf %566, %657 : vector<16x32xf32>
      %659 = vector.extract_strided_slice %640 {offsets = [0, 0, 1], sizes = [1, 16, 32], strides = [1, 1, 1]} : vector<1x18x34xf32> to vector<1x16x32xf32>
      %660 = vector.shape_cast %659 : vector<1x16x32xf32> to vector<16x32xf32>
      %c10 = arith.constant 10 : index
      %661 = memref.load %arg2[%c10] : memref<192xf32, #tpu.memory_space<smem>>
      %662 = vector.broadcast %661 : f32 to vector<16x32xf32>
      %663 = arith.mulf %662, %660 : vector<16x32xf32>
      %664 = arith.addf %646, %663 : vector<16x32xf32>
      %c22 = arith.constant 22 : index
      %665 = memref.load %arg2[%c22] : memref<192xf32, #tpu.memory_space<smem>>
      %666 = vector.broadcast %665 : f32 to vector<16x32xf32>
      %667 = arith.mulf %666, %660 : vector<16x32xf32>
      %668 = arith.addf %650, %667 : vector<16x32xf32>
      %c34 = arith.constant 34 : index
      %669 = memref.load %arg2[%c34] : memref<192xf32, #tpu.memory_space<smem>>
      %670 = vector.broadcast %669 : f32 to vector<16x32xf32>
      %671 = arith.mulf %670, %660 : vector<16x32xf32>
      %672 = arith.addf %654, %671 : vector<16x32xf32>
      %c46 = arith.constant 46 : index
      %673 = memref.load %arg2[%c46] : memref<192xf32, #tpu.memory_space<smem>>
      %674 = vector.broadcast %673 : f32 to vector<16x32xf32>
      %675 = arith.mulf %674, %660 : vector<16x32xf32>
      %676 = arith.addf %658, %675 : vector<16x32xf32>
      %677 = vector.extract_strided_slice %640 {offsets = [0, 0, 2], sizes = [1, 16, 32], strides = [1, 1, 1]} : vector<1x18x34xf32> to vector<1x16x32xf32>
      %678 = vector.shape_cast %677 : vector<1x16x32xf32> to vector<16x32xf32>
      %c11 = arith.constant 11 : index
      %679 = memref.load %arg2[%c11] : memref<192xf32, #tpu.memory_space<smem>>
      %680 = vector.broadcast %679 : f32 to vector<16x32xf32>
      %681 = arith.mulf %680, %678 : vector<16x32xf32>
      %682 = arith.addf %664, %681 : vector<16x32xf32>
      %c23 = arith.constant 23 : index
      %683 = memref.load %arg2[%c23] : memref<192xf32, #tpu.memory_space<smem>>
      %684 = vector.broadcast %683 : f32 to vector<16x32xf32>
      %685 = arith.mulf %684, %678 : vector<16x32xf32>
      %686 = arith.addf %668, %685 : vector<16x32xf32>
      %c35 = arith.constant 35 : index
      %687 = memref.load %arg2[%c35] : memref<192xf32, #tpu.memory_space<smem>>
      %688 = vector.broadcast %687 : f32 to vector<16x32xf32>
      %689 = arith.mulf %688, %678 : vector<16x32xf32>
      %690 = arith.addf %672, %689 : vector<16x32xf32>
      %c47 = arith.constant 47 : index
      %691 = memref.load %arg2[%c47] : memref<192xf32, #tpu.memory_space<smem>>
      %692 = vector.broadcast %691 : f32 to vector<16x32xf32>
      %693 = arith.mulf %692, %678 : vector<16x32xf32>
      %694 = arith.addf %676, %693 : vector<16x32xf32>
      %695 = vector.extract_strided_slice %640 {offsets = [0, 1, 0], sizes = [1, 16, 32], strides = [1, 1, 1]} : vector<1x18x34xf32> to vector<1x16x32xf32>
      %696 = vector.shape_cast %695 : vector<1x16x32xf32> to vector<16x32xf32>
      %c57 = arith.constant 57 : index
      %697 = memref.load %arg2[%c57] : memref<192xf32, #tpu.memory_space<smem>>
      %698 = vector.broadcast %697 : f32 to vector<16x32xf32>
      %699 = arith.mulf %698, %696 : vector<16x32xf32>
      %700 = arith.addf %682, %699 : vector<16x32xf32>
      %c69 = arith.constant 69 : index
      %701 = memref.load %arg2[%c69] : memref<192xf32, #tpu.memory_space<smem>>
      %702 = vector.broadcast %701 : f32 to vector<16x32xf32>
      %703 = arith.mulf %702, %696 : vector<16x32xf32>
      %704 = arith.addf %686, %703 : vector<16x32xf32>
      %c81 = arith.constant 81 : index
      %705 = memref.load %arg2[%c81] : memref<192xf32, #tpu.memory_space<smem>>
      %706 = vector.broadcast %705 : f32 to vector<16x32xf32>
      %707 = arith.mulf %706, %696 : vector<16x32xf32>
      %708 = arith.addf %690, %707 : vector<16x32xf32>
      %c93 = arith.constant 93 : index
      %709 = memref.load %arg2[%c93] : memref<192xf32, #tpu.memory_space<smem>>
      %710 = vector.broadcast %709 : f32 to vector<16x32xf32>
      %711 = arith.mulf %710, %696 : vector<16x32xf32>
      %712 = arith.addf %694, %711 : vector<16x32xf32>
      %c105 = arith.constant 105 : index
      %713 = memref.load %arg2[%c105] : memref<192xf32, #tpu.memory_space<smem>>
      %714 = vector.broadcast %713 : f32 to vector<16x32xf32>
      %715 = arith.mulf %714, %696 : vector<16x32xf32>
      %716 = arith.addf %624, %715 : vector<16x32xf32>
      %c117 = arith.constant 117 : index
      %717 = memref.load %arg2[%c117] : memref<192xf32, #tpu.memory_space<smem>>
      %718 = vector.broadcast %717 : f32 to vector<16x32xf32>
      %719 = arith.mulf %718, %696 : vector<16x32xf32>
      %720 = arith.addf %628, %719 : vector<16x32xf32>
      %c129 = arith.constant 129 : index
      %721 = memref.load %arg2[%c129] : memref<192xf32, #tpu.memory_space<smem>>
      %722 = vector.broadcast %721 : f32 to vector<16x32xf32>
      %723 = arith.mulf %722, %696 : vector<16x32xf32>
      %724 = arith.addf %632, %723 : vector<16x32xf32>
      %c141 = arith.constant 141 : index
      %725 = memref.load %arg2[%c141] : memref<192xf32, #tpu.memory_space<smem>>
      %726 = vector.broadcast %725 : f32 to vector<16x32xf32>
      %727 = arith.mulf %726, %696 : vector<16x32xf32>
      %728 = arith.addf %636, %727 : vector<16x32xf32>
      %729 = vector.extract_strided_slice %640 {offsets = [0, 1, 1], sizes = [1, 16, 32], strides = [1, 1, 1]} : vector<1x18x34xf32> to vector<1x16x32xf32>
      %730 = vector.shape_cast %729 : vector<1x16x32xf32> to vector<16x32xf32>
      %c58 = arith.constant 58 : index
      %731 = memref.load %arg2[%c58] : memref<192xf32, #tpu.memory_space<smem>>
      %732 = vector.broadcast %731 : f32 to vector<16x32xf32>
      %733 = arith.mulf %732, %730 : vector<16x32xf32>
      %734 = arith.addf %700, %733 : vector<16x32xf32>
      %c70 = arith.constant 70 : index
      %735 = memref.load %arg2[%c70] : memref<192xf32, #tpu.memory_space<smem>>
      %736 = vector.broadcast %735 : f32 to vector<16x32xf32>
      %737 = arith.mulf %736, %730 : vector<16x32xf32>
      %738 = arith.addf %704, %737 : vector<16x32xf32>
      %c82 = arith.constant 82 : index
      %739 = memref.load %arg2[%c82] : memref<192xf32, #tpu.memory_space<smem>>
      %740 = vector.broadcast %739 : f32 to vector<16x32xf32>
      %741 = arith.mulf %740, %730 : vector<16x32xf32>
      %742 = arith.addf %708, %741 : vector<16x32xf32>
      %c94 = arith.constant 94 : index
      %743 = memref.load %arg2[%c94] : memref<192xf32, #tpu.memory_space<smem>>
      %744 = vector.broadcast %743 : f32 to vector<16x32xf32>
      %745 = arith.mulf %744, %730 : vector<16x32xf32>
      %746 = arith.addf %712, %745 : vector<16x32xf32>
      %c106 = arith.constant 106 : index
      %747 = memref.load %arg2[%c106] : memref<192xf32, #tpu.memory_space<smem>>
      %748 = vector.broadcast %747 : f32 to vector<16x32xf32>
      %749 = arith.mulf %748, %730 : vector<16x32xf32>
      %750 = arith.addf %716, %749 : vector<16x32xf32>
      %c118 = arith.constant 118 : index
      %751 = memref.load %arg2[%c118] : memref<192xf32, #tpu.memory_space<smem>>
      %752 = vector.broadcast %751 : f32 to vector<16x32xf32>
      %753 = arith.mulf %752, %730 : vector<16x32xf32>
      %754 = arith.addf %720, %753 : vector<16x32xf32>
      %c130 = arith.constant 130 : index
      %755 = memref.load %arg2[%c130] : memref<192xf32, #tpu.memory_space<smem>>
      %756 = vector.broadcast %755 : f32 to vector<16x32xf32>
      %757 = arith.mulf %756, %730 : vector<16x32xf32>
      %758 = arith.addf %724, %757 : vector<16x32xf32>
      %c142 = arith.constant 142 : index
      %759 = memref.load %arg2[%c142] : memref<192xf32, #tpu.memory_space<smem>>
      %760 = vector.broadcast %759 : f32 to vector<16x32xf32>
      %761 = arith.mulf %760, %730 : vector<16x32xf32>
      %762 = arith.addf %728, %761 : vector<16x32xf32>
      %763 = vector.extract_strided_slice %640 {offsets = [0, 1, 2], sizes = [1, 16, 32], strides = [1, 1, 1]} : vector<1x18x34xf32> to vector<1x16x32xf32>
      %764 = vector.shape_cast %763 : vector<1x16x32xf32> to vector<16x32xf32>
      %c59 = arith.constant 59 : index
      %765 = memref.load %arg2[%c59] : memref<192xf32, #tpu.memory_space<smem>>
      %766 = vector.broadcast %765 : f32 to vector<16x32xf32>
      %767 = arith.mulf %766, %764 : vector<16x32xf32>
      %768 = arith.addf %734, %767 : vector<16x32xf32>
      %c71 = arith.constant 71 : index
      %769 = memref.load %arg2[%c71] : memref<192xf32, #tpu.memory_space<smem>>
      %770 = vector.broadcast %769 : f32 to vector<16x32xf32>
      %771 = arith.mulf %770, %764 : vector<16x32xf32>
      %772 = arith.addf %738, %771 : vector<16x32xf32>
      %c83 = arith.constant 83 : index
      %773 = memref.load %arg2[%c83] : memref<192xf32, #tpu.memory_space<smem>>
      %774 = vector.broadcast %773 : f32 to vector<16x32xf32>
      %775 = arith.mulf %774, %764 : vector<16x32xf32>
      %776 = arith.addf %742, %775 : vector<16x32xf32>
      %c95 = arith.constant 95 : index
      %777 = memref.load %arg2[%c95] : memref<192xf32, #tpu.memory_space<smem>>
      %778 = vector.broadcast %777 : f32 to vector<16x32xf32>
      %779 = arith.mulf %778, %764 : vector<16x32xf32>
      %780 = arith.addf %746, %779 : vector<16x32xf32>
      %c107 = arith.constant 107 : index
      %781 = memref.load %arg2[%c107] : memref<192xf32, #tpu.memory_space<smem>>
      %782 = vector.broadcast %781 : f32 to vector<16x32xf32>
      %783 = arith.mulf %782, %764 : vector<16x32xf32>
      %784 = arith.addf %750, %783 : vector<16x32xf32>
      %c119 = arith.constant 119 : index
      %785 = memref.load %arg2[%c119] : memref<192xf32, #tpu.memory_space<smem>>
      %786 = vector.broadcast %785 : f32 to vector<16x32xf32>
      %787 = arith.mulf %786, %764 : vector<16x32xf32>
      %788 = arith.addf %754, %787 : vector<16x32xf32>
      %c131 = arith.constant 131 : index
      %789 = memref.load %arg2[%c131] : memref<192xf32, #tpu.memory_space<smem>>
      %790 = vector.broadcast %789 : f32 to vector<16x32xf32>
      %791 = arith.mulf %790, %764 : vector<16x32xf32>
      %792 = arith.addf %758, %791 : vector<16x32xf32>
      %c143 = arith.constant 143 : index
      %793 = memref.load %arg2[%c143] : memref<192xf32, #tpu.memory_space<smem>>
      %794 = vector.broadcast %793 : f32 to vector<16x32xf32>
      %795 = arith.mulf %794, %764 : vector<16x32xf32>
      %796 = arith.addf %762, %795 : vector<16x32xf32>
      %797 = vector.extract_strided_slice %640 {offsets = [0, 2, 0], sizes = [1, 16, 32], strides = [1, 1, 1]} : vector<1x18x34xf32> to vector<1x16x32xf32>
      %798 = vector.shape_cast %797 : vector<1x16x32xf32> to vector<16x32xf32>
      %c153 = arith.constant 153 : index
      %799 = memref.load %arg2[%c153] : memref<192xf32, #tpu.memory_space<smem>>
      %800 = vector.broadcast %799 : f32 to vector<16x32xf32>
      %801 = arith.mulf %800, %798 : vector<16x32xf32>
      %802 = arith.addf %784, %801 : vector<16x32xf32>
      %c165 = arith.constant 165 : index
      %803 = memref.load %arg2[%c165] : memref<192xf32, #tpu.memory_space<smem>>
      %804 = vector.broadcast %803 : f32 to vector<16x32xf32>
      %805 = arith.mulf %804, %798 : vector<16x32xf32>
      %806 = arith.addf %788, %805 : vector<16x32xf32>
      %c177 = arith.constant 177 : index
      %807 = memref.load %arg2[%c177] : memref<192xf32, #tpu.memory_space<smem>>
      %808 = vector.broadcast %807 : f32 to vector<16x32xf32>
      %809 = arith.mulf %808, %798 : vector<16x32xf32>
      %810 = arith.addf %792, %809 : vector<16x32xf32>
      %c189 = arith.constant 189 : index
      %811 = memref.load %arg2[%c189] : memref<192xf32, #tpu.memory_space<smem>>
      %812 = vector.broadcast %811 : f32 to vector<16x32xf32>
      %813 = arith.mulf %812, %798 : vector<16x32xf32>
      %814 = arith.addf %796, %813 : vector<16x32xf32>
      %815 = vector.extract_strided_slice %640 {offsets = [0, 2, 1], sizes = [1, 16, 32], strides = [1, 1, 1]} : vector<1x18x34xf32> to vector<1x16x32xf32>
      %816 = vector.shape_cast %815 : vector<1x16x32xf32> to vector<16x32xf32>
      %c154 = arith.constant 154 : index
      %817 = memref.load %arg2[%c154] : memref<192xf32, #tpu.memory_space<smem>>
      %818 = vector.broadcast %817 : f32 to vector<16x32xf32>
      %819 = arith.mulf %818, %816 : vector<16x32xf32>
      %820 = arith.addf %802, %819 : vector<16x32xf32>
      %c166 = arith.constant 166 : index
      %821 = memref.load %arg2[%c166] : memref<192xf32, #tpu.memory_space<smem>>
      %822 = vector.broadcast %821 : f32 to vector<16x32xf32>
      %823 = arith.mulf %822, %816 : vector<16x32xf32>
      %824 = arith.addf %806, %823 : vector<16x32xf32>
      %c178 = arith.constant 178 : index
      %825 = memref.load %arg2[%c178] : memref<192xf32, #tpu.memory_space<smem>>
      %826 = vector.broadcast %825 : f32 to vector<16x32xf32>
      %827 = arith.mulf %826, %816 : vector<16x32xf32>
      %828 = arith.addf %810, %827 : vector<16x32xf32>
      %c190 = arith.constant 190 : index
      %829 = memref.load %arg2[%c190] : memref<192xf32, #tpu.memory_space<smem>>
      %830 = vector.broadcast %829 : f32 to vector<16x32xf32>
      %831 = arith.mulf %830, %816 : vector<16x32xf32>
      %832 = arith.addf %814, %831 : vector<16x32xf32>
      %833 = vector.extract_strided_slice %640 {offsets = [0, 2, 2], sizes = [1, 16, 32], strides = [1, 1, 1]} : vector<1x18x34xf32> to vector<1x16x32xf32>
      %834 = vector.shape_cast %833 : vector<1x16x32xf32> to vector<16x32xf32>
      %c155 = arith.constant 155 : index
      %835 = memref.load %arg2[%c155] : memref<192xf32, #tpu.memory_space<smem>>
      %836 = vector.broadcast %835 : f32 to vector<16x32xf32>
      %837 = arith.mulf %836, %834 : vector<16x32xf32>
      %838 = arith.addf %820, %837 : vector<16x32xf32>
      %c167 = arith.constant 167 : index
      %839 = memref.load %arg2[%c167] : memref<192xf32, #tpu.memory_space<smem>>
      %840 = vector.broadcast %839 : f32 to vector<16x32xf32>
      %841 = arith.mulf %840, %834 : vector<16x32xf32>
      %842 = arith.addf %824, %841 : vector<16x32xf32>
      %c179 = arith.constant 179 : index
      %843 = memref.load %arg2[%c179] : memref<192xf32, #tpu.memory_space<smem>>
      %844 = vector.broadcast %843 : f32 to vector<16x32xf32>
      %845 = arith.mulf %844, %834 : vector<16x32xf32>
      %846 = arith.addf %828, %845 : vector<16x32xf32>
      %c191 = arith.constant 191 : index
      %847 = memref.load %arg2[%c191] : memref<192xf32, #tpu.memory_space<smem>>
      %848 = vector.broadcast %847 : f32 to vector<16x32xf32>
      %849 = arith.mulf %848, %834 : vector<16x32xf32>
      %850 = arith.addf %832, %849 : vector<16x32xf32>
      %c0_21 = arith.constant 0 : index
      %851 = memref.load %arg3[%c0_21] : memref<4xf32, #tpu.memory_space<smem>>
      %852 = vector.broadcast %851 : f32 to vector<16x32xf32>
      %853 = arith.addf %768, %852 : vector<16x32xf32>
      %854 = arith.index_cast %arg9 : i32 to index
      %c0_22 = arith.constant 0 : index
      %c0_23 = arith.constant 0 : index
      %c0_24 = arith.constant 0 : index
      %c0_25 = arith.constant 0 : index
      %855 = vector.load %arg8[%854, %c0_22, %c0_23, %c0_24, %c0_25] : memref<10x2x4x16x32xf32, #tpu.memory_space<vmem>>, vector<1x1x1x16x32xf32>
      %856 = vector.shape_cast %855 : vector<1x1x1x16x32xf32> to vector<16x32xf32>
      %857 = vector.shape_cast %853 : vector<16x32xf32> to vector<1x1x1x16x32xf32>
      tpu.vector_store %arg8[%854, %c0_22, %c0_23, %c0_24, %c0_25], %857 {strides = array<i32>} : memref<10x2x4x16x32xf32, #tpu.memory_space<vmem>>, vector<1x1x1x16x32xf32>,
      %c1_26 = arith.constant 1 : index
      %858 = memref.load %arg3[%c1_26] : memref<4xf32, #tpu.memory_space<smem>>
      %859 = vector.broadcast %858 : f32 to vector<16x32xf32>
      %860 = arith.addf %772, %859 : vector<16x32xf32>
      %861 = arith.index_cast %arg9 : i32 to index
      %c0_27 = arith.constant 0 : index
      %c1_28 = arith.constant 1 : index
      %c0_29 = arith.constant 0 : index
      %c0_30 = arith.constant 0 : index
      %862 = vector.load %arg8[%861, %c0_27, %c1_28, %c0_29, %c0_30] : memref<10x2x4x16x32xf32, #tpu.memory_space<vmem>>, vector<1x1x1x16x32xf32>
      %863 = vector.shape_cast %862 : vector<1x1x1x16x32xf32> to vector<16x32xf32>
      %864 = vector.shape_cast %860 : vector<16x32xf32> to vector<1x1x1x16x32xf32>
      tpu.vector_store %arg8[%861, %c0_27, %c1_28, %c0_29, %c0_30], %864 {strides = array<i32>} : memref<10x2x4x16x32xf32, #tpu.memory_space<vmem>>, vector<1x1x1x16x32xf32>,
      %c2_31 = arith.constant 2 : index
      %865 = memref.load %arg3[%c2_31] : memref<4xf32, #tpu.memory_space<smem>>
      %866 = vector.broadcast %865 : f32 to vector<16x32xf32>
      %867 = arith.addf %776, %866 : vector<16x32xf32>
      %868 = arith.index_cast %arg9 : i32 to index
      %c0_32 = arith.constant 0 : index
      %c2_33 = arith.constant 2 : index
      %c0_34 = arith.constant 0 : index
      %c0_35 = arith.constant 0 : index
      %869 = vector.load %arg8[%868, %c0_32, %c2_33, %c0_34, %c0_35] : memref<10x2x4x16x32xf32, #tpu.memory_space<vmem>>, vector<1x1x1x16x32xf32>
      %870 = vector.shape_cast %869 : vector<1x1x1x16x32xf32> to vector<16x32xf32>
      %871 = vector.shape_cast %867 : vector<16x32xf32> to vector<1x1x1x16x32xf32>
      tpu.vector_store %arg8[%868, %c0_32, %c2_33, %c0_34, %c0_35], %871 {strides = array<i32>} : memref<10x2x4x16x32xf32, #tpu.memory_space<vmem>>, vector<1x1x1x16x32xf32>,
      %c3_36 = arith.constant 3 : index
      %872 = memref.load %arg3[%c3_36] : memref<4xf32, #tpu.memory_space<smem>>
      %873 = vector.broadcast %872 : f32 to vector<16x32xf32>
      %874 = arith.addf %780, %873 : vector<16x32xf32>
      %875 = arith.index_cast %arg9 : i32 to index
      %c0_37 = arith.constant 0 : index
      %c3_38 = arith.constant 3 : index
      %c0_39 = arith.constant 0 : index
      %c0_40 = arith.constant 0 : index
      %876 = vector.load %arg8[%875, %c0_37, %c3_38, %c0_39, %c0_40] : memref<10x2x4x16x32xf32, #tpu.memory_space<vmem>>, vector<1x1x1x16x32xf32>
      %877 = vector.shape_cast %876 : vector<1x1x1x16x32xf32> to vector<16x32xf32>
      %878 = vector.shape_cast %874 : vector<16x32xf32> to vector<1x1x1x16x32xf32>
      tpu.vector_store %arg8[%875, %c0_37, %c3_38, %c0_39, %c0_40], %878 {strides = array<i32>} : memref<10x2x4x16x32xf32, #tpu.memory_space<vmem>>, vector<1x1x1x16x32xf32>,
      %c0_41 = arith.constant 0 : index
      %879 = memref.load %arg3[%c0_41] : memref<4xf32, #tpu.memory_space<smem>>
      %880 = vector.broadcast %879 : f32 to vector<16x32xf32>
      %881 = arith.addf %838, %880 : vector<16x32xf32>
      %882 = arith.index_cast %arg9 : i32 to index
      %c1_42 = arith.constant 1 : index
      %c0_43 = arith.constant 0 : index
      %c0_44 = arith.constant 0 : index
      %c0_45 = arith.constant 0 : index
      %883 = vector.load %arg8[%882, %c1_42, %c0_43, %c0_44, %c0_45] : memref<10x2x4x16x32xf32, #tpu.memory_space<vmem>>, vector<1x1x1x16x32xf32>
      %884 = vector.shape_cast %883 : vector<1x1x1x16x32xf32> to vector<16x32xf32>
      %885 = vector.shape_cast %881 : vector<16x32xf32> to vector<1x1x1x16x32xf32>
      tpu.vector_store %arg8[%882, %c1_42, %c0_43, %c0_44, %c0_45], %885 {strides = array<i32>} : memref<10x2x4x16x32xf32, #tpu.memory_space<vmem>>, vector<1x1x1x16x32xf32>,
      %c1_46 = arith.constant 1 : index
      %886 = memref.load %arg3[%c1_46] : memref<4xf32, #tpu.memory_space<smem>>
      %887 = vector.broadcast %886 : f32 to vector<16x32xf32>
      %888 = arith.addf %842, %887 : vector<16x32xf32>
      %889 = arith.index_cast %arg9 : i32 to index
      %c1_47 = arith.constant 1 : index
      %c1_48 = arith.constant 1 : index
      %c0_49 = arith.constant 0 : index
      %c0_50 = arith.constant 0 : index
      %890 = vector.load %arg8[%889, %c1_47, %c1_48, %c0_49, %c0_50] : memref<10x2x4x16x32xf32, #tpu.memory_space<vmem>>, vector<1x1x1x16x32xf32>
      %891 = vector.shape_cast %890 : vector<1x1x1x16x32xf32> to vector<16x32xf32>
      %892 = vector.shape_cast %888 : vector<16x32xf32> to vector<1x1x1x16x32xf32>
      tpu.vector_store %arg8[%889, %c1_47, %c1_48, %c0_49, %c0_50], %892 {strides = array<i32>} : memref<10x2x4x16x32xf32, #tpu.memory_space<vmem>>, vector<1x1x1x16x32xf32>,
      %c2_51 = arith.constant 2 : index
      %893 = memref.load %arg3[%c2_51] : memref<4xf32, #tpu.memory_space<smem>>
      %894 = vector.broadcast %893 : f32 to vector<16x32xf32>
      %895 = arith.addf %846, %894 : vector<16x32xf32>
      %896 = arith.index_cast %arg9 : i32 to index
      %c1_52 = arith.constant 1 : index
      %c2_53 = arith.constant 2 : index
      %c0_54 = arith.constant 0 : index
      %c0_55 = arith.constant 0 : index
      %897 = vector.load %arg8[%896, %c1_52, %c2_53, %c0_54, %c0_55] : memref<10x2x4x16x32xf32, #tpu.memory_space<vmem>>, vector<1x1x1x16x32xf32>
      %898 = vector.shape_cast %897 : vector<1x1x1x16x32xf32> to vector<16x32xf32>
      %899 = vector.shape_cast %895 : vector<16x32xf32> to vector<1x1x1x16x32xf32>
      tpu.vector_store %arg8[%896, %c1_52, %c2_53, %c0_54, %c0_55], %899 {strides = array<i32>} : memref<10x2x4x16x32xf32, #tpu.memory_space<vmem>>, vector<1x1x1x16x32xf32>,
      %c3_56 = arith.constant 3 : index
      %900 = memref.load %arg3[%c3_56] : memref<4xf32, #tpu.memory_space<smem>>
      %901 = vector.broadcast %900 : f32 to vector<16x32xf32>
      %902 = arith.addf %850, %901 : vector<16x32xf32>
      %903 = arith.index_cast %arg9 : i32 to index
      %c1_57 = arith.constant 1 : index
      %c3_58 = arith.constant 3 : index
      %c0_59 = arith.constant 0 : index
      %c0_60 = arith.constant 0 : index
      %904 = vector.load %arg8[%903, %c1_57, %c3_58, %c0_59, %c0_60] : memref<10x2x4x16x32xf32, #tpu.memory_space<vmem>>, vector<1x1x1x16x32xf32>
      %905 = vector.shape_cast %904 : vector<1x1x1x16x32xf32> to vector<16x32xf32>
      %906 = vector.shape_cast %902 : vector<16x32xf32> to vector<1x1x1x16x32xf32>
      tpu.vector_store %arg8[%903, %c1_57, %c3_58, %c0_59, %c0_60], %906 {strides = array<i32>} : memref<10x2x4x16x32xf32, #tpu.memory_space<vmem>>, vector<1x1x1x16x32xf32>,
    }
    %c10_i32_0 = arith.constant 10 : i32
    %c0_i32_1 = arith.constant 0 : i32
    %c8_i32_2 = arith.constant 8 : i32
    %2 = arith.addi %c0_i32_1, %c8_i32_2 : i32
    %c1_i32_3 = arith.constant 1 : i32
    scf.for %arg9 = %c0_i32_1 to %2 step %c1_i32_3  : i32 {
      %c0_i32_5 = arith.constant 0 : i32
      %3 = arith.addi %arg9, %c0_i32_5 : i32
      %4 = arith.index_cast %3 : i32 to index
      %c0 = arith.constant 0 : index
      %c0_6 = arith.constant 0 : index
      %c0_7 = arith.constant 0 : index
      %c0_8 = arith.constant 0 : index
      %5 = vector.load %arg8[%4, %c0, %c0_6, %c0_7, %c0_8] : memref<10x2x4x16x32xf32, #tpu.memory_space<vmem>>, vector<1x1x1x16x32xf32>
      %6 = vector.shape_cast %5 : vector<1x1x1x16x32xf32> to vector<16x32xf32>
      %c0_9 = arith.constant 0 : index
      %7 = memref.load %arg4[%c0_9] : memref<64xf32, #tpu.memory_space<smem>>
      %8 = vector.broadcast %7 : f32 to vector<16x32xf32>
      %9 = arith.mulf %8, %6 : vector<16x32xf32>
      %c4 = arith.constant 4 : index
      %10 = memref.load %arg4[%c4] : memref<64xf32, #tpu.memory_space<smem>>
      %11 = vector.broadcast %10 : f32 to vector<16x32xf32>
      %12 = arith.mulf %11, %6 : vector<16x32xf32>
      %c8 = arith.constant 8 : index
      %13 = memref.load %arg4[%c8] : memref<64xf32, #tpu.memory_space<smem>>
      %14 = vector.broadcast %13 : f32 to vector<16x32xf32>
      %15 = arith.mulf %14, %6 : vector<16x32xf32>
      %c12 = arith.constant 12 : index
      %16 = memref.load %arg4[%c12] : memref<64xf32, #tpu.memory_space<smem>>
      %17 = vector.broadcast %16 : f32 to vector<16x32xf32>
      %18 = arith.mulf %17, %6 : vector<16x32xf32>
      %c0_i32_10 = arith.constant 0 : i32
      %19 = arith.addi %arg9, %c0_i32_10 : i32
      %20 = arith.index_cast %19 : i32 to index
      %c0_11 = arith.constant 0 : index
      %c1 = arith.constant 1 : index
      %c0_12 = arith.constant 0 : index
      %c0_13 = arith.constant 0 : index
      %21 = vector.load %arg8[%20, %c0_11, %c1, %c0_12, %c0_13] : memref<10x2x4x16x32xf32, #tpu.memory_space<vmem>>, vector<1x1x1x16x32xf32>
      %22 = vector.shape_cast %21 : vector<1x1x1x16x32xf32> to vector<16x32xf32>
      %c1_14 = arith.constant 1 : index
      %23 = memref.load %arg4[%c1_14] : memref<64xf32, #tpu.memory_space<smem>>
      %24 = vector.broadcast %23 : f32 to vector<16x32xf32>
      %25 = arith.mulf %24, %22 : vector<16x32xf32>
      %26 = arith.addf %9, %25 : vector<16x32xf32>
      %c5 = arith.constant 5 : index
      %27 = memref.load %arg4[%c5] : memref<64xf32, #tpu.memory_space<smem>>
      %28 = vector.broadcast %27 : f32 to vector<16x32xf32>
      %29 = arith.mulf %28, %22 : vector<16x32xf32>
      %30 = arith.addf %12, %29 : vector<16x32xf32>
      %c9 = arith.constant 9 : index
      %31 = memref.load %arg4[%c9] : memref<64xf32, #tpu.memory_space<smem>>
      %32 = vector.broadcast %31 : f32 to vector<16x32xf32>
      %33 = arith.mulf %32, %22 : vector<16x32xf32>
      %34 = arith.addf %15, %33 : vector<16x32xf32>
      %c13 = arith.constant 13 : index
      %35 = memref.load %arg4[%c13] : memref<64xf32, #tpu.memory_space<smem>>
      %36 = vector.broadcast %35 : f32 to vector<16x32xf32>
      %37 = arith.mulf %36, %22 : vector<16x32xf32>
      %38 = arith.addf %18, %37 : vector<16x32xf32>
      %c0_i32_15 = arith.constant 0 : i32
      %39 = arith.addi %arg9, %c0_i32_15 : i32
      %40 = arith.index_cast %39 : i32 to index
      %c0_16 = arith.constant 0 : index
      %c2 = arith.constant 2 : index
      %c0_17 = arith.constant 0 : index
      %c0_18 = arith.constant 0 : index
      %41 = vector.load %arg8[%40, %c0_16, %c2, %c0_17, %c0_18] : memref<10x2x4x16x32xf32, #tpu.memory_space<vmem>>, vector<1x1x1x16x32xf32>
      %42 = vector.shape_cast %41 : vector<1x1x1x16x32xf32> to vector<16x32xf32>
      %c2_19 = arith.constant 2 : index
      %43 = memref.load %arg4[%c2_19] : memref<64xf32, #tpu.memory_space<smem>>
      %44 = vector.broadcast %43 : f32 to vector<16x32xf32>
      %45 = arith.mulf %44, %42 : vector<16x32xf32>
      %46 = arith.addf %26, %45 : vector<16x32xf32>
      %c6 = arith.constant 6 : index
      %47 = memref.load %arg4[%c6] : memref<64xf32, #tpu.memory_space<smem>>
      %48 = vector.broadcast %47 : f32 to vector<16x32xf32>
      %49 = arith.mulf %48, %42 : vector<16x32xf32>
      %50 = arith.addf %30, %49 : vector<16x32xf32>
      %c10 = arith.constant 10 : index
      %51 = memref.load %arg4[%c10] : memref<64xf32, #tpu.memory_space<smem>>
      %52 = vector.broadcast %51 : f32 to vector<16x32xf32>
      %53 = arith.mulf %52, %42 : vector<16x32xf32>
      %54 = arith.addf %34, %53 : vector<16x32xf32>
      %c14 = arith.constant 14 : index
      %55 = memref.load %arg4[%c14] : memref<64xf32, #tpu.memory_space<smem>>
      %56 = vector.broadcast %55 : f32 to vector<16x32xf32>
      %57 = arith.mulf %56, %42 : vector<16x32xf32>
      %58 = arith.addf %38, %57 : vector<16x32xf32>
      %c0_i32_20 = arith.constant 0 : i32
      %59 = arith.addi %arg9, %c0_i32_20 : i32
      %60 = arith.index_cast %59 : i32 to index
      %c0_21 = arith.constant 0 : index
      %c3 = arith.constant 3 : index
      %c0_22 = arith.constant 0 : index
      %c0_23 = arith.constant 0 : index
      %61 = vector.load %arg8[%60, %c0_21, %c3, %c0_22, %c0_23] : memref<10x2x4x16x32xf32, #tpu.memory_space<vmem>>, vector<1x1x1x16x32xf32>
      %62 = vector.shape_cast %61 : vector<1x1x1x16x32xf32> to vector<16x32xf32>
      %c3_24 = arith.constant 3 : index
      %63 = memref.load %arg4[%c3_24] : memref<64xf32, #tpu.memory_space<smem>>
      %64 = vector.broadcast %63 : f32 to vector<16x32xf32>
      %65 = arith.mulf %64, %62 : vector<16x32xf32>
      %66 = arith.addf %46, %65 : vector<16x32xf32>
      %c7 = arith.constant 7 : index
      %67 = memref.load %arg4[%c7] : memref<64xf32, #tpu.memory_space<smem>>
      %68 = vector.broadcast %67 : f32 to vector<16x32xf32>
      %69 = arith.mulf %68, %62 : vector<16x32xf32>
      %70 = arith.addf %50, %69 : vector<16x32xf32>
      %c11 = arith.constant 11 : index
      %71 = memref.load %arg4[%c11] : memref<64xf32, #tpu.memory_space<smem>>
      %72 = vector.broadcast %71 : f32 to vector<16x32xf32>
      %73 = arith.mulf %72, %62 : vector<16x32xf32>
      %74 = arith.addf %54, %73 : vector<16x32xf32>
      %c15 = arith.constant 15 : index
      %75 = memref.load %arg4[%c15] : memref<64xf32, #tpu.memory_space<smem>>
      %76 = vector.broadcast %75 : f32 to vector<16x32xf32>
      %77 = arith.mulf %76, %62 : vector<16x32xf32>
      %78 = arith.addf %58, %77 : vector<16x32xf32>
      %c1_i32_25 = arith.constant 1 : i32
      %79 = arith.addi %arg9, %c1_i32_25 : i32
      %80 = arith.index_cast %79 : i32 to index
      %c0_26 = arith.constant 0 : index
      %c0_27 = arith.constant 0 : index
      %c0_28 = arith.constant 0 : index
      %c0_29 = arith.constant 0 : index
      %81 = vector.load %arg8[%80, %c0_26, %c0_27, %c0_28, %c0_29] : memref<10x2x4x16x32xf32, #tpu.memory_space<vmem>>, vector<1x1x1x16x32xf32>
      %82 = vector.shape_cast %81 : vector<1x1x1x16x32xf32> to vector<16x32xf32>
      %c16 = arith.constant 16 : index
      %83 = memref.load %arg4[%c16] : memref<64xf32, #tpu.memory_space<smem>>
      %84 = vector.broadcast %83 : f32 to vector<16x32xf32>
      %85 = arith.mulf %84, %82 : vector<16x32xf32>
      %86 = arith.addf %66, %85 : vector<16x32xf32>
      %c20 = arith.constant 20 : index
      %87 = memref.load %arg4[%c20] : memref<64xf32, #tpu.memory_space<smem>>
      %88 = vector.broadcast %87 : f32 to vector<16x32xf32>
      %89 = arith.mulf %88, %82 : vector<16x32xf32>
      %90 = arith.addf %70, %89 : vector<16x32xf32>
      %c24 = arith.constant 24 : index
      %91 = memref.load %arg4[%c24] : memref<64xf32, #tpu.memory_space<smem>>
      %92 = vector.broadcast %91 : f32 to vector<16x32xf32>
      %93 = arith.mulf %92, %82 : vector<16x32xf32>
      %94 = arith.addf %74, %93 : vector<16x32xf32>
      %c28 = arith.constant 28 : index
      %95 = memref.load %arg4[%c28] : memref<64xf32, #tpu.memory_space<smem>>
      %96 = vector.broadcast %95 : f32 to vector<16x32xf32>
      %97 = arith.mulf %96, %82 : vector<16x32xf32>
      %98 = arith.addf %78, %97 : vector<16x32xf32>
      %c32 = arith.constant 32 : index
      %99 = memref.load %arg4[%c32] : memref<64xf32, #tpu.memory_space<smem>>
      %100 = vector.broadcast %99 : f32 to vector<16x32xf32>
      %101 = arith.mulf %100, %82 : vector<16x32xf32>
      %c36 = arith.constant 36 : index
      %102 = memref.load %arg4[%c36] : memref<64xf32, #tpu.memory_space<smem>>
      %103 = vector.broadcast %102 : f32 to vector<16x32xf32>
      %104 = arith.mulf %103, %82 : vector<16x32xf32>
      %c40 = arith.constant 40 : index
      %105 = memref.load %arg4[%c40] : memref<64xf32, #tpu.memory_space<smem>>
      %106 = vector.broadcast %105 : f32 to vector<16x32xf32>
      %107 = arith.mulf %106, %82 : vector<16x32xf32>
      %c44 = arith.constant 44 : index
      %108 = memref.load %arg4[%c44] : memref<64xf32, #tpu.memory_space<smem>>
      %109 = vector.broadcast %108 : f32 to vector<16x32xf32>
      %110 = arith.mulf %109, %82 : vector<16x32xf32>
      %c1_i32_30 = arith.constant 1 : i32
      %111 = arith.addi %arg9, %c1_i32_30 : i32
      %112 = arith.index_cast %111 : i32 to index
      %c0_31 = arith.constant 0 : index
      %c1_32 = arith.constant 1 : index
      %c0_33 = arith.constant 0 : index
      %c0_34 = arith.constant 0 : index
      %113 = vector.load %arg8[%112, %c0_31, %c1_32, %c0_33, %c0_34] : memref<10x2x4x16x32xf32, #tpu.memory_space<vmem>>, vector<1x1x1x16x32xf32>
      %114 = vector.shape_cast %113 : vector<1x1x1x16x32xf32> to vector<16x32xf32>
      %c17 = arith.constant 17 : index
      %115 = memref.load %arg4[%c17] : memref<64xf32, #tpu.memory_space<smem>>
      %116 = vector.broadcast %115 : f32 to vector<16x32xf32>
      %117 = arith.mulf %116, %114 : vector<16x32xf32>
      %118 = arith.addf %86, %117 : vector<16x32xf32>
      %c21 = arith.constant 21 : index
      %119 = memref.load %arg4[%c21] : memref<64xf32, #tpu.memory_space<smem>>
      %120 = vector.broadcast %119 : f32 to vector<16x32xf32>
      %121 = arith.mulf %120, %114 : vector<16x32xf32>
      %122 = arith.addf %90, %121 : vector<16x32xf32>
      %c25 = arith.constant 25 : index
      %123 = memref.load %arg4[%c25] : memref<64xf32, #tpu.memory_space<smem>>
      %124 = vector.broadcast %123 : f32 to vector<16x32xf32>
      %125 = arith.mulf %124, %114 : vector<16x32xf32>
      %126 = arith.addf %94, %125 : vector<16x32xf32>
      %c29 = arith.constant 29 : index
      %127 = memref.load %arg4[%c29] : memref<64xf32, #tpu.memory_space<smem>>
      %128 = vector.broadcast %127 : f32 to vector<16x32xf32>
      %129 = arith.mulf %128, %114 : vector<16x32xf32>
      %130 = arith.addf %98, %129 : vector<16x32xf32>
      %c33 = arith.constant 33 : index
      %131 = memref.load %arg4[%c33] : memref<64xf32, #tpu.memory_space<smem>>
      %132 = vector.broadcast %131 : f32 to vector<16x32xf32>
      %133 = arith.mulf %132, %114 : vector<16x32xf32>
      %134 = arith.addf %101, %133 : vector<16x32xf32>
      %c37 = arith.constant 37 : index
      %135 = memref.load %arg4[%c37] : memref<64xf32, #tpu.memory_space<smem>>
      %136 = vector.broadcast %135 : f32 to vector<16x32xf32>
      %137 = arith.mulf %136, %114 : vector<16x32xf32>
      %138 = arith.addf %104, %137 : vector<16x32xf32>
      %c41 = arith.constant 41 : index
      %139 = memref.load %arg4[%c41] : memref<64xf32, #tpu.memory_space<smem>>
      %140 = vector.broadcast %139 : f32 to vector<16x32xf32>
      %141 = arith.mulf %140, %114 : vector<16x32xf32>
      %142 = arith.addf %107, %141 : vector<16x32xf32>
      %c45 = arith.constant 45 : index
      %143 = memref.load %arg4[%c45] : memref<64xf32, #tpu.memory_space<smem>>
      %144 = vector.broadcast %143 : f32 to vector<16x32xf32>
      %145 = arith.mulf %144, %114 : vector<16x32xf32>
      %146 = arith.addf %110, %145 : vector<16x32xf32>
      %c1_i32_35 = arith.constant 1 : i32
      %147 = arith.addi %arg9, %c1_i32_35 : i32
      %148 = arith.index_cast %147 : i32 to index
      %c0_36 = arith.constant 0 : index
      %c2_37 = arith.constant 2 : index
      %c0_38 = arith.constant 0 : index
      %c0_39 = arith.constant 0 : index
      %149 = vector.load %arg8[%148, %c0_36, %c2_37, %c0_38, %c0_39] : memref<10x2x4x16x32xf32, #tpu.memory_space<vmem>>, vector<1x1x1x16x32xf32>
      %150 = vector.shape_cast %149 : vector<1x1x1x16x32xf32> to vector<16x32xf32>
      %c18 = arith.constant 18 : index
      %151 = memref.load %arg4[%c18] : memref<64xf32, #tpu.memory_space<smem>>
      %152 = vector.broadcast %151 : f32 to vector<16x32xf32>
      %153 = arith.mulf %152, %150 : vector<16x32xf32>
      %154 = arith.addf %118, %153 : vector<16x32xf32>
      %c22 = arith.constant 22 : index
      %155 = memref.load %arg4[%c22] : memref<64xf32, #tpu.memory_space<smem>>
      %156 = vector.broadcast %155 : f32 to vector<16x32xf32>
      %157 = arith.mulf %156, %150 : vector<16x32xf32>
      %158 = arith.addf %122, %157 : vector<16x32xf32>
      %c26 = arith.constant 26 : index
      %159 = memref.load %arg4[%c26] : memref<64xf32, #tpu.memory_space<smem>>
      %160 = vector.broadcast %159 : f32 to vector<16x32xf32>
      %161 = arith.mulf %160, %150 : vector<16x32xf32>
      %162 = arith.addf %126, %161 : vector<16x32xf32>
      %c30 = arith.constant 30 : index
      %163 = memref.load %arg4[%c30] : memref<64xf32, #tpu.memory_space<smem>>
      %164 = vector.broadcast %163 : f32 to vector<16x32xf32>
      %165 = arith.mulf %164, %150 : vector<16x32xf32>
      %166 = arith.addf %130, %165 : vector<16x32xf32>
      %c34 = arith.constant 34 : index
      %167 = memref.load %arg4[%c34] : memref<64xf32, #tpu.memory_space<smem>>
      %168 = vector.broadcast %167 : f32 to vector<16x32xf32>
      %169 = arith.mulf %168, %150 : vector<16x32xf32>
      %170 = arith.addf %134, %169 : vector<16x32xf32>
      %c38 = arith.constant 38 : index
      %171 = memref.load %arg4[%c38] : memref<64xf32, #tpu.memory_space<smem>>
      %172 = vector.broadcast %171 : f32 to vector<16x32xf32>
      %173 = arith.mulf %172, %150 : vector<16x32xf32>
      %174 = arith.addf %138, %173 : vector<16x32xf32>
      %c42 = arith.constant 42 : index
      %175 = memref.load %arg4[%c42] : memref<64xf32, #tpu.memory_space<smem>>
      %176 = vector.broadcast %175 : f32 to vector<16x32xf32>
      %177 = arith.mulf %176, %150 : vector<16x32xf32>
      %178 = arith.addf %142, %177 : vector<16x32xf32>
      %c46 = arith.constant 46 : index
      %179 = memref.load %arg4[%c46] : memref<64xf32, #tpu.memory_space<smem>>
      %180 = vector.broadcast %179 : f32 to vector<16x32xf32>
      %181 = arith.mulf %180, %150 : vector<16x32xf32>
      %182 = arith.addf %146, %181 : vector<16x32xf32>
      %c1_i32_40 = arith.constant 1 : i32
      %183 = arith.addi %arg9, %c1_i32_40 : i32
      %184 = arith.index_cast %183 : i32 to index
      %c0_41 = arith.constant 0 : index
      %c3_42 = arith.constant 3 : index
      %c0_43 = arith.constant 0 : index
      %c0_44 = arith.constant 0 : index
      %185 = vector.load %arg8[%184, %c0_41, %c3_42, %c0_43, %c0_44] : memref<10x2x4x16x32xf32, #tpu.memory_space<vmem>>, vector<1x1x1x16x32xf32>
      %186 = vector.shape_cast %185 : vector<1x1x1x16x32xf32> to vector<16x32xf32>
      %c19 = arith.constant 19 : index
      %187 = memref.load %arg4[%c19] : memref<64xf32, #tpu.memory_space<smem>>
      %188 = vector.broadcast %187 : f32 to vector<16x32xf32>
      %189 = arith.mulf %188, %186 : vector<16x32xf32>
      %190 = arith.addf %154, %189 : vector<16x32xf32>
      %c23 = arith.constant 23 : index
      %191 = memref.load %arg4[%c23] : memref<64xf32, #tpu.memory_space<smem>>
      %192 = vector.broadcast %191 : f32 to vector<16x32xf32>
      %193 = arith.mulf %192, %186 : vector<16x32xf32>
      %194 = arith.addf %158, %193 : vector<16x32xf32>
      %c27 = arith.constant 27 : index
      %195 = memref.load %arg4[%c27] : memref<64xf32, #tpu.memory_space<smem>>
      %196 = vector.broadcast %195 : f32 to vector<16x32xf32>
      %197 = arith.mulf %196, %186 : vector<16x32xf32>
      %198 = arith.addf %162, %197 : vector<16x32xf32>
      %c31 = arith.constant 31 : index
      %199 = memref.load %arg4[%c31] : memref<64xf32, #tpu.memory_space<smem>>
      %200 = vector.broadcast %199 : f32 to vector<16x32xf32>
      %201 = arith.mulf %200, %186 : vector<16x32xf32>
      %202 = arith.addf %166, %201 : vector<16x32xf32>
      %c35 = arith.constant 35 : index
      %203 = memref.load %arg4[%c35] : memref<64xf32, #tpu.memory_space<smem>>
      %204 = vector.broadcast %203 : f32 to vector<16x32xf32>
      %205 = arith.mulf %204, %186 : vector<16x32xf32>
      %206 = arith.addf %170, %205 : vector<16x32xf32>
      %c39 = arith.constant 39 : index
      %207 = memref.load %arg4[%c39] : memref<64xf32, #tpu.memory_space<smem>>
      %208 = vector.broadcast %207 : f32 to vector<16x32xf32>
      %209 = arith.mulf %208, %186 : vector<16x32xf32>
      %210 = arith.addf %174, %209 : vector<16x32xf32>
      %c43 = arith.constant 43 : index
      %211 = memref.load %arg4[%c43] : memref<64xf32, #tpu.memory_space<smem>>
      %212 = vector.broadcast %211 : f32 to vector<16x32xf32>
      %213 = arith.mulf %212, %186 : vector<16x32xf32>
      %214 = arith.addf %178, %213 : vector<16x32xf32>
      %c47 = arith.constant 47 : index
      %215 = memref.load %arg4[%c47] : memref<64xf32, #tpu.memory_space<smem>>
      %216 = vector.broadcast %215 : f32 to vector<16x32xf32>
      %217 = arith.mulf %216, %186 : vector<16x32xf32>
      %218 = arith.addf %182, %217 : vector<16x32xf32>
      %c2_i32 = arith.constant 2 : i32
      %219 = arith.addi %arg9, %c2_i32 : i32
      %220 = arith.index_cast %219 : i32 to index
      %c0_45 = arith.constant 0 : index
      %c0_46 = arith.constant 0 : index
      %c0_47 = arith.constant 0 : index
      %c0_48 = arith.constant 0 : index
      %221 = vector.load %arg8[%220, %c0_45, %c0_46, %c0_47, %c0_48] : memref<10x2x4x16x32xf32, #tpu.memory_space<vmem>>, vector<1x1x1x16x32xf32>
      %222 = vector.shape_cast %221 : vector<1x1x1x16x32xf32> to vector<16x32xf32>
      %c48 = arith.constant 48 : index
      %223 = memref.load %arg4[%c48] : memref<64xf32, #tpu.memory_space<smem>>
      %224 = vector.broadcast %223 : f32 to vector<16x32xf32>
      %225 = arith.mulf %224, %222 : vector<16x32xf32>
      %226 = arith.addf %206, %225 : vector<16x32xf32>
      %c52 = arith.constant 52 : index
      %227 = memref.load %arg4[%c52] : memref<64xf32, #tpu.memory_space<smem>>
      %228 = vector.broadcast %227 : f32 to vector<16x32xf32>
      %229 = arith.mulf %228, %222 : vector<16x32xf32>
      %230 = arith.addf %210, %229 : vector<16x32xf32>
      %c56 = arith.constant 56 : index
      %231 = memref.load %arg4[%c56] : memref<64xf32, #tpu.memory_space<smem>>
      %232 = vector.broadcast %231 : f32 to vector<16x32xf32>
      %233 = arith.mulf %232, %222 : vector<16x32xf32>
      %234 = arith.addf %214, %233 : vector<16x32xf32>
      %c60 = arith.constant 60 : index
      %235 = memref.load %arg4[%c60] : memref<64xf32, #tpu.memory_space<smem>>
      %236 = vector.broadcast %235 : f32 to vector<16x32xf32>
      %237 = arith.mulf %236, %222 : vector<16x32xf32>
      %238 = arith.addf %218, %237 : vector<16x32xf32>
      %c2_i32_49 = arith.constant 2 : i32
      %239 = arith.addi %arg9, %c2_i32_49 : i32
      %240 = arith.index_cast %239 : i32 to index
      %c0_50 = arith.constant 0 : index
      %c1_51 = arith.constant 1 : index
      %c0_52 = arith.constant 0 : index
      %c0_53 = arith.constant 0 : index
      %241 = vector.load %arg8[%240, %c0_50, %c1_51, %c0_52, %c0_53] : memref<10x2x4x16x32xf32, #tpu.memory_space<vmem>>, vector<1x1x1x16x32xf32>
      %242 = vector.shape_cast %241 : vector<1x1x1x16x32xf32> to vector<16x32xf32>
      %c49 = arith.constant 49 : index
      %243 = memref.load %arg4[%c49] : memref<64xf32, #tpu.memory_space<smem>>
      %244 = vector.broadcast %243 : f32 to vector<16x32xf32>
      %245 = arith.mulf %244, %242 : vector<16x32xf32>
      %246 = arith.addf %226, %245 : vector<16x32xf32>
      %c53 = arith.constant 53 : index
      %247 = memref.load %arg4[%c53] : memref<64xf32, #tpu.memory_space<smem>>
      %248 = vector.broadcast %247 : f32 to vector<16x32xf32>
      %249 = arith.mulf %248, %242 : vector<16x32xf32>
      %250 = arith.addf %230, %249 : vector<16x32xf32>
      %c57 = arith.constant 57 : index
      %251 = memref.load %arg4[%c57] : memref<64xf32, #tpu.memory_space<smem>>
      %252 = vector.broadcast %251 : f32 to vector<16x32xf32>
      %253 = arith.mulf %252, %242 : vector<16x32xf32>
      %254 = arith.addf %234, %253 : vector<16x32xf32>
      %c61 = arith.constant 61 : index
      %255 = memref.load %arg4[%c61] : memref<64xf32, #tpu.memory_space<smem>>
      %256 = vector.broadcast %255 : f32 to vector<16x32xf32>
      %257 = arith.mulf %256, %242 : vector<16x32xf32>
      %258 = arith.addf %238, %257 : vector<16x32xf32>
      %c2_i32_54 = arith.constant 2 : i32
      %259 = arith.addi %arg9, %c2_i32_54 : i32
      %260 = arith.index_cast %259 : i32 to index
      %c0_55 = arith.constant 0 : index
      %c2_56 = arith.constant 2 : index
      %c0_57 = arith.constant 0 : index
      %c0_58 = arith.constant 0 : index
      %261 = vector.load %arg8[%260, %c0_55, %c2_56, %c0_57, %c0_58] : memref<10x2x4x16x32xf32, #tpu.memory_space<vmem>>, vector<1x1x1x16x32xf32>
      %262 = vector.shape_cast %261 : vector<1x1x1x16x32xf32> to vector<16x32xf32>
      %c50 = arith.constant 50 : index
      %263 = memref.load %arg4[%c50] : memref<64xf32, #tpu.memory_space<smem>>
      %264 = vector.broadcast %263 : f32 to vector<16x32xf32>
      %265 = arith.mulf %264, %262 : vector<16x32xf32>
      %266 = arith.addf %246, %265 : vector<16x32xf32>
      %c54 = arith.constant 54 : index
      %267 = memref.load %arg4[%c54] : memref<64xf32, #tpu.memory_space<smem>>
      %268 = vector.broadcast %267 : f32 to vector<16x32xf32>
      %269 = arith.mulf %268, %262 : vector<16x32xf32>
      %270 = arith.addf %250, %269 : vector<16x32xf32>
      %c58 = arith.constant 58 : index
      %271 = memref.load %arg4[%c58] : memref<64xf32, #tpu.memory_space<smem>>
      %272 = vector.broadcast %271 : f32 to vector<16x32xf32>
      %273 = arith.mulf %272, %262 : vector<16x32xf32>
      %274 = arith.addf %254, %273 : vector<16x32xf32>
      %c62 = arith.constant 62 : index
      %275 = memref.load %arg4[%c62] : memref<64xf32, #tpu.memory_space<smem>>
      %276 = vector.broadcast %275 : f32 to vector<16x32xf32>
      %277 = arith.mulf %276, %262 : vector<16x32xf32>
      %278 = arith.addf %258, %277 : vector<16x32xf32>
      %c2_i32_59 = arith.constant 2 : i32
      %279 = arith.addi %arg9, %c2_i32_59 : i32
      %280 = arith.index_cast %279 : i32 to index
      %c0_60 = arith.constant 0 : index
      %c3_61 = arith.constant 3 : index
      %c0_62 = arith.constant 0 : index
      %c0_63 = arith.constant 0 : index
      %281 = vector.load %arg8[%280, %c0_60, %c3_61, %c0_62, %c0_63] : memref<10x2x4x16x32xf32, #tpu.memory_space<vmem>>, vector<1x1x1x16x32xf32>
      %282 = vector.shape_cast %281 : vector<1x1x1x16x32xf32> to vector<16x32xf32>
      %c51 = arith.constant 51 : index
      %283 = memref.load %arg4[%c51] : memref<64xf32, #tpu.memory_space<smem>>
      %284 = vector.broadcast %283 : f32 to vector<16x32xf32>
      %285 = arith.mulf %284, %282 : vector<16x32xf32>
      %286 = arith.addf %266, %285 : vector<16x32xf32>
      %c55 = arith.constant 55 : index
      %287 = memref.load %arg4[%c55] : memref<64xf32, #tpu.memory_space<smem>>
      %288 = vector.broadcast %287 : f32 to vector<16x32xf32>
      %289 = arith.mulf %288, %282 : vector<16x32xf32>
      %290 = arith.addf %270, %289 : vector<16x32xf32>
      %c59 = arith.constant 59 : index
      %291 = memref.load %arg4[%c59] : memref<64xf32, #tpu.memory_space<smem>>
      %292 = vector.broadcast %291 : f32 to vector<16x32xf32>
      %293 = arith.mulf %292, %282 : vector<16x32xf32>
      %294 = arith.addf %274, %293 : vector<16x32xf32>
      %c63 = arith.constant 63 : index
      %295 = memref.load %arg4[%c63] : memref<64xf32, #tpu.memory_space<smem>>
      %296 = vector.broadcast %295 : f32 to vector<16x32xf32>
      %297 = arith.mulf %296, %282 : vector<16x32xf32>
      %298 = arith.addf %278, %297 : vector<16x32xf32>
      %c0_i32_64 = arith.constant 0 : i32
      %299 = arith.addi %arg9, %c0_i32_64 : i32
      %300 = arith.index_cast %299 : i32 to index
      %c1_65 = arith.constant 1 : index
      %c0_66 = arith.constant 0 : index
      %c0_67 = arith.constant 0 : index
      %c0_68 = arith.constant 0 : index
      %301 = vector.load %arg8[%300, %c1_65, %c0_66, %c0_67, %c0_68] : memref<10x2x4x16x32xf32, #tpu.memory_space<vmem>>, vector<1x1x1x16x32xf32>
      %302 = vector.shape_cast %301 : vector<1x1x1x16x32xf32> to vector<16x32xf32>
      %c0_69 = arith.constant 0 : index
      %303 = memref.load %arg4[%c0_69] : memref<64xf32, #tpu.memory_space<smem>>
      %304 = vector.broadcast %303 : f32 to vector<16x32xf32>
      %305 = arith.mulf %304, %302 : vector<16x32xf32>
      %c4_70 = arith.constant 4 : index
      %306 = memref.load %arg4[%c4_70] : memref<64xf32, #tpu.memory_space<smem>>
      %307 = vector.broadcast %306 : f32 to vector<16x32xf32>
      %308 = arith.mulf %307, %302 : vector<16x32xf32>
      %c8_71 = arith.constant 8 : index
      %309 = memref.load %arg4[%c8_71] : memref<64xf32, #tpu.memory_space<smem>>
      %310 = vector.broadcast %309 : f32 to vector<16x32xf32>
      %311 = arith.mulf %310, %302 : vector<16x32xf32>
      %c12_72 = arith.constant 12 : index
      %312 = memref.load %arg4[%c12_72] : memref<64xf32, #tpu.memory_space<smem>>
      %313 = vector.broadcast %312 : f32 to vector<16x32xf32>
      %314 = arith.mulf %313, %302 : vector<16x32xf32>
      %c0_i32_73 = arith.constant 0 : i32
      %315 = arith.addi %arg9, %c0_i32_73 : i32
      %316 = arith.index_cast %315 : i32 to index
      %c1_74 = arith.constant 1 : index
      %c1_75 = arith.constant 1 : index
      %c0_76 = arith.constant 0 : index
      %c0_77 = arith.constant 0 : index
      %317 = vector.load %arg8[%316, %c1_74, %c1_75, %c0_76, %c0_77] : memref<10x2x4x16x32xf32, #tpu.memory_space<vmem>>, vector<1x1x1x16x32xf32>
      %318 = vector.shape_cast %317 : vector<1x1x1x16x32xf32> to vector<16x32xf32>
      %c1_78 = arith.constant 1 : index
      %319 = memref.load %arg4[%c1_78] : memref<64xf32, #tpu.memory_space<smem>>
      %320 = vector.broadcast %319 : f32 to vector<16x32xf32>
      %321 = arith.mulf %320, %318 : vector<16x32xf32>
      %322 = arith.addf %305, %321 : vector<16x32xf32>
      %c5_79 = arith.constant 5 : index
      %323 = memref.load %arg4[%c5_79] : memref<64xf32, #tpu.memory_space<smem>>
      %324 = vector.broadcast %323 : f32 to vector<16x32xf32>
      %325 = arith.mulf %324, %318 : vector<16x32xf32>
      %326 = arith.addf %308, %325 : vector<16x32xf32>
      %c9_80 = arith.constant 9 : index
      %327 = memref.load %arg4[%c9_80] : memref<64xf32, #tpu.memory_space<smem>>
      %328 = vector.broadcast %327 : f32 to vector<16x32xf32>
      %329 = arith.mulf %328, %318 : vector<16x32xf32>
      %330 = arith.addf %311, %329 : vector<16x32xf32>
      %c13_81 = arith.constant 13 : index
      %331 = memref.load %arg4[%c13_81] : memref<64xf32, #tpu.memory_space<smem>>
      %332 = vector.broadcast %331 : f32 to vector<16x32xf32>
      %333 = arith.mulf %332, %318 : vector<16x32xf32>
      %334 = arith.addf %314, %333 : vector<16x32xf32>
      %c0_i32_82 = arith.constant 0 : i32
      %335 = arith.addi %arg9, %c0_i32_82 : i32
      %336 = arith.index_cast %335 : i32 to index
      %c1_83 = arith.constant 1 : index
      %c2_84 = arith.constant 2 : index
      %c0_85 = arith.constant 0 : index
      %c0_86 = arith.constant 0 : index
      %337 = vector.load %arg8[%336, %c1_83, %c2_84, %c0_85, %c0_86] : memref<10x2x4x16x32xf32, #tpu.memory_space<vmem>>, vector<1x1x1x16x32xf32>
      %338 = vector.shape_cast %337 : vector<1x1x1x16x32xf32> to vector<16x32xf32>
      %c2_87 = arith.constant 2 : index
      %339 = memref.load %arg4[%c2_87] : memref<64xf32, #tpu.memory_space<smem>>
      %340 = vector.broadcast %339 : f32 to vector<16x32xf32>
      %341 = arith.mulf %340, %338 : vector<16x32xf32>
      %342 = arith.addf %322, %341 : vector<16x32xf32>
      %c6_88 = arith.constant 6 : index
      %343 = memref.load %arg4[%c6_88] : memref<64xf32, #tpu.memory_space<smem>>
      %344 = vector.broadcast %343 : f32 to vector<16x32xf32>
      %345 = arith.mulf %344, %338 : vector<16x32xf32>
      %346 = arith.addf %326, %345 : vector<16x32xf32>
      %c10_89 = arith.constant 10 : index
      %347 = memref.load %arg4[%c10_89] : memref<64xf32, #tpu.memory_space<smem>>
      %348 = vector.broadcast %347 : f32 to vector<16x32xf32>
      %349 = arith.mulf %348, %338 : vector<16x32xf32>
      %350 = arith.addf %330, %349 : vector<16x32xf32>
      %c14_90 = arith.constant 14 : index
      %351 = memref.load %arg4[%c14_90] : memref<64xf32, #tpu.memory_space<smem>>
      %352 = vector.broadcast %351 : f32 to vector<16x32xf32>
      %353 = arith.mulf %352, %338 : vector<16x32xf32>
      %354 = arith.addf %334, %353 : vector<16x32xf32>
      %c0_i32_91 = arith.constant 0 : i32
      %355 = arith.addi %arg9, %c0_i32_91 : i32
      %356 = arith.index_cast %355 : i32 to index
      %c1_92 = arith.constant 1 : index
      %c3_93 = arith.constant 3 : index
      %c0_94 = arith.constant 0 : index
      %c0_95 = arith.constant 0 : index
      %357 = vector.load %arg8[%356, %c1_92, %c3_93, %c0_94, %c0_95] : memref<10x2x4x16x32xf32, #tpu.memory_space<vmem>>, vector<1x1x1x16x32xf32>
      %358 = vector.shape_cast %357 : vector<1x1x1x16x32xf32> to vector<16x32xf32>
      %c3_96 = arith.constant 3 : index
      %359 = memref.load %arg4[%c3_96] : memref<64xf32, #tpu.memory_space<smem>>
      %360 = vector.broadcast %359 : f32 to vector<16x32xf32>
      %361 = arith.mulf %360, %358 : vector<16x32xf32>
      %362 = arith.addf %342, %361 : vector<16x32xf32>
      %c7_97 = arith.constant 7 : index
      %363 = memref.load %arg4[%c7_97] : memref<64xf32, #tpu.memory_space<smem>>
      %364 = vector.broadcast %363 : f32 to vector<16x32xf32>
      %365 = arith.mulf %364, %358 : vector<16x32xf32>
      %366 = arith.addf %346, %365 : vector<16x32xf32>
      %c11_98 = arith.constant 11 : index
      %367 = memref.load %arg4[%c11_98] : memref<64xf32, #tpu.memory_space<smem>>
      %368 = vector.broadcast %367 : f32 to vector<16x32xf32>
      %369 = arith.mulf %368, %358 : vector<16x32xf32>
      %370 = arith.addf %350, %369 : vector<16x32xf32>
      %c15_99 = arith.constant 15 : index
      %371 = memref.load %arg4[%c15_99] : memref<64xf32, #tpu.memory_space<smem>>
      %372 = vector.broadcast %371 : f32 to vector<16x32xf32>
      %373 = arith.mulf %372, %358 : vector<16x32xf32>
      %374 = arith.addf %354, %373 : vector<16x32xf32>
      %c1_i32_100 = arith.constant 1 : i32
      %375 = arith.addi %arg9, %c1_i32_100 : i32
      %376 = arith.index_cast %375 : i32 to index
      %c1_101 = arith.constant 1 : index
      %c0_102 = arith.constant 0 : index
      %c0_103 = arith.constant 0 : index
      %c0_104 = arith.constant 0 : index
      %377 = vector.load %arg8[%376, %c1_101, %c0_102, %c0_103, %c0_104] : memref<10x2x4x16x32xf32, #tpu.memory_space<vmem>>, vector<1x1x1x16x32xf32>
      %378 = vector.shape_cast %377 : vector<1x1x1x16x32xf32> to vector<16x32xf32>
      %c16_105 = arith.constant 16 : index
      %379 = memref.load %arg4[%c16_105] : memref<64xf32, #tpu.memory_space<smem>>
      %380 = vector.broadcast %379 : f32 to vector<16x32xf32>
      %381 = arith.mulf %380, %378 : vector<16x32xf32>
      %382 = arith.addf %362, %381 : vector<16x32xf32>
      %c20_106 = arith.constant 20 : index
      %383 = memref.load %arg4[%c20_106] : memref<64xf32, #tpu.memory_space<smem>>
      %384 = vector.broadcast %383 : f32 to vector<16x32xf32>
      %385 = arith.mulf %384, %378 : vector<16x32xf32>
      %386 = arith.addf %366, %385 : vector<16x32xf32>
      %c24_107 = arith.constant 24 : index
      %387 = memref.load %arg4[%c24_107] : memref<64xf32, #tpu.memory_space<smem>>
      %388 = vector.broadcast %387 : f32 to vector<16x32xf32>
      %389 = arith.mulf %388, %378 : vector<16x32xf32>
      %390 = arith.addf %370, %389 : vector<16x32xf32>
      %c28_108 = arith.constant 28 : index
      %391 = memref.load %arg4[%c28_108] : memref<64xf32, #tpu.memory_space<smem>>
      %392 = vector.broadcast %391 : f32 to vector<16x32xf32>
      %393 = arith.mulf %392, %378 : vector<16x32xf32>
      %394 = arith.addf %374, %393 : vector<16x32xf32>
      %c32_109 = arith.constant 32 : index
      %395 = memref.load %arg4[%c32_109] : memref<64xf32, #tpu.memory_space<smem>>
      %396 = vector.broadcast %395 : f32 to vector<16x32xf32>
      %397 = arith.mulf %396, %378 : vector<16x32xf32>
      %c36_110 = arith.constant 36 : index
      %398 = memref.load %arg4[%c36_110] : memref<64xf32, #tpu.memory_space<smem>>
      %399 = vector.broadcast %398 : f32 to vector<16x32xf32>
      %400 = arith.mulf %399, %378 : vector<16x32xf32>
      %c40_111 = arith.constant 40 : index
      %401 = memref.load %arg4[%c40_111] : memref<64xf32, #tpu.memory_space<smem>>
      %402 = vector.broadcast %401 : f32 to vector<16x32xf32>
      %403 = arith.mulf %402, %378 : vector<16x32xf32>
      %c44_112 = arith.constant 44 : index
      %404 = memref.load %arg4[%c44_112] : memref<64xf32, #tpu.memory_space<smem>>
      %405 = vector.broadcast %404 : f32 to vector<16x32xf32>
      %406 = arith.mulf %405, %378 : vector<16x32xf32>
      %c1_i32_113 = arith.constant 1 : i32
      %407 = arith.addi %arg9, %c1_i32_113 : i32
      %408 = arith.index_cast %407 : i32 to index
      %c1_114 = arith.constant 1 : index
      %c1_115 = arith.constant 1 : index
      %c0_116 = arith.constant 0 : index
      %c0_117 = arith.constant 0 : index
      %409 = vector.load %arg8[%408, %c1_114, %c1_115, %c0_116, %c0_117] : memref<10x2x4x16x32xf32, #tpu.memory_space<vmem>>, vector<1x1x1x16x32xf32>
      %410 = vector.shape_cast %409 : vector<1x1x1x16x32xf32> to vector<16x32xf32>
      %c17_118 = arith.constant 17 : index
      %411 = memref.load %arg4[%c17_118] : memref<64xf32, #tpu.memory_space<smem>>
      %412 = vector.broadcast %411 : f32 to vector<16x32xf32>
      %413 = arith.mulf %412, %410 : vector<16x32xf32>
      %414 = arith.addf %382, %413 : vector<16x32xf32>
      %c21_119 = arith.constant 21 : index
      %415 = memref.load %arg4[%c21_119] : memref<64xf32, #tpu.memory_space<smem>>
      %416 = vector.broadcast %415 : f32 to vector<16x32xf32>
      %417 = arith.mulf %416, %410 : vector<16x32xf32>
      %418 = arith.addf %386, %417 : vector<16x32xf32>
      %c25_120 = arith.constant 25 : index
      %419 = memref.load %arg4[%c25_120] : memref<64xf32, #tpu.memory_space<smem>>
      %420 = vector.broadcast %419 : f32 to vector<16x32xf32>
      %421 = arith.mulf %420, %410 : vector<16x32xf32>
      %422 = arith.addf %390, %421 : vector<16x32xf32>
      %c29_121 = arith.constant 29 : index
      %423 = memref.load %arg4[%c29_121] : memref<64xf32, #tpu.memory_space<smem>>
      %424 = vector.broadcast %423 : f32 to vector<16x32xf32>
      %425 = arith.mulf %424, %410 : vector<16x32xf32>
      %426 = arith.addf %394, %425 : vector<16x32xf32>
      %c33_122 = arith.constant 33 : index
      %427 = memref.load %arg4[%c33_122] : memref<64xf32, #tpu.memory_space<smem>>
      %428 = vector.broadcast %427 : f32 to vector<16x32xf32>
      %429 = arith.mulf %428, %410 : vector<16x32xf32>
      %430 = arith.addf %397, %429 : vector<16x32xf32>
      %c37_123 = arith.constant 37 : index
      %431 = memref.load %arg4[%c37_123] : memref<64xf32, #tpu.memory_space<smem>>
      %432 = vector.broadcast %431 : f32 to vector<16x32xf32>
      %433 = arith.mulf %432, %410 : vector<16x32xf32>
      %434 = arith.addf %400, %433 : vector<16x32xf32>
      %c41_124 = arith.constant 41 : index
      %435 = memref.load %arg4[%c41_124] : memref<64xf32, #tpu.memory_space<smem>>
      %436 = vector.broadcast %435 : f32 to vector<16x32xf32>
      %437 = arith.mulf %436, %410 : vector<16x32xf32>
      %438 = arith.addf %403, %437 : vector<16x32xf32>
      %c45_125 = arith.constant 45 : index
      %439 = memref.load %arg4[%c45_125] : memref<64xf32, #tpu.memory_space<smem>>
      %440 = vector.broadcast %439 : f32 to vector<16x32xf32>
      %441 = arith.mulf %440, %410 : vector<16x32xf32>
      %442 = arith.addf %406, %441 : vector<16x32xf32>
      %c1_i32_126 = arith.constant 1 : i32
      %443 = arith.addi %arg9, %c1_i32_126 : i32
      %444 = arith.index_cast %443 : i32 to index
      %c1_127 = arith.constant 1 : index
      %c2_128 = arith.constant 2 : index
      %c0_129 = arith.constant 0 : index
      %c0_130 = arith.constant 0 : index
      %445 = vector.load %arg8[%444, %c1_127, %c2_128, %c0_129, %c0_130] : memref<10x2x4x16x32xf32, #tpu.memory_space<vmem>>, vector<1x1x1x16x32xf32>
      %446 = vector.shape_cast %445 : vector<1x1x1x16x32xf32> to vector<16x32xf32>
      %c18_131 = arith.constant 18 : index
      %447 = memref.load %arg4[%c18_131] : memref<64xf32, #tpu.memory_space<smem>>
      %448 = vector.broadcast %447 : f32 to vector<16x32xf32>
      %449 = arith.mulf %448, %446 : vector<16x32xf32>
      %450 = arith.addf %414, %449 : vector<16x32xf32>
      %c22_132 = arith.constant 22 : index
      %451 = memref.load %arg4[%c22_132] : memref<64xf32, #tpu.memory_space<smem>>
      %452 = vector.broadcast %451 : f32 to vector<16x32xf32>
      %453 = arith.mulf %452, %446 : vector<16x32xf32>
      %454 = arith.addf %418, %453 : vector<16x32xf32>
      %c26_133 = arith.constant 26 : index
      %455 = memref.load %arg4[%c26_133] : memref<64xf32, #tpu.memory_space<smem>>
      %456 = vector.broadcast %455 : f32 to vector<16x32xf32>
      %457 = arith.mulf %456, %446 : vector<16x32xf32>
      %458 = arith.addf %422, %457 : vector<16x32xf32>
      %c30_134 = arith.constant 30 : index
      %459 = memref.load %arg4[%c30_134] : memref<64xf32, #tpu.memory_space<smem>>
      %460 = vector.broadcast %459 : f32 to vector<16x32xf32>
      %461 = arith.mulf %460, %446 : vector<16x32xf32>
      %462 = arith.addf %426, %461 : vector<16x32xf32>
      %c34_135 = arith.constant 34 : index
      %463 = memref.load %arg4[%c34_135] : memref<64xf32, #tpu.memory_space<smem>>
      %464 = vector.broadcast %463 : f32 to vector<16x32xf32>
      %465 = arith.mulf %464, %446 : vector<16x32xf32>
      %466 = arith.addf %430, %465 : vector<16x32xf32>
      %c38_136 = arith.constant 38 : index
      %467 = memref.load %arg4[%c38_136] : memref<64xf32, #tpu.memory_space<smem>>
      %468 = vector.broadcast %467 : f32 to vector<16x32xf32>
      %469 = arith.mulf %468, %446 : vector<16x32xf32>
      %470 = arith.addf %434, %469 : vector<16x32xf32>
      %c42_137 = arith.constant 42 : index
      %471 = memref.load %arg4[%c42_137] : memref<64xf32, #tpu.memory_space<smem>>
      %472 = vector.broadcast %471 : f32 to vector<16x32xf32>
      %473 = arith.mulf %472, %446 : vector<16x32xf32>
      %474 = arith.addf %438, %473 : vector<16x32xf32>
      %c46_138 = arith.constant 46 : index
      %475 = memref.load %arg4[%c46_138] : memref<64xf32, #tpu.memory_space<smem>>
      %476 = vector.broadcast %475 : f32 to vector<16x32xf32>
      %477 = arith.mulf %476, %446 : vector<16x32xf32>
      %478 = arith.addf %442, %477 : vector<16x32xf32>
      %c1_i32_139 = arith.constant 1 : i32
      %479 = arith.addi %arg9, %c1_i32_139 : i32
      %480 = arith.index_cast %479 : i32 to index
      %c1_140 = arith.constant 1 : index
      %c3_141 = arith.constant 3 : index
      %c0_142 = arith.constant 0 : index
      %c0_143 = arith.constant 0 : index
      %481 = vector.load %arg8[%480, %c1_140, %c3_141, %c0_142, %c0_143] : memref<10x2x4x16x32xf32, #tpu.memory_space<vmem>>, vector<1x1x1x16x32xf32>
      %482 = vector.shape_cast %481 : vector<1x1x1x16x32xf32> to vector<16x32xf32>
      %c19_144 = arith.constant 19 : index
      %483 = memref.load %arg4[%c19_144] : memref<64xf32, #tpu.memory_space<smem>>
      %484 = vector.broadcast %483 : f32 to vector<16x32xf32>
      %485 = arith.mulf %484, %482 : vector<16x32xf32>
      %486 = arith.addf %450, %485 : vector<16x32xf32>
      %c23_145 = arith.constant 23 : index
      %487 = memref.load %arg4[%c23_145] : memref<64xf32, #tpu.memory_space<smem>>
      %488 = vector.broadcast %487 : f32 to vector<16x32xf32>
      %489 = arith.mulf %488, %482 : vector<16x32xf32>
      %490 = arith.addf %454, %489 : vector<16x32xf32>
      %c27_146 = arith.constant 27 : index
      %491 = memref.load %arg4[%c27_146] : memref<64xf32, #tpu.memory_space<smem>>
      %492 = vector.broadcast %491 : f32 to vector<16x32xf32>
      %493 = arith.mulf %492, %482 : vector<16x32xf32>
      %494 = arith.addf %458, %493 : vector<16x32xf32>
      %c31_147 = arith.constant 31 : index
      %495 = memref.load %arg4[%c31_147] : memref<64xf32, #tpu.memory_space<smem>>
      %496 = vector.broadcast %495 : f32 to vector<16x32xf32>
      %497 = arith.mulf %496, %482 : vector<16x32xf32>
      %498 = arith.addf %462, %497 : vector<16x32xf32>
      %c35_148 = arith.constant 35 : index
      %499 = memref.load %arg4[%c35_148] : memref<64xf32, #tpu.memory_space<smem>>
      %500 = vector.broadcast %499 : f32 to vector<16x32xf32>
      %501 = arith.mulf %500, %482 : vector<16x32xf32>
      %502 = arith.addf %466, %501 : vector<16x32xf32>
      %c39_149 = arith.constant 39 : index
      %503 = memref.load %arg4[%c39_149] : memref<64xf32, #tpu.memory_space<smem>>
      %504 = vector.broadcast %503 : f32 to vector<16x32xf32>
      %505 = arith.mulf %504, %482 : vector<16x32xf32>
      %506 = arith.addf %470, %505 : vector<16x32xf32>
      %c43_150 = arith.constant 43 : index
      %507 = memref.load %arg4[%c43_150] : memref<64xf32, #tpu.memory_space<smem>>
      %508 = vector.broadcast %507 : f32 to vector<16x32xf32>
      %509 = arith.mulf %508, %482 : vector<16x32xf32>
      %510 = arith.addf %474, %509 : vector<16x32xf32>
      %c47_151 = arith.constant 47 : index
      %511 = memref.load %arg4[%c47_151] : memref<64xf32, #tpu.memory_space<smem>>
      %512 = vector.broadcast %511 : f32 to vector<16x32xf32>
      %513 = arith.mulf %512, %482 : vector<16x32xf32>
      %514 = arith.addf %478, %513 : vector<16x32xf32>
      %c2_i32_152 = arith.constant 2 : i32
      %515 = arith.addi %arg9, %c2_i32_152 : i32
      %516 = arith.index_cast %515 : i32 to index
      %c1_153 = arith.constant 1 : index
      %c0_154 = arith.constant 0 : index
      %c0_155 = arith.constant 0 : index
      %c0_156 = arith.constant 0 : index
      %517 = vector.load %arg8[%516, %c1_153, %c0_154, %c0_155, %c0_156] : memref<10x2x4x16x32xf32, #tpu.memory_space<vmem>>, vector<1x1x1x16x32xf32>
      %518 = vector.shape_cast %517 : vector<1x1x1x16x32xf32> to vector<16x32xf32>
      %c48_157 = arith.constant 48 : index
      %519 = memref.load %arg4[%c48_157] : memref<64xf32, #tpu.memory_space<smem>>
      %520 = vector.broadcast %519 : f32 to vector<16x32xf32>
      %521 = arith.mulf %520, %518 : vector<16x32xf32>
      %522 = arith.addf %502, %521 : vector<16x32xf32>
      %c52_158 = arith.constant 52 : index
      %523 = memref.load %arg4[%c52_158] : memref<64xf32, #tpu.memory_space<smem>>
      %524 = vector.broadcast %523 : f32 to vector<16x32xf32>
      %525 = arith.mulf %524, %518 : vector<16x32xf32>
      %526 = arith.addf %506, %525 : vector<16x32xf32>
      %c56_159 = arith.constant 56 : index
      %527 = memref.load %arg4[%c56_159] : memref<64xf32, #tpu.memory_space<smem>>
      %528 = vector.broadcast %527 : f32 to vector<16x32xf32>
      %529 = arith.mulf %528, %518 : vector<16x32xf32>
      %530 = arith.addf %510, %529 : vector<16x32xf32>
      %c60_160 = arith.constant 60 : index
      %531 = memref.load %arg4[%c60_160] : memref<64xf32, #tpu.memory_space<smem>>
      %532 = vector.broadcast %531 : f32 to vector<16x32xf32>
      %533 = arith.mulf %532, %518 : vector<16x32xf32>
      %534 = arith.addf %514, %533 : vector<16x32xf32>
      %c2_i32_161 = arith.constant 2 : i32
      %535 = arith.addi %arg9, %c2_i32_161 : i32
      %536 = arith.index_cast %535 : i32 to index
      %c1_162 = arith.constant 1 : index
      %c1_163 = arith.constant 1 : index
      %c0_164 = arith.constant 0 : index
      %c0_165 = arith.constant 0 : index
      %537 = vector.load %arg8[%536, %c1_162, %c1_163, %c0_164, %c0_165] : memref<10x2x4x16x32xf32, #tpu.memory_space<vmem>>, vector<1x1x1x16x32xf32>
      %538 = vector.shape_cast %537 : vector<1x1x1x16x32xf32> to vector<16x32xf32>
      %c49_166 = arith.constant 49 : index
      %539 = memref.load %arg4[%c49_166] : memref<64xf32, #tpu.memory_space<smem>>
      %540 = vector.broadcast %539 : f32 to vector<16x32xf32>
      %541 = arith.mulf %540, %538 : vector<16x32xf32>
      %542 = arith.addf %522, %541 : vector<16x32xf32>
      %c53_167 = arith.constant 53 : index
      %543 = memref.load %arg4[%c53_167] : memref<64xf32, #tpu.memory_space<smem>>
      %544 = vector.broadcast %543 : f32 to vector<16x32xf32>
      %545 = arith.mulf %544, %538 : vector<16x32xf32>
      %546 = arith.addf %526, %545 : vector<16x32xf32>
      %c57_168 = arith.constant 57 : index
      %547 = memref.load %arg4[%c57_168] : memref<64xf32, #tpu.memory_space<smem>>
      %548 = vector.broadcast %547 : f32 to vector<16x32xf32>
      %549 = arith.mulf %548, %538 : vector<16x32xf32>
      %550 = arith.addf %530, %549 : vector<16x32xf32>
      %c61_169 = arith.constant 61 : index
      %551 = memref.load %arg4[%c61_169] : memref<64xf32, #tpu.memory_space<smem>>
      %552 = vector.broadcast %551 : f32 to vector<16x32xf32>
      %553 = arith.mulf %552, %538 : vector<16x32xf32>
      %554 = arith.addf %534, %553 : vector<16x32xf32>
      %c2_i32_170 = arith.constant 2 : i32
      %555 = arith.addi %arg9, %c2_i32_170 : i32
      %556 = arith.index_cast %555 : i32 to index
      %c1_171 = arith.constant 1 : index
      %c2_172 = arith.constant 2 : index
      %c0_173 = arith.constant 0 : index
      %c0_174 = arith.constant 0 : index
      %557 = vector.load %arg8[%556, %c1_171, %c2_172, %c0_173, %c0_174] : memref<10x2x4x16x32xf32, #tpu.memory_space<vmem>>, vector<1x1x1x16x32xf32>
      %558 = vector.shape_cast %557 : vector<1x1x1x16x32xf32> to vector<16x32xf32>
      %c50_175 = arith.constant 50 : index
      %559 = memref.load %arg4[%c50_175] : memref<64xf32, #tpu.memory_space<smem>>
      %560 = vector.broadcast %559 : f32 to vector<16x32xf32>
      %561 = arith.mulf %560, %558 : vector<16x32xf32>
      %562 = arith.addf %542, %561 : vector<16x32xf32>
      %c54_176 = arith.constant 54 : index
      %563 = memref.load %arg4[%c54_176] : memref<64xf32, #tpu.memory_space<smem>>
      %564 = vector.broadcast %563 : f32 to vector<16x32xf32>
      %565 = arith.mulf %564, %558 : vector<16x32xf32>
      %566 = arith.addf %546, %565 : vector<16x32xf32>
      %c58_177 = arith.constant 58 : index
      %567 = memref.load %arg4[%c58_177] : memref<64xf32, #tpu.memory_space<smem>>
      %568 = vector.broadcast %567 : f32 to vector<16x32xf32>
      %569 = arith.mulf %568, %558 : vector<16x32xf32>
      %570 = arith.addf %550, %569 : vector<16x32xf32>
      %c62_178 = arith.constant 62 : index
      %571 = memref.load %arg4[%c62_178] : memref<64xf32, #tpu.memory_space<smem>>
      %572 = vector.broadcast %571 : f32 to vector<16x32xf32>
      %573 = arith.mulf %572, %558 : vector<16x32xf32>
      %574 = arith.addf %554, %573 : vector<16x32xf32>
      %c2_i32_179 = arith.constant 2 : i32
      %575 = arith.addi %arg9, %c2_i32_179 : i32
      %576 = arith.index_cast %575 : i32 to index
      %c1_180 = arith.constant 1 : index
      %c3_181 = arith.constant 3 : index
      %c0_182 = arith.constant 0 : index
      %c0_183 = arith.constant 0 : index
      %577 = vector.load %arg8[%576, %c1_180, %c3_181, %c0_182, %c0_183] : memref<10x2x4x16x32xf32, #tpu.memory_space<vmem>>, vector<1x1x1x16x32xf32>
      %578 = vector.shape_cast %577 : vector<1x1x1x16x32xf32> to vector<16x32xf32>
      %c51_184 = arith.constant 51 : index
      %579 = memref.load %arg4[%c51_184] : memref<64xf32, #tpu.memory_space<smem>>
      %580 = vector.broadcast %579 : f32 to vector<16x32xf32>
      %581 = arith.mulf %580, %578 : vector<16x32xf32>
      %582 = arith.addf %562, %581 : vector<16x32xf32>
      %c55_185 = arith.constant 55 : index
      %583 = memref.load %arg4[%c55_185] : memref<64xf32, #tpu.memory_space<smem>>
      %584 = vector.broadcast %583 : f32 to vector<16x32xf32>
      %585 = arith.mulf %584, %578 : vector<16x32xf32>
      %586 = arith.addf %566, %585 : vector<16x32xf32>
      %c59_186 = arith.constant 59 : index
      %587 = memref.load %arg4[%c59_186] : memref<64xf32, #tpu.memory_space<smem>>
      %588 = vector.broadcast %587 : f32 to vector<16x32xf32>
      %589 = arith.mulf %588, %578 : vector<16x32xf32>
      %590 = arith.addf %570, %589 : vector<16x32xf32>
      %c63_187 = arith.constant 63 : index
      %591 = memref.load %arg4[%c63_187] : memref<64xf32, #tpu.memory_space<smem>>
      %592 = vector.broadcast %591 : f32 to vector<16x32xf32>
      %593 = arith.mulf %592, %578 : vector<16x32xf32>
      %594 = arith.addf %574, %593 : vector<16x32xf32>
      %c2_i32_188 = arith.constant 2 : i32
      %595 = arith.muli %c2_i32_188, %arg9 : i32
      %c0_i32_189 = arith.constant 0 : i32
      %596 = arith.addi %595, %c0_i32_189 : i32
      %c0_190 = arith.constant 0 : index
      %597 = memref.load %arg5[%c0_190] : memref<4xf32, #tpu.memory_space<smem>>
      %598 = vector.broadcast %597 : f32 to vector<16x32xf32>
      %599 = arith.addf %190, %598 : vector<16x32xf32>
      %c0_191 = arith.constant 0 : index
      %c0_192 = arith.constant 0 : index
      %600 = arith.index_cast %596 : i32 to index
      %c0_193 = arith.constant 0 : index
      %c0_194 = arith.constant 0 : index
      %601 = vector.load %arg7[%c0_191, %c0_192, %600, %c0_193, %c0_194] : memref<1x4x16x16x64xf32, #tpu.memory_space<vmem>>, vector<1x1x1x16x32xf32>
      %602 = vector.shape_cast %601 : vector<1x1x1x16x32xf32> to vector<16x32xf32>
      %603 = vector.shape_cast %599 : vector<16x32xf32> to vector<1x1x1x16x32xf32>
      tpu.vector_store %arg7[%c0_191, %c0_192, %600, %c0_193, %c0_194], %603 {strides = array<i32>} : memref<1x4x16x16x64xf32, #tpu.memory_space<vmem>>, vector<1x1x1x16x32xf32>,
      %c1_195 = arith.constant 1 : index
      %604 = memref.load %arg5[%c1_195] : memref<4xf32, #tpu.memory_space<smem>>
      %605 = vector.broadcast %604 : f32 to vector<16x32xf32>
      %606 = arith.addf %194, %605 : vector<16x32xf32>
      %c0_196 = arith.constant 0 : index
      %c1_197 = arith.constant 1 : index
      %607 = arith.index_cast %596 : i32 to index
      %c0_198 = arith.constant 0 : index
      %c0_199 = arith.constant 0 : index
      %608 = vector.load %arg7[%c0_196, %c1_197, %607, %c0_198, %c0_199] : memref<1x4x16x16x64xf32, #tpu.memory_space<vmem>>, vector<1x1x1x16x32xf32>
      %609 = vector.shape_cast %608 : vector<1x1x1x16x32xf32> to vector<16x32xf32>
      %610 = vector.shape_cast %606 : vector<16x32xf32> to vector<1x1x1x16x32xf32>
      tpu.vector_store %arg7[%c0_196, %c1_197, %607, %c0_198, %c0_199], %610 {strides = array<i32>} : memref<1x4x16x16x64xf32, #tpu.memory_space<vmem>>, vector<1x1x1x16x32xf32>,
      %c2_200 = arith.constant 2 : index
      %611 = memref.load %arg5[%c2_200] : memref<4xf32, #tpu.memory_space<smem>>
      %612 = vector.broadcast %611 : f32 to vector<16x32xf32>
      %613 = arith.addf %198, %612 : vector<16x32xf32>
      %c0_201 = arith.constant 0 : index
      %c2_202 = arith.constant 2 : index
      %614 = arith.index_cast %596 : i32 to index
      %c0_203 = arith.constant 0 : index
      %c0_204 = arith.constant 0 : index
      %615 = vector.load %arg7[%c0_201, %c2_202, %614, %c0_203, %c0_204] : memref<1x4x16x16x64xf32, #tpu.memory_space<vmem>>, vector<1x1x1x16x32xf32>
      %616 = vector.shape_cast %615 : vector<1x1x1x16x32xf32> to vector<16x32xf32>
      %617 = vector.shape_cast %613 : vector<16x32xf32> to vector<1x1x1x16x32xf32>
      tpu.vector_store %arg7[%c0_201, %c2_202, %614, %c0_203, %c0_204], %617 {strides = array<i32>} : memref<1x4x16x16x64xf32, #tpu.memory_space<vmem>>, vector<1x1x1x16x32xf32>,
      %c3_205 = arith.constant 3 : index
      %618 = memref.load %arg5[%c3_205] : memref<4xf32, #tpu.memory_space<smem>>
      %619 = vector.broadcast %618 : f32 to vector<16x32xf32>
      %620 = arith.addf %202, %619 : vector<16x32xf32>
      %c0_206 = arith.constant 0 : index
      %c3_207 = arith.constant 3 : index
      %621 = arith.index_cast %596 : i32 to index
      %c0_208 = arith.constant 0 : index
      %c0_209 = arith.constant 0 : index
      %622 = vector.load %arg7[%c0_206, %c3_207, %621, %c0_208, %c0_209] : memref<1x4x16x16x64xf32, #tpu.memory_space<vmem>>, vector<1x1x1x16x32xf32>
      %623 = vector.shape_cast %622 : vector<1x1x1x16x32xf32> to vector<16x32xf32>
      %624 = vector.shape_cast %620 : vector<16x32xf32> to vector<1x1x1x16x32xf32>
      tpu.vector_store %arg7[%c0_206, %c3_207, %621, %c0_208, %c0_209], %624 {strides = array<i32>} : memref<1x4x16x16x64xf32, #tpu.memory_space<vmem>>, vector<1x1x1x16x32xf32>,
      %c0_210 = arith.constant 0 : index
      %625 = memref.load %arg5[%c0_210] : memref<4xf32, #tpu.memory_space<smem>>
      %626 = vector.broadcast %625 : f32 to vector<16x32xf32>
      %627 = arith.addf %486, %626 : vector<16x32xf32>
      %c0_211 = arith.constant 0 : index
      %c0_212 = arith.constant 0 : index
      %628 = arith.index_cast %596 : i32 to index
      %c0_213 = arith.constant 0 : index
      %c32_214 = arith.constant 32 : index
      %629 = vector.load %arg7[%c0_211, %c0_212, %628, %c0_213, %c32_214] : memref<1x4x16x16x64xf32, #tpu.memory_space<vmem>>, vector<1x1x1x16x32xf32>
      %630 = vector.shape_cast %629 : vector<1x1x1x16x32xf32> to vector<16x32xf32>
      %631 = vector.shape_cast %627 : vector<16x32xf32> to vector<1x1x1x16x32xf32>
      tpu.vector_store %arg7[%c0_211, %c0_212, %628, %c0_213, %c32_214], %631 {strides = array<i32>} : memref<1x4x16x16x64xf32, #tpu.memory_space<vmem>>, vector<1x1x1x16x32xf32>,
      %c1_215 = arith.constant 1 : index
      %632 = memref.load %arg5[%c1_215] : memref<4xf32, #tpu.memory_space<smem>>
      %633 = vector.broadcast %632 : f32 to vector<16x32xf32>
      %634 = arith.addf %490, %633 : vector<16x32xf32>
      %c0_216 = arith.constant 0 : index
      %c1_217 = arith.constant 1 : index
      %635 = arith.index_cast %596 : i32 to index
      %c0_218 = arith.constant 0 : index
      %c32_219 = arith.constant 32 : index
      %636 = vector.load %arg7[%c0_216, %c1_217, %635, %c0_218, %c32_219] : memref<1x4x16x16x64xf32, #tpu.memory_space<vmem>>, vector<1x1x1x16x32xf32>
      %637 = vector.shape_cast %636 : vector<1x1x1x16x32xf32> to vector<16x32xf32>
      %638 = vector.shape_cast %634 : vector<16x32xf32> to vector<1x1x1x16x32xf32>
      tpu.vector_store %arg7[%c0_216, %c1_217, %635, %c0_218, %c32_219], %638 {strides = array<i32>} : memref<1x4x16x16x64xf32, #tpu.memory_space<vmem>>, vector<1x1x1x16x32xf32>,
      %c2_220 = arith.constant 2 : index
      %639 = memref.load %arg5[%c2_220] : memref<4xf32, #tpu.memory_space<smem>>
      %640 = vector.broadcast %639 : f32 to vector<16x32xf32>
      %641 = arith.addf %494, %640 : vector<16x32xf32>
      %c0_221 = arith.constant 0 : index
      %c2_222 = arith.constant 2 : index
      %642 = arith.index_cast %596 : i32 to index
      %c0_223 = arith.constant 0 : index
      %c32_224 = arith.constant 32 : index
      %643 = vector.load %arg7[%c0_221, %c2_222, %642, %c0_223, %c32_224] : memref<1x4x16x16x64xf32, #tpu.memory_space<vmem>>, vector<1x1x1x16x32xf32>
      %644 = vector.shape_cast %643 : vector<1x1x1x16x32xf32> to vector<16x32xf32>
      %645 = vector.shape_cast %641 : vector<16x32xf32> to vector<1x1x1x16x32xf32>
      tpu.vector_store %arg7[%c0_221, %c2_222, %642, %c0_223, %c32_224], %645 {strides = array<i32>} : memref<1x4x16x16x64xf32, #tpu.memory_space<vmem>>, vector<1x1x1x16x32xf32>,
      %c3_225 = arith.constant 3 : index
      %646 = memref.load %arg5[%c3_225] : memref<4xf32, #tpu.memory_space<smem>>
      %647 = vector.broadcast %646 : f32 to vector<16x32xf32>
      %648 = arith.addf %498, %647 : vector<16x32xf32>
      %c0_226 = arith.constant 0 : index
      %c3_227 = arith.constant 3 : index
      %649 = arith.index_cast %596 : i32 to index
      %c0_228 = arith.constant 0 : index
      %c32_229 = arith.constant 32 : index
      %650 = vector.load %arg7[%c0_226, %c3_227, %649, %c0_228, %c32_229] : memref<1x4x16x16x64xf32, #tpu.memory_space<vmem>>, vector<1x1x1x16x32xf32>
      %651 = vector.shape_cast %650 : vector<1x1x1x16x32xf32> to vector<16x32xf32>
      %652 = vector.shape_cast %648 : vector<16x32xf32> to vector<1x1x1x16x32xf32>
      tpu.vector_store %arg7[%c0_226, %c3_227, %649, %c0_228, %c32_229], %652 {strides = array<i32>} : memref<1x4x16x16x64xf32, #tpu.memory_space<vmem>>, vector<1x1x1x16x32xf32>,
      %c2_i32_230 = arith.constant 2 : i32
      %653 = arith.muli %c2_i32_230, %arg9 : i32
      %c1_i32_231 = arith.constant 1 : i32
      %654 = arith.addi %653, %c1_i32_231 : i32
      %c0_232 = arith.constant 0 : index
      %655 = memref.load %arg5[%c0_232] : memref<4xf32, #tpu.memory_space<smem>>
      %656 = vector.broadcast %655 : f32 to vector<16x32xf32>
      %657 = arith.addf %286, %656 : vector<16x32xf32>
      %c0_233 = arith.constant 0 : index
      %c0_234 = arith.constant 0 : index
      %658 = arith.index_cast %654 : i32 to index
      %c0_235 = arith.constant 0 : index
      %c0_236 = arith.constant 0 : index
      %659 = vector.load %arg7[%c0_233, %c0_234, %658, %c0_235, %c0_236] : memref<1x4x16x16x64xf32, #tpu.memory_space<vmem>>, vector<1x1x1x16x32xf32>
      %660 = vector.shape_cast %659 : vector<1x1x1x16x32xf32> to vector<16x32xf32>
      %661 = vector.shape_cast %657 : vector<16x32xf32> to vector<1x1x1x16x32xf32>
      tpu.vector_store %arg7[%c0_233, %c0_234, %658, %c0_235, %c0_236], %661 {strides = array<i32>} : memref<1x4x16x16x64xf32, #tpu.memory_space<vmem>>, vector<1x1x1x16x32xf32>,
      %c1_237 = arith.constant 1 : index
      %662 = memref.load %arg5[%c1_237] : memref<4xf32, #tpu.memory_space<smem>>
      %663 = vector.broadcast %662 : f32 to vector<16x32xf32>
      %664 = arith.addf %290, %663 : vector<16x32xf32>
      %c0_238 = arith.constant 0 : index
      %c1_239 = arith.constant 1 : index
      %665 = arith.index_cast %654 : i32 to index
      %c0_240 = arith.constant 0 : index
      %c0_241 = arith.constant 0 : index
      %666 = vector.load %arg7[%c0_238, %c1_239, %665, %c0_240, %c0_241] : memref<1x4x16x16x64xf32, #tpu.memory_space<vmem>>, vector<1x1x1x16x32xf32>
      %667 = vector.shape_cast %666 : vector<1x1x1x16x32xf32> to vector<16x32xf32>
      %668 = vector.shape_cast %664 : vector<16x32xf32> to vector<1x1x1x16x32xf32>
      tpu.vector_store %arg7[%c0_238, %c1_239, %665, %c0_240, %c0_241], %668 {strides = array<i32>} : memref<1x4x16x16x64xf32, #tpu.memory_space<vmem>>, vector<1x1x1x16x32xf32>,
      %c2_242 = arith.constant 2 : index
      %669 = memref.load %arg5[%c2_242] : memref<4xf32, #tpu.memory_space<smem>>
      %670 = vector.broadcast %669 : f32 to vector<16x32xf32>
      %671 = arith.addf %294, %670 : vector<16x32xf32>
      %c0_243 = arith.constant 0 : index
      %c2_244 = arith.constant 2 : index
      %672 = arith.index_cast %654 : i32 to index
      %c0_245 = arith.constant 0 : index
      %c0_246 = arith.constant 0 : index
      %673 = vector.load %arg7[%c0_243, %c2_244, %672, %c0_245, %c0_246] : memref<1x4x16x16x64xf32, #tpu.memory_space<vmem>>, vector<1x1x1x16x32xf32>
      %674 = vector.shape_cast %673 : vector<1x1x1x16x32xf32> to vector<16x32xf32>
      %675 = vector.shape_cast %671 : vector<16x32xf32> to vector<1x1x1x16x32xf32>
      tpu.vector_store %arg7[%c0_243, %c2_244, %672, %c0_245, %c0_246], %675 {strides = array<i32>} : memref<1x4x16x16x64xf32, #tpu.memory_space<vmem>>, vector<1x1x1x16x32xf32>,
      %c3_247 = arith.constant 3 : index
      %676 = memref.load %arg5[%c3_247] : memref<4xf32, #tpu.memory_space<smem>>
      %677 = vector.broadcast %676 : f32 to vector<16x32xf32>
      %678 = arith.addf %298, %677 : vector<16x32xf32>
      %c0_248 = arith.constant 0 : index
      %c3_249 = arith.constant 3 : index
      %679 = arith.index_cast %654 : i32 to index
      %c0_250 = arith.constant 0 : index
      %c0_251 = arith.constant 0 : index
      %680 = vector.load %arg7[%c0_248, %c3_249, %679, %c0_250, %c0_251] : memref<1x4x16x16x64xf32, #tpu.memory_space<vmem>>, vector<1x1x1x16x32xf32>
      %681 = vector.shape_cast %680 : vector<1x1x1x16x32xf32> to vector<16x32xf32>
      %682 = vector.shape_cast %678 : vector<16x32xf32> to vector<1x1x1x16x32xf32>
      tpu.vector_store %arg7[%c0_248, %c3_249, %679, %c0_250, %c0_251], %682 {strides = array<i32>} : memref<1x4x16x16x64xf32, #tpu.memory_space<vmem>>, vector<1x1x1x16x32xf32>,
      %c0_252 = arith.constant 0 : index
      %683 = memref.load %arg5[%c0_252] : memref<4xf32, #tpu.memory_space<smem>>
      %684 = vector.broadcast %683 : f32 to vector<16x32xf32>
      %685 = arith.addf %582, %684 : vector<16x32xf32>
      %c0_253 = arith.constant 0 : index
      %c0_254 = arith.constant 0 : index
      %686 = arith.index_cast %654 : i32 to index
      %c0_255 = arith.constant 0 : index
      %c32_256 = arith.constant 32 : index
      %687 = vector.load %arg7[%c0_253, %c0_254, %686, %c0_255, %c32_256] : memref<1x4x16x16x64xf32, #tpu.memory_space<vmem>>, vector<1x1x1x16x32xf32>
      %688 = vector.shape_cast %687 : vector<1x1x1x16x32xf32> to vector<16x32xf32>
      %689 = vector.shape_cast %685 : vector<16x32xf32> to vector<1x1x1x16x32xf32>
      tpu.vector_store %arg7[%c0_253, %c0_254, %686, %c0_255, %c32_256], %689 {strides = array<i32>} : memref<1x4x16x16x64xf32, #tpu.memory_space<vmem>>, vector<1x1x1x16x32xf32>,
      %c1_257 = arith.constant 1 : index
      %690 = memref.load %arg5[%c1_257] : memref<4xf32, #tpu.memory_space<smem>>
      %691 = vector.broadcast %690 : f32 to vector<16x32xf32>
      %692 = arith.addf %586, %691 : vector<16x32xf32>
      %c0_258 = arith.constant 0 : index
      %c1_259 = arith.constant 1 : index
      %693 = arith.index_cast %654 : i32 to index
      %c0_260 = arith.constant 0 : index
      %c32_261 = arith.constant 32 : index
      %694 = vector.load %arg7[%c0_258, %c1_259, %693, %c0_260, %c32_261] : memref<1x4x16x16x64xf32, #tpu.memory_space<vmem>>, vector<1x1x1x16x32xf32>
      %695 = vector.shape_cast %694 : vector<1x1x1x16x32xf32> to vector<16x32xf32>
      %696 = vector.shape_cast %692 : vector<16x32xf32> to vector<1x1x1x16x32xf32>
      tpu.vector_store %arg7[%c0_258, %c1_259, %693, %c0_260, %c32_261], %696 {strides = array<i32>} : memref<1x4x16x16x64xf32, #tpu.memory_space<vmem>>, vector<1x1x1x16x32xf32>,
      %c2_262 = arith.constant 2 : index
      %697 = memref.load %arg5[%c2_262] : memref<4xf32, #tpu.memory_space<smem>>
      %698 = vector.broadcast %697 : f32 to vector<16x32xf32>
      %699 = arith.addf %590, %698 : vector<16x32xf32>
      %c0_263 = arith.constant 0 : index
      %c2_264 = arith.constant 2 : index
      %700 = arith.index_cast %654 : i32 to index
      %c0_265 = arith.constant 0 : index
      %c32_266 = arith.constant 32 : index
      %701 = vector.load %arg7[%c0_263, %c2_264, %700, %c0_265, %c32_266] : memref<1x4x16x16x64xf32, #tpu.memory_space<vmem>>, vector<1x1x1x16x32xf32>
      %702 = vector.shape_cast %701 : vector<1x1x1x16x32xf32> to vector<16x32xf32>
      %703 = vector.shape_cast %699 : vector<16x32xf32> to vector<1x1x1x16x32xf32>
      tpu.vector_store %arg7[%c0_263, %c2_264, %700, %c0_265, %c32_266], %703 {strides = array<i32>} : memref<1x4x16x16x64xf32, #tpu.memory_space<vmem>>, vector<1x1x1x16x32xf32>,
      %c3_267 = arith.constant 3 : index
      %704 = memref.load %arg5[%c3_267] : memref<4xf32, #tpu.memory_space<smem>>
      %705 = vector.broadcast %704 : f32 to vector<16x32xf32>
      %706 = arith.addf %594, %705 : vector<16x32xf32>
      %c0_268 = arith.constant 0 : index
      %c3_269 = arith.constant 3 : index
      %707 = arith.index_cast %654 : i32 to index
      %c0_270 = arith.constant 0 : index
      %c32_271 = arith.constant 32 : index
      %708 = vector.load %arg7[%c0_268, %c3_269, %707, %c0_270, %c32_271] : memref<1x4x16x16x64xf32, #tpu.memory_space<vmem>>, vector<1x1x1x16x32xf32>
      %709 = vector.shape_cast %708 : vector<1x1x1x16x32xf32> to vector<16x32xf32>
      %710 = vector.shape_cast %706 : vector<16x32xf32> to vector<1x1x1x16x32xf32>
      tpu.vector_store %arg7[%c0_268, %c3_269, %707, %c0_270, %c32_271], %710 {strides = array<i32>} : memref<1x4x16x16x64xf32, #tpu.memory_space<vmem>>, vector<1x1x1x16x32xf32>,
    }
    %c8_i32_4 = arith.constant 8 : i32
    return
  }
  func.func @transform_0(%arg0: i32, %arg1: i32) -> i32 {
    %c0_i32 = arith.constant 0 : i32
    %c0_i32_0 = arith.constant 0 : i32
    return %c0_i32 : i32
  }
  func.func @transform_1(%arg0: i32, %arg1: i32) -> i32 {
    %c0_i32 = arith.constant 0 : i32
    %c0_i32_0 = arith.constant 0 : i32
    return %c0_i32 : i32
  }
  func.func @transform_2(%arg0: i32, %arg1: i32) -> i32 {
    %c0_i32 = arith.constant 0 : i32
    %c0_i32_0 = arith.constant 0 : i32
    return %c0_i32 : i32
  }
  func.func @transform_3(%arg0: i32, %arg1: i32) -> i32 {
    %c0_i32 = arith.constant 0 : i32
    %c0_i32_0 = arith.constant 0 : i32
    return %c0_i32 : i32
  }
  func.func @transform_4(%arg0: i32, %arg1: i32) -> (i32, i32, i32, i32, i32) {
    %c0_i32 = arith.constant 0 : i32
    %c0_i32_0 = arith.constant 0 : i32
    %c0_i32_1 = arith.constant 0 : i32
    %c0_i32_2 = arith.constant 0 : i32
    %c0_i32_3 = arith.constant 0 : i32
    return %arg0, %c0_i32, %c0_i32_0, %c0_i32_1, %c0_i32_2 : i32, i32, i32, i32, i32
  }
  func.func @transform_5(%arg0: i32, %arg1: i32) -> (i32, i32, i32, i32, i32) {
    %c0_i32 = arith.constant 0 : i32
    %c0_i32_0 = arith.constant 0 : i32
    %c0_i32_1 = arith.constant 0 : i32
    %c0_i32_2 = arith.constant 0 : i32
    return %arg0, %c0_i32, %arg1, %c0_i32_0, %c0_i32_1 : i32, i32, i32, i32, i32
  }
}

</mosaic_0001>

<bundles_post_ra>
// kernel: upsample_forward.1
= control target key start
LH: loop header
LB: loop body
LE: loop exit
PB: predicated region body
PF: predicated region fallthrough
CT: control target
= control target key end

     0   :  { %10 = vsyncpa [#allocation4], 0  ;;  %s9723_s0 = inlined_call_operand.vmem [shape: f32[192], index: 0, kind: input, shape index: {}]   ;;  %s9724_s1 = inlined_call_operand.vmem [shape: f32[4], index: 1, kind: input, shape index: {}]   ;;  %s9725_s2 = inlined_call_operand.vmem [shape: f32[64], index: 2, kind: input, shape index: {}]   ;;  %s9726_s3 = inlined_call_operand.vmem [shape: f32[4], index: 3, kind: input, shape index: {}]   ;;  %s9727_s4 = inlined_call_operand.vmem [shape: f32[2,4,10,18,34], index: 4, kind: input, shape index: {}]   ;;  %s9728_s5 = inlined_call_operand.vmem [shape: f32[2,4,16,16,64], index: 5, kind: output, shape index: {}]  }
   0x1   :  { %11 = vsyncpa [#allocation6], 0 }
   0x2   :  { %12 = vsyncpa [#allocation9], 0  ;;  %s5608_s18 = smov 0   ;;  %s5610_s19 = smov 0  }
   0x3   :  { %s5612_s20 = smov 0  }
   0x4 LB: > { %s195_s23 = sshll.u32 %s9724_s1, 4  ;;  %s4916_s24 = sadd.s32 4294967295, %s5561_s20   ;;  %s5561_s20 = sphi %s5612_s20, %s18_s20   ;;  %s5557_s19 = sphi %s5610_s19, %s10309_s19   ;;  %s5553_s18 = sphi %s5608_s18, %s10308_s18   ;;  %s196_s23 = int_to_ptr.vmem [resolvable:$true] %s195_s23 }
   0x5   : > { %p4918_p0 = scmp.ge.s32.totalorder %s5561_s20, 1  ;;  %p173_p1 = scmp.lt.s32.totalorder %s5561_s20, 3 }
   0x6   : > { %p5629_p2 = scmp.eq.s32.totalorder %s4916_s24, 0  ;;  %s30_s27 = sadd.s32 1, %s5557_s19 }
   0x7   : > { %p5633_p3 = pnand %p4918_p0, %p173_p1  ;;  %s185_s30 = sshll.u32 %s9723_s0, 4  ;;  %s186_s30 = int_to_ptr.vmem [resolvable:$true] %s185_s30 }
   0x8   : > { %p32_p6 = scmp.ge.s32.totalorder %s30_s27, 2  ;;  %s205_s9 = sshll.u32 %s9725_s2, 4  ;;  %s206_s9 = int_to_ptr.vmem [resolvable:$true] %s205_s9 }
   0x9   : > { %p5375_p4 = pneg %p5633_p3  ;;  %s5571_s10 = smov [#allocation5]  }
   0xa   : > { %s10311_s27 = smov (%p32_p6, %s30_s27), 0  ;;  %s5572_s11 = smov [#allocation3]  }
   0xb   : > { %p5645_p5 = pnand %p5629_p2, %p5375_p4  ;;  %s5573_s12 = smov [#allocation7]  }
   0xc   : > { %s215_s15 = sshll.u32 %s9726_s3, 4  ;;  %s5574_s16 = smov [#allocation8]   ;;  %s216_s15 = int_to_ptr.vmem [resolvable:$true] %s215_s15 }
   0xd   : > { %5381 = dma.vmem_to_smem (!%p5645_p5), %s196_s23, 16, %s5571_s10, [#allocation6]  }
   0xe   : > { %5378 = dma.vmem_to_smem (!%p5645_p5), %s186_s30, 32, %s5572_s11, [#allocation4]  }
   0xf   : > { %5384 = dma.vmem_to_smem (!%p5645_p5), %s206_s9, 16, %s5573_s12, [#allocation6]  }
  0x10   : > { %5387 = dma.vmem_to_smem (!%p5645_p5), %s216_s15, 16, %s5574_s16, [#allocation9]  }
  0x11   : > { %236 = sbr.rel (%p5633_p3) target bundleno = 1217 (0x4c1), region = 40 }
  0x16   : > { %5540 = dma.done.wait (%p5629_p2), [#allocation4], 32  }
  0x17   : > { %5542 = vsyncadd (%p5629_p2), [#allocation4], 4294967264 }
  0x18   : > { %5544 = dma.done.wait (%p5629_p2), [#allocation6], 32  }
  0x19   : > { %5546 = vsyncadd (%p5629_p2), [#allocation6], 4294967264 }
  0x1a   : > { %5548 = dma.done.wait (%p5629_p2), [#allocation9], 16  }
  0x1b   : > { %5550 = vsyncadd (%p5629_p2), [#allocation9], 4294967280 }
  0x1c   : > { %258 = sfence }
  0x1d   : > { %p286_p7 = scmp.lt.s32.totalorder %s5553_s18, 1  ;;  %s5691_s30 = smov 0  }
  0x1f   : > { %s10313_s18 = smov (!%p286_p7, %s5553_s18), 1 }
  0x20   : > { %s5358_s17 = smul.u32 960, %s10313_s18  ;;  %s5352_s21 = sshll.u32 %s10313_s18, 10 }
  0x21   : > { %s5684_s24 = scalar_lea.vmem %s9728_s5, %s5352_s21 }
  0x22   : > { %s5689_s29 = scalar_lea.vmem %s9727_s4, %s5358_s17 }
  0x23 LB: >> { %s4937_s18 = sld [smem:[#allocation3 + $0x19]]  ;;  %s310_s25 = smul.u32 24, %s5565_s30  ;;  %vm451_vm0 = vcmask 1046528   ;;  %vm3677_vm1 = vcmask 261120   ;;  %vm3711_vm2 = vcmask 261121   ;;  %vm3714_vm3 = vcmask 253952   ;;  %s5565_s30 = sphi %s5691_s30, %s308_s30  }
  0x24   : >> { %s4936_s6 = sld [smem:[#allocation3 + $0xd]]  ;;  %s5575_s9 = smov 127  }
  0x25   : >> { %s4935_s7 = sld [smem:[#allocation3 + $0x1]]  ;;  %s5698_s8 = scalar_lea.vmem %s5689_s29, %s310_s25 }
  0x26   : >> { %v5701_v0 = vld [vmem:[%s5698_s8] sm:$0xff]  ;;  %v5708_v7 = vld [vmem:[%s5698_s8 + $0x8] sm:$0xff]  ;;  %s4939_s10 = sld [smem:[#allocation3 + $0x2]]  ;;  %s5576_s13 = smov 126   ;;  %v5734_v22 = vld [vmem:[%s5698_s8 + $0x10] sm:$0x3] }
  0x27   : >> { %s4938_s11 = sld [smem:[#allocation3 + $0x25]] }
  0x28   : >> { %s4940_s12 = sld [smem:[#allocation3 + $0xe]] }
  0x29   : >> { %v360_v1 = vstv %s4937_s18  ;;  %s5722_s14 = sld [smem:[#allocation3 + $0x26]] }
  0x2a   : >> { %v361_v2 = vmul.f32 %v360_v1, %v5701_v0  ;;  %v346_v3 = vstv %s4936_s6  ;;  %v362_v8 = vmul.f32 %v360_v1, %v5708_v7  ;;  %s4941_s15 = sld [smem:[#allocation3 + $0x1a]] }
  0x2b   : >> { %v347_v4 = vmul.f32 %v346_v3, %v5701_v0  ;;  %v332_v5 = vstv %s4935_s7  ;;  %v348_v9 = vmul.f32 %v346_v3, %v5708_v7  ;;  %s4951_s16 = sld [smem:[#allocation3 + $0x31]] }
  0x2c   : >> { %365 = vrot.lane.b32.xlu2 %v361_v2, %s5575_s9  ;;  %v333_v6 = vmul.f32 %v332_v5, %v5701_v0  ;;  %v334_v10 = vmul.f32 %v332_v5, %v5708_v7  ;;  %v388_v11 = vstv %s4939_s10  ;;  %s4953_s17 = sld [smem:[#allocation3 + $0x49]] }
  0x2d   : >> { %351 = vrot.lane.b32.xlu1 %v347_v4, %s5575_s9  ;;  %v374_v12 = vstv %s4938_s11  ;;  %v389_v13 = vmul.f32 %v388_v11, %v5701_v0  ;;  %v390_v19 = vmul.f32 %v388_v11, %v5708_v7  ;;  %s4952_s21 = sld [smem:[#allocation3 + $0x3d]] }
  0x2e   : >> { %337 = vrot.lane.b32.xlu0 %v333_v6, %s5575_s9  ;;  %v376_v14 = vmul.f32 %v374_v12, %v5708_v7  ;;  %v375_v15 = vmul.f32 %v374_v12, %v5701_v0  ;;  %v402_v16 = vstv %s4940_s12  ;;  %s4954_s22 = sld [smem:[#allocation3 + $0x55]] }
  0x2f   : >> { %v404_v17 = vmul.f32 %v402_v16, %v5708_v7  ;;  %v403_v18 = vmul.f32 %v402_v16, %v5701_v0  ;;  %v430_v20 = vstv %s5722_s14  ;;  %s4955_s23 = sld [smem:[#allocation3 + $0x61]] }
  0x30   : >> { %v416_v21 = vstv %s4941_s15  ;;  %v431_v24 = vmul.f32 %v430_v20, %v5701_v0  ;;  %v432_v39 = vmul.f32 %v430_v20, %v5708_v7  ;;  %s4956_s26 = sld [smem:[#allocation3 + $0x6d]] }
  0x31   : >> { %v533_v23 = vstv %s4951_s16  ;;  %v418_v25 = vmul.f32 %v416_v21, %v5708_v7  ;;  %v417_v28 = vmul.f32 %v416_v21, %v5701_v0  ;;  %s4957_s28 = sld [smem:[#allocation3 + $0x79]] }
  0x32   : >> { %v535_v26 = vmul.f32 %v533_v23, %v5708_v7  ;;  %v536_v27 = vmul.f32 %v533_v23, %v5734_v22  ;;  %v534_v29 = vmul.f32 %v533_v23, %v5701_v0  ;;  %v575_v33 = vstv %s4953_s17  ;;  %s4958_s18 = sld [smem:[#allocation3 + $0x85]] }
  0x33   : >> { %v554_v34 = vstv %s4952_s21  ;;  %v576_v36 = vmul.f32 %v575_v33, %v5701_v0  ;;  %v577_v37 = vmul.f32 %v575_v33, %v5708_v7  ;;  %v578_v55 = vmul.f32 %v575_v33, %v5734_v22  ;;  %s4960_s25 = sld [smem:[#allocation3 + $0x3e]] }
  0x34   : >> { %367 = vrot.lane.b32.xlu2 %v362_v8, %s5575_s9  ;;  %v541_v30 = vrot.slane %v535_v26, 1  ;;  %v543_v31 = vrot.slane %v536_v27, 1  ;;  %v540_v32 = vrot.slane %v534_v29, 1  ;;  %v556_v40 = vmul.f32 %v554_v34, %v5708_v7  ;;  %s4959_s6 = sld [smem:[#allocation3 + $0x32]] }
  0x35   : >> { %353 = vrot.lane.b32.xlu1 %v348_v9, %s5575_s9  ;;  %v557_v41 = vmul.f32 %v554_v34, %v5734_v22  ;;  %v555_v42 = vmul.f32 %v554_v34, %v5701_v0  ;;  %v582_v43 = vrot.slane %v576_v36, 1  ;;  %v583_v44 = vrot.slane %v577_v37, 1  ;;  %s4961_s7 = sld [smem:[#allocation3 + $0x4a]] }
  0x36   : >> { %339 = vrot.lane.b32.xlu0 %v334_v10, %s5575_s9  ;;  %v544_v35 = vsel %vm451_vm0, %v541_v30, %v543_v31  ;;  %v542_v38 = vsel %vm451_vm0, %v540_v32, %v541_v30  ;;  %v562_v45 = vrot.slane %v556_v40, 1  ;;  %v596_v47 = vstv %s4954_s22  ;;  %s4962_s10 = sld [smem:[#allocation3 + $0x56]] }
  0x37   : >> { %v564_v46 = vrot.slane %v557_v41, 1  ;;  %v561_v48 = vrot.slane %v555_v42, 1  ;;  %v584_v49 = vsel %vm451_vm0, %v582_v43, %v583_v44  ;;  %v598_v50 = vmul.f32 %v596_v47, %v5708_v7  ;;  %s4963_s11 = sld [smem:[#allocation3 + $0x62]] }
  0x38   : >> { %v599_v51 = vmul.f32 %v596_v47, %v5734_v22  ;;  %v597_v53 = vmul.f32 %v596_v47, %v5701_v0  ;;  %v585_v59 = vrot.slane %v578_v55, 1  ;;  %v617_v63 = vstv %s4955_s23  ;;  %s4964_s12 = sld [smem:[#allocation3 + $0x6e]] }
  0x39   : >> { %v565_v52 = vsel %vm451_vm0, %v562_v45, %v564_v46  ;;  %v563_v54 = vsel %vm451_vm0, %v561_v48, %v562_v45  ;;  %v604_v56 = vrot.slane %v598_v50, 1  ;;  %v620_v1 = vmul.f32 %v617_v63, %v5734_v22  ;;  %s4965_s14 = sld [smem:[#allocation3 + $0x7a]] }
  0x3a   : >> { %v606_v57 = vrot.slane %v599_v51, 1  ;;  %v603_v58 = vrot.slane %v597_v53, 1  ;;  %v586_v62 = vsel %vm451_vm0, %v583_v44, %v585_v59  ;;  %v619_v2 = vmul.f32 %v617_v63, %v5708_v7  ;;  %s4966_s15 = sld [smem:[#allocation3 + $0x86]] }
  0x3b   : >> { %v618_v3 = vmul.f32 %v617_v63, %v5701_v0  ;;  %v637_v4 = vstv %s4956_s26  ;;  %v657_v9 = vstv %s4957_s28  ;;  %v739_v30 = vstv %s4961_s7  ;;  %s4971_s16 = sld [smem:[#allocation3 + $0x91]] }
  0x3c   : >> { %393 = vrot.lane.b32.xlu2 %v389_v13, %s5576_s13  ;;  %v607_v60 = vsel %vm451_vm0, %v604_v56, %v606_v57  ;;  %v605_v61 = vsel %vm451_vm0, %v603_v58, %v604_v56  ;;  %v640_v5 = vmul.f32 %v637_v4, %v5734_v22  ;;  %v639_v6 = vmul.f32 %v637_v4, %v5708_v7  ;;  %s4972_s17 = sld [smem:[#allocation3 + $0x9d]] }
  0x3d   : >> { %381 = vrot.lane.b32.xlu1 %v376_v14, %s5575_s9  ;;  %v638_v8 = vmul.f32 %v637_v4, %v5701_v0  ;;  %v660_v10 = vmul.f32 %v657_v9, %v5734_v22  ;;  %v659_v11 = vmul.f32 %v657_v9, %v5708_v7  ;;  %v658_v12 = vmul.f32 %v657_v9, %v5701_v0  ;;  %s4973_s21 = sld [smem:[#allocation3 + $0xa9]] }
  0x3e   : >> { %379 = vrot.lane.b32.xlu0 %v375_v15, %s5575_s9  ;;  %v677_v13 = vstv %s4958_s18  ;;  %v718_v14 = vstv %s4960_s25  ;;  %v697_v15 = vstv %s4959_s6  ;;  %v741_v33 = vmul.f32 %v739_v30, %v5708_v7  ;;  %s4974_s22 = sld [smem:[#allocation3 + $0xb5]] }
  0x3f   : >> { %v680_v16 = vmul.f32 %v677_v13, %v5734_v22  ;;  %v678_v20 = vmul.f32 %v677_v13, %v5701_v0  ;;  %v699_v21 = vmul.f32 %v697_v15, %v5708_v7  ;;  %v700_v23 = vmul.f32 %v697_v15, %v5734_v22  ;;  %s4975_s23 = sld [smem:[#allocation3 + $0x92]] }
  0x40   : >> { %v742_v34 = vmul.f32 %v739_v30, %v5734_v22  ;;  %v740_v36 = vmul.f32 %v739_v30, %v5701_v0  ;;  %v760_v44 = vstv %s4962_s10  ;;  %v781_v51 = vstv %s4963_s11  ;;  %s4976_s26 = sld [smem:[#allocation3 + $0x9e]] }
  0x41   : >> { %v707_v29 = vrot.slane %v700_v23, 1  ;;  %v762_v47 = vmul.f32 %v760_v44, %v5708_v7  ;;  %v763_v48 = vmul.f32 %v760_v44, %v5734_v22  ;;  %v761_v50 = vmul.f32 %v760_v44, %v5701_v0  ;;  %s4977_s28 = sld [smem:[#allocation3 + $0xaa]] }
  0x42   : >> { %v749_v40 = vrot.slane %v742_v34, 1  ;;  %v746_v42 = vrot.slane %v740_v36, 1  ;;  %v782_v56 = vmul.f32 %v781_v51, %v5701_v0  ;;  %v801_v59 = vstv %s4964_s12  ;;  %s4978_s18 = sld [smem:[#allocation3 + $0xb6]] }
  0x43   : >> { %v768_v53 = vrot.slane %v762_v47, 1  ;;  %v767_v55 = vrot.slane %v761_v50, 1  ;;  %v802_v63 = vmul.f32 %v801_v59, %v5701_v0  ;;  %v804_v9 = vmul.f32 %v801_v59, %v5734_v22  ;;  %s5968_s25 = sld [smem:[#allocation3 + $0x4]] }
  0x44   : >> { %409 = vrot.lane.b32.xlu2 %v404_v17, %s5576_s13  ;;  %v679_v17 = vmul.f32 %v677_v13, %v5708_v7  ;;  %v937_v13 = vstv %s4971_s16  ;;  %s4987_s6 = sld [smem:[#allocation3 + $0x10]] }
  0x45   : >> { %407 = vrot.lane.b32.xlu1 %v403_v18, %s5576_s13  ;;  %v719_v18 = vmul.f32 %v718_v14, %v5701_v0  ;;  %v769_v58 = vsel %vm451_vm0, %v767_v55, %v768_v53  ;;  %v940_v34 = vmul.f32 %v937_v13, %v5734_v22  ;;  %s5997_s7 = sld [smem:[#allocation3 + $0x28]] }
  0x46   : >> { %395 = vrot.lane.b32.xlu0 %v390_v19, %s5576_s13  ;;  %v720_v19 = vmul.f32 %v718_v14, %v5708_v7  ;;  %s4988_s10 = sld [smem:[#allocation3 + $0x1c]] }
  0x47   : >> { %s4990_s11 = sld [smem:[#allocation3 + $0x5]] }
  0x48   : >> { %v726_v26 = vrot.slane %v720_v19, 1  ;;  %v939_v19 = vmul.f32 %v937_v13, %v5708_v7  ;;  %s6027_s12 = sld [smem:[#allocation3 + $0x1d]] }
  0x49   : >> { %s5003_s16 = sld [smem:[#allocation3 + $0x40]] }
  0x4a   : >> { %v945_v23 = vrot.slane %v939_v19, 1 }
  0x4c   : >> { %435 = vrot.lane.b32.xlu2 %v431_v24, %s5576_s13  ;;  %v698_v24 = vmul.f32 %v697_v15, %v5701_v0 }
  0x4d   : >> { %423 = vrot.lane.b32.xlu1 %v418_v25, %s5576_s13  ;;  %v725_v25 = vrot.slane %v719_v18, 1  ;;  %v938_v18 = vmul.f32 %v937_v13, %v5701_v0 }
  0x4e   : >> { %421 = vrot.lane.b32.xlu0 %v417_v28, %s5576_s13  ;;  %v705_v28 = vrot.slane %v699_v21, 1  ;;  %v704_v31 = vrot.slane %v698_v24, 1 }
  0x4f   : >> { %v727_v32 = vsel %vm451_vm0, %v725_v25, %v726_v26  ;;  %v944_v21 = vrot.slane %v938_v18, 1  ;;  %v962_v25 = vstv %s4972_s17  ;;  %s5002_s17 = sld [smem:[#allocation3 + $0x34]] }
  0x50   : >> { %v706_v37 = vsel %vm451_vm0, %v704_v31, %v705_v28  ;;  %v963_v31 = vmul.f32 %v962_v25, %v5701_v0  ;;  %v965_v47 = vmul.f32 %v962_v25, %v5734_v22 }
  0x54   : >> { %547 = vrot.lane.b32.xlu2 %v544_v35, %s5575_s9  ;;  %v708_v35 = vsel %vm451_vm0, %v705_v28, %v707_v29  ;;  %v946_v29 = vsel %vm451_vm0, %v944_v21, %v945_v23 }
  0x55   : >> { %545 = vrot.lane.b32.xlu1 %v542_v38, %s5575_s9  ;;  %v721_v38 = vmul.f32 %v718_v14, %v5734_v22 }
  0x56   : >> { %437 = vrot.lane.b32.xlu0 %v432_v39, %s5576_s13  ;;  %v747_v39 = vrot.slane %v741_v33, 1 }
  0x57   : >> { %v728_v43 = vrot.slane %v721_v38, 1  ;;  %v987_v38 = vstv %s4973_s21  ;;  %s5004_s21 = sld [smem:[#allocation3 + $0x4c]] }
  0x58   : >> { %v750_v45 = vsel %vm451_vm0, %v747_v39, %v749_v40  ;;  %v748_v46 = vsel %vm451_vm0, %v746_v42, %v747_v39  ;;  %v947_v40 = vrot.slane %v940_v34, 1  ;;  %v988_v44 = vmul.f32 %v987_v38, %v5701_v0 }
  0x5c   : >> { %587 = vrot.lane.b32.xlu2 %v584_v49, %s5575_s9  ;;  %v729_v49 = vsel %vm451_vm0, %v726_v26, %v728_v43 }
  0x5d   : >> { %568 = vrot.lane.b32.xlu1 %v565_v52, %s5575_s9 }
  0x5e   : >> { %566 = vrot.lane.b32.xlu0 %v563_v54, %s5575_s9  ;;  %v770_v54 = vrot.slane %v763_v48, 1  ;;  %v994_v48 = vrot.slane %v988_v44, 1  ;;  %v1087_v44 = vstv %s4977_s28  ;;  %s5008_s28 = sld [smem:[#allocation3 + $0x7c]] }
  0x60   : >> { %v771_v57 = vsel %vm451_vm0, %v768_v53, %v770_v54  ;;  %v972_v54 = vrot.slane %v965_v47, 1 }
  0x64   : >> { %610 = vrot.lane.b32.xlu2 %v607_v60, %s5575_s9 }
  0x65   : >> { %608 = vrot.lane.b32.xlu1 %v605_v61, %s5575_s9 }
  0x66   : >> { %589 = vrot.lane.b32.xlu0 %v586_v62, %s5575_s9 }
  0x6c   : >> { %628 = vrot.lane.b32.xlu2 %v620_v1, %s5575_s9  ;;  %v784_v1 = vmul.f32 %v781_v51, %v5734_v22 }
  0x6d   : >> { %626 = vrot.lane.b32.xlu1 %v619_v2, %s5575_s9  ;;  %v783_v2 = vmul.f32 %v781_v51, %v5708_v7  ;;  %v1012_v51 = vstv %s4974_s22  ;;  %s5005_s22 = sld [smem:[#allocation3 + $0x58]] }
  0x6e   : >> { %624 = vrot.lane.b32.xlu0 %v618_v3, %s5575_s9  ;;  %v821_v3 = vstv %s4965_s14  ;;  %v1015_v19 = vmul.f32 %v1012_v51, %v5734_v22  ;;  %s4991_s14 = sld [smem:[#allocation3 + $0x11]] }
  0x74   : >> { %648 = vrot.lane.b32.xlu2 %v640_v5, %s5575_s9 }
  0x75   : >> { %646 = vrot.lane.b32.xlu1 %v639_v6, %s5575_s9 }
  0x76   : >> { %644 = vrot.lane.b32.xlu0 %v638_v8, %s5575_s9  ;;  %v822_v8 = vmul.f32 %v821_v3, %v5701_v0 }
  0x7c   : >> { %668 = vrot.lane.b32.xlu2 %v660_v10, %s5575_s9  ;;  %v803_v10 = vmul.f32 %v801_v59, %v5708_v7 }
  0x7d   : >> { %666 = vrot.lane.b32.xlu1 %v659_v11, %s5575_s9  ;;  %v841_v11 = vstv %s4966_s15  ;;  %s4993_s15 = sld [smem:[#allocation3 + $0x29]] }
  0x7e   : >> { %664 = vrot.lane.b32.xlu0 %v658_v12, %s5575_s9  ;;  %v844_v30 = vmul.f32 %v841_v11, %v5734_v22  ;;  %v843_v33 = vmul.f32 %v841_v11, %v5708_v7 }
  0x84   : >> { %688 = vrot.lane.b32.xlu2 %v680_v16, %s5575_s9  ;;  %v842_v16 = vmul.f32 %v841_v11, %v5701_v0 }
  0x85   : >> { %686 = vrot.lane.b32.xlu1 %v679_v17, %s5575_s9  ;;  %v824_v17 = vmul.f32 %v821_v3, %v5734_v22 }
  0x86   : >> { %684 = vrot.lane.b32.xlu0 %v678_v20, %s5575_s9  ;;  %v5801_v27 = vpop.permute.xlu2 %365  ;;  %v823_v20 = vmul.f32 %v821_v3, %v5708_v7 }
  0x8c   : >> { %730 = vrot.lane.b32.xlu2 %v727_v32, %s5576_s13  ;;  %v964_v32 = vmul.f32 %v962_v25, %v5708_v7  ;;  %v1062_v25 = vstv %s4976_s26  ;;  %s5007_s26 = sld [smem:[#allocation3 + $0x70]] }
  0x8d   : >> { %711 = vrot.lane.b32.xlu1 %v708_v35, %s5576_s13  ;;  %v969_v35 = vrot.slane %v963_v31, 1  ;;  %v1064_v34 = vmul.f32 %v1062_v25, %v5708_v7 }
  0x8e   : >> { %709 = vrot.lane.b32.xlu0 %v706_v37, %s5576_s13  ;;  %v5813_v41 = vpop.permute.xlu2 %367  ;;  %v970_v36 = vrot.slane %v964_v32, 1 }
  0x90   : >> { %v971_v43 = vsel %vm451_vm0, %v969_v35, %v970_v36  ;;  %v973_v59 = vsel %vm451_vm0, %v970_v36, %v972_v54 }
  0x94   : >> { %753 = vrot.lane.b32.xlu2 %v750_v45, %s5576_s13  ;;  %v989_v45 = vmul.f32 %v987_v38, %v5708_v7 }
  0x95   : >> { %751 = vrot.lane.b32.xlu1 %v748_v46, %s5576_s13  ;;  %v948_v46 = vsel %vm451_vm0, %v945_v23, %v947_v40 }
  0x96   : >> { %732 = vrot.lane.b32.xlu0 %v729_v49, %s5576_s13  ;;  %v5824_v52 = vpop.permute.xlu2 %393  ;;  %v995_v49 = vrot.slane %v989_v45, 1 }
  0x9c   : >> { %788 = vrot.lane.b32.xlu2 %v782_v56, %s5576_s13  ;;  %v996_v56 = vsel %vm451_vm0, %v994_v48, %v995_v49 }
  0x9d   : >> { %774 = vrot.lane.b32.xlu1 %v771_v57, %s5576_s13  ;;  %v1013_v57 = vmul.f32 %v1012_v51, %v5701_v0 }
  0x9e   : >> { %772 = vrot.lane.b32.xlu0 %v769_v58, %s5576_s13  ;;  %v5832_v60 = vpop.permute.xlu2 %409  ;;  %v1014_v58 = vmul.f32 %v1012_v51, %v5708_v7  ;;  %v1089_v51 = vmul.f32 %v1087_v44, %v5708_v7 }
  0x9f   : >> { %v5834_v61 = vpop.permute.xlu1 %351 }
  0xa0   : >> { %v5836_v62 = vpop.permute.xlu0 %337 }
  0xa4   : >> { %808 = vrot.lane.b32.xlu2 %v802_v63, %s5576_s13  ;;  %v990_v63 = vmul.f32 %v987_v38, %v5734_v22 }
  0xa5   : >> { %792 = vrot.lane.b32.xlu1 %v784_v1, %s5576_s13  ;;  %v1019_v1 = vrot.slane %v1013_v57, 1 }
  0xa6   : >> { %790 = vrot.lane.b32.xlu0 %v783_v2, %s5576_s13  ;;  %v5844_v4 = vpop.permute.xlu2 %435  ;;  %v1020_v2 = vrot.slane %v1014_v58, 1  ;;  %v1095_v58 = vrot.slane %v1089_v51, 1 }
  0xa7   : >> { %v5846_v5 = vpop.permute.xlu1 %353 }
  0xa8   : >> { %v5848_v6 = vpop.permute.xlu0 %339  ;;  %v1021_v13 = vsel %vm451_vm0, %v1019_v1, %v1020_v2 }
  0xac   : >> { %828 = vrot.lane.b32.xlu2 %v822_v8, %s5576_s13  ;;  %v1037_v8 = vstv %s4975_s23  ;;  %s5006_s23 = sld [smem:[#allocation3 + $0x64]] }
  0xad   : >> { %812 = vrot.lane.b32.xlu1 %v804_v9, %s5576_s13  ;;  %v1040_v36 = vmul.f32 %v1037_v8, %v5734_v22 }
  0xae   : >> { %810 = vrot.lane.b32.xlu0 %v803_v10, %s5576_s13  ;;  %v5856_v12 = vpop.permute.xlu2 %547  ;;  %v997_v10 = vrot.slane %v990_v63, 1  ;;  %v1112_v63 = vstv %s4978_s18  ;;  %s5009_s18 = sld [smem:[#allocation3 + $0x88]] }
  0xaf   : >> { %v5858_v14 = vpop.permute.xlu1 %381 }
  0xb0   : >> { %v5860_v15 = vpop.permute.xlu0 %379  ;;  %v998_v18 = vsel %vm451_vm0, %v995_v49, %v997_v10  ;;  %v1088_v49 = vmul.f32 %v1087_v44, %v5701_v0 }
  0xb2   : >> { %v1094_v57 = vrot.slane %v1088_v49, 1 }
  0xb4   : >> { %848 = vrot.lane.b32.xlu2 %v842_v16, %s5576_s13  ;;  %v1038_v16 = vmul.f32 %v1037_v8, %v5701_v0 }
  0xb5   : >> { %832 = vrot.lane.b32.xlu1 %v824_v17, %s5576_s13  ;;  %v1039_v17 = vmul.f32 %v1037_v8, %v5708_v7 }
  0xb6   : >> { %830 = vrot.lane.b32.xlu0 %v823_v20, %s5576_s13  ;;  %v5870_v24 = vpop.permute.xlu2 %587  ;;  %v1044_v20 = vrot.slane %v1038_v16, 1  ;;  %v1114_v16 = vmul.f32 %v1112_v63, %v5708_v7 }
  0xb7   : >> { %v5872_v26 = vpop.permute.xlu1 %407  ;;  %v1045_v21 = vrot.slane %v1039_v17, 1 }
  0xb8   : >> { %v5874_v28 = vpop.permute.xlu0 %395 }
  0xb9   : >> { %v1046_v32 = vsel %vm451_vm0, %v1044_v20, %v1045_v21  ;;  %v1120_v20 = vrot.slane %v1114_v16, 1 }
  0xbc   : >> { %949 = vrot.lane.b32.xlu2 %v946_v29, %s5575_s9 }
  0xbd   : >> { %852 = vrot.lane.b32.xlu1 %v844_v30, %s5576_s13  ;;  %v1022_v30 = vrot.slane %v1015_v19, 1 }
  0xbe   : >> { %850 = vrot.lane.b32.xlu0 %v843_v33, %s5576_s13  ;;  %v5885_v37 = vpop.permute.xlu2 %610  ;;  %v1063_v33 = vmul.f32 %v1062_v25, %v5701_v0 }
  0xbf   : >> { %v5887_v39 = vpop.permute.xlu1 %423  ;;  %v1023_v35 = vsel %vm451_vm0, %v1020_v2, %v1022_v30 }
  0xc0   : >> { %v5889_v42 = vpop.permute.xlu0 %421  ;;  %v1069_v38 = vrot.slane %v1063_v33, 1  ;;  %v1115_v33 = vmul.f32 %v1112_v63, %v5734_v22 }
  0xc4   : >> { %974 = vrot.lane.b32.xlu2 %v971_v43, %s5575_s9 }
  0xc5   : >> { %953 = vrot.lane.b32.xlu1 %v947_v40, %s5575_s9  ;;  %v1070_v40 = vrot.slane %v1064_v34, 1  ;;  %v1166_v34 = vstv %s5968_s25  ;;  %s5010_s25 = sld [smem:[#allocation3 + $0x35]] }
  0xc6   : >> { %951 = vrot.lane.b32.xlu0 %v948_v46, %s5575_s9  ;;  %v5899_v50 = vpop.permute.xlu2 %628  ;;  %v1047_v46 = vrot.slane %v1040_v36, 1 }
  0xc7   : >> { %v5901_v53 = vpop.permute.xlu1 %545  ;;  %v1071_v48 = vsel %vm451_vm0, %v1069_v38, %v1070_v40  ;;  %v5989_v38 = vld [vmem:[%s5698_s8 + $0xf0] sm:$0xff] }
  0xc8   : >> { %v5903_v55 = vpop.permute.xlu0 %437 }
  0xcc   : >> { %999 = vrot.lane.b32.xlu2 %v996_v56, %s5575_s9  ;;  %v1065_v56 = vmul.f32 %v1062_v25, %v5734_v22 }
  0xcd   : >> { %978 = vrot.lane.b32.xlu1 %v972_v54, %s5575_s9  ;;  %v1048_v54 = vsel %vm451_vm0, %v1045_v21, %v1047_v46 }
  0xce   : >> { %976 = vrot.lane.b32.xlu0 %v973_v59, %s5575_s9  ;;  %v5913_v3 = vpop.permute.xlu2 %648  ;;  %v1072_v2 = vrot.slane %v1065_v56, 1 }
  0xcf   : >> { %v5915_v9 = vpop.permute.xlu1 %568 }
  0xd0   : >> { %v5917_v11 = vpop.permute.xlu0 %566  ;;  %v1073_v17 = vsel %vm451_vm0, %v1070_v40, %v1072_v2  ;;  %v1122_v40 = vrot.slane %v1115_v33, 1 }
  0xd4   : >> { %1024 = vrot.lane.b32.xlu2 %v1021_v13, %s5575_s9  ;;  %v1113_v13 = vmul.f32 %v1112_v63, %v5701_v0 }
  0xd5   : >> { %1003 = vrot.lane.b32.xlu1 %v997_v10, %s5575_s9  ;;  %v1096_v10 = vsel %vm451_vm0, %v1094_v57, %v1095_v58 }
  0xd6   : >> { %1001 = vrot.lane.b32.xlu0 %v998_v18, %s5575_s9  ;;  %v5927_v23 = vpop.permute.xlu2 %668  ;;  %v1090_v18 = vmul.f32 %v1087_v44, %v5734_v22  ;;  %v1119_v19 = vrot.slane %v1113_v13, 1  ;;  %v1167_v22 = vmul.f32 %v5989_v38, %v1166_v34  ;;  %v1194_v13 = vstv %s4988_s10  ;;  %s5012_s10 = sld [smem:[#allocation3 + $0x4d]] }
  0xd7   : >> { %v5929_v29 = vpop.permute.xlu1 %608 }
  0xd8   : >> { %v5931_v31 = vpop.permute.xlu0 %589  ;;  %v1097_v7 = vrot.slane %v1090_v18, 1 }
  0xdc   : >> { %1049 = vrot.lane.b32.xlu2 %v1046_v32, %s5576_s13  ;;  %v1098_v32 = vsel %vm451_vm0, %v1095_v58, %v1097_v7 }
  0xdd   : >> { %1028 = vrot.lane.b32.xlu1 %v1022_v30, %s5575_s9  ;;  %v1121_v30 = vsel %vm451_vm0, %v1119_v19, %v1120_v20 }
  0xde   : >> { %1026 = vrot.lane.b32.xlu0 %v1023_v35, %s5575_s9  ;;  %v5941_v43 = vpop.permute.xlu2 %688 }
  0xdf   : >> { %v5943_v45 = vpop.permute.xlu1 %626 }
  0xe0   : >> { %9859 = vst [vmem:[#allocation13_spill] sm:$0xff] %v5943_v45  ;;  %v5945_v47 = vpop.permute.xlu0 %624 }
  0xe1   : >> { %9860 = vst [vmem:[#allocation14_spill] sm:$0xff] %v5945_v47 }
  0xe4   : >> { %1074 = vrot.lane.b32.xlu2 %v1071_v48, %s5576_s13  ;;  %v1180_v48 = vstv %s4987_s6  ;;  %s5011_s6 = sld [smem:[#allocation3 + $0x41]] }
  0xe5   : >> { %1053 = vrot.lane.b32.xlu1 %v1047_v46, %s5576_s13  ;;  %v1123_v46 = vsel %vm451_vm0, %v1120_v20, %v1122_v40  ;;  %v1181_v58 = vmul.f32 %v5989_v38, %v1180_v48  ;;  %v1195_v20 = vmul.f32 %v5989_v38, %v1194_v13 }
  0xe6   : >> { %1051 = vrot.lane.b32.xlu0 %v1048_v54, %s5576_s13  ;;  %v5955_v59 = vpop.permute.xlu2 %730  ;;  %v6005_v54 = vld [vmem:[%s5698_s8 + $0xf8] sm:$0xff] }
  0xe7   : >> { %9861 = vst [vmem:[#allocation15_spill] sm:$0xff] %v5955_v59  ;;  %v5957_v1 = vpop.permute.xlu1 %646  ;;  %v1182_v57 = vmul.f32 %v6005_v54, %v1180_v48  ;;  %v1168_v63 = vmul.f32 %v6005_v54, %v1166_v34  ;;  %v1196_v19 = vmul.f32 %v6005_v54, %v1194_v13 }
  0xe8   : >> { %9862 = vst [vmem:[#allocation16_spill] sm:$0xff] %v5957_v1  ;;  %v5959_v8 = vpop.permute.xlu0 %644 }
  0xe9   : >> { %9863 = vst [vmem:[#allocation17_spill] sm:$0xff] %v5959_v8 }
  0xec   : >> { %1099 = vrot.lane.b32.xlu2 %v1096_v10, %s5576_s13 }
  0xed   : >> { %1078 = vrot.lane.b32.xlu1 %v1072_v2, %s5576_s13  ;;  %v1208_v2 = vstv %s5997_s7  ;;  %s5013_s7 = sld [smem:[#allocation3 + $0x59]] }
  0xee   : >> { %1076 = vrot.lane.b32.xlu0 %v1073_v17, %s5576_s13  ;;  %v5971_v21 = vpop.permute.xlu2 %753  ;;  %v1209_v18 = vmul.f32 %v5989_v38, %v1208_v2 }
  0xef   : >> { %9864 = vst [vmem:[#allocation18_spill] sm:$0xff] %v5971_v21  ;;  %v5973_v0 = vpop.permute.xlu1 %666 }
  0xf0   : >> { %9865 = vst [vmem:[#allocation19_spill] sm:$0xff] %v5973_v0  ;;  %v5975_v25 = vpop.permute.xlu0 %664 }
  0xf1   : >> { %9866 = vst [vmem:[#allocation20_spill] sm:$0xff] %v5975_v25 }
  0xf4   : >> { %1124 = vrot.lane.b32.xlu2 %v1121_v30, %s5576_s13 }
  0xf5   : >> { %1103 = vrot.lane.b32.xlu1 %v1097_v7, %s5576_s13  ;;  %v1222_v7 = vstv %s4990_s11  ;;  %s5014_s11 = sld [smem:[#allocation3 + $0x65]] }
  0xf6   : >> { %1101 = vrot.lane.b32.xlu0 %v1098_v32, %s5576_s13  ;;  %v5984_v35 = vpop.permute.xlu2 %788  ;;  %v1224_v34 = vmul.f32 %v6005_v54, %v1222_v7 }
  0xf7   : >> { %9867 = vst [vmem:[#allocation21_spill] sm:$0xff] %v5984_v35  ;;  %v5986_v36 = vpop.permute.xlu1 %686 }
  0xf8   : >> { %9868 = vst [vmem:[#allocation22_spill] sm:$0xff] %v5986_v36  ;;  %v5991_v44 = vpop.permute.xlu0 %684 }
  0xf9   : >> { %9869 = vst [vmem:[#allocation23_spill] sm:$0xff] %v5991_v44 }
  0xfc   : >> { %1171 = vrot.lane.b32.xlu2 %v1167_v22, %s5575_s9  ;;  %v1210_v22 = vmul.f32 %v6005_v54, %v1208_v2 }
  0xfd   : >> { %1128 = vrot.lane.b32.xlu1 %v1122_v40, %s5576_s13  ;;  %v1223_v40 = vmul.f32 %v5989_v38, %v1222_v7  ;;  %v1399_v7 = vstv %s5003_s16  ;;  %s5022_s16 = sld [smem:[#allocation3 + $0x94]] }
  0xfe   : >> { %1126 = vrot.lane.b32.xlu0 %v1123_v46, %s5576_s13  ;;  %v6000_v49 = vpop.permute.xlu2 %808  ;;  %v1250_v46 = vstv %s6027_s12  ;;  %s5015_s12 = sld [smem:[#allocation3 + $0x71]] }
  0xff   : >> { %9870 = vst [vmem:[#allocation24_spill] sm:$0xff] %v6000_v49  ;;  %v6002_v51 = vpop.permute.xlu1 %711  ;;  %v1251_v2 = vmul.f32 %v5989_v38, %v1250_v46 }
 0x100   : >> { %9871 = vst [vmem:[#allocation25_spill] sm:$0xff] %v6002_v51  ;;  %v6007_v56 = vpop.permute.xlu0 %709 }
 0x101   : >> { %9872 = vst [vmem:[#allocation26_spill] sm:$0xff] %v6007_v56 }
 0x104   : >> { %1187 = vrot.lane.b32.xlu2 %v1182_v57, %s5575_s9  ;;  %v1236_v57 = vstv %s4991_s14  ;;  %s5016_s14 = sld [smem:[#allocation3 + $0x7d]] }
 0x105   : >> { %1185 = vrot.lane.b32.xlu1 %v1181_v58, %s5575_s9  ;;  %v1238_v13 = vmul.f32 %v6005_v54, %v1236_v57 }
 0x106   : >> { %1173 = vrot.lane.b32.xlu0 %v1168_v63, %s5575_s9  ;;  %v6016_v10 = vpop.permute.xlu2 %828 }
 0x107   : >> { %9873 = vst [vmem:[#allocation27_spill] sm:$0xff] %v6016_v10  ;;  %v6018_v16 = vpop.permute.xlu1 %751 }
 0x108   : >> { %9874 = vst [vmem:[#allocation28_spill] sm:$0xff] %v6018_v16  ;;  %v6020_v17 = vpop.permute.xlu0 %732  ;;  %v1420_v16 = vstv %s5004_s21  ;;  %s5024_s21 = sld [smem:[#allocation3 + $0xac]] }
 0x109   : >> { %9875 = vst [vmem:[#allocation29_spill] sm:$0xff] %v6020_v17 }
 0x10c   : >> { %1213 = vrot.lane.b32.xlu2 %v1209_v18, %s5575_s9  ;;  %v1237_v18 = vmul.f32 %v5989_v38, %v1236_v57 }
 0x10d   : >> { %1201 = vrot.lane.b32.xlu1 %v1196_v19, %s5575_s9  ;;  %v1264_v19 = vstv %s4993_s15  ;;  %s5017_s15 = sld [smem:[#allocation3 + $0x89]] }
 0x10e   : >> { %1199 = vrot.lane.b32.xlu0 %v1195_v20, %s5575_s9  ;;  %v6030_v30 = vpop.permute.xlu2 %848  ;;  %v1266_v57 = vmul.f32 %v6005_v54, %v1264_v19 }
 0x10f   : >> { %9876 = vst [vmem:[#allocation30_spill] sm:$0xff] %v6030_v30  ;;  %v6032_v32 = vpop.permute.xlu1 %774 }
 0x110   : >> { %9877 = vst [vmem:[#allocation31_spill] sm:$0xff] %v6032_v32  ;;  %v6034_v33 = vpop.permute.xlu0 %772 }
 0x111   : >> { %9878 = vst [vmem:[#allocation32_spill] sm:$0xff] %v6034_v33 }
 0x114   : >> { %1229 = vrot.lane.b32.xlu2 %v1224_v34, %s5576_s13 }
 0x115   : >> { %1227 = vrot.lane.b32.xlu1 %v1223_v40, %s5576_s13  ;;  %v6060_v40 = vld [vmem:[%s5698_s8 + $0x100] sm:$0x3] }
 0x116   : >> { %1215 = vrot.lane.b32.xlu0 %v1210_v22, %s5575_s9  ;;  %v6043_v48 = vpop.permute.xlu2 %949  ;;  %v1378_v22 = vstv %s5002_s17  ;;  %s5023_s17 = sld [smem:[#allocation3 + $0xa0]] }
 0x117   : >> { %9879 = vst [vmem:[#allocation33_spill] sm:$0xff] %v6043_v48  ;;  %v6045_v58 = vpop.permute.xlu1 %792 }
 0x118   : >> { %9880 = vst [vmem:[#allocation34_spill] sm:$0xff] %v6045_v58  ;;  %v6047_v63 = vpop.permute.xlu0 %790  ;;  %v1381_v58 = vmul.f32 %v6060_v40, %v1378_v22 }
 0x119   : >> { %9881 = vst [vmem:[#allocation35_spill] sm:$0xff] %v6047_v63  ;;  %v1401_v63 = vmul.f32 %v6005_v54, %v1399_v7 }
 0x11a   : >> { %v1388_v30 = vrot.slane %v1381_v58, 1  ;;  %v1402_v58 = vmul.f32 %v6060_v40, %v1399_v7 }
 0x11b   : >> { %v1407_v33 = vrot.slane %v1401_v63, 1 }
 0x11c   : >> { %1255 = vrot.lane.b32.xlu2 %v1251_v2, %s5576_s13  ;;  %v1265_v2 = vmul.f32 %v5989_v38, %v1264_v19 }
 0x11d   : >> { %1243 = vrot.lane.b32.xlu1 %v1238_v13, %s5576_s13  ;;  %v1400_v13 = vmul.f32 %v5989_v38, %v1399_v7 }
 0x11e   : >> { %1241 = vrot.lane.b32.xlu0 %v1237_v18, %s5576_s13  ;;  %v6055_v20 = vpop.permute.xlu2 %974  ;;  %v1252_v18 = vmul.f32 %v6005_v54, %v1250_v46 }
 0x11f   : >> { %9882 = vst [vmem:[#allocation36_spill] sm:$0xff] %v6055_v20  ;;  %v6057_v34 = vpop.permute.xlu1 %812  ;;  %v1380_v20 = vmul.f32 %v6005_v54, %v1378_v22 }
 0x120   : >> { %9883 = vst [vmem:[#allocation37_spill] sm:$0xff] %v6057_v34  ;;  %v6062_v48 = vpop.permute.xlu0 %810  ;;  %v1379_v34 = vmul.f32 %v5989_v38, %v1378_v22 }
 0x121   : >> { %9884 = vst [vmem:[#allocation38_spill] sm:$0xff] %v6062_v48  ;;  %v1406_v48 = vrot.slane %v1400_v13, 1  ;;  %v1386_v32 = vrot.slane %v1380_v20, 1  ;;  %v1421_v13 = vmul.f32 %v5989_v38, %v1420_v16 }
 0x122   : >> { %v1385_v17 = vrot.slane %v1379_v34, 1 }
 0x123   : >> { %v1408_v22 = vsel %vm451_vm0, %v1406_v48, %v1407_v33  ;;  %v1389_v63 = vsel %vm451_vm0, %v1386_v32, %v1388_v30  ;;  %v1409_v30 = vrot.slane %v1402_v58, 1 }
 0x124   : >> { %1271 = vrot.lane.b32.xlu2 %v1266_v57, %s5576_s13  ;;  %v1422_v57 = vmul.f32 %v6005_v54, %v1420_v16  ;;  %v1387_v20 = vsel %vm451_vm0, %v1385_v17, %v1386_v32 }
 0x125   : >> { %1269 = vrot.lane.b32.xlu1 %v1265_v2, %s5576_s13  ;;  %v1423_v2 = vmul.f32 %v6060_v40, %v1420_v16  ;;  %v1441_v16 = vstv %s5005_s22  ;;  %s5025_s22 = sld [smem:[#allocation3 + $0xb8]] }
 0x126   : >> { %1257 = vrot.lane.b32.xlu0 %v1252_v18, %s5576_s13  ;;  %v6075_v19 = vpop.permute.xlu2 %999  ;;  %v1428_v34 = vrot.slane %v1422_v57, 1  ;;  %v1443_v7 = vmul.f32 %v6005_v54, %v1441_v16  ;;  %v1410_v57 = vsel %vm451_vm0, %v1407_v33, %v1409_v30 }
 0x127   : >> { %9885 = vst [vmem:[#allocation39_spill] sm:$0xff] %v6075_v19  ;;  %v6077_v46 = vpop.permute.xlu1 %832  ;;  %v1430_v18 = vrot.slane %v1423_v2, 1  ;;  %v1427_v19 = vrot.slane %v1421_v13, 1  ;;  %v1442_v2 = vmul.f32 %v5989_v38, %v1441_v16 }
 0x128   : >> { %9886 = vst [vmem:[#allocation40_spill] sm:$0xff] %v6077_v46  ;;  %v6079_v10 = vpop.permute.xlu0 %830 }
 0x129   : >> { %9887 = vst [vmem:[#allocation41_spill] sm:$0xff] %v6079_v10  ;;  %v1431_v17 = vsel %vm451_vm0, %v1428_v34, %v1430_v18  ;;  %v1429_v32 = vsel %vm451_vm0, %v1427_v19, %v1428_v34  ;;  %v1448_v34 = vrot.slane %v1442_v2, 1 }
 0x12c   : >> { %1411 = vrot.lane.b32.xlu2 %v1408_v22, %s5575_s9  ;;  %v1444_v22 = vmul.f32 %v6060_v40, %v1441_v16 }
 0x12d   : >> { %1392 = vrot.lane.b32.xlu1 %v1389_v63, %s5575_s9  ;;  %v1462_v63 = vstv %s5006_s23  ;;  %s5026_s23 = sld [smem:[#allocation3 + $0x95]] }
 0x12e   : >> { %1390 = vrot.lane.b32.xlu0 %v1387_v20, %s5575_s9  ;;  %v6091_v48 = vpop.permute.xlu2 %1024  ;;  %v1449_v20 = vrot.slane %v1443_v7, 1  ;;  %v1451_v19 = vrot.slane %v1444_v22, 1  ;;  %v1463_v33 = vmul.f32 %v5989_v38, %v1462_v63  ;;  %v1465_v2 = vmul.f32 %v6060_v40, %v1462_v63 }
 0x12f   : >> { %9888 = vst [vmem:[#allocation42_spill] sm:$0xff] %v6091_v48  ;;  %v6093_v10 = vpop.permute.xlu1 %852  ;;  %v1605_v48 = vstv %s5013_s7  ;;  %s5038_s7 = sld [smem:[#allocation3 + $0x13]] }
 0x130   : >> { %9889 = vst [vmem:[#allocation43_spill] sm:$0xff] %v6093_v10  ;;  %v6095_v46 = vpop.permute.xlu0 %850  ;;  %v1452_v30 = vsel %vm451_vm0, %v1449_v20, %v1451_v19  ;;  %v1450_v16 = vsel %vm451_vm0, %v1448_v34, %v1449_v20  ;;  %v1464_v20 = vmul.f32 %v6005_v54, %v1462_v63  ;;  %v1502_v19 = vstv %s5008_s28  ;;  %s5028_s28 = sld [smem:[#allocation3 + $0xad]] }
 0x131   : >> { %9890 = vst [vmem:[#allocation44_spill] sm:$0xff] %v6095_v46 }
 0x134   : >> { %1434 = vrot.lane.b32.xlu2 %v1431_v17, %s5575_s9  ;;  %v1482_v17 = vstv %s5007_s26  ;;  %s5027_s26 = sld [smem:[#allocation3 + $0xa1]] }
 0x135   : >> { %1432 = vrot.lane.b32.xlu1 %v1429_v32, %s5575_s9  ;;  %v1484_v63 = vmul.f32 %v6005_v54, %v1482_v17 }
 0x136   : >> { %1413 = vrot.lane.b32.xlu0 %v1410_v57, %s5575_s9  ;;  %v6106_v13 = vpop.permute.xlu2 %1049  ;;  %v1483_v57 = vmul.f32 %v5989_v38, %v1482_v17 }
 0x137   : >> { %9891 = vst [vmem:[#allocation45_spill] sm:$0xff] %v6106_v13  ;;  %v6108_v58 = vpop.permute.xlu1 %953 }
 0x138   : >> { %9892 = vst [vmem:[#allocation46_spill] sm:$0xff] %v6108_v58  ;;  %v6110_v18 = vpop.permute.xlu0 %951 }
 0x139   : >> { %9893 = vst [vmem:[#allocation47_spill] sm:$0xff] %v6110_v18 }
 0x13c   : >> { %1469 = vrot.lane.b32.xlu2 %v1463_v33, %s5575_s9 }
 0x13d   : >> { %1455 = vrot.lane.b32.xlu1 %v1452_v30, %s5575_s9 }
 0x13e   : >> { %1453 = vrot.lane.b32.xlu0 %v1450_v16, %s5575_s9  ;;  %v6118_v32 = vpop.permute.xlu2 %1074  ;;  %v1503_v16 = vmul.f32 %v5989_v38, %v1502_v19 }
 0x13f   : >> { %9894 = vst [vmem:[#allocation48_spill] sm:$0xff] %v6118_v32  ;;  %v6120_v7 = vpop.permute.xlu1 %978 }
 0x140   : >> { %9895 = vst [vmem:[#allocation49_spill] sm:$0xff] %v6120_v7  ;;  %v6122_v22 = vpop.permute.xlu0 %976 }
 0x141   : >> { %9896 = vst [vmem:[#allocation50_spill] sm:$0xff] %v6122_v22  ;;  %v1485_v22 = vmul.f32 %v6060_v40, %v1482_v17 }
 0x144   : >> { %1489 = vrot.lane.b32.xlu2 %v1483_v57, %s5575_s9  ;;  %v1522_v57 = vstv %s5009_s18  ;;  %s5029_s18 = sld [smem:[#allocation3 + $0xb9]] }
 0x145   : >> { %1473 = vrot.lane.b32.xlu1 %v1465_v2, %s5575_s9  ;;  %v1523_v7 = vmul.f32 %v5989_v38, %v1522_v57 }
 0x146   : >> { %1471 = vrot.lane.b32.xlu0 %v1464_v20, %s5575_s9  ;;  %v6130_v34 = vpop.permute.xlu2 %1099  ;;  %v1542_v20 = vstv %s5010_s25  ;;  %s5037_s25 = sld [smem:[#allocation3 + $0x7]] }
 0x147   : >> { %9897 = vst [vmem:[#allocation51_spill] sm:$0xff] %v6130_v34  ;;  %v6132_v33 = vpop.permute.xlu1 %1003  ;;  %v1505_v34 = vmul.f32 %v6060_v40, %v1502_v19  ;;  %v1543_v17 = vmul.f32 %v5989_v38, %v1542_v20 }
 0x148   : >> { %9898 = vst [vmem:[#allocation52_spill] sm:$0xff] %v6132_v33  ;;  %v6134_v30 = vpop.permute.xlu0 %1001 }
 0x149   : >> { %9899 = vst [vmem:[#allocation53_spill] sm:$0xff] %v6134_v30 }
 0x14c   : >> { %1509 = vrot.lane.b32.xlu2 %v1503_v16, %s5575_s9  ;;  %v1544_v16 = vmul.f32 %v6005_v54, %v1542_v20 }
 0x14d   : >> { %1493 = vrot.lane.b32.xlu1 %v1485_v22, %s5575_s9  ;;  %v1504_v22 = vmul.f32 %v6005_v54, %v1502_v19  ;;  %v1525_v19 = vmul.f32 %v6060_v40, %v1522_v57 }
 0x14e   : >> { %1491 = vrot.lane.b32.xlu0 %v1484_v63, %s5575_s9  ;;  %v6142_v2 = vpop.permute.xlu2 %1124  ;;  %v1549_v63 = vrot.slane %v1543_v17, 1  ;;  %v1524_v17 = vmul.f32 %v6005_v54, %v1522_v57  ;;  %v1584_v57 = vstv %s5012_s10  ;;  %s5040_s10 = sld [smem:[#allocation3 + $0x2b]] }
 0x14f   : >> { %9900 = vst [vmem:[#allocation54_spill] sm:$0xff] %v6142_v2  ;;  %v6144_v33 = vpop.permute.xlu1 %1028  ;;  %v1550_v2 = vrot.slane %v1544_v16, 1 }
 0x150   : >> { %9901 = vst [vmem:[#allocation55_spill] sm:$0xff] %v6144_v33  ;;  %v6146_v30 = vpop.permute.xlu0 %1026 }
 0x151   : >> { %9902 = vst [vmem:[#allocation56_spill] sm:$0xff] %v6146_v30  ;;  %v1563_v30 = vstv %s5011_s6  ;;  %v1551_v32 = vsel %vm451_vm0, %v1549_v63, %v1550_v2  ;;  %s6362_s6 = sld [smem:[#allocation3 + $0x1f]] }
 0x152   : >> { %v1564_v16 = vmul.f32 %v5989_v38, %v1563_v30 }
 0x154   : >> { %1529 = vrot.lane.b32.xlu2 %v1523_v7, %s5575_s9  ;;  %v1565_v7 = vmul.f32 %v6005_v54, %v1563_v30 }
 0x155   : >> { %1513 = vrot.lane.b32.xlu1 %v1505_v34, %s5575_s9  ;;  %v1566_v34 = vmul.f32 %v6060_v40, %v1563_v30 }
 0x156   : >> { %1511 = vrot.lane.b32.xlu0 %v1504_v22, %s5575_s9  ;;  %v6156_v33 = vpop.permute.xlu2 %1171  ;;  %v1545_v22 = vmul.f32 %v6060_v40, %v1542_v20  ;;  %v1607_v20 = vmul.f32 %v6005_v54, %v1605_v48 }
 0x157   : >> { %9903 = vst [vmem:[#allocation57_spill] sm:$0xff] %v6156_v33  ;;  %v6158_v18 = vpop.permute.xlu1 %1053  ;;  %v1571_v33 = vrot.slane %v1565_v7, 1  ;;  %v1586_v7 = vmul.f32 %v6005_v54, %v1584_v57 }
 0x158   : >> { %9904 = vst [vmem:[#allocation58_spill] sm:$0xff] %v6158_v18  ;;  %v6160_v58 = vpop.permute.xlu0 %1051  ;;  %v1570_v18 = vrot.slane %v1564_v16, 1  ;;  %v1552_v46 = vrot.slane %v1545_v22, 1  ;;  %v1585_v16 = vmul.f32 %v5989_v38, %v1584_v57 }
 0x159   : >> { %9905 = vst [vmem:[#allocation59_spill] sm:$0xff] %v6160_v58  ;;  %v1573_v58 = vrot.slane %v1566_v34, 1  ;;  %v1587_v34 = vmul.f32 %v6060_v40, %v1584_v57 }
 0x15b   : >> { %v1574_v30 = vsel %vm451_vm0, %v1571_v33, %v1573_v58  ;;  %v1613_v58 = vrot.slane %v1607_v20, 1 }
 0x15c   : >> { %1554 = vrot.lane.b32.xlu2 %v1551_v32, %s5576_s13  ;;  %v1606_v32 = vmul.f32 %v5989_v38, %v1605_v48 }
 0x15d   : >> { %1533 = vrot.lane.b32.xlu1 %v1525_v19, %s5575_s9  ;;  %v1572_v19 = vsel %vm451_vm0, %v1570_v18, %v1571_v33  ;;  %v1592_v18 = vrot.slane %v1586_v7, 1  ;;  %v1594_v33 = vrot.slane %v1587_v34, 1 }
 0x15e   : >> { %1531 = vrot.lane.b32.xlu0 %v1524_v17, %s5575_s9  ;;  %v6172_v63 = vpop.permute.xlu2 %1187  ;;  %v1553_v17 = vsel %vm451_vm0, %v1550_v2, %v1552_v46  ;;  %v1612_v22 = vrot.slane %v1606_v32, 1  ;;  %v1626_v32 = vstv %s5014_s11  ;;  %s6394_s11 = sld [smem:[#allocation3 + $0x14]] }
 0x15f   : >> { %9906 = vst [vmem:[#allocation60_spill] sm:$0xff] %v6172_v63  ;;  %v6174_v13 = vpop.permute.xlu1 %1078  ;;  %v1595_v2 = vsel %vm451_vm0, %v1592_v18, %v1594_v33 }
 0x160   : >> { %9907 = vst [vmem:[#allocation61_spill] sm:$0xff] %v6174_v13  ;;  %v6176_v10 = vpop.permute.xlu0 %1076  ;;  %v1591_v13 = vrot.slane %v1585_v16, 1  ;;  %v1614_v46 = vsel %vm451_vm0, %v1612_v22, %v1613_v58  ;;  %v1646_v16 = vstv %s5015_s12  ;;  %s5041_s12 = sld [smem:[#allocation3 + $0x8]] }
 0x161   : >> { %9908 = vst [vmem:[#allocation62_spill] sm:$0xff] %v6176_v10 }
 0x162   : >> { %v1593_v57 = vsel %vm451_vm0, %v1591_v13, %v1592_v18  ;;  %v1627_v13 = vmul.f32 %v5989_v38, %v1626_v32 }
 0x164   : >> { %1577 = vrot.lane.b32.xlu2 %v1574_v30, %s5576_s13  ;;  %v1608_v30 = vmul.f32 %v6060_v40, %v1605_v48 }
 0x165   : >> { %1575 = vrot.lane.b32.xlu1 %v1572_v19, %s5576_s13 }
 0x166   : >> { %1556 = vrot.lane.b32.xlu0 %v1553_v17, %s5576_s13  ;;  %v6189_v63 = vpop.permute.xlu2 %1213  ;;  %v1615_v7 = vrot.slane %v1608_v30, 1  ;;  %v1628_v17 = vmul.f32 %v6005_v54, %v1626_v32 }
 0x167   : >> { %9909 = vst [vmem:[#allocation63_spill] sm:$0xff] %v6189_v63  ;;  %v6191_v10 = vpop.permute.xlu1 %1103 }
 0x168   : >> { %9910 = vst [vmem:[#allocation64_spill] sm:$0xff] %v6191_v10  ;;  %v6193_v56 = vpop.permute.xlu0 %1101  ;;  %v1616_v48 = vsel %vm451_vm0, %v1613_v58, %v1615_v7  ;;  %v1629_v58 = vmul.f32 %v6060_v40, %v1626_v32  ;;  %v1649_v32 = vmul.f32 %v6060_v40, %v1646_v16  ;;  %v1807_v10 = vstv %s5023_s17  ;;  %s5054_s17 = sld [smem:[#allocation3 + $0x43]] }
 0x169   : >> { %9911 = vst [vmem:[#allocation65_spill] sm:$0xff] %v6193_v56 }
 0x16c   : >> { %1617 = vrot.lane.b32.xlu2 %v1614_v46, %s5576_s13  ;;  %v1648_v46 = vmul.f32 %v6005_v54, %v1646_v16 }
 0x16d   : >> { %1598 = vrot.lane.b32.xlu1 %v1595_v2, %s5576_s13  ;;  %v1647_v2 = vmul.f32 %v5989_v38, %v1646_v16 }
 0x16e   : >> { %1596 = vrot.lane.b32.xlu0 %v1593_v57, %s5576_s13  ;;  %v6202_v20 = vpop.permute.xlu2 %1229  ;;  %v1666_v57 = vstv %s5016_s14  ;;  %s5043_s14 = sld [smem:[#allocation3 + $0x20]] }
 0x16f   : >> { %9912 = vst [vmem:[#allocation66_spill] sm:$0xff] %v6202_v20  ;;  %v6204_v19 = vpop.permute.xlu1 %1128 }
 0x170   : >> { %9913 = vst [vmem:[#allocation67_spill] sm:$0xff] %v6204_v19  ;;  %v6206_v34 = vpop.permute.xlu0 %1126 }
 0x171   : >> { %9914 = vst [vmem:[#allocation68_spill] sm:$0xff] %v6206_v34 }
 0x174   : >> { %1635 = vrot.lane.b32.xlu2 %v1628_v17, %s5576_s13 }
 0x175   : >> { %1633 = vrot.lane.b32.xlu1 %v1627_v13, %s5576_s13  ;;  %v1668_v13 = vmul.f32 %v6005_v54, %v1666_v57 }
 0x176   : >> { %1619 = vrot.lane.b32.xlu0 %v1616_v48, %s5576_s13  ;;  %v6214_v22 = vpop.permute.xlu2 %1255  ;;  %v1667_v48 = vmul.f32 %v5989_v38, %v1666_v57 }
 0x177   : >> { %9915 = vst [vmem:[#allocation69_spill] sm:$0xff] %v6214_v22  ;;  %v6216_v18 = vpop.permute.xlu1 %1185 }
 0x178   : >> { %9916 = vst [vmem:[#allocation70_spill] sm:$0xff] %v6216_v18  ;;  %v6218_v33 = vpop.permute.xlu0 %1173 }
 0x179   : >> { %9917 = vst [vmem:[#allocation71_spill] sm:$0xff] %v6218_v33  ;;  %v1832_v33 = vstv %s5024_s21  ;;  %s5056_s21 = sld [smem:[#allocation3 + $0x5b]] }
 0x17c   : >> { %1655 = vrot.lane.b32.xlu2 %v1648_v46, %s5576_s13  ;;  %v1686_v46 = vstv %s5017_s15  ;;  %s5053_s15 = sld [smem:[#allocation3 + $0x37]] }
 0x17d   : >> { %1653 = vrot.lane.b32.xlu1 %v1647_v2, %s5576_s13  ;;  %v1688_v18 = vmul.f32 %v6005_v54, %v1686_v46  ;;  %v1687_v22 = vmul.f32 %v5989_v38, %v1686_v46 }
 0x17e   : >> { %1637 = vrot.lane.b32.xlu0 %v1629_v58, %s5576_s13  ;;  %v6226_v30 = vpop.permute.xlu2 %1271  ;;  %v1782_v58 = vstv %s5022_s16  ;;  %s5044_s16 = sld [smem:[#allocation3 + $0x2c]] }
 0x17f   : >> { %9918 = vst [vmem:[#allocation72_spill] sm:$0xff] %v6226_v30  ;;  %v6228_v7 = vpop.permute.xlu1 %1201  ;;  %v1784_v16 = vmul.f32 %v6005_v54, %v1782_v58 }
 0x180   : >> { %9919 = vst [vmem:[#allocation73_spill] sm:$0xff] %v6228_v7  ;;  %v6230_v17 = vpop.permute.xlu0 %1199 }
 0x181   : >> { %9920 = vst [vmem:[#allocation74_spill] sm:$0xff] %v6230_v17 }
 0x184   : >> { %1675 = vrot.lane.b32.xlu2 %v1668_v13, %s5576_s13  ;;  %v1785_v13 = vmul.f32 %v6060_v40, %v1782_v58 }
 0x185   : >> { %1673 = vrot.lane.b32.xlu1 %v1667_v48, %s5576_s13  ;;  %v1669_v48 = vmul.f32 %v6060_v40, %v1666_v57 }
 0x186   : >> { %1657 = vrot.lane.b32.xlu0 %v1649_v32, %s5576_s13  ;;  %v6238_v2 = vpop.permute.xlu2 %1411  ;;  %v1783_v32 = vmul.f32 %v5989_v38, %v1782_v58  ;;  %v1809_v58 = vmul.f32 %v6005_v54, %v1807_v10 }
 0x187   : >> { %9921 = vst [vmem:[#allocation75_spill] sm:$0xff] %v6238_v2  ;;  %v6240_v34 = vpop.permute.xlu1 %1227  ;;  %v1790_v2 = vrot.slane %v1784_v16, 1  ;;  %v1689_v16 = vmul.f32 %v6060_v40, %v1686_v46 }
 0x188   : >> { %9922 = vst [vmem:[#allocation76_spill] sm:$0xff] %v6240_v34  ;;  %v6242_v19 = vpop.permute.xlu0 %1215  ;;  %v1792_v34 = vrot.slane %v1785_v13, 1  ;;  %v1789_v56 = vrot.slane %v1783_v32, 1  ;;  %v1808_v13 = vmul.f32 %v5989_v38, %v1807_v10 }
 0x189   : >> { %9923 = vst [vmem:[#allocation77_spill] sm:$0xff] %v6242_v19 }
 0x18a   : >> { %v1793_v57 = vsel %vm451_vm0, %v1790_v2, %v1792_v34 }
 0x18c   : >> { %1695 = vrot.lane.b32.xlu2 %v1688_v18, %s5576_s13  ;;  %v1810_v18 = vmul.f32 %v6060_v40, %v1807_v10  ;;  %v1834_v10 = vmul.f32 %v6005_v54, %v1832_v33 }
 0x18d   : >> { %1693 = vrot.lane.b32.xlu1 %v1687_v22, %s5576_s13  ;;  %v1791_v22 = vsel %vm451_vm0, %v1789_v56, %v1790_v2  ;;  %v1835_v2 = vmul.f32 %v6060_v40, %v1832_v33 }
 0x18e   : >> { %1677 = vrot.lane.b32.xlu0 %v1669_v48, %s5576_s13  ;;  %v6253_v17 = vpop.permute.xlu2 %1434  ;;  %v1815_v48 = vrot.slane %v1809_v58, 1  ;;  %v1817_v32 = vrot.slane %v1810_v18, 1  ;;  %v1833_v58 = vmul.f32 %v5989_v38, %v1832_v33  ;;  %v1840_v18 = vrot.slane %v1834_v10, 1 }
 0x18f   : >> { %9924 = vst [vmem:[#allocation78_spill] sm:$0xff] %v6253_v17  ;;  %v6255_v20 = vpop.permute.xlu1 %1243 }
 0x190   : >> { %9925 = vst [vmem:[#allocation79_spill] sm:$0xff] %v6255_v20  ;;  %v6257_v30 = vpop.permute.xlu0 %1241  ;;  %v1818_v46 = vsel %vm451_vm0, %v1815_v48, %v1817_v32 }
 0x191   : >> { %9926 = vst [vmem:[#allocation80_spill] sm:$0xff] %v6257_v30  ;;  %v1814_v30 = vrot.slane %v1808_v13, 1  ;;  %v1839_v13 = vrot.slane %v1833_v58, 1 }
 0x194   : >> { %1796 = vrot.lane.b32.xlu2 %v1793_v57, %s5575_s9  ;;  %v1816_v57 = vsel %vm451_vm0, %v1814_v30, %v1815_v48 }
 0x195   : >> { %1794 = vrot.lane.b32.xlu1 %v1791_v22, %s5575_s9  ;;  %v1842_v22 = vrot.slane %v1835_v2, 1 }
 0x196   : >> { %1697 = vrot.lane.b32.xlu0 %v1689_v16, %s5576_s13  ;;  %v6268_v20 = vpop.permute.xlu2 %1469 }
 0x197   : >> { %9927 = vst [vmem:[#allocation81_spill] sm:$0xff] %v6268_v20  ;;  %v6270_v17 = vpop.permute.xlu1 %1269  ;;  %v1857_v20 = vstv %s5025_s22  ;;  %v1843_v30 = vsel %vm451_vm0, %v1840_v18, %v1842_v22  ;;  %s5055_s22 = sld [smem:[#allocation3 + $0x4f]] }
 0x198   : >> { %9928 = vst [vmem:[#allocation82_spill] sm:$0xff] %v6270_v17  ;;  %v6272_v56 = vpop.permute.xlu0 %1257  ;;  %v1859_v33 = vmul.f32 %v6005_v54, %v1857_v20  ;;  %v1860_v48 = vmul.f32 %v6060_v40, %v1857_v20  ;;  %v1858_v10 = vmul.f32 %v5989_v38, %v1857_v20 }
 0x199   : >> { %9929 = vst [vmem:[#allocation83_spill] sm:$0xff] %v6272_v56 }
 0x19a   : >> { %v1867_v2 = vrot.slane %v1860_v48, 1  ;;  %v1864_v58 = vrot.slane %v1858_v10, 1 }
 0x19c   : >> { %1821 = vrot.lane.b32.xlu2 %v1818_v46, %s5575_s9  ;;  %v1841_v46 = vsel %vm451_vm0, %v1839_v13, %v1840_v18 }
 0x19d   : >> { %1819 = vrot.lane.b32.xlu1 %v1816_v57, %s5575_s9 }
 0x19e   : >> { %1798 = vrot.lane.b32.xlu0 %v1792_v34, %s5575_s9  ;;  %v6282_v16 = vpop.permute.xlu2 %1489  ;;  %v1865_v34 = vrot.slane %v1859_v33, 1 }
 0x19f   : >> { %9930 = vst [vmem:[#allocation84_spill] sm:$0xff] %v6282_v16  ;;  %v6284_v19 = vpop.permute.xlu1 %1392 }
 0x1a0   : >> { %9931 = vst [vmem:[#allocation85_spill] sm:$0xff] %v6284_v19  ;;  %v6286_v56 = vpop.permute.xlu0 %1390  ;;  %v1868_v18 = vsel %vm451_vm0, %v1865_v34, %v1867_v2 }
 0x1a1   : >> { %9932 = vst [vmem:[#allocation86_spill] sm:$0xff] %v6286_v56  ;;  %v1882_v56 = vstv %s5026_s23  ;;  %s5057_s23 = sld [smem:[#allocation3 + $0x67]] }
 0x1a2   : >> { %v1884_v20 = vmul.f32 %v6005_v54, %v1882_v56  ;;  %v1885_v13 = vmul.f32 %v6060_v40, %v1882_v56  ;;  %v1883_v33 = vmul.f32 %v5989_v38, %v1882_v56 }
 0x1a4   : >> { %1846 = vrot.lane.b32.xlu2 %v1843_v30, %s5575_s9  ;;  %v1866_v30 = vsel %vm451_vm0, %v1864_v58, %v1865_v34  ;;  %v1892_v48 = vrot.slane %v1885_v13, 1  ;;  %v1889_v10 = vrot.slane %v1883_v33, 1 }
 0x1a5   : >> { %1844 = vrot.lane.b32.xlu1 %v1841_v46, %s5575_s9 }
 0x1a6   : >> { %1823 = vrot.lane.b32.xlu0 %v1817_v32, %s5575_s9  ;;  %v6296_v57 = vpop.permute.xlu2 %1509  ;;  %v1890_v32 = vrot.slane %v1884_v20, 1 }
 0x1a7   : >> { %9933 = vst [vmem:[#allocation87_spill] sm:$0xff] %v6296_v57  ;;  %v6298_v16 = vpop.permute.xlu1 %1432 }
 0x1a8   : >> { %9934 = vst [vmem:[#allocation88_spill] sm:$0xff] %v6298_v16  ;;  %v6300_v19 = vpop.permute.xlu0 %1413  ;;  %v1893_v34 = vsel %vm451_vm0, %v1890_v32, %v1892_v48 }
 0x1a9   : >> { %9935 = vst [vmem:[#allocation89_spill] sm:$0xff] %v6300_v19  ;;  %v1907_v19 = vstv %s5027_s26  ;;  %s4943_s26 = sld [smem:[#allocation3 + $0x30]] }
 0x1aa   : >> { %v1909_v56 = vmul.f32 %v6005_v54, %v1907_v19  ;;  %v1910_v58 = vmul.f32 %v6060_v40, %v1907_v19  ;;  %v1908_v20 = vmul.f32 %v5989_v38, %v1907_v19 }
 0x1ac   : >> { %1871 = vrot.lane.b32.xlu2 %v1868_v18, %s5575_s9  ;;  %v1891_v18 = vsel %vm451_vm0, %v1889_v10, %v1890_v32  ;;  %v1917_v13 = vrot.slane %v1910_v58, 1  ;;  %v1914_v33 = vrot.slane %v1908_v20, 1 }
 0x1ad   : >> { %1869 = vrot.lane.b32.xlu1 %v1866_v30, %s5575_s9 }
 0x1ae   : >> { %1848 = vrot.lane.b32.xlu0 %v1842_v22, %s5575_s9  ;;  %v6310_v46 = vpop.permute.xlu2 %1529  ;;  %v1915_v22 = vrot.slane %v1909_v56, 1 }
 0x1af   : >> { %9936 = vst [vmem:[#allocation90_spill] sm:$0xff] %v6310_v46  ;;  %v6312_v57 = vpop.permute.xlu1 %1455  ;;  %v1932_v46 = vstv %s5028_s28  ;;  %s4944_s28 = sld [smem:[#allocation3 + $0x3c]] }
 0x1b0   : >> { %9937 = vst [vmem:[#allocation91_spill] sm:$0xff] %v6312_v57  ;;  %v6314_v16 = vpop.permute.xlu0 %1453  ;;  %v1918_v32 = vsel %vm451_vm0, %v1915_v22, %v1917_v13  ;;  %v1934_v19 = vmul.f32 %v6005_v54, %v1932_v46  ;;  %v1935_v10 = vmul.f32 %v6060_v40, %v1932_v46  ;;  %v1933_v56 = vmul.f32 %v5989_v38, %v1932_v46 }
 0x1b1   : >> { %9938 = vst [vmem:[#allocation92_spill] sm:$0xff] %v6314_v16 }
 0x1b2   : >> { %v1942_v58 = vrot.slane %v1935_v10, 1  ;;  %v1939_v20 = vrot.slane %v1933_v56, 1 }
 0x1b4   : >> { %1896 = vrot.lane.b32.xlu2 %v1893_v34, %s5576_s13  ;;  %v1916_v34 = vsel %vm451_vm0, %v1914_v33, %v1915_v22 }
 0x1b5   : >> { %1894 = vrot.lane.b32.xlu1 %v1891_v18, %s5576_s13 }
 0x1b6   : >> { %1873 = vrot.lane.b32.xlu0 %v1867_v2, %s5575_s9  ;;  %v6324_v30 = vpop.permute.xlu2 %1554  ;;  %v1940_v2 = vrot.slane %v1934_v19, 1 }
 0x1b7   : >> { %9939 = vst [vmem:[#allocation93_spill] sm:$0xff] %v6324_v30  ;;  %v6326_v57 = vpop.permute.xlu1 %1473 }
 0x1b8   : >> { %9940 = vst [vmem:[#allocation94_spill] sm:$0xff] %v6326_v57  ;;  %v6328_v16 = vpop.permute.xlu0 %1471  ;;  %v1943_v22 = vsel %vm451_vm0, %v1940_v2, %v1942_v58 }
 0x1b9   : >> { %9941 = vst [vmem:[#allocation95_spill] sm:$0xff] %v6328_v16  ;;  %v1957_v16 = vstv %s5029_s18  ;;  %s6482_s18 = sld [smem:[#allocation3 + $0x18]] }
 0x1ba   : >> { %v1959_v46 = vmul.f32 %v6005_v54, %v1957_v16  ;;  %v1960_v33 = vmul.f32 %v6060_v40, %v1957_v16  ;;  %v1958_v19 = vmul.f32 %v5989_v38, %v1957_v16 }
 0x1bc   : >> { %1921 = vrot.lane.b32.xlu2 %v1918_v32, %s5576_s13  ;;  %v1941_v32 = vsel %vm451_vm0, %v1939_v20, %v1940_v2  ;;  %v1967_v10 = vrot.slane %v1960_v33, 1  ;;  %v1964_v56 = vrot.slane %v1958_v19, 1  ;;  %v2011_v2 = vstv %s5037_s25  ;;  %s5058_s25 = sld [smem:[#allocation3 + $0x73]] }
 0x1bd   : >> { %1919 = vrot.lane.b32.xlu1 %v1916_v34, %s5576_s13 }
 0x1be   : >> { %1898 = vrot.lane.b32.xlu0 %v1892_v48, %s5576_s13  ;;  %v6338_v18 = vpop.permute.xlu2 %1577  ;;  %v1965_v48 = vrot.slane %v1959_v46, 1 }
 0x1bf   : >> { %9942 = vst [vmem:[#allocation96_spill] sm:$0xff] %v6338_v18  ;;  %v6340_v30 = vpop.permute.xlu1 %1493 }
 0x1c0   : >> { %9943 = vst [vmem:[#allocation97_spill] sm:$0xff] %v6340_v30  ;;  %v6342_v57 = vpop.permute.xlu0 %1491  ;;  %v1968_v38 = vsel %vm451_vm0, %v1965_v48, %v1967_v10  ;;  %v1966_v16 = vsel %vm451_vm0, %v1964_v56, %v1965_v48  ;;  %v2025_v56 = vstv %s5038_s7  ;;  %v2109_v30 = vstv %s5044_s16  ;;  %s6491_s7 = sld [smem:[#allocation3 + $0xc]] }
 0x1c1   : >> { %9944 = vst [vmem:[#allocation98_spill] sm:$0xff] %v6342_v57  ;;  %s6567_s16 = sld [smem:[#allocation3 + $0x8b]] }
 0x1c4   : >> { %1946 = vrot.lane.b32.xlu2 %v1943_v22, %s5576_s13  ;;  %v6370_v22 = vld [vmem:[%s5698_s8 + $0x1e8] sm:$0xff] }
 0x1c5   : >> { %1944 = vrot.lane.b32.xlu1 %v1941_v32, %s5576_s13  ;;  %v2013_v33 = vmul.f32 %v6370_v22, %v2011_v2  ;;  %v6376_v32 = vld [vmem:[%s5698_s8 + $0x1e0] sm:$0xff] }
 0x1c6   : >> { %1923 = vrot.lane.b32.xlu0 %v1917_v13, %s5576_s13  ;;  %v6352_v34 = vpop.permute.xlu2 %1617  ;;  %v2012_v19 = vmul.f32 %v6376_v32, %v2011_v2  ;;  %v2026_v2 = vmul.f32 %v6376_v32, %v2025_v56 }
 0x1c7   : >> { %9945 = vst [vmem:[#allocation99_spill] sm:$0xff] %v6352_v34  ;;  %v6354_v54 = vpop.permute.xlu1 %1513 }
 0x1c8   : >> { %9946 = vst [vmem:[#allocation100_spill] sm:$0xff] %v6354_v54  ;;  %v6356_v40 = vpop.permute.xlu0 %1511 }
 0x1c9   : >> { %9947 = vst [vmem:[#allocation101_spill] sm:$0xff] %v6356_v40  ;;  %v2027_v40 = vmul.f32 %v6370_v22, %v2025_v56 }
 0x1cc   : >> { %1971 = vrot.lane.b32.xlu2 %v1968_v38, %s5576_s13 }
 0x1cd   : >> { %1969 = vrot.lane.b32.xlu1 %v1966_v16, %s5576_s13 }
 0x1ce   : >> { %1948 = vrot.lane.b32.xlu0 %v1942_v58, %s5576_s13  ;;  %v6365_v13 = vpop.permute.xlu2 %1635  ;;  %v2039_v58 = vstv %s6362_s6  ;;  %s6486_s6 = sld [smem:[#allocation3]] }
 0x1cf   : >> { %9948 = vst [vmem:[#allocation102_spill] sm:$0xff] %v6365_v13  ;;  %v6367_v20 = vpop.permute.xlu1 %1533 }
 0x1d0   : >> { %9949 = vst [vmem:[#allocation103_spill] sm:$0xff] %v6367_v20  ;;  %v6372_v46 = vpop.permute.xlu0 %1531 }
 0x1d1   : >> { %9950 = vst [vmem:[#allocation104_spill] sm:$0xff] %v6372_v46  ;;  %v2040_v46 = vmul.f32 %v6376_v32, %v2039_v58 }
 0x1d4   : >> { %2018 = vrot.lane.b32.xlu2 %v2013_v33, %s5575_s9  ;;  %v2053_v33 = vstv %s5040_s10  ;;  %s4946_s10 = sld [smem:[#allocation3 + $0x54]] }
 0x1d5   : >> { %2016 = vrot.lane.b32.xlu1 %v2012_v19, %s5575_s9  ;;  %v2055_v20 = vmul.f32 %v6370_v22, %v2053_v33  ;;  %v2054_v56 = vmul.f32 %v6376_v32, %v2053_v33 }
 0x1d6   : >> { %1973 = vrot.lane.b32.xlu0 %v1967_v10, %s5576_s13  ;;  %v6383_v48 = vpop.permute.xlu2 %1655 }
 0x1d7   : >> { %9951 = vst [vmem:[#allocation105_spill] sm:$0xff] %v6383_v48  ;;  %v6385_v38 = vpop.permute.xlu1 %1575 }
 0x1d8   : >> { %9952 = vst [vmem:[#allocation106_spill] sm:$0xff] %v6385_v38  ;;  %v6387_v16 = vpop.permute.xlu0 %1556 }
 0x1d9   : >> { %9953 = vst [vmem:[#allocation107_spill] sm:$0xff] %v6387_v16 }
 0x1da   : >> { %v496_v63 = vstv %s4946_s10  ;;  %s6690_s10 = sld [smem:[#allocation3 + $0x5c]] }
 0x1dc   : >> { %2044 = vrot.lane.b32.xlu2 %v2040_v46, %s5575_s9  ;;  %v2041_v46 = vmul.f32 %v6370_v22, %v2039_v58 }
 0x1dd   : >> { %2032 = vrot.lane.b32.xlu1 %v2027_v40, %s5575_s9  ;;  %v2081_v40 = vstv %s6394_s11  ;;  %s4945_s11 = sld [smem:[#allocation3 + $0x48]] }
 0x1de   : >> { %2030 = vrot.lane.b32.xlu0 %v2026_v2, %s5575_s9  ;;  %v6397_v10 = vpop.permute.xlu2 %1675  ;;  %v2082_v33 = vmul.f32 %v6376_v32, %v2081_v40  ;;  %v2083_v18 = vmul.f32 %v6370_v22, %v2081_v40  ;;  %v2111_v40 = vmul.f32 %v6370_v22, %v2109_v30 }
 0x1df   : >> { %9954 = vst [vmem:[#allocation108_spill] sm:$0xff] %v6397_v10  ;;  %v6399_v19 = vpop.permute.xlu1 %1598  ;;  %v2067_v10 = vstv %s5041_s12  ;;  %s6510_s12 = sld [smem:[#allocation3 + $0x24]] }
 0x1e0   : >> { %9955 = vst [vmem:[#allocation109_spill] sm:$0xff] %v6399_v19  ;;  %v6401_v48 = vpop.permute.xlu0 %1596  ;;  %v2069_v58 = vmul.f32 %v6370_v22, %v2067_v10  ;;  %v2286_v19 = vstv %s5056_s21  ;;  %s6584_s21 = sld [smem:[#allocation3 + $0x6c]] }
 0x1e1   : >> { %9956 = vst [vmem:[#allocation110_spill] sm:$0xff] %v6401_v48 }
 0x1e4   : >> { %2060 = vrot.lane.b32.xlu2 %v2055_v20, %s5575_s9  ;;  %v2068_v20 = vmul.f32 %v6376_v32, %v2067_v10 }
 0x1e5   : >> { %2058 = vrot.lane.b32.xlu1 %v2054_v56, %s5575_s9  ;;  %v2095_v56 = vstv %s5043_s14  ;;  %s6516_s14 = sld [smem:[#allocation3 + $0x7f]]  ;;  %v328_v21 = vstv %s6510_s12 }
 0x1e6   : >> { %2046 = vrot.lane.b32.xlu0 %v2041_v46, %s5575_s9  ;;  %v6410_v2 = vpop.permute.xlu2 %1695  ;;  %v2097_v38 = vmul.f32 %v6370_v22, %v2095_v56  ;;  %v2096_v10 = vmul.f32 %v6376_v32, %v2095_v56  ;;  %v2244_v56 = vstv %s5054_s17  ;;  %s6576_s17 = sld [smem:[#allocation3 + $0x38]] }
 0x1e7   : >> { %9957 = vst [vmem:[#allocation111_spill] sm:$0xff] %v6410_v2  ;;  %v6412_v13 = vpop.permute.xlu1 %1633  ;;  %v2223_v2 = vstv %s5053_s15  ;;  %s6555_s15 = sld [smem:[#allocation3 + $0x60]] }
 0x1e8   : >> { %9958 = vst [vmem:[#allocation112_spill] sm:$0xff] %v6412_v13  ;;  %v6414_v57 = vpop.permute.xlu0 %1619  ;;  %s6736_s12 = sld [smem:[#allocation3 + $0xb4]] }
 0x1e9   : >> { %9959 = vst [vmem:[#allocation113_spill] sm:$0xff] %v6414_v57 }
 0x1ec   : >> { %2086 = vrot.lane.b32.xlu2 %v2082_v33, %s5576_s13  ;;  %v2224_v33 = vmul.f32 %v6376_v32, %v2223_v2 }
 0x1ed   : >> { %2074 = vrot.lane.b32.xlu1 %v2069_v58, %s5576_s13  ;;  %v2225_v58 = vmul.f32 %v6370_v22, %v2223_v2 }
 0x1ee   : >> { %2072 = vrot.lane.b32.xlu0 %v2068_v20, %s5576_s13  ;;  %v6422_v46 = vpop.permute.xlu2 %1796  ;;  %v2230_v20 = vrot.slane %v2224_v33, 1  ;;  %v2110_v33 = vmul.f32 %v6376_v32, %v2109_v30  ;;  %v2265_v30 = vstv %s5055_s22  ;;  %s6600_s22 = sld [smem:[#allocation3 + $0x78]] }
 0x1ef   : >> { %9960 = vst [vmem:[#allocation114_spill] sm:$0xff] %v6422_v46  ;;  %v6424_v13 = vpop.permute.xlu1 %1653  ;;  %v2231_v46 = vrot.slane %v2225_v58, 1  ;;  %v2245_v58 = vmul.f32 %v6376_v32, %v2244_v56 }
 0x1f0   : >> { %9961 = vst [vmem:[#allocation115_spill] sm:$0xff] %v6424_v13  ;;  %v6426_v54 = vpop.permute.xlu0 %1637 }
 0x1f1   : >> { %9962 = vst [vmem:[#allocation116_spill] sm:$0xff] %v6426_v54  ;;  %v6439_v54 = vld [vmem:[%s5698_s8 + $0x1f0] sm:$0x3]  ;;  %v2251_v57 = vrot.slane %v2245_v58, 1  ;;  %v2266_v58 = vmul.f32 %v6376_v32, %v2265_v30 }
 0x1f4   : >> { %2102 = vrot.lane.b32.xlu2 %v2097_v38, %s5576_s13  ;;  %v2232_v38 = vsel %vm451_vm0, %v2230_v20, %v2231_v46 }
 0x1f5   : >> { %2100 = vrot.lane.b32.xlu1 %v2096_v10, %s5576_s13  ;;  %v2246_v10 = vmul.f32 %v6370_v22, %v2244_v56 }
 0x1f6   : >> { %2088 = vrot.lane.b32.xlu0 %v2083_v18, %s5576_s13  ;;  %v6436_v13 = vpop.permute.xlu2 %1821  ;;  %v2247_v18 = vmul.f32 %v6439_v54, %v2244_v56  ;;  %v2287_v56 = vmul.f32 %v6376_v32, %v2286_v19 }
 0x1f7   : >> { %9963 = vst [vmem:[#allocation117_spill] sm:$0xff] %v6436_v13  ;;  %v6441_v48 = vpop.permute.xlu1 %1673  ;;  %v2226_v13 = vmul.f32 %v6439_v54, %v2223_v2 }
 0x1f8   : >> { %9964 = vst [vmem:[#allocation118_spill] sm:$0xff] %v6441_v48  ;;  %v6443_v16 = vpop.permute.xlu0 %1657  ;;  %v2252_v48 = vrot.slane %v2246_v10, 1  ;;  %v2267_v10 = vmul.f32 %v6370_v22, %v2265_v30 }
 0x1f9   : >> { %9965 = vst [vmem:[#allocation119_spill] sm:$0xff] %v6443_v16  ;;  %v2254_v16 = vrot.slane %v2247_v18, 1  ;;  %v2233_v7 = vrot.slane %v2226_v13, 1  ;;  %v2268_v18 = vmul.f32 %v6439_v54, %v2265_v30  ;;  %v2293_v13 = vrot.slane %v2287_v56, 1 }
 0x1fa   : >> { %v2289_v56 = vmul.f32 %v6439_v54, %v2286_v19 }
 0x1fb   : >> { %v2255_v2 = vsel %vm451_vm0, %v2252_v48, %v2254_v16 }
 0x1fc   : >> { %2235 = vrot.lane.b32.xlu2 %v2232_v38, %s5575_s9  ;;  %v2288_v38 = vmul.f32 %v6370_v22, %v2286_v19  ;;  %v2296_v19 = vrot.slane %v2289_v56, 1  ;;  %v6514_v56 = vstv %s5058_s25  ;;  %s6644_s25 = sld [smem:[#allocation3 + $0x90]] }
 0x1fd   : >> { %2116 = vrot.lane.b32.xlu1 %v2111_v40, %s5576_s13  ;;  %v2253_v40 = vsel %vm451_vm0, %v2251_v57, %v2252_v48  ;;  %v2273_v57 = vrot.slane %v2267_v10, 1  ;;  %v2275_v48 = vrot.slane %v2268_v18, 1  ;;  %v444_v10 = vstv %s4943_s26  ;;  %s6624_s26 = sld [smem:[#allocation3 + $0x50]] }
 0x1fe   : >> { %2114 = vrot.lane.b32.xlu0 %v2110_v33, %s5576_s13  ;;  %v6455_v20 = vpop.permute.xlu2 %1846  ;;  %v2234_v33 = vsel %vm451_vm0, %v2231_v46, %v2233_v7  ;;  %v2294_v16 = vrot.slane %v2288_v38, 1  ;;  %v2307_v38 = vstv %s5057_s23  ;;  %v2329_v49 = vmul.f32 %v6370_v22, %v6514_v56  ;;  %s6608_s23 = sld [smem:[#allocation3 + $0x84]] }
 0x1ff   : >> { %9966 = vst [vmem:[#allocation120_spill] sm:$0xff] %v6455_v20  ;;  %v6457_v34 = vpop.permute.xlu1 %1693  ;;  %v2276_v30 = vsel %vm451_vm0, %v2273_v57, %v2275_v48  ;;  %v6506_v48 = vld [vmem:[%s5698_s8] sm:$0xff]  ;;  %v2310_v35 = vmul.f32 %v6439_v54, %v2307_v38 }
 0x200   : >> { %9967 = vst [vmem:[#allocation121_spill] sm:$0xff] %v6457_v34  ;;  %v6459_v17 = vpop.permute.xlu0 %1677  ;;  %v2295_v46 = vsel %vm451_vm0, %v2293_v13, %v2294_v16  ;;  %v6500_v13 = vld [vmem:[%s5698_s8 + $0x8] sm:$0xff] }
 0x201   : >> { %9968 = vst [vmem:[#allocation122_spill] sm:$0xff] %v6459_v17  ;;  %v2272_v17 = vrot.slane %v2266_v58, 1  ;;  %v2308_v58 = vmul.f32 %v6376_v32, %v2307_v38  ;;  %v6551_v8 = vmul.f32 %v6500_v13, %v496_v63 }
 0x204   : >> { %2258 = vrot.lane.b32.xlu2 %v2255_v2, %s5575_s9  ;;  %v2274_v2 = vsel %vm451_vm0, %v2272_v17, %v2273_v57  ;;  %v6503_v57 = vmul.f32 %v6500_v13, %v444_v10 }
 0x205   : >> { %2256 = vrot.lane.b32.xlu1 %v2253_v40, %s5575_s9 }
 0x206   : >> { %2237 = vrot.lane.b32.xlu0 %v2234_v33, %s5575_s9  ;;  %v6472_v34 = vpop.permute.xlu2 %1871  ;;  %v2309_v33 = vmul.f32 %v6370_v22, %v2307_v38  ;;  %v9978_v0 = vrot.slane %v6503_v57, 1  ;;  %v497_v38 = vmul.f32 %v6506_v48, %v496_v63 }
 0x207   : >> { %9969 = vst [vmem:[#allocation123_spill] sm:$0xff] %v6472_v34  ;;  %v6474_v20 = vpop.permute.xlu1 %1794  ;;  %v324_v34 = vstv %s6482_s18  ;;  %s6637_s18 = sld [smem:[#allocation3 + $0xf]] }
 0x208   : >> { %9970 = vst [vmem:[#allocation124_spill] sm:$0xff] %v6474_v20  ;;  %v6476_v7 = vpop.permute.xlu0 %1697  ;;  %v6524_v20 = vld [vmem:[%s5698_s8 + $0x10] sm:$0x3]  ;;  %v325_v44 = vmul.f32 %v6506_v48, %v324_v34  ;;  %v326_v36 = vmul.f32 %v6500_v13, %v324_v34 }
 0x209   : >> { %9971 = vst [vmem:[#allocation125_spill] sm:$0xff] %v6476_v7  ;;  %v447_v1 = vmul.f32 %v6524_v20, %v444_v10  ;;  %v499_v47 = vmul.f32 %v6524_v20, %v496_v63 }
 0x20c   : >> { %2298 = vrot.lane.b32.xlu2 %v2295_v46, %s5575_s9  ;;  %v445_v46 = vmul.f32 %v6506_v48, %v444_v10 }
 0x20d   : >> { %2279 = vrot.lane.b32.xlu1 %v2276_v30, %s5575_s9  ;;  %v462_v30 = vstv %s4944_s28  ;;  %s6633_s28 = sld [smem:[#allocation3 + $0x44]] }
 0x20e   : >> { %2277 = vrot.lane.b32.xlu0 %v2274_v2, %s5575_s9  ;;  %v6489_v40 = vpop.permute.xlu2 %1896  ;;  %v2297_v2 = vsel %vm451_vm0, %v2294_v16, %v2296_v19  ;;  %v465_v16 = vmul.f32 %v6524_v20, %v462_v30 }
 0x20f   : >> { %9972 = vst [vmem:[#allocation126_spill] sm:$0xff] %v6489_v40  ;;  %v6493_v17 = vpop.permute.xlu1 %1819  ;;  %v6521_v40 = vmul.f32 %v6500_v13, %v462_v30 }
 0x210   : >> { %9973 = vst [vmem:[#allocation127_spill] sm:$0xff] %v6493_v17  ;;  %v6495_v18 = vpop.permute.xlu0 %1798  ;;  %v316_v17 = vstv %s6486_s6  ;;  %s6666_s6 = sld [smem:[#allocation3 + $0x1b]] }
 0x211   : >> { %9974 = vst [vmem:[#allocation128_spill] sm:$0xff] %v6495_v18  ;;  %v320_v18 = vstv %s6491_s7  ;;  %s6676_s7 = sld [smem:[#allocation3 + $0x9c]] }
 0x212   : >> { %v322_v25 = vmul.f32 %v6500_v13, %v320_v18 }
 0x214   : >> { %2316 = vrot.lane.b32.xlu2 %v2309_v33, %s5575_s9  ;;  %v2328_v33 = vmul.f32 %v6376_v32, %v6514_v56 }
 0x215   : >> { %2314 = vrot.lane.b32.xlu1 %v2308_v58, %s5575_s9  ;;  %v452_v58 = vrot.slane %v445_v46, 1  ;;  %v479_v46 = vstv %s4945_s11  ;;  %s6716_s11 = sld [smem:[#allocation3 + $0xa8]] }
 0x216   : >> { %2300 = vrot.lane.b32.xlu0 %v2297_v2, %s5575_s9  ;;  %v6528_v19 = vpop.permute.xlu2 %1921  ;;  %v317_v2 = vmul.f32 %v6506_v48, %v316_v17 }
 0x217   : >> { %9975 = vst [vmem:[#allocation129_spill] sm:$0xff] %v6528_v19  ;;  %v6531_v7 = vpop.permute.xlu1 %1844  ;;  %v472_v19 = vrot.slane %v465_v16, 1  ;;  %v454_v34 = vsel %vm451_vm0, %v452_v58, %v9978_v0  ;;  %v480_v16 = vmul.f32 %v6506_v48, %v479_v46  ;;  %v481_v0 = vmul.f32 %v6500_v13, %v479_v46 }
 0x218   : >> { %9976 = vst [vmem:[#allocation130_spill] sm:$0xff] %v6531_v7  ;;  %v6534_v51 = vpop.permute.xlu0 %1823  ;;  %v470_v7 = vrot.slane %v6521_v40, 1  ;;  %v463_v40 = vmul.f32 %v6506_v48, %v462_v30  ;;  %v6565_v58 = vstv %s6516_s14  ;;  %v343_v10 = vadd.f32 %v5836_v62, %v317_v2  ;;  %s6764_s14 = sld [smem:[#allocation3 + $0x3]] }
 0x219   : >> { %9977 = vst [vmem:[#allocation131_spill] sm:$0xff] %v6534_v51  ;;  %v321_v51 = vmul.f32 %v6506_v48, %v320_v18  ;;  %v371_v18 = vadd.f32 %v5801_v27, %v325_v44  ;;  %v318_v30 = vmul.f32 %v6500_v13, %v316_v17  ;;  %v358_v44 = vadd.f32 %v5846_v5, %v322_v25 }
 0x21a   : >> { %v473_v59 = vsel %vm451_vm0, %v470_v7, %v472_v19  ;;  %v504_v62 = vrot.slane %v6551_v8, 1  ;;  %v455_v17 = vrot.slane %v447_v1, 1  ;;  %v469_v19 = vrot.slane %v463_v40, 1 }
 0x21b   : >> { %v372_v5 = vadd.f32 %v5813_v41, %v326_v36  ;;  %v486_v25 = vrot.slane %v480_v16, 1  ;;  %v487_v45 = vrot.slane %v481_v0, 1  ;;  %v2348_v63 = vmul.f32 %v6376_v32, %v6565_v58 }
 0x21c   : >> { %2336 = vrot.lane.b32.xlu2 %v2329_v49, %s5575_s9  ;;  %v482_v49 = vmul.f32 %v6524_v20, %v479_v46  ;;  %v503_v46 = vrot.slane %v497_v38, 1  ;;  %v399_v8 = vadd.f32 %v5824_v52, %v343_v10  ;;  %v344_v1 = vadd.f32 %v5848_v6, %v318_v30 }
 0x21d   : >> { %2334 = vrot.lane.b32.xlu1 %v2328_v33, %s5575_s9  ;;  %v329_v33 = vmul.f32 %v6506_v48, %v328_v21  ;;  %v2330_v40 = vmul.f32 %v6439_v54, %v6514_v56  ;;  %v414_v38 = vadd.f32 %v5832_v60, %v358_v44  ;;  %v506_v36 = vrot.slane %v499_v47, 1 }
 0x21e   : >> { %2318 = vrot.lane.b32.xlu0 %v2310_v35, %s5575_s9  ;;  %v6574_v27 = vpop.permute.xlu2 %1946  ;;  %v9982_v16 = vrot.slane %v6503_v57, 1  ;;  %v400_v6 = vadd.f32 %v5874_v28, %v344_v1  ;;  %v471_v0 = vsel %vm451_vm0, %v469_v19, %v470_v7  ;;  %v505_v56 = vsel %vm451_vm0, %v503_v46, %v504_v62 }
 0x21f   : >> { %9979 = vst [vmem:[#allocation132_spill] sm:$0xff] %v6574_v27  ;;  %v6582_v2 = vpop.permute.xlu1 %1869  ;;  %v2349_v27 = vmul.f32 %v6370_v22, %v6565_v58  ;;  %v385_v41 = vadd.f32 %v5860_v15, %v329_v33  ;;  %v357_v60 = vadd.f32 %v5834_v61, %v321_v51  ;;  %v488_v15 = vsel %vm451_vm0, %v486_v25, %v487_v45 }
 0x220   : >> { %9980 = vst [vmem:[#allocation133_spill] sm:$0xff] %v6582_v2  ;;  %v6586_v35 = vpop.permute.xlu0 %1848  ;;  %v489_v2 = vrot.slane %v482_v49, 1  ;;  %v456_v52 = vsel %vm451_vm0, %v9982_v16, %v455_v17  ;;  %v513_v47 = vstv %s6555_s15  ;;  %v459_v57 = vadd.f32 %v454_v34, %v399_v8  ;;  %s6822_s15 = sld [smem:[#allocation3 + $0x27]] }
 0x221   : >> { %9981 = vst [vmem:[#allocation134_spill] sm:$0xff] %v6586_v35  ;;  %v330_v35 = vmul.f32 %v6500_v13, %v328_v21  ;;  %v6616_v21 = vstv %s6567_s16  ;;  %v516_v28 = vmul.f32 %v6524_v20, %v513_v47  ;;  %v2387_v30 = vstv %s6576_s17  ;;  %s6839_s16 = sld [smem:[#allocation3 + $0x68]] }
 0x222   : >> { %v490_v7 = vsel %vm451_vm0, %v487_v45, %v489_v2  ;;  %v441_v61 = vadd.f32 %v5844_v4, %v385_v41  ;;  %v427_v51 = vadd.f32 %v5889_v42, %v371_v18  ;;  %v507_v49 = vsel %vm451_vm0, %v504_v62, %v506_v36  ;;  %s6919_s17 = sld [smem:[#allocation3 + $0x74]] }
 0x223   : >> { %v413_v45 = vadd.f32 %v5872_v26, %v357_v60  ;;  %v460_v34 = vadd.f32 %v456_v52, %v400_v6  ;;  %v518_v33 = vstv %s6584_s21  ;;  %v2369_v4 = vmul.f32 %v6370_v22, %v6616_v21  ;;  %s6950_s21 = sld [smem:[#allocation3 + $0x63]] }
 0x224   : >> { %2356 = vrot.lane.b32.xlu2 %v2349_v27, %s5575_s9  ;;  %v6629_v27 = vadd.f32 %v473_v59, %v414_v38  ;;  %v386_v42 = vadd.f32 %v5858_v14, %v330_v35  ;;  %v2368_v59 = vmul.f32 %v6376_v32, %v6616_v21  ;;  %v2389_v26 = vmul.f32 %v6370_v22, %v2387_v30 }
 0x225   : >> { %2354 = vrot.lane.b32.xlu1 %v2348_v63, %s5575_s9  ;;  %v2390_v18 = vmul.f32 %v6439_v54, %v2387_v30  ;;  %v428_v62 = vadd.f32 %v5887_v39, %v372_v5  ;;  %v521_v17 = vmul.f32 %v6524_v20, %v518_v33  ;;  %v2350_v19 = vmul.f32 %v6439_v54, %v6565_v58 }
 0x226   : >> { %2338 = vrot.lane.b32.xlu0 %v2330_v40, %s5575_s9  ;;  %v6621_v10 = vpop.permute.xlu2 %1971  ;;  %v2388_v46 = vmul.f32 %v6376_v32, %v2387_v30  ;;  %v493_v25 = vadd.f32 %v488_v15, %v427_v51  ;;  %v442_v14 = vadd.f32 %v5903_v55, %v386_v42  ;;  %v523_v35 = vstv %s6600_s22  ;;  %v6739_v42 = vld [vmem:[%s5698_s8 + $0xf0] sm:$0xff]  ;;  %s6965_s22 = sld [smem:[#allocation3 + $0x6f]] }
 0x227   : >> { %9983 = vst [vmem:[#allocation135_spill] sm:$0xff] %v6621_v10  ;;  %v6631_v44 = vpop.permute.xlu1 %1894  ;;  %v6657_v63 = vadd.f32 %v505_v56, %v441_v61  ;;  %v476_v8 = vadd.f32 %v471_v0, %v413_v45  ;;  %v526_v1 = vmul.f32 %v6524_v20, %v523_v35  ;;  %v6661_v40 = vstv %s6608_s23  ;;  %s6973_s23 = sld [smem:[#allocation3 + $0x7b]] }
 0x228   : >> { %9984 = vst [vmem:[#allocation136_spill] sm:$0xff] %v6631_v44  ;;  %v6639_v2 = vpop.permute.xlu0 %1873  ;;  %v6664_v39 = vadd.f32 %v5856_v12, %v460_v34  ;;  %v6671_v58 = vmul.f32 %v6524_v20, %v6661_v40  ;;  %v6674_v55 = vmul.f32 %v6500_v13, %v513_v47  ;;  %v2395_v5 = vrot.slane %v2389_v26, 1 }
 0x229   : >> { %9985 = vst [vmem:[#allocation137_spill] sm:$0xff] %v6639_v2  ;;  %v2397_v38 = vrot.slane %v2390_v18, 1  ;;  %v6679_v12 = vadd.f32 %v490_v7, %v428_v62  ;;  %v6682_v41 = vmul.f32 %v6506_v48, %v513_v47  ;;  %v2394_v16 = vrot.slane %v2388_v46, 1 }
 0x22a   : >> { %v6688_v52 = vstv %s6624_s26  ;;  %v6693_v6 = vadd.f32 %v5899_v50, %v516_v28  ;;  %v511_v0 = vadd.f32 %v507_v49, %v442_v14  ;;  %v6696_v56 = vadd.f32 %v5870_v24, %v493_v25  ;;  %s6982_s26 = sld [smem:[#allocation3 + $0x87]] }
 0x22b   : >> { %v2408_v15 = vstv %s6633_s28  ;;  %v6702_v47 = vadd.f32 %v5901_v53, %v459_v57  ;;  %v6705_v7 = vmul.f32 %v6500_v13, %v518_v33  ;;  %v6708_v30 = vmul.f32 %v6506_v48, %v518_v33  ;;  %s6995_s28 = sld [smem:[#allocation3 + $0x80]] }
 0x22c   : >> { %2376 = vrot.lane.b32.xlu2 %v2369_v4, %s5575_s9  ;;  %v9730_v50 = vstv %s6637_s18  ;;  %v6714_v61 = vstv %s6644_s25  ;;  %v2398_v24 = vsel %vm451_vm0, %v2395_v5, %v2397_v38  ;;  %v2430_v53 = vmul.f32 %v6376_v32, %v6688_v52  ;;  %s7054_s25 = sld [smem:[#allocation3 + $0x8c]] }
 0x22d   : >> { %2374 = vrot.lane.b32.xlu1 %v2368_v59, %s5575_s9  ;;  %v6723_v57 = vmul.f32 %v6370_v22, %v6688_v52  ;;  %v2396_v51 = vsel %vm451_vm0, %v2394_v16, %v2395_v5  ;;  %v2370_v49 = vmul.f32 %v6439_v54, %v6616_v21  ;;  %v2410_v45 = vmul.f32 %v6370_v22, %v2408_v15  ;;  %v6781_v16 = vld [vmem:[%s5698_s8 + $0xf8] sm:$0xff] }
 0x22e   : >> { %2358 = vrot.lane.b32.xlu0 %v2350_v19, %s5575_s9  ;;  %v6685_v36 = vpop.permute.xlu2 %2018  ;;  %v2411_v34 = vmul.f32 %v6439_v54, %v2408_v15  ;;  %v6731_v33 = vadd.f32 %v5913_v3, %v521_v17  ;;  %v6734_v4 = vadd.f32 %v5885_v37, %v511_v0  ;;  %v6744_v59 = vmul.f32 %v6739_v42, %v9730_v50 }
 0x22f   : >> { %v6698_v60 = vpop.permute.xlu1 %1919  ;;  %v2409_v21 = vmul.f32 %v6376_v32, %v2408_v15  ;;  %v6749_v26 = vadd.f32 %v5915_v9, %v6629_v27  ;;  %v6752_v3 = vmul.f32 %v6500_v13, %v523_v35  ;;  %v6755_v37 = vmul.f32 %v6506_v48, %v523_v35 }
 0x230   : >> { %9986 = vst [vmem:[#allocation138_spill] sm:$0xff] %v6698_v60  ;;  %v6711_v28 = vpop.permute.xlu0 %1898  ;;  %v9729_v18 = vstv %s6666_s6  ;;  %v862_v62 = vmul.f32 %v6506_v48, %v6714_v61  ;;  %v6762_v17 = vstv %s6676_s7  ;;  %v2436_v9 = vrot.slane %v2430_v53, 1  ;;  %v9994_v60 = vld [vmem:[#allocation15_spill] sm:$0xff]  ;;  %s7070_s7 = sld [smem:[#allocation3 + $0x97]] }
 0x231   : >> { %9987 = vst [vmem:[#allocation139_spill] sm:$0xff] %v6711_v28  ;;  %v9731_v27 = vrot.slane %v6723_v57, 1  ;;  %v6770_v19 = vmul.f32 %v6500_v13, %v6714_v61  ;;  %v2416_v25 = vrot.slane %v2410_v45, 1  ;;  %v2418_v14 = vrot.slane %v2411_v34, 1 }
 0x232   : >> { %v2450_v35 = vstv %s6690_s10  ;;  %v572_v5 = vadd.f32 %v5917_v11, %v476_v8  ;;  %v6778_v38 = vadd.f32 %v5927_v23, %v526_v1  ;;  %v6786_v0 = vmul.f32 %v6781_v16, %v9729_v18  ;;  %s7080_s10 = sld [smem:[#allocation3 + $0x33]] }
 0x233   : >> { %v6792_v53 = vmul.f32 %v6500_v13, %v6661_v40  ;;  %v6796_v11 = vmul.f32 %v6506_v48, %v6661_v40  ;;  %v881_v23 = vmul.f32 %v6506_v48, %v6762_v17  ;;  %v6802_v8 = vmul.f32 %v6500_v13, %v6762_v17 }
 0x234   : >> { %2401 = vrot.lane.b32.xlu2 %v2398_v24, %s5576_s13  ;;  %v2415_v24 = vrot.slane %v2409_v21, 1  ;;  %v2452_v45 = vmul.f32 %v6370_v22, %v2450_v35  ;;  %v2453_v40 = vmul.f32 %v6439_v54, %v2450_v35  ;;  %v868_v34 = vrot.slane %v862_v62, 1 }
 0x235   : >> { %2399 = vrot.lane.b32.xlu1 %v2396_v51, %s5576_s13  ;;  %v6807_v51 = vstv %s6716_s11  ;;  %v2419_v18 = vsel %vm451_vm0, %v2416_v25, %v2418_v14  ;;  %v2451_v50 = vmul.f32 %v6376_v32, %v2450_v35  ;;  %v6819_v10 = vadd.f32 %v5929_v29, %v6657_v63  ;;  %s7130_s11 = sld [smem:[#allocation3 + $0x5a]] }
 0x236   : >> { %2378 = vrot.lane.b32.xlu0 %v2370_v49, %s5575_s9  ;;  %v6773_v46 = vpop.permute.xlu2 %2044  ;;  %v2438_v49 = vsel %vm451_vm0, %v2436_v9, %v9731_v27  ;;  %v2417_v9 = vsel %vm451_vm0, %v2415_v24, %v2416_v25  ;;  %v2432_v27 = vmul.f32 %v6439_v54, %v6688_v52  ;;  %v594_v62 = vadd.f32 %v5931_v31, %v6679_v12 }
 0x237   : >> { %v6788_v15 = vpop.permute.xlu1 %1944  ;;  %v887_v21 = vrot.slane %v881_v23, 1  ;;  %v900_v14 = vmul.f32 %v6506_v48, %v6807_v51  ;;  %v6833_v35 = vmul.f32 %v6500_v13, %v6807_v51  ;;  %v1142_v63 = vstv %s6764_s14  ;;  %s7156_s14 = sld [smem:[#allocation3 + $0xa3]] }
 0x238   : >> { %9988 = vst [vmem:[#allocation140_spill] sm:$0xff] %v6788_v15  ;;  %v6804_v1 = vpop.permute.xlu0 %1923  ;;  %v918_v15 = vstv %s6736_s12  ;;  %v2458_v25 = vrot.slane %v2452_v45, 1  ;;  %v2460_v52 = vrot.slane %v2453_v40, 1  ;;  %v9990_v31 = vrot.slane %v6770_v19, 1  ;;  %v9991_v45 = vld [vmem:[#allocation13_spill] sm:$0xff]  ;;  %s7141_s12 = sld [smem:[#allocation3 + $0x2a]] }
 0x239   : >> { %9989 = vst [vmem:[#allocation141_spill] sm:$0xff] %v6804_v1  ;;  %v919_v24 = vmul.f32 %v6506_v48, %v918_v15  ;;  %v6848_v23 = vmul.f32 %v6500_v13, %v918_v15  ;;  %v2457_v29 = vrot.slane %v2451_v50, 1  ;;  %v6859_v40 = vadd.f32 %v9991_v45, %v6674_v55  ;;  %v9996_v55 = vld [vmem:[#allocation16_spill] sm:$0xff] }
 0x23a   : >> { %v6844_v12 = vsel %vm451_vm0, %v868_v34, %v9990_v31  ;;  %v9992_v34 = vld [vmem:[#allocation14_spill] sm:$0xff]  ;;  %v2439_v13 = vrot.slane %v2432_v27, 1  ;;  %v906_v44 = vrot.slane %v900_v14, 1  ;;  %v6874_v45 = vadd.f32 %v9996_v55, %v6705_v7 }
 0x23b   : >> { %v633_v31 = vadd.f32 %v9992_v34, %v6682_v41  ;;  %v9997_v41 = vrot.slane %v6802_v8, 1  ;;  %v1144_v34 = vmul.f32 %v6781_v16, %v1142_v63  ;;  %v925_v50 = vrot.slane %v919_v24, 1 }
 0x23c   : >> { %2441 = vrot.lane.b32.xlu2 %v2438_v49, %s5576_s13  ;;  %v2459_v2 = vsel %vm451_vm0, %v2457_v29, %v2458_v25  ;;  %v10000_v55 = vstv %s6637_s18  ;;  %v1160_v28 = vstv %s6822_s15  ;;  %v6898_v24 = vmul.f32 %v6524_v20, %v6714_v61  ;;  %s7031_s18 = sld [smem:[#allocation3 + $0x57]] }
 0x23d   : >> { %2422 = vrot.lane.b32.xlu1 %v2419_v18, %s5576_s13  ;;  %v6855_v18 = vadd.f32 %v5941_v43, %v6671_v58  ;;  %v6868_v43 = vmul.f32 %v6739_v42, %v1142_v63  ;;  %v889_v27 = vsel %vm451_vm0, %v887_v21, %v9997_v41  ;;  %v1150_v1 = vmul.f32 %v6781_v16, %v10000_v55  ;;  %s7209_s15 = sld [smem:[#allocation3 + $0x1e]] }
 0x23e   : >> { %2420 = vrot.lane.b32.xlu0 %v2417_v9, %s5576_s13  ;;  %v6851_v49 = vpop.permute.xlu2 %2060  ;;  %v736_v9 = vadd.f32 %v9994_v60, %v572_v5  ;;  %v2461_v60 = vsel %vm451_vm0, %v2458_v25, %v2460_v52  ;;  %v9998_v5 = vld [vmem:[#allocation18_spill] sm:$0xff]  ;;  %v10001_v21 = vrot.slane %v6723_v57, 1  ;;  %v10002_v52 = vrot.slane %v6833_v35, 1  ;;  %v10004_v57 = vld [vmem:[#allocation19_spill] sm:$0xff] }
 0x23f   : >> { %v6863_v48 = vpop.permute.xlu1 %1969  ;;  %v758_v14 = vadd.f32 %v9998_v5, %v594_v62  ;;  %v2471_v61 = vstv %s6839_s16  ;;  %v10008_v5 = vld [vmem:[#allocation22_spill] sm:$0xff]  ;;  %s7220_s16 = sld [smem:[#allocation3 + $0x4e]] }
 0x240   : >> { %9993 = vst [vmem:[#allocation13_spill] sm:$0xff] %v6863_v48  ;;  %v6870_v58 = vpop.permute.xlu0 %1948  ;;  %v9732_v48 = vrot.slane %v6848_v23, 1  ;;  %v2440_v63 = vsel %vm451_vm0, %v10001_v21, %v2439_v13  ;;  %v908_v62 = vsel %vm451_vm0, %v906_v44, %v10002_v52  ;;  %v6901_v29 = vadd.f32 %v6744_v59, %v736_v9  ;;  %v10005_v13 = vld [vmem:[#allocation20_spill] sm:$0xff] }
 0x241   : >> { %9995 = vst [vmem:[#allocation14_spill] sm:$0xff] %v6870_v58  ;;  %v9999_v58 = vld [vmem:[#allocation17_spill] sm:$0xff]  ;;  %v673_v41 = vadd.f32 %v10005_v13, %v6755_v37  ;;  %v6915_v44 = vmul.f32 %v6524_v20, %v6762_v17  ;;  %v1161_v9 = vmul.f32 %v6739_v42, %v1160_v28  ;;  %v6930_v37 = vadd.f32 %v6786_v0, %v758_v14  ;;  %v10010_v0 = vld [vmem:[#allocation23_spill] sm:$0xff]  ;;  %v10011_v52 = vld [vmem:[#allocation24_spill] sm:$0xff] }
 0x242   : >> { %v653_v7 = vadd.f32 %v9999_v58, %v6708_v30  ;;  %v10003_v30 = vstv %s6666_s6  ;;  %v6909_v58 = vadd.f32 %v10004_v57, %v6752_v3  ;;  %v927_v59 = vsel %vm451_vm0, %v925_v50, %v9732_v48  ;;  %s7058_s6 = sld [smem:[#allocation3 + $0x4b]] }
 0x243   : >> { %v1155_v25 = vmul.f32 %v6739_v42, %v10003_v30  ;;  %v6926_v3 = vmul.f32 %v6524_v20, %v6807_v51  ;;  %v6938_v55 = vadd.f32 %v10008_v5, %v6792_v53  ;;  %v6941_v50 = vmul.f32 %v6524_v20, %v918_v15  ;;  %v10013_v20 = vld [vmem:[#allocation25_spill] sm:$0xff] }
 0x244   : >> { %2464 = vrot.lane.b32.xlu2 %v2461_v60, %s5576_s13  ;;  %v1162_v51 = vmul.f32 %v6781_v16, %v1160_v28  ;;  %v693_v14 = vadd.f32 %v10010_v0, %v6796_v11  ;;  %v871_v30 = vrot.slane %v6898_v24, 1  ;;  %v2474_v53 = vmul.f32 %v6439_v54, %v2471_v61  ;;  %v10014_v28 = vld [vmem:[#allocation26_spill] sm:$0xff]  ;;  %v10016_v24 = vld [vmem:[#allocation29_spill] sm:$0xff] }
 0x245   : >> { %2462 = vrot.lane.b32.xlu1 %v2459_v2, %s5576_s13  ;;  %v10007_v2 = vld [vmem:[#allocation21_spill] sm:$0xff]  ;;  %v716_v15 = vadd.f32 %v10013_v20, %v6664_v39  ;;  %v715_v57 = vadd.f32 %v10014_v28, %v6702_v47  ;;  %v890_v13 = vrot.slane %v6915_v44, 1  ;;  %v2473_v11 = vmul.f32 %v6370_v22, %v2471_v61  ;;  %v10017_v39 = vld [vmem:[#allocation28_spill] sm:$0xff]  ;;  %v10018_v47 = vld [vmem:[#allocation30_spill] sm:$0xff] }
 0x246   : >> { %2443 = vrot.lane.b32.xlu0 %v2440_v63, %s5576_s13  ;;  %v6933_v17 = vpop.permute.xlu2 %2086  ;;  %v797_v60 = vadd.f32 %v10007_v2, %v633_v31  ;;  %v817_v63 = vadd.f32 %v10011_v52, %v653_v7  ;;  %v10015_v2 = vld [vmem:[#allocation27_spill] sm:$0xff]  ;;  %v737_v5 = vadd.f32 %v10016_v24, %v6749_v26  ;;  %v909_v0 = vrot.slane %v6926_v3, 1  ;;  %v10020_v3 = vld [vmem:[#allocation32_spill] sm:$0xff] }
 0x247   : >> { %10006 = vst [vmem:[#allocation15_spill] sm:$0xff] %v6933_v17  ;;  %v6944_v21 = vpop.permute.xlu1 %2016  ;;  %v837_v7 = vadd.f32 %v10015_v2, %v673_v41  ;;  %v2472_v52 = vmul.f32 %v6376_v32, %v2471_v61  ;;  %v757_v20 = vadd.f32 %v10017_v39, %v6696_v56  ;;  %v857_v28 = vadd.f32 %v10018_v47, %v693_v14  ;;  %v10019_v26 = vld [vmem:[#allocation31_spill] sm:$0xff] }
 0x248   : >> { %10009 = vst [vmem:[#allocation16_spill] sm:$0xff] %v6944_v21  ;;  %v6952_v31 = vpop.permute.xlu0 %1973  ;;  %v876_v44 = vadd.f32 %v6844_v12, %v797_v60  ;;  %v928_v48 = vrot.slane %v6941_v50, 1  ;;  %v779_v41 = vadd.f32 %v10019_v26, %v6734_v4  ;;  %v778_v2 = vadd.f32 %v10020_v3, %v6819_v10  ;;  %v7091_v50 = vld [vmem:[%s5698_s8 + $0x100] sm:$0x3] }
 0x249   : >> { %10012 = vst [vmem:[#allocation18_spill] sm:$0xff] %v6952_v31  ;;  %v895_v24 = vadd.f32 %v889_v27, %v817_v63  ;;  %v10021_v61 = vrot.slane %v6770_v19, 1  ;;  %v10022_v56 = vrot.slane %v6802_v8, 1  ;;  %v6989_v60 = vadd.f32 %v6868_v43, %v715_v57  ;;  %v10023_v19 = vld [vmem:[#allocation34_spill] sm:$0xff] }
 0x24a   : >> { %v6991_v4 = vadd.f32 %v1144_v34, %v716_v15  ;;  %v2491_v10 = vstv %s6919_s17  ;;  %v799_v27 = vadd.f32 %v10023_v19, %v6693_v6  ;;  %v914_v14 = vadd.f32 %v908_v62, %v837_v7  ;;  %v10025_v34 = vld [vmem:[#allocation35_spill] sm:$0xff]  ;;  %s7229_s17 = sld [smem:[#allocation3 + $0xaf]] }
 0x24b   : >> { %v872_v31 = vsel %vm451_vm0, %v10021_v61, %v871_v30  ;;  %v891_v12 = vsel %vm451_vm0, %v10022_v56, %v890_v13  ;;  %v10024_v63 = vrot.slane %v6833_v35, 1  ;;  %v798_v15 = vadd.f32 %v10025_v34, %v6859_v40 }
 0x24c   : >> { %2482 = vrot.lane.b32.xlu2 %v2474_v53, %s5576_s13  ;;  %v7002_v53 = vadd.f32 %v1150_v1, %v737_v5  ;;  %v933_v57 = vadd.f32 %v927_v59, %v857_v28  ;;  %v7014_v35 = vadd.f32 %v1155_v25, %v757_v20  ;;  %v7018_v1 = vadd.f32 %v1161_v9, %v778_v2  ;;  %v10029_v59 = vld [vmem:[#allocation33_spill] sm:$0xff]  ;;  %v10031_v25 = vld [vmem:[#allocation38_spill] sm:$0xff] }
 0x24d   : >> { %2480 = vrot.lane.b32.xlu1 %v2473_v11, %s5576_s13  ;;  %v910_v8 = vsel %vm451_vm0, %v10024_v63, %v909_v0  ;;  %v10026_v11 = vrot.slane %v6848_v23, 1  ;;  %v7020_v7 = vadd.f32 %v1162_v51, %v779_v41  ;;  %v1346_v5 = vstv %s6950_s21  ;;  %v10030_v23 = vld [vmem:[#allocation37_spill] sm:$0xff]  ;;  %v10032_v51 = vld [vmem:[#allocation40_spill] sm:$0xff]  ;;  %v10035_v63 = vld [vmem:[#allocation43_spill] sm:$0xff]  ;;  %s7287_s21 = sld [smem:[#allocation3 + $0xbb]] }
 0x24e   : >> { %2478 = vrot.lane.b32.xlu0 %v2472_v52, %s5576_s13  ;;  %v7005_v43 = vpop.permute.xlu2 %2102  ;;  %v2494_v40 = vmul.f32 %v6439_v54, %v2491_v10  ;;  %v958_v39 = vadd.f32 %v10029_v59, %v876_v44  ;;  %v819_v47 = vadd.f32 %v10030_v23, %v6731_v33  ;;  %v818_v20 = vadd.f32 %v10031_v25, %v6874_v45  ;;  %v10033_v44 = vld [vmem:[#allocation41_spill] sm:$0xff]  ;;  %v10034_v45 = vld [vmem:[#allocation36_spill] sm:$0xff] }
 0x24f   : >> { %v929_v6 = vsel %vm451_vm0, %v10026_v11, %v928_v48  ;;  %v7016_v62 = vpop.permute.xlu1 %2032  ;;  %v2493_v9 = vmul.f32 %v6370_v22, %v2491_v10  ;;  %v839_v28 = vadd.f32 %v10032_v51, %v6778_v38  ;;  %v878_v26 = vadd.f32 %v871_v30, %v799_v27  ;;  %v10036_v11 = vld [vmem:[#allocation44_spill] sm:$0xff]  ;;  %v10038_v59 = vld [vmem:[#allocation45_spill] sm:$0xff] }
 0x250   : >> { %10027 = vst [vmem:[#allocation17_spill] sm:$0xff] %v7016_v62  ;;  %v7023_v52 = vpop.permute.xlu0 %2030  ;;  %v1354_v41 = vstv %s6965_s22  ;;  %v2492_v3 = vmul.f32 %v6376_v32, %v2491_v10  ;;  %v838_v2 = vadd.f32 %v10033_v44, %v6909_v58  ;;  %v877_v61 = vadd.f32 %v872_v31, %v798_v15  ;;  %v10043_v44 = vld [vmem:[#allocation47_spill] sm:$0xff]  ;;  %s7314_s22 = sld [smem:[#allocation3 + $0x3f]] }
 0x251   : >> { %10028 = vst [vmem:[#allocation19_spill] sm:$0xff] %v7023_v52  ;;  %v1347_v33 = vmul.f32 %v6739_v42, %v1346_v5  ;;  %v1362_v56 = vstv %s6973_s23  ;;  %v983_v19 = vadd.f32 %v10034_v45, %v895_v24  ;;  %v859_v34 = vadd.f32 %v10035_v63, %v6855_v18  ;;  %v10037_v24 = vld [vmem:[#allocation39_spill] sm:$0xff]  ;;  %s7326_s23 = sld [smem:[#allocation3 + $0x6]] }
 0x252   : >> { %v858_v38 = vadd.f32 %v10036_v11, %v6938_v55  ;;  %v7048_v30 = vstv %s6982_s26  ;;  %v897_v10 = vadd.f32 %v890_v13, %v819_v47  ;;  %v896_v27 = vadd.f32 %v891_v12, %v818_v20  ;;  %v10040_v12 = vld [vmem:[#allocation42_spill] sm:$0xff]  ;;  %v10041_v47 = vld [vmem:[#allocation48_spill] sm:$0xff]  ;;  %v10063_v62 = vld [vmem:[#allocation59_spill] sm:$0xff]  ;;  %s7336_s26 = sld [smem:[#allocation3 + $0x36]] }
 0x253   : >> { %v1355_v58 = vmul.f32 %v6739_v42, %v1354_v41  ;;  %v2511_v31 = vstv %s6995_s28  ;;  %v1008_v15 = vadd.f32 %v10037_v24, %v914_v14  ;;  %v1058_v18 = vadd.f32 %v10038_v59, %v958_v39  ;;  %s7350_s28 = sld [smem:[#allocation3 + $0x98]] }
 0x254   : >> { %2502 = vrot.lane.b32.xlu2 %v2494_v40, %s5576_s13  ;;  %v916_v23 = vadd.f32 %v909_v0, %v839_v28  ;;  %v1363_v55 = vmul.f32 %v6739_v42, %v1362_v56  ;;  %v1033_v40 = vadd.f32 %v10040_v12, %v933_v57  ;;  %v1083_v25 = vadd.f32 %v10041_v47, %v983_v19  ;;  %v10042_v0 = vld [vmem:[#allocation46_spill] sm:$0xff] }
 0x255   : >> { %2500 = vrot.lane.b32.xlu1 %v2493_v9, %s5576_s13  ;;  %v915_v20 = vadd.f32 %v910_v8, %v838_v2  ;;  %v1371_v14 = vmul.f32 %v6739_v42, %v7048_v30  ;;  %v960_v9 = vadd.f32 %v10042_v0, %v878_v26  ;;  %v935_v51 = vadd.f32 %v928_v48, %v859_v34  ;;  %v10044_v2 = vld [vmem:[#allocation51_spill] sm:$0xff] }
 0x256   : >> { %2498 = vrot.lane.b32.xlu0 %v2492_v3, %s5576_s13  ;;  %v7062_v13 = vpop.permute.xlu2 %2235  ;;  %v934_v28 = vadd.f32 %v929_v6, %v858_v38  ;;  %v2514_v57 = vmul.f32 %v6439_v54, %v2511_v31  ;;  %v959_v8 = vadd.f32 %v10043_v44, %v877_v61  ;;  %v1108_v45 = vadd.f32 %v10044_v2, %v1008_v15  ;;  %v10046_v61 = vld [vmem:[#allocation49_spill] sm:$0xff]  ;;  %v10047_v38 = vld [vmem:[#allocation50_spill] sm:$0xff] }
 0x257   : >> { %10039 = vst [vmem:[#allocation20_spill] sm:$0xff] %v7062_v13  ;;  %v7068_v39 = vpop.permute.xlu1 %2058  ;;  %v7083_v19 = vstv %s7031_s18  ;;  %v2513_v63 = vmul.f32 %v6370_v22, %v2511_v31  ;;  %v7086_v11 = vadd.f32 %v1347_v33, %v1058_v18  ;;  %v7094_v6 = vmul.f32 %v7091_v50, %v1346_v5  ;;  %v10049_v15 = vld [vmem:[#allocation54_spill] sm:$0xff]  ;;  %s7407_s18 = sld [smem:[#allocation3 + $0xa4]] }
 0x258   : >> { %v7075_v3 = vpop.permute.xlu0 %2046  ;;  %v1330_v48 = vmul.f32 %v6739_v42, %v7083_v19  ;;  %v2512_v26 = vmul.f32 %v6376_v32, %v2511_v31  ;;  %v7098_v34 = vadd.f32 %v10046_v61, %v897_v10  ;;  %v7101_v24 = vadd.f32 %v10047_v38, %v896_v27  ;;  %v10050_v27 = vld [vmem:[#allocation52_spill] sm:$0xff]  ;;  %v10051_v31 = vld [vmem:[#allocation53_spill] sm:$0xff]  ;;  %v10059_v38 = vld [vmem:[#allocation82_spill] sm:$0xff] }
 0x259   : >> { %10045 = vst [vmem:[#allocation21_spill] sm:$0xff] %v7086_v11  ;;  %v7103_v22 = vadd.f32 %v1355_v58, %v1083_v25  ;;  %v7106_v33 = vmul.f32 %v6781_v16, %v1346_v5  ;;  %v1133_v59 = vadd.f32 %v10049_v15, %v1033_v40  ;;  %v7111_v18 = vmul.f32 %v6781_v16, %v7083_v19 }
 0x25a   : >> { %v7114_v32 = vmul.f32 %v7091_v50, %v1354_v41  ;;  %v7117_v10 = vmul.f32 %v6781_v16, %v1354_v41  ;;  %v7121_v58 = vadd.f32 %v10050_v27, %v916_v23  ;;  %v7124_v5 = vadd.f32 %v10051_v31, %v915_v20  ;;  %v10054_v20 = vld [vmem:[#allocation55_spill] sm:$0xff] }
 0x25b   : >> { %10048 = vst [vmem:[#allocation22_spill] sm:$0xff] %v7103_v22  ;;  %v7126_v12 = vadd.f32 %v1363_v55, %v1108_v45  ;;  %v2531_v40 = vstv %s7054_s25  ;;  %v7133_v47 = vstv %s7058_s6  ;;  %v1336_v41 = vrot.slane %v1330_v48, 1  ;;  %s7450_s25 = sld [smem:[#allocation3 + $0xb0]] }
 0x25c   : >> { %2522 = vrot.lane.b32.xlu2 %v2514_v57, %s5576_s13  ;;  %v7136_v25 = vmul.f32 %v7091_v50, %v1362_v56  ;;  %v7139_v23 = vmul.f32 %v6781_v16, %v1362_v56  ;;  %v7147_v0 = vadd.f32 %v10054_v20, %v935_v51  ;;  %v10055_v57 = vld [vmem:[#allocation63_spill] sm:$0xff]  ;;  %v1315_v2 = vmul.f32 %v7091_v50, %v7133_v47  ;;  %v7176_v20 = vld [vmem:[%s5698_s8 + $0x1e8] sm:$0xff]  ;;  %s7455_s6 = sld [smem:[#allocation3 + $0x93]] }
 0x25d   : >> { %10052 = vst [vmem:[#allocation23_spill] sm:$0xff] %v7126_v12  ;;  %2520 = vrot.lane.b32.xlu1 %v2513_v63, %s5576_s13  ;;  %v1219_v44 = vadd.f32 %v10055_v57, %v7018_v1  ;;  %v2627_v45 = vstv %s7070_s7  ;;  %v10056_v63 = vld [vmem:[#allocation56_spill] sm:$0xff]  ;;  %v9733_v51 = vrot.slane %v7111_v18, 1  ;;  %v2534_v1 = vmul.f32 %v6439_v54, %v2531_v40  ;;  %s7465_s7 = sld [smem:[#allocation3 + $0x9f]] }
 0x25e   : >> { %2518 = vrot.lane.b32.xlu0 %v2512_v26, %s5576_s13  ;;  %v7144_v55 = vpop.permute.xlu2 %2258  ;;  %v7159_v48 = vadd.f32 %v10056_v63, %v934_v28  ;;  %v7161_v26 = vadd.f32 %v1371_v14, %v1133_v59  ;;  %v7170_v27 = vmul.f32 %v6781_v16, %v7133_v47  ;;  %v7173_v31 = vstv %s7080_s10  ;;  %v7183_v59 = vld [vmem:[%s5698_s8 + $0x1e0] sm:$0xff]  ;;  %s7471_s10 = sld [smem:[#allocation3 + $0x12]] }
 0x25f   : >> { %10053 = vst [vmem:[#allocation24_spill] sm:$0xff] %v7144_v55  ;;  %v7153_v56 = vpop.permute.xlu1 %2074  ;;  %v1275_v15 = vadd.f32 %v10059_v38, %v1219_v44  ;;  %v2533_v28 = vmul.f32 %v7176_v20, %v2531_v40  ;;  %v1338_v14 = vsel %vm451_vm0, %v1336_v41, %v9733_v51  ;;  %v2532_v57 = vmul.f32 %v7183_v59, %v2531_v40  ;;  %v10061_v51 = vld [vmem:[#allocation58_spill] sm:$0xff]  ;;  %v10062_v40 = vld [vmem:[#allocation73_spill] sm:$0xff] }
 0x260   : >> { %10057 = vst [vmem:[#allocation25_spill] sm:$0xff] %v7161_v26  ;;  %v7164_v61 = vpop.permute.xlu0 %2072  ;;  %v2630_v44 = vmul.f32 %v6439_v54, %v2627_v45  ;;  %v2629_v63 = vmul.f32 %v7176_v20, %v2627_v45  ;;  %v1322_v38 = vrot.slane %v1315_v2, 1  ;;  %v7190_v26 = vmul.f32 %v7091_v50, %v7048_v30 }
 0x261   : >> { %10058 = vst [vmem:[#allocation26_spill] sm:$0xff] %v7164_v61  ;;  %v7194_v55 = vmul.f32 %v6781_v16, %v7048_v30  ;;  %v2628_v41 = vmul.f32 %v7183_v59, %v2627_v45  ;;  %v1060_v17 = vadd.f32 %v10061_v51, %v960_v9  ;;  %v1206_v13 = vadd.f32 %v10062_v40, %v6930_v37  ;;  %v10064_v9 = vld [vmem:[#allocation83_spill] sm:$0xff] }
 0x262   : >> { %v7202_v52 = vmul.f32 %v6781_v16, %v7173_v31  ;;  %v1281_v2 = vmul.f32 %v7091_v50, %v7173_v31  ;;  %v1059_v61 = vadd.f32 %v10063_v62, %v959_v8  ;;  %v9734_v30 = vrot.slane %v7170_v27, 1  ;;  %v10065_v8 = vld [vmem:[#allocation92_spill] sm:$0xff] }
 0x263   : >> { %10060 = vst [vmem:[#allocation27_spill] sm:$0xff] %v7194_v55  ;;  %v1343_v45 = vadd.f32 %v1338_v14, %v1275_v15  ;;  %v7213_v37 = vstv %s7130_s11  ;;  %v1262_v51 = vadd.f32 %v10064_v9, %v1206_v13  ;;  %v2635_v12 = vrot.slane %v2629_v63, 1  ;;  %s7503_s11 = sld [smem:[#allocation3 + $0xbc]] }
 0x264   : >> { %2542 = vrot.lane.b32.xlu2 %v2534_v1, %s5576_s13  ;;  %v2637_v1 = vrot.slane %v2630_v44, 1  ;;  %v1323_v62 = vsel %vm451_vm0, %v9734_v30, %v1322_v38  ;;  %v2634_v14 = vrot.slane %v2628_v41, 1  ;;  %v2652_v13 = vstv %s7156_s14  ;;  %v10068_v38 = vld [vmem:[#allocation57_spill] sm:$0xff]  ;;  %s7551_s14 = sld [smem:[#allocation3 + $0x66]] }
 0x265   : >> { %2540 = vrot.lane.b32.xlu1 %v2533_v28, %s5576_s13  ;;  %v1459_v15 = vadd.f32 %v10065_v8, %v1343_v45  ;;  %v1288_v9 = vrot.slane %v1281_v2, 1  ;;  %v2175_v63 = vmul.f32 %v7183_v59, %v7213_v37  ;;  %v7238_v40 = vmul.f32 %v7176_v20, %v7213_v37  ;;  %v10069_v8 = vld [vmem:[#allocation99_spill] sm:$0xff] }
 0x266   : >> { %2538 = vrot.lane.b32.xlu0 %v2532_v57, %s5576_s13  ;;  %v7218_v21 = vpop.permute.xlu2 %2298  ;;  %v7242_v45 = vadd.f32 %v10068_v38, %v6989_v60  ;;  %v1332_v41 = vmul.f32 %v7091_v50, %v7083_v19  ;;  %v10070_v57 = vstv %s7141_s12  ;;  %v2638_v22 = vsel %vm451_vm0, %v2635_v12, %v2637_v1 }
 0x267   : >> { %v7226_v28 = vpop.permute.xlu1 %2100  ;;  %v1623_v30 = vadd.f32 %v10069_v8, %v1459_v15  ;;  %v2006_v2 = vmul.f32 %v7183_v59, %v10070_v57  ;;  %v2655_v11 = vmul.f32 %v6439_v54, %v2652_v13  ;;  %v7254_v55 = vadd.f32 %v7094_v6, %v1060_v17  ;;  %v10071_v57 = vld [vmem:[#allocation61_spill] sm:$0xff] }
 0x268   : >> { %10066 = vst [vmem:[#allocation29_spill] sm:$0xff] %v7226_v28  ;;  %v7232_v44 = vpop.permute.xlu0 %2088  ;;  %v2654_v28 = vmul.f32 %v7176_v20, %v2652_v13  ;;  %v7257_v60 = vadd.f32 %v7106_v33, %v1059_v61  ;;  %v2636_v19 = vsel %vm451_vm0, %v2634_v14, %v2635_v12  ;;  %v2653_v15 = vmul.f32 %v7183_v59, %v2652_v13  ;;  %v10073_v6 = vld [vmem:[#allocation77_spill] sm:$0xff]  ;;  %v10074_v13 = vld [vmem:[#allocation78_spill] sm:$0xff] }
 0x269   : >> { %10067 = vst [vmem:[#allocation28_spill] sm:$0xff] %v7232_v44  ;;  %v1327_v44 = vadd.f32 %v1323_v62, %v1262_v51  ;;  %v1085_v38 = vadd.f32 %v10071_v57, %v7098_v34  ;;  %v10072_v51 = vrot.slane %v7202_v52, 1  ;;  %v2181_v54 = vrot.slane %v2175_v63, 1 }
 0x26a   : >> { %v2182_v17 = vrot.slane %v7238_v40, 1  ;;  %v1220_v33 = vadd.f32 %v10073_v6, %v7020_v7  ;;  %v1339_v12 = vrot.slane %v1332_v41, 1  ;;  %v9735_v61 = vstv %s7209_s15  ;;  %v10079_v6 = vld [vmem:[#allocation72_spill] sm:$0xff] }
 0x26b   : >> { %v7266_v62 = vsel %vm451_vm0, %v10072_v51, %v1288_v9  ;;  %v2008_v14 = vadd.f32 %v2006_v2, %v1623_v30  ;;  %v1313_v34 = vmul.f32 %v6739_v42, %v7133_v47  ;;  %v1439_v9 = vadd.f32 %v10074_v13, %v1327_v44  ;;  %v10077_v44 = vld [vmem:[#allocation109_spill] sm:$0xff] }
 0x26c   : >> { %2643 = vrot.lane.b32.xlu2 %v2637_v1, %s5575_s9  ;;  %v2662_v63 = vrot.slane %v2655_v11, 1  ;;  %v2660_v8 = vrot.slane %v2654_v28, 1  ;;  %v2659_v30 = vrot.slane %v2653_v15, 1  ;;  %v2677_v41 = vstv %s7229_s17  ;;  %v10078_v15 = vld [vmem:[#allocation71_spill] sm:$0xff]  ;;  %s7612_s17 = sld [smem:[#allocation3 + $0x16]] }
 0x26d   : >> { %2641 = vrot.lane.b32.xlu1 %v2638_v22, %s5575_s9  ;;  %v2064_v57 = vadd.f32 %v7068_v39, %v2008_v14  ;;  %v7285_v2 = vstv %s7220_s16  ;;  %v10076_v22 = vld [vmem:[#allocation62_spill] sm:$0xff]  ;;  %v2001_v11 = vmul.f32 %v7176_v20, %v9735_v61  ;;  %v2183_v39 = vsel %vm451_vm0, %v2181_v54, %v2182_v17  ;;  %s7603_s16 = sld [smem:[#allocation3 + $0x72]] }
 0x26e   : >> { %2639 = vrot.lane.b32.xlu0 %v2636_v19, %s5575_s9  ;;  %v7278_v1 = vpop.permute.xlu2 %2316  ;;  %v1084_v47 = vadd.f32 %v10076_v22, %v7101_v24  ;;  %v1603_v19 = vadd.f32 %v10077_v44, %v1439_v9  ;;  %v1178_v51 = vadd.f32 %v10078_v15, %v6991_v4  ;;  %v1276_v14 = vadd.f32 %v10079_v6, %v1220_v33  ;;  %v7306_v22 = vld [vmem:[%s5698_s8 + $0x1f0] sm:$0x3] }
 0x26f   : >> { %10075 = vst [vmem:[#allocation30_spill] sm:$0xff] %v7278_v1  ;;  %v7281_v7 = vpop.permute.xlu1 %2116  ;;  %v10080_v13 = vrot.slane %v7111_v18, 1  ;;  %v2663_v9 = vsel %vm451_vm0, %v2660_v8, %v2662_v63  ;;  %v2680_v44 = vmul.f32 %v7306_v22, %v2677_v41  ;;  %v2679_v61 = vmul.f32 %v7176_v20, %v2677_v41 }
 0x270   : >> { %v2115_v28 = vpop.permute.xlu0 %2114  ;;  %v7312_v54 = vmul.f32 %v7176_v20, %v7285_v2  ;;  %v2661_v18 = vsel %vm451_vm0, %v2659_v30, %v2660_v8  ;;  %v2678_v33 = vmul.f32 %v7183_v59, %v2677_v41  ;;  %v1279_v15 = vmul.f32 %v6739_v42, %v7173_v31 }
 0x271   : >> { %v1340_v1 = vsel %vm451_vm0, %v10080_v13, %v1339_v12  ;;  %v2120_v24 = vadd.f32 %v2115_v28, %v2064_v57  ;;  %v2160_v12 = vmul.f32 %v7306_v22, %v7285_v2  ;;  %v10081_v57 = vld [vmem:[#allocation60_spill] sm:$0xff]  ;;  %v1319_v6 = vrot.slane %v1313_v34, 1 }
 0x272   : >> { %v7322_v28 = vadd.f32 %v10081_v57, %v7002_v53  ;;  %v2003_v13 = vadd.f32 %v2001_v11, %v1603_v19  ;;  %v7331_v30 = vadd.f32 %v7114_v32, %v1085_v38  ;;  %v7334_v41 = vadd.f32 %v7117_v10, %v1084_v47 }
 0x273   : >> { %v2188_v4 = vadd.f32 %v2183_v39, %v2120_v24  ;;  %v10082_v39 = vld [vmem:[#allocation66_spill] sm:$0xff]  ;;  %v1344_v31 = vadd.f32 %v1340_v1, %v1276_v14  ;;  %v2687_v19 = vrot.slane %v2680_v44, 1  ;;  %v2685_v32 = vrot.slane %v2679_v61, 1 }
 0x274   : >> { %2668 = vrot.lane.b32.xlu2 %v2662_v63, %s5575_s9  ;;  %v1234_v8 = vadd.f32 %v10082_v39, %v1178_v51  ;;  %v2051_v34 = vadd.f32 %v7075_v3, %v2003_v13  ;;  %v2684_v10 = vrot.slane %v2678_v33, 1  ;;  %v2165_v47 = vrot.slane %v7312_v54, 1  ;;  %v10084_v3 = vld [vmem:[#allocation65_spill] sm:$0xff] }
 0x275   : >> { %2666 = vrot.lane.b32.xlu1 %v2663_v9, %s5575_s9  ;;  %v7340_v53 = vadd.f32 %v7218_v21, %v2188_v4  ;;  %v2167_v11 = vrot.slane %v2160_v12, 1  ;;  %v2702_v51 = vstv %s7287_s21  ;;  %v10083_v21 = vld [vmem:[#allocation64_spill] sm:$0xff]  ;;  %v7356_v14 = vadd.f32 %v10084_v3, %v7124_v5  ;;  %v10086_v4 = vld [vmem:[#allocation74_spill] sm:$0xff]  ;;  %v10087_v12 = vld [vmem:[#allocation91_spill] sm:$0xff]  ;;  %s7617_s21 = sld [smem:[#allocation3 + $0xa]] }
 0x276   : >> { %2664 = vrot.lane.b32.xlu0 %v2661_v18, %s5575_s9  ;;  %v7344_v63 = vpop.permute.xlu2 %2336  ;;  %v1110_v1 = vadd.f32 %v10083_v21, %v7121_v58  ;;  %v1285_v24 = vrot.slane %v1279_v15, 1  ;;  %v10085_v61 = vrot.slane %v7170_v27, 1  ;;  %v1205_v18 = vadd.f32 %v10086_v4, %v7014_v35  ;;  %v10089_v39 = vld [vmem:[#allocation113_spill] sm:$0xff] }
 0x277   : >> { %v7346_v38 = vpop.permute.xlu1 %2256  ;;  %v1293_v33 = vadd.f32 %v7266_v62, %v1234_v8  ;;  %v1460_v57 = vadd.f32 %v10087_v12, %v1344_v31  ;;  %v10088_v58 = vstv %s7141_s12  ;;  %v2107_v5 = vadd.f32 %v7005_v43, %v2051_v34  ;;  %s7525_s12 = sld [smem:[#allocation3 + $0xab]] }
 0x278   : >> { %v1321_v9 = vsel %vm451_vm0, %v1319_v6, %v10085_v61  ;;  %v7361_v44 = vpop.permute.xlu0 %2237  ;;  %v2007_v13 = vmul.f32 %v7176_v20, %v10088_v58  ;;  %v2688_v27 = vsel %vm451_vm0, %v2685_v32, %v2687_v19  ;;  %v2705_v15 = vmul.f32 %v7306_v22, %v2702_v51 }
 0x279   : >> { %v2704_v6 = vmul.f32 %v7176_v20, %v2702_v51  ;;  %v1624_v35 = vadd.f32 %v10089_v39, %v1460_v57  ;;  %v2686_v62 = vsel %vm451_vm0, %v2684_v10, %v2685_v32  ;;  %v2168_v8 = vsel %vm451_vm0, %v2165_v47, %v2167_v11  ;;  %v10091_v10 = vld [vmem:[#allocation69_spill] sm:$0xff] }
 0x27a   : >> { %v2703_v31 = vmul.f32 %v7183_v59, %v2702_v51  ;;  %v1295_v21 = vstv %s7314_s22  ;;  %v10090_v43 = vrot.slane %v7202_v52, 1  ;;  %v7387_v3 = vadd.f32 %v7136_v25, %v1110_v1  ;;  %v10092_v11 = vld [vmem:[#allocation85_spill] sm:$0xff]  ;;  %s7644_s22 = sld [smem:[#allocation3 + $0xb7]] }
 0x27b   : >> { %v2177_v32 = vmul.f32 %v7306_v22, %v7213_v37  ;;  %v1261_v61 = vadd.f32 %v10091_v10, %v1205_v18  ;;  %v1397_v4 = vadd.f32 %v10092_v11, %v1293_v33  ;;  %v9736_v51 = vstv %s7326_s23 }
 0x27c   : >> { %v7384_v34 = vsel %vm451_vm0, %v1285_v24, %v10090_v43  ;;  %2693 = vrot.lane.b32.xlu2 %v2687_v19, %s5575_s9  ;;  %v7396_v12 = vstv %s7336_s26  ;;  %v1989_v52 = vmul.f32 %v7176_v20, %v9736_v51  ;;  %v2172_v19 = vadd.f32 %v2168_v8, %v2107_v5  ;;  %v10093_v24 = vld [vmem:[#allocation107_spill] sm:$0xff]  ;;  %s7673_s26 = sld [smem:[#allocation3 + $0x7e]] }
 0x27d   : >> { %2691 = vrot.lane.b32.xlu1 %v2688_v27, %s5575_s9  ;;  %v2712_v1 = vrot.slane %v2705_v15, 1  ;;  %v2710_v37 = vrot.slane %v2704_v6, 1  ;;  %v1561_v57 = vadd.f32 %v10093_v24, %v1397_v4  ;;  %v2009_v18 = vadd.f32 %v2007_v13, %v1624_v35 }
 0x27e   : >> { %2689 = vrot.lane.b32.xlu0 %v2686_v62, %s5575_s9  ;;  %v7403_v25 = vpop.permute.xlu2 %2356  ;;  %v2709_v33 = vrot.slane %v2703_v31, 1  ;;  %v2727_v39 = vstv %s7350_s28  ;;  %v7411_v27 = vmul.f32 %v7176_v20, %v7396_v12  ;;  %v2126_v62 = vmul.f32 %v7306_v22, %v7396_v12  ;;  %s7725_s28 = sld [smem:[#allocation3 + $0x8a]] }
 0x27f   : >> { %v2280_v58 = vpop.permute.xlu1 %2279  ;;  %v2184_v15 = vrot.slane %v2177_v32, 1  ;;  %v1296_v6 = vmul.f32 %v6739_v42, %v1295_v21  ;;  %v1297_v13 = vmul.f32 %v6781_v16, %v1295_v21  ;;  %v1298_v35 = vmul.f32 %v7091_v50, %v1295_v21 }
 0x280   : >> { %v7415_v43 = vadd.f32 %v2280_v58, %v2172_v19  ;;  %v7417_v5 = vpop.permute.xlu0 %2277  ;;  %v2065_v8 = vadd.f32 %v6851_v49, %v2009_v18  ;;  %v1326_v31 = vadd.f32 %v1321_v9, %v1261_v61  ;;  %v2713_v10 = vsel %vm451_vm0, %v2710_v37, %v2712_v1  ;;  %v10094_v58 = vld [vmem:[#allocation88_spill] sm:$0xff]  ;;  %v10095_v61 = vld [vmem:[#allocation70_spill] sm:$0xff] }
 0x281   : >> { %v2730_v11 = vmul.f32 %v7306_v22, %v2727_v39  ;;  %v2729_v4 = vmul.f32 %v7176_v20, %v2727_v39  ;;  %v1991_v19 = vadd.f32 %v1989_v52, %v1561_v57  ;;  %v2711_v32 = vsel %vm451_vm0, %v2709_v33, %v2710_v37  ;;  %v10096_v18 = vld [vmem:[#allocation110_spill] sm:$0xff] }
 0x282   : >> { %v2121_v24 = vadd.f32 %v7281_v7, %v2065_v8  ;;  %v2728_v42 = vmul.f32 %v7183_v59, %v2727_v39  ;;  %v1438_v51 = vadd.f32 %v10094_v58, %v1326_v31  ;;  %v9737_v21 = vrot.slane %v7411_v27, 1  ;;  %v10100_v31 = vld [vmem:[#allocation80_spill] sm:$0xff] }
 0x283   : >> { %v2133_v49 = vrot.slane %v2126_v62, 1  ;;  %v2185_v9 = vsel %vm451_vm0, %v2182_v17, %v2184_v15  ;;  %v1191_v52 = vadd.f32 %v10095_v61, %v6901_v29  ;;  %v1302_v7 = vrot.slane %v1296_v6, 1  ;;  %v10102_v58 = vld [vmem:[#allocation76_spill] sm:$0xff] }
 0x284   : >> { %2718 = vrot.lane.b32.xlu2 %v2712_v1, %s5575_s9  ;;  %v1303_v57 = vrot.slane %v1297_v13, 1  ;;  %v2023_v37 = vadd.f32 %v6685_v36, %v1991_v19  ;;  %v1602_v33 = vadd.f32 %v10096_v18, %v1438_v51  ;;  %v10097_v39 = vstv %s7209_s15  ;;  %v10099_v51 = vld [vmem:[#allocation67_spill] sm:$0xff]  ;;  %v10101_v19 = vld [vmem:[#allocation68_spill] sm:$0xff]  ;;  %s7562_s15 = sld [smem:[#allocation3 + $0x42]] }
 0x285   : >> { %2716 = vrot.lane.b32.xlu1 %v2713_v10, %s5575_s9  ;;  %v2000_v62 = vmul.f32 %v7183_v59, %v10097_v39  ;;  %v2737_v17 = vrot.slane %v2730_v11, 1  ;;  %v2735_v1 = vrot.slane %v2729_v4, 1  ;;  %v2189_v6 = vadd.f32 %v2185_v9, %v2121_v24 }
 0x286   : >> { %2714 = vrot.lane.b32.xlu0 %v2711_v32, %s5575_s9  ;;  %v7444_v40 = vpop.permute.xlu2 %2376  ;;  %v2079_v15 = vadd.f32 %v7153_v56, %v2023_v37  ;;  %v2734_v13 = vrot.slane %v2728_v42, 1  ;;  %v2752_v36 = vstv %s7407_s18  ;;  %v1135_v8 = vadd.f32 %v10099_v51, %v7147_v0  ;;  %v10103_v37 = vld [vmem:[#allocation79_spill] sm:$0xff]  ;;  %s7732_s18 = sld [smem:[#allocation3 + $0xb]] }
 0x287   : >> { %10098 = vst [vmem:[#allocation31_spill] sm:$0xff] %v7444_v40  ;;  %v7447_v29 = vpop.permute.xlu1 %2314  ;;  %v1247_v10 = vadd.f32 %v10100_v31, %v1191_v52  ;;  %v2134_v11 = vsel %vm451_vm0, %v9737_v21, %v2133_v49  ;;  %v2158_v56 = vmul.f32 %v7183_v59, %v7285_v2  ;;  %v1134_v24 = vadd.f32 %v10101_v19, %v7159_v48  ;;  %v10108_v31 = vld [vmem:[#allocation81_spill] sm:$0xff] }
 0x288   : >> { %v2301_v4 = vpop.permute.xlu0 %2300  ;;  %v1304_v32 = vsel %vm451_vm0, %v1302_v7, %v1303_v57  ;;  %v1305_v42 = vrot.slane %v1298_v35, 1  ;;  %v1233_v9 = vadd.f32 %v10102_v58, %v7242_v45  ;;  %v2738_v49 = vsel %vm451_vm0, %v2735_v1, %v2737_v17 }
 0x289   : >> { %v7467_v0 = vadd.f32 %v2301_v4, %v2189_v6  ;;  %v2755_v2 = vmul.f32 %v7306_v22, %v2752_v36  ;;  %v2754_v61 = vmul.f32 %v7176_v20, %v2752_v36  ;;  %v2002_v52 = vadd.f32 %v2000_v62, %v1602_v33 }
 0x28a   : >> { %v2138_v48 = vadd.f32 %v2134_v11, %v2079_v15  ;;  %v2736_v7 = vsel %vm451_vm0, %v2734_v13, %v2735_v1  ;;  %v2753_v35 = vmul.f32 %v7183_v59, %v2752_v36  ;;  %v1248_v18 = vadd.f32 %v10103_v37, %v7322_v28  ;;  %v10104_v15 = vld [vmem:[#allocation27_spill] sm:$0xff] }
 0x28b   : >> { %v1309_v39 = vadd.f32 %v1304_v32, %v1247_v10  ;;  %v7482_v45 = vadd.f32 %v7139_v23, %v7356_v14  ;;  %v2164_v6 = vrot.slane %v2158_v56, 1  ;;  %v1306_v51 = vsel %vm451_vm0, %v1303_v57, %v1305_v42  ;;  %v10109_v56 = vld [vmem:[#allocation75_spill] sm:$0xff]  ;;  %v10110_v32 = vld [vmem:[#allocation22_spill] sm:$0xff]  ;;  %v10111_v42 = vld [vmem:[#allocation84_spill] sm:$0xff] }
 0x28c   : >> { %2743 = vrot.lane.b32.xlu2 %v2737_v17, %s5576_s13  ;;  %v7487_v33 = vadd.f32 %v7190_v26, %v1135_v8  ;;  %v2050_v62 = vadd.f32 %v6773_v46, %v2002_v52  ;;  %v2242_v1 = vadd.f32 %v7361_v44, %v2138_v48  ;;  %v1292_v28 = vadd.f32 %v7384_v34, %v1233_v9  ;;  %v10105_v26 = vld [vmem:[#allocation29_spill] sm:$0xff] }
 0x28d   : >> { %2741 = vrot.lane.b32.xlu1 %v2738_v49, %s5576_s13  ;;  %v7494_v23 = vadd.f32 %v10104_v15, %v1134_v24  ;;  %v2762_v57 = vrot.slane %v2755_v2, 1  ;;  %v2760_v17 = vrot.slane %v2754_v61, 1  ;;  %v2759_v36 = vrot.slane %v2753_v35, 1  ;;  %v10107_v8 = vld [vmem:[#allocation21_spill] sm:$0xff] }
 0x28e   : >> { %2739 = vrot.lane.b32.xlu0 %v2736_v7, %s5576_s13  ;;  %v2402_v14 = vpop.permute.xlu2 %2401  ;;  %v2106_v13 = vadd.f32 %v10105_v26, %v2050_v62  ;;  %v2777_v34 = vstv %s7450_s25  ;;  %v7507_v10 = vadd.f32 %v10108_v31, %v10107_v8  ;;  %v1310_v11 = vadd.f32 %v1306_v51, %v1248_v18  ;;  %v10113_v7 = vld [vmem:[#allocation86_spill] sm:$0xff]  ;;  %s7740_s25 = sld [smem:[#allocation3 + $0x2e]] }
 0x28f   : >> { %v7498_v46 = vadd.f32 %v2402_v14, %v2242_v1  ;;  %v7500_v44 = vpop.permute.xlu1 %2334  ;;  %v1417_v4 = vadd.f32 %v10109_v56, %v1309_v39  ;;  %v2166_v19 = vsel %vm451_vm0, %v2164_v6, %v2165_v47  ;;  %v7517_v58 = vadd.f32 %v10111_v42, %v10110_v32  ;;  %v10114_v6 = vld [vmem:[#allocation94_spill] sm:$0xff] }
 0x290   : >> { %v7513_v24 = vpop.permute.xlu0 %2318  ;;  %v7520_v9 = vstv %s7455_s6  ;;  %v7523_v49 = vstv %s7465_s7  ;;  %v10112_v2 = vstv %s7326_s23  ;;  %v1993_v52 = vstv %s7471_s10  ;;  %s7670_s23 = sld [smem:[#allocation3 + $0x22]] }
 0x291   : >> { %10106 = vst [vmem:[#allocation32_spill] sm:$0xff] %v7498_v46  ;;  %v1988_v61 = vmul.f32 %v7183_v59, %v10112_v2  ;;  %v2763_v54 = vsel %vm451_vm0, %v2760_v17, %v2762_v57  ;;  %v2780_v47 = vmul.f32 %v7306_v22, %v2777_v34  ;;  %v2779_v48 = vmul.f32 %v7176_v20, %v2777_v34  ;;  %s7771_s6 = sld [smem:[#allocation3 + $0x96]] }
 0x292   : >> { %v1396_v35 = vadd.f32 %v10113_v7, %v1292_v28  ;;  %v2171_v37 = vadd.f32 %v2166_v19, %v2106_v13  ;;  %v2761_v18 = vsel %vm451_vm0, %v2759_v36, %v2760_v17  ;;  %v2778_v39 = vmul.f32 %v7183_v59, %v2777_v34  ;;  %v10115_v28 = vld [vmem:[#allocation93_spill] sm:$0xff]  ;;  %v10117_v13 = vld [vmem:[#allocation87_spill] sm:$0xff]  ;;  %s7788_s7 = sld [smem:[#allocation3 + $0x17]] }
 0x293   : >> { %v1480_v51 = vadd.f32 %v10114_v6, %v7254_v55  ;;  %v7541_v62 = vmul.f32 %v6781_v16, %v7520_v9  ;;  %v7545_v1 = vmul.f32 %v7091_v50, %v7520_v9  ;;  %v7549_v15 = vmul.f32 %v6781_v16, %v7523_v49  ;;  %v10116_v16 = vld [vmem:[#allocation23_spill] sm:$0xff]  ;;  %s7820_s10 = sld [smem:[#allocation3 + $0xa2]] }
 0x294   : >> { %2768 = vrot.lane.b32.xlu2 %v2762_v57, %s5576_s13  ;;  %v1560_v14 = vadd.f32 %v10115_v28, %v1396_v35  ;;  %v7557_v55 = vmul.f32 %v7091_v50, %v7523_v49  ;;  %v7560_v17 = vmul.f32 %v7176_v20, %v1993_v52  ;;  %v2283_v26 = vadd.f32 %v7417_v5, %v2171_v37  ;;  %v10118_v57 = vld [vmem:[#allocation116_spill] sm:$0xff]  ;;  %v10126_v35 = vld [vmem:[#allocation106_spill] sm:$0xff] }
 0x295   : >> { %2766 = vrot.lane.b32.xlu1 %v2763_v54, %s5576_s13  ;;  %v7568_v36 = vadd.f32 %v10117_v13, %v10116_v16  ;;  %v1644_v34 = vadd.f32 %v10118_v57, %v1480_v51  ;;  %v2787_v31 = vrot.slane %v2780_v47, 1  ;;  %v2785_v56 = vrot.slane %v2779_v48, 1  ;;  %v10121_v54 = vld [vmem:[#allocation89_spill] sm:$0xff] }
 0x296   : >> { %2764 = vrot.lane.b32.xlu0 %v2761_v18, %s5576_s13  ;;  %v2442_v8 = vpop.permute.xlu2 %2441  ;;  %v2124_v19 = vmul.f32 %v7183_v59, %v7396_v12  ;;  %v2784_v42 = vrot.slane %v2778_v39, 1  ;;  %v2802_v2 = vstv %s7503_s11  ;;  %v1418_v7 = vadd.f32 %v10121_v54, %v1310_v11  ;;  %s7838_s11 = sld [smem:[#allocation3 + $0x2f]] }
 0x297   : >> { %v7574_v32 = vadd.f32 %v2442_v8, %v2283_v26  ;;  %v7576_v5 = vpop.permute.xlu1 %2354  ;;  %v1716_v37 = vrot.slane %v7545_v1, 1  ;;  %v1735_v47 = vrot.slane %v7557_v55, 1  ;;  %v7587_v12 = vstv %s7525_s12  ;;  %v10122_v26 = vld [vmem:[#allocation97_spill] sm:$0xff]  ;;  %v10123_v8 = vld [vmem:[#allocation96_spill] sm:$0xff]  ;;  %s7847_s12 = sld [smem:[#allocation3 + $0x23]] }
 0x298   : >> { %10120 = vst [vmem:[#allocation35_spill] sm:$0xff] %v7576_v5  ;;  %v7583_v6 = vpop.permute.xlu0 %2338  ;;  %v1990_v48 = vadd.f32 %v1988_v61, %v1560_v14  ;;  %v1994_v51 = vmul.f32 %v7183_v59, %v1993_v52  ;;  %v2788_v11 = vsel %vm451_vm0, %v2785_v56, %v2787_v31  ;;  %v2805_v28 = vmul.f32 %v7306_v22, %v2802_v2  ;;  %v10124_v14 = vld [vmem:[#allocation128_spill] sm:$0xff]  ;;  %v10139_v5 = vld [vmem:[#allocation17_spill] sm:$0xff] }
 0x299   : >> { %10119 = vst [vmem:[#allocation34_spill] sm:$0xff] %v7574_v32  ;;  %v1723_v39 = vadd.f32 %v1716_v37, %v1644_v34  ;;  %v2804_v1 = vmul.f32 %v7176_v20, %v2802_v2  ;;  %v1500_v16 = vadd.f32 %v10122_v26, %v7331_v30  ;;  %v2130_v13 = vrot.slane %v2124_v19, 1  ;;  %v10125_v34 = vld [vmem:[#allocation16_spill] sm:$0xff]  ;;  %v10127_v30 = vld [vmem:[#allocation119_spill] sm:$0xff] }
 0x29a   : >> { %v2786_v57 = vsel %vm451_vm0, %v2784_v42, %v2785_v56  ;;  %v2803_v55 = vmul.f32 %v7183_v59, %v2802_v2  ;;  %v1582_v61 = vadd.f32 %v10123_v8, %v1418_v7  ;;  %v2022_v54 = vadd.f32 %v10125_v34, %v1990_v48  ;;  %v10128_v42 = vld [vmem:[#allocation139_spill] sm:$0xff]  ;;  %v10129_v7 = vld [vmem:[#allocation26_spill] sm:$0xff] }
 0x29b   : >> { %v1805_v52 = vadd.f32 %v10124_v14, %v1723_v39  ;;  %v7601_v18 = vstv %s7551_s14  ;;  %v1581_v21 = vadd.f32 %v10126_v35, %v1417_v4  ;;  %v1664_v19 = vadd.f32 %v10127_v30, %v1500_v16  ;;  %v10133_v34 = vld [vmem:[#allocation95_spill] sm:$0xff]  ;;  %s7855_s14 = sld [smem:[#allocation3 + $0x3a]] }
 0x29c   : >> { %2793 = vrot.lane.b32.xlu2 %v2787_v31, %s5576_s13  ;;  %v2140_v26 = vstv %s7562_s15  ;;  %v2194_v56 = vmul.f32 %v7306_v22, %v7601_v18  ;;  %v2078_v48 = vadd.f32 %v10129_v7, %v2022_v54  ;;  %v2812_v39 = vrot.slane %v2805_v28, 1  ;;  %v5452_v54 = vld [vmem:[%s5698_s8 + $0xf8] sm:$0xff]  ;;  %s7869_s15 = sld [smem:[#allocation3 + $0xae]] }
 0x29d   : >> { %2791 = vrot.lane.b32.xlu1 %v2788_v11, %s5576_s13  ;;  %v1905_v2 = vadd.f32 %v10128_v42, %v1805_v52  ;;  %v2810_v4 = vrot.slane %v2804_v1, 1  ;;  %v10130_v35 = vrot.slane %v7411_v27, 1  ;;  %v2143_v11 = vmul.f32 %v7306_v22, %v2140_v26 }
 0x29e   : >> { %2789 = vrot.lane.b32.xlu0 %v2786_v57, %s5576_s13  ;;  %v2465_v31 = vpop.permute.xlu2 %2464  ;;  %v2809_v52 = vrot.slane %v2803_v55, 1  ;;  %v1479_v57 = vadd.f32 %v10133_v34, %v7257_v60  ;;  %v10134_v28 = vrot.slane %v7541_v62, 1  ;;  %v10135_v27 = vrot.slane %v7549_v15, 1  ;;  %v10136_v60 = vld [vmem:[#allocation100_spill] sm:$0xff] }
 0x29f   : >> { %v2132_v16 = vsel %vm451_vm0, %v2130_v13, %v10130_v35  ;;  %v7624_v8 = vadd.f32 %v2465_v31, %v7467_v0  ;;  %v7626_v14 = vpop.permute.xlu1 %2374  ;;  %v7642_v0 = vmul.f32 %v5452_v54, %v7587_v12  ;;  %v1520_v30 = vadd.f32 %v10136_v60, %v7387_v3  ;;  %v10137_v60 = vld [vmem:[#allocation122_spill] sm:$0xff] }
 0x2a0   : >> { %10132 = vst [vmem:[#allocation37_spill] sm:$0xff] %v7626_v14  ;;  %v7633_v1 = vsel %vm451_vm0, %v10134_v28, %v1716_v37  ;;  %v7638_v13 = vsel %vm451_vm0, %v10135_v27, %v1735_v47  ;;  %v7646_v55 = vpop.permute.xlu0 %2358  ;;  %v7652_v37 = vmul.f32 %v7091_v50, %v7587_v12  ;;  %v1997_v42 = vadd.f32 %v7560_v17, %v1582_v61  ;;  %v10138_v14 = vld [vmem:[#allocation131_spill] sm:$0xff] }
 0x2a1   : >> { %10131 = vst [vmem:[#allocation33_spill] sm:$0xff] %v7624_v8  ;;  %v2142_v7 = vmul.f32 %v7176_v20, %v2140_v26  ;;  %v1742_v31 = vadd.f32 %v1735_v47, %v1664_v19  ;;  %v2137_v35 = vadd.f32 %v2132_v16, %v2078_v48  ;;  %v2141_v34 = vmul.f32 %v7183_v59, %v2140_v26  ;;  %v10140_v47 = vld [vmem:[#allocation19_spill] sm:$0xff] }
 0x2a2   : >> { %v2813_v28 = vsel %vm451_vm0, %v2810_v4, %v2812_v39  ;;  %v1996_v27 = vadd.f32 %v1994_v51, %v1581_v21  ;;  %v2150_v8 = vrot.slane %v2143_v11, 1  ;;  %v2197_v32 = vadd.f32 %v2194_v56, %v1905_v2  ;;  %v10141_v56 = vld [vmem:[#allocation28_spill] sm:$0xff] }
 0x2a3   : >> { %v2811_v3 = vsel %vm451_vm0, %v2809_v52, %v2810_v4  ;;  %v1684_v46 = vadd.f32 %v10137_v60, %v1520_v30  ;;  %v1830_v40 = vadd.f32 %v10138_v14, %v1742_v31  ;;  %v2037_v17 = vadd.f32 %v10139_v5, %v1997_v42  ;;  %v10143_v4 = vld [vmem:[#allocation141_spill] sm:$0xff]  ;;  %v7685_v42 = vld [vmem:[%s5698_s8 + $0x2d0] sm:$0xff] }
 0x2a4   : >> { %v7663_v61 = vstv %s7603_s16  ;;  %2818 = vrot.lane.b32.xlu2 %v2812_v39, %s5576_s13  ;;  %v2036_v19 = vadd.f32 %v10140_v47, %v1996_v27  ;;  %v2148_v26 = vrot.slane %v2142_v7, 1  ;;  %v2325_v21 = vadd.f32 %v7513_v24, %v2197_v32  ;;  %v10142_v39 = vld [vmem:[#allocation20_spill] sm:$0xff]  ;;  %v7691_v31 = vld [vmem:[%s5698_s8 + $0xf0] sm:$0xff]  ;;  %s7910_s16 = sld [smem:[#allocation3 + $0x52]] }
 0x2a5   : >> { %2816 = vrot.lane.b32.xlu1 %v2813_v28, %s5576_s13  ;;  %v9738_v51 = vstv %s7612_s17  ;;  %v2093_v2 = vadd.f32 %v10141_v56, %v2037_v17  ;;  %v2147_v5 = vrot.slane %v2141_v34, 1  ;;  %v2241_v24 = vadd.f32 %v10142_v39, %v2137_v35  ;;  %v7703_v28 = vld [vmem:[%s5698_s8 + $0x2d8] sm:$0xff]  ;;  %v10144_v60 = vld [vmem:[#allocation15_spill] sm:$0xff]  ;;  %v10145_v39 = vld [vmem:[#allocation98_spill] sm:$0xff] }
 0x2a6   : >> { %2814 = vrot.lane.b32.xlu0 %v2811_v3, %s5576_s13  ;;  %v2483_v48 = vpop.permute.xlu2 %2482  ;;  %v2856_v32 = vstv %s7617_s21  ;;  %v1930_v16 = vadd.f32 %v10143_v4, %v1830_v40  ;;  %v2151_v11 = vsel %vm451_vm0, %v2148_v26, %v2150_v8  ;;  %v2202_v14 = vmul.f32 %v7306_v22, %v7663_v61  ;;  %s7928_s21 = sld [smem:[#allocation3 + $0xba]] }
 0x2a7   : >> { %v7682_v52 = vadd.f32 %v2483_v48, %v2325_v21  ;;  %v2400_v30 = vpop.permute.xlu1 %2399  ;;  %v7688_v7 = vstv %s7644_s22  ;;  %v1707_v35 = vmul.f32 %v7691_v31, %v7520_v9  ;;  %v2871_v8 = vmul.f32 %v7685_v42, %v9738_v51  ;;  %v10147_v51 = vld [vmem:[#allocation103_spill] sm:$0xff]  ;;  %s7961_s22 = sld [smem:[#allocation3 + $0x5e]] }
 0x2a8   : >> { %v7695_v34 = vadd.f32 %v2400_v30, %v2241_v24  ;;  %v7697_v40 = vpop.permute.xlu0 %2378  ;;  %v1752_v27 = vrot.slane %v7642_v0, 1  ;;  %v1754_v3 = vrot.slane %v7652_v37, 1  ;;  %v2092_v17 = vadd.f32 %v10144_v60, %v2036_v19  ;;  %v10146_v30 = vld [vmem:[#allocation102_spill] sm:$0xff] }
 0x2a9   : >> { %v2858_v47 = vmul.f32 %v7703_v28, %v2856_v32  ;;  %v1726_v9 = vmul.f32 %v7691_v31, %v7523_v49  ;;  %v2155_v21 = vadd.f32 %v2151_v11, %v2093_v2  ;;  %v2149_v56 = vsel %vm451_vm0, %v2147_v5, %v2148_v26  ;;  %v10150_v11 = vld [vmem:[#allocation24_spill] sm:$0xff] }
 0x2aa   : >> { %v2857_v48 = vmul.f32 %v7685_v42, %v2856_v32  ;;  %v1499_v24 = vadd.f32 %v10145_v39, %v7334_v41  ;;  %v7716_v4 = vmul.f32 %v5452_v54, %v7688_v7  ;;  %v1761_v37 = vadd.f32 %v1754_v3, %v1684_v46  ;;  %v10148_v41 = vld [vmem:[#allocation134_spill] sm:$0xff] }
 0x2ab   : >> { %v2205_v19 = vadd.f32 %v2202_v14, %v1930_v16  ;;  %v1643_v60 = vadd.f32 %v10146_v30, %v1479_v57  ;;  %v1540_v49 = vadd.f32 %v10147_v51, %v7487_v33  ;;  %v7723_v26 = vmul.f32 %v7091_v50, %v7688_v7  ;;  %v10149_v33 = vld [vmem:[#allocation125_spill] sm:$0xff] }
 0x2ac   : >> { %v1713_v2 = vrot.slane %v1707_v35, 1  ;;  %2875 = vrot.lane.b32.xlu2 %v2871_v8, %s5575_s9  ;;  %v1855_v54 = vadd.f32 %v10148_v41, %v1761_v37  ;;  %v2154_v5 = vadd.f32 %v2149_v56, %v2092_v17  ;;  %v2884_v57 = vstv %s7670_s23  ;;  %v10151_v35 = vld [vmem:[#allocation14_spill] sm:$0xff]  ;;  %s5108_s23 = sld [smem:[#allocation3 + $0x6a]] }
 0x2ad   : >> { %v2345_v46 = vadd.f32 %v7583_v6, %v2205_v19  ;;  %2863 = vrot.lane.b32.xlu1 %v2858_v47, %s5575_s9  ;;  %v1704_v51 = vadd.f32 %v10149_v33, %v1540_v49  ;;  %v1732_v32 = vrot.slane %v1726_v9, 1  ;;  %v7736_v50 = vstv %s7673_s26  ;;  %s5109_s26 = sld [smem:[#allocation3 + $0x76]] }
 0x2ae   : >> { %2861 = vrot.lane.b32.xlu0 %v2857_v48, %s5575_s9  ;;  %v2503_v16 = vpop.permute.xlu2 %2502  ;;  %v2263_v14 = vadd.f32 %v10150_v11, %v2155_v21  ;;  %v1955_v8 = vadd.f32 %v10151_v35, %v1855_v54  ;;  %v2262_v6 = vadd.f32 %v7346_v38, %v2154_v5  ;;  %v2210_v17 = vmul.f32 %v7306_v22, %v7736_v50  ;;  %v10152_v38 = vld [vmem:[#allocation112_spill] sm:$0xff]  ;;  %v10153_v54 = vld [vmem:[#allocation101_spill] sm:$0xff] }
 0x2af   : >> { %v7746_v47 = vadd.f32 %v2503_v16, %v2345_v46  ;;  %v2423_v9 = vpop.permute.xlu1 %2422  ;;  %v1755_v56 = vsel %vm451_vm0, %v1752_v27, %v1754_v3  ;;  %v1745_v21 = vmul.f32 %v7691_v31, %v7587_v12  ;;  %v2886_v37 = vmul.f32 %v7703_v28, %v2884_v57 }
 0x2b0   : >> { %v7753_v48 = vadd.f32 %v2423_v9, %v2263_v14  ;;  %v2421_v39 = vpop.permute.xlu0 %2420  ;;  %v1642_v19 = vadd.f32 %v10152_v38, %v7507_v10  ;;  %v1773_v30 = vrot.slane %v7723_v26, 1  ;;  %v2885_v41 = vmul.f32 %v7685_v42, %v2884_v57  ;;  %v10157_v14 = vld [vmem:[#allocation105_spill] sm:$0xff] }
 0x2b1   : >> { %v7759_v49 = vadd.f32 %v2421_v39, %v2262_v6  ;;  %v1519_v3 = vadd.f32 %v10153_v54, %v7482_v45  ;;  %v1771_v5 = vrot.slane %v7716_v4, 1  ;;  %v10154_v12 = vrot.slane %v7541_v62, 1  ;;  %v10158_v62 = vld [vmem:[#allocation108_spill] sm:$0xff] }
 0x2b2   : >> { %v10155_v33 = vstv %s7612_s17  ;;  %v1722_v10 = vadd.f32 %v7633_v1, %v1643_v60  ;;  %v10156_v26 = vrot.slane %v7549_v15, 1  ;;  %v1780_v45 = vadd.f32 %v1773_v30, %v1704_v51  ;;  %v10159_v60 = vld [vmem:[#allocation137_spill] sm:$0xff]  ;;  %s7917_s17 = sld [smem:[#allocation3 + $0x46]] }
 0x2b3   : >> { %v1715_v46 = vsel %vm451_vm0, %v1713_v2, %v10154_v12  ;;  %v2872_v16 = vmul.f32 %v7703_v28, %v10155_v33  ;;  %v2213_v11 = vadd.f32 %v2210_v17, %v1955_v8  ;;  %v1663_v35 = vadd.f32 %v10157_v14, %v1499_v24  ;;  %v10160_v24 = vld [vmem:[#allocation114_spill] sm:$0xff]  ;;  %v10161_v17 = vld [vmem:[#allocation115_spill] sm:$0xff] }
 0x2b4   : >> { %v1734_v57 = vsel %vm451_vm0, %v1732_v32, %v10156_v26  ;;  %v1683_v2 = vadd.f32 %v10158_v62, %v1519_v3  ;;  %v1751_v6 = vrot.slane %v1745_v21, 1  ;;  %v7781_v9 = vmul.f32 %v7691_v31, %v7688_v7  ;;  %2891 = vrot.lane.b32.xlu2 %v2886_v37, %s5575_s9  ;;  %v10162_v37 = vld [vmem:[#allocation124_spill] sm:$0xff]  ;;  %v10164_v12 = vld [vmem:[#allocation126_spill] sm:$0xff] }
 0x2b5   : >> { %v1721_v1 = vadd.f32 %v1715_v46, %v1642_v19  ;;  %v1880_v15 = vadd.f32 %v10159_v60, %v1780_v45  ;;  %v2365_v32 = vadd.f32 %v7646_v55, %v2213_v11  ;;  %2889 = vrot.lane.b32.xlu1 %v2885_v41, %s5575_s9  ;;  %v2912_v51 = vstv %s7732_s18  ;;  %v10163_v55 = vld [vmem:[#allocation18_spill] sm:$0xff]  ;;  %v10165_v26 = vld [vmem:[#allocation136_spill] sm:$0xff]  ;;  %s8097_s18 = sld [smem:[#allocation3 + $0x15]] }
 0x2b6   : >> { %v1804_v8 = vadd.f32 %v10160_v24, %v1722_v10  ;;  %v1662_v21 = vadd.f32 %v10161_v17, %v7517_v58  ;;  %v7794_v7 = vstv %s7725_s28  ;;  %2877 = vrot.lane.b32.xlu0 %v2872_v16, %s5575_s9  ;;  %v2523_v31 = vpop.permute.xlu2 %2522  ;;  %v2898_v39 = vstv %s7740_s25  ;;  %v10167_v17 = vld [vmem:[#allocation111_spill] sm:$0xff]  ;;  %s5110_s28 = sld [smem:[#allocation3 + $0x82]] }
 0x2b7   : >> { %v1803_v38 = vadd.f32 %v10162_v37, %v1721_v1  ;;  %v1980_v19 = vadd.f32 %v10163_v55, %v1880_v15  ;;  %v2218_v41 = vmul.f32 %v7306_v22, %v7794_v7  ;;  %v7802_v54 = vadd.f32 %v2523_v31, %v2365_v32  ;;  %v2463_v3 = vpop.permute.xlu1 %2462  ;;  %v10166_v1 = vld [vmem:[#allocation104_spill] sm:$0xff]  ;;  %s5111_s25 = sld [smem:[#allocation3 + $0x8e]] }
 0x2b8   : >> { %v1904_v46 = vadd.f32 %v10164_v12, %v1804_v8  ;;  %v2193_v58 = vmul.f32 %v7176_v20, %v7601_v18  ;;  %v7808_v33 = vadd.f32 %v2463_v3, %v7340_v53  ;;  %v2444_v16 = vpop.permute.xlu0 %2443  ;;  %v2913_v10 = vmul.f32 %v7685_v42, %v2912_v51  ;;  %v10172_v12 = vld [vmem:[#allocation129_spill] sm:$0xff] }
 0x2b9   : >> { %v1903_v45 = vadd.f32 %v10165_v26, %v1803_v38  ;;  %v2192_v11 = vmul.f32 %v7183_v59, %v7601_v18  ;;  %v7817_v14 = vadd.f32 %v2444_v16, %v7415_v43  ;;  %v2900_v62 = vmul.f32 %v7703_v28, %v2898_v39 }
 0x2ba   : >> { %v1539_v53 = vadd.f32 %v10166_v1, %v7494_v23  ;;  %v1774_v60 = vsel %vm451_vm0, %v1771_v5, %v1773_v30  ;;  %v2899_v15 = vmul.f32 %v7685_v42, %v2898_v39  ;;  %v7829_v32 = vstv %s7771_s6  ;;  %v10174_v1 = vld [vmem:[#allocation25_spill] sm:$0xff]  ;;  %s5113_s6 = sld [smem:[#allocation3 + $0x47]] }
 0x2bb   : >> { %v1741_v18 = vadd.f32 %v7638_v13, %v1663_v35  ;;  %v1753_v43 = vsel %vm451_vm0, %v1751_v6, %v1752_v27  ;;  %v1770_v24 = vrot.slane %v7781_v9, 1  ;;  %v2221_v8 = vadd.f32 %v2218_v41, %v1980_v19  ;;  %v10168_v27 = vld [vmem:[#allocation117_spill] sm:$0xff]  ;;  %v10171_v9 = vld [vmem:[#allocation30_spill] sm:$0xff] }
 0x2bc   : >> { %v1703_v23 = vadd.f32 %v10167_v17, %v1539_v53  ;;  %v1760_v31 = vadd.f32 %v1755_v56, %v1683_v2  ;;  %v1740_v37 = vadd.f32 %v1734_v57, %v1662_v21  ;;  %v2196_v38 = vadd.f32 %v2193_v58, %v1904_v46  ;;  %2917 = vrot.lane.b32.xlu2 %v2913_v10, %s5576_s13  ;;  %v10169_v57 = vld [vmem:[#allocation118_spill] sm:$0xff]  ;;  %v10170_v2 = vld [vmem:[#allocation127_spill] sm:$0xff] }
 0x2bd   : >> { %v2195_v30 = vadd.f32 %v2192_v11, %v1903_v45  ;;  %v2385_v39 = vadd.f32 %v7697_v40, %v2221_v8  ;;  %2905 = vrot.lane.b32.xlu1 %v2900_v62, %s5575_s9  ;;  %v2926_v13 = vstv %s7788_s7  ;;  %v7845_v0 = vmul.f32 %v7306_v22, %v7829_v32  ;;  %v10173_v58 = vld [vmem:[#allocation138_spill] sm:$0xff]  ;;  %v10176_v8 = vld [vmem:[#allocation120_spill] sm:$0xff]  ;;  %s5112_s7 = sld [smem:[#allocation3 + $0x3b]] }
 0x2be   : >> { %v1829_v56 = vadd.f32 %v10168_v27, %v1741_v18  ;;  %v1682_v35 = vadd.f32 %v10169_v57, %v7568_v36  ;;  %v1828_v6 = vadd.f32 %v10170_v2, %v1740_v37  ;;  %v2324_v21 = vadd.f32 %v10171_v9, %v2196_v38  ;;  %2903 = vrot.lane.b32.xlu0 %v2899_v15, %s5575_s9  ;;  %v2543_v40 = vpop.permute.xlu2 %2542  ;;  %v10175_v53 = vld [vmem:[#allocation90_spill] sm:$0xff] }
 0x2bf   : >> { %v2201_v55 = vmul.f32 %v7176_v20, %v7663_v61  ;;  %v2323_v19 = vadd.f32 %v7447_v29, %v2195_v30  ;;  %v2200_v41 = vmul.f32 %v7183_v59, %v7663_v61  ;;  %v7862_v36 = vadd.f32 %v2543_v40, %v2385_v39  ;;  %v2481_v3 = vpop.permute.xlu1 %2480  ;;  %v10177_v39 = vld [vmem:[#allocation121_spill] sm:$0xff] }
 0x2c0   : >> { %v1929_v46 = vadd.f32 %v10172_v12, %v1829_v56  ;;  %v1928_v16 = vadd.f32 %v10173_v58, %v1828_v6  ;;  %v7866_v10 = vadd.f32 %v2481_v3, %v2324_v21  ;;  %v2479_v26 = vpop.permute.xlu0 %2478  ;;  %v2928_v45 = vmul.f32 %v7703_v28, %v2926_v13  ;;  %v10179_v6 = vld [vmem:[#allocation132_spill] sm:$0xff] }
 0x2c1   : >> { %v7871_v11 = vadd.f32 %v2479_v26, %v2323_v19  ;;  %v2927_v29 = vmul.f32 %v7685_v42, %v2926_v13  ;;  %v2561_v61 = vrot.slane %v7845_v0, 1  ;;  %v7876_v62 = vstv %s7820_s10  ;;  %s5114_s10 = sld [smem:[#allocation3 + $0x53]] }
 0x2c2   : >> { %v1538_v15 = vadd.f32 %v10175_v53, %v10174_v1  ;;  %v2914_v18 = vmul.f32 %v7703_v28, %v2912_v51  ;;  %v1854_v17 = vadd.f32 %v10176_v8, %v1760_v31  ;;  %v1779_v37 = vadd.f32 %v1774_v60, %v1703_v23  ;;  %v10178_v60 = vld [vmem:[#allocation130_spill] sm:$0xff]  ;;  %v10182_v53 = vld [vmem:[#allocation133_spill] sm:$0xff] }
 0x2c3   : >> { %v1759_v38 = vadd.f32 %v1753_v43, %v1682_v35  ;;  %v1772_v30 = vsel %vm451_vm0, %v1770_v24, %v1771_v5  ;;  %v2204_v27 = vadd.f32 %v2201_v55, %v1929_v46  ;;  %v2209_v56 = vmul.f32 %v7176_v20, %v7736_v50  ;;  %v7907_v35 = vld [vmem:[%s5698_s8 + $0x2e0] sm:$0x3]  ;;  %v7940_v8 = vld [vmem:[%s5698_s8 + $0x1e8] sm:$0xff] }
 0x2c4   : >> { %v1702_v13 = vadd.f32 %v10177_v39, %v1538_v15  ;;  %2933 = vrot.lane.b32.xlu2 %v2928_v45, %s5576_s13  ;;  %v7893_v51 = vmul.f32 %v7306_v22, %v7876_v62  ;;  %v2203_v4 = vadd.f32 %v2200_v41, %v1928_v16  ;;  %v2568_v5 = vadd.f32 %v2561_v61, %v7682_v52  ;;  %v10180_v52 = vld [vmem:[#allocation140_spill] sm:$0xff] }
 0x2c5   : >> { %v1853_v43 = vadd.f32 %v10178_v60, %v1759_v38  ;;  %2931 = vrot.lane.b32.xlu1 %v2927_v29, %s5576_s13  ;;  %v2954_v24 = vstv %s7838_s11  ;;  %v2344_v23 = vadd.f32 %v7344_v63, %v2204_v27  ;;  %v2208_v20 = vmul.f32 %v7183_v59, %v7736_v50  ;;  %v10181_v29 = vld [vmem:[#allocation123_spill] sm:$0xff]  ;;  %s8120_s11 = sld [smem:[#allocation3 + $0x21]] }
 0x2c6   : >> { %2919 = vrot.lane.b32.xlu0 %v2914_v18, %s5576_s13  ;;  %v2644_v31 = vpop.permute.xlu2 %2643  ;;  %v2940_v57 = vstv %s7847_s12  ;;  %v3068_v2 = vstv %s7855_s14  ;;  %v1954_v9 = vadd.f32 %v10179_v6, %v1854_v17  ;;  %v2343_v63 = vadd.f32 %v7500_v44, %v2203_v4  ;;  %v10185_v6 = vld [vmem:[#allocation13_spill] sm:$0xff]  ;;  %s5115_s12 = sld [smem:[#allocation3 + $0x5f]] }
 0x2c7   : >> { %v1953_v21 = vadd.f32 %v10180_v52, %v1853_v43  ;;  %v7915_v40 = vadd.f32 %v2644_v31, %v2568_v5  ;;  %v2501_v55 = vpop.permute.xlu1 %2500  ;;  %v2955_v19 = vmul.f32 %v7685_v42, %v2954_v24  ;;  %v2580_v41 = vrot.slane %v7893_v51, 1  ;;  %s5116_s14 = sld [smem:[#allocation3 + $0x6b]] }
 0x2c8   : >> { %v7919_v59 = vadd.f32 %v2501_v55, %v2344_v23  ;;  %v2499_v50 = vpop.permute.xlu0 %2498  ;;  %v7926_v3 = vstv %s7869_s15  ;;  %v2942_v44 = vmul.f32 %v7703_v28, %v2940_v57  ;;  %v3070_v46 = vmul.f32 %v7703_v28, %v3068_v2  ;;  %v10183_v23 = vld [vmem:[#allocation135_spill] sm:$0xff]  ;;  %s5084_s15 = sld [smem:[#allocation3 + $0x9]] }
 0x2c9   : >> { %v7930_v12 = vadd.f32 %v2499_v50, %v2343_v63  ;;  %v3071_v58 = vmul.f32 %v7907_v35, %v3068_v2  ;;  %v1778_v16 = vadd.f32 %v1772_v30, %v1702_v13  ;;  %v2941_v26 = vmul.f32 %v7685_v42, %v2940_v57 }
 0x2ca   : >> { %v3069_v45 = vmul.f32 %v7685_v42, %v3068_v2  ;;  %v1879_v1 = vadd.f32 %v10181_v29, %v1779_v37  ;;  %v2212_v18 = vadd.f32 %v2209_v56, %v1954_v9  ;;  %v2217_v17 = vmul.f32 %v7940_v8, %v7794_v7  ;;  %v7955_v56 = vld [vmem:[%s5698_s8 + $0x1e0] sm:$0xff] }
 0x2cb   : >> { %v1878_v15 = vadd.f32 %v10182_v53, %v1778_v16  ;;  %v7947_v38 = vmul.f32 %v7306_v22, %v7926_v3  ;;  %v2211_v30 = vadd.f32 %v2208_v20, %v1953_v21  ;;  %v2587_v37 = vadd.f32 %v2580_v41, %v7746_v47  ;;  %v10184_v20 = vld [vmem:[#allocation35_spill] sm:$0xff] }
 0x2cc   : >> { %2959 = vrot.lane.b32.xlu2 %v2955_v19, %s5576_s13  ;;  %v3076_v39 = vrot.slane %v3070_v46, 1  ;;  %v3078_v13 = vrot.slane %v3071_v58, 1  ;;  %v2364_v27 = vadd.f32 %v7403_v25, %v2212_v18  ;;  %v2216_v60 = vmul.f32 %v7955_v56, %v7794_v7 }
 0x2cd   : >> { %2947 = vrot.lane.b32.xlu1 %v2942_v44, %s5576_s13  ;;  %v3075_v4 = vrot.slane %v3069_v45, 1  ;;  %v3110_v5 = vstv %s7910_s16  ;;  %v1979_v47 = vadd.f32 %v10183_v23, %v1879_v1  ;;  %v2363_v31 = vadd.f32 %v10184_v20, %v2211_v30  ;;  %s5117_s16 = sld [smem:[#allocation3 + $0x77]] }
 0x2ce   : >> { %2945 = vrot.lane.b32.xlu0 %v2941_v26, %s5576_s13  ;;  %v2669_v43 = vpop.permute.xlu2 %2668  ;;  %v3089_v2 = vstv %s7917_s17  ;;  %v1978_v9 = vadd.f32 %v10185_v6, %v1878_v15  ;;  %v2599_v21 = vrot.slane %v7947_v38, 1  ;;  %v7973_v63 = vstv %s7928_s21  ;;  %s5118_s17 = sld [smem:[#allocation3 + $0x83]] }
 0x2cf   : >> { %v7965_v57 = vadd.f32 %v2669_v43, %v2587_v37  ;;  %v2521_v25 = vpop.permute.xlu1 %2520  ;;  %v3079_v50 = vsel %vm451_vm0, %v3076_v39, %v3078_v13  ;;  %v3111_v19 = vmul.f32 %v7685_v42, %v3110_v5  ;;  %v7980_v44 = vmul.f32 %v7703_v28, %v3110_v5  ;;  %s5087_s21 = sld [smem:[#allocation3 + $0x2d]] }
 0x2d0   : >> { %v7969_v52 = vadd.f32 %v2521_v25, %v2364_v27  ;;  %v2519_v7 = vpop.permute.xlu0 %2518  ;;  %v3077_v46 = vsel %vm451_vm0, %v3075_v4, %v3076_v39  ;;  %v2956_v58 = vmul.f32 %v7703_v28, %v2954_v24  ;;  %v3091_v16 = vmul.f32 %v7703_v28, %v3089_v2  ;;  %v10187_v4 = vld [vmem:[#allocation37_spill] sm:$0xff] }
 0x2d1   : >> { %v7975_v55 = vadd.f32 %v2519_v7, %v2363_v31  ;;  %v3092_v26 = vmul.f32 %v7907_v35, %v3089_v2  ;;  %v3090_v45 = vmul.f32 %v7685_v42, %v3089_v2  ;;  %v2553_v29 = vmul.f32 %v7940_v8, %v7829_v32 }
 0x2d2   : >> { %v2220_v1 = vadd.f32 %v2217_v17, %v1979_v47  ;;  %v7994_v53 = vmul.f32 %v7306_v22, %v7973_v63  ;;  %v2552_v24 = vmul.f32 %v7955_v56, %v7829_v32  ;;  %v2219_v15 = vadd.f32 %v2216_v60, %v1978_v9  ;;  %v10186_v17 = vld [vmem:[#allocation31_spill] sm:$0xff] }
 0x2d3   : >> { %v2606_v18 = vadd.f32 %v2599_v21, %v7802_v54  ;;  %v3117_v30 = vrot.slane %v3111_v19, 1  ;;  %v3118_v37 = vrot.slane %v7980_v44, 1  ;;  %v3097_v22 = vrot.slane %v3091_v16, 1 }
 0x2d4   : >> { %3082 = vrot.lane.b32.xlu2 %v3079_v50, %s5575_s9  ;;  %v2384_v39 = vadd.f32 %v10186_v17, %v2220_v1  ;;  %v3099_v27 = vrot.slane %v3092_v26, 1  ;;  %v3131_v43 = vstv %s7961_s22  ;;  %v2383_v32 = vadd.f32 %v10187_v4, %v2219_v15  ;;  %s5119_s22 = sld [smem:[#allocation3 + $0x8f]] }
 0x2d5   : >> { %3080 = vrot.lane.b32.xlu1 %v3077_v46, %s5575_s9  ;;  %v3096_v47 = vrot.slane %v3090_v45, 1  ;;  %v2559_v20 = vrot.slane %v2553_v29, 1  ;;  %v2618_v25 = vrot.slane %v7994_v53, 1  ;;  %v2558_v2 = vrot.slane %v2552_v24, 1 }
 0x2d6   : >> { %2961 = vrot.lane.b32.xlu0 %v2956_v58, %s5576_s13  ;;  %v2694_v13 = vpop.permute.xlu2 %2693  ;;  %v3119_v9 = vsel %vm451_vm0, %v3117_v30, %v3118_v37  ;;  %v3133_v7 = vmul.f32 %v7703_v28, %v3131_v43  ;;  %v3134_v50 = vmul.f32 %v7907_v35, %v3131_v43  ;;  %v3100_v19 = vsel %vm451_vm0, %v3097_v22, %v3099_v27 }
 0x2d7   : >> { %v8007_v60 = vadd.f32 %v2694_v13, %v2606_v18  ;;  %v2541_v23 = vpop.permute.xlu1 %2540  ;;  %v3132_v44 = vmul.f32 %v7685_v42, %v3131_v43  ;;  %v3098_v46 = vsel %vm451_vm0, %v3096_v47, %v3097_v22  ;;  %v2562_v58 = vsel %vm451_vm0, %v2559_v20, %v2561_v61 }
 0x2d8   : >> { %v8009_v31 = vadd.f32 %v2541_v23, %v2384_v39  ;;  %v2539_v54 = vpop.permute.xlu0 %2538  ;;  %v3113_v16 = vmul.f32 %v7907_v35, %v3110_v5  ;;  %v2572_v26 = vmul.f32 %v7940_v8, %v7876_v62  ;;  %v2560_v45 = vsel %vm451_vm0, %v2558_v2, %v2559_v20 }
 0x2d9   : >> { %v8012_v6 = vadd.f32 %v2539_v54, %v2383_v32  ;;  %v2571_v29 = vmul.f32 %v7955_v56, %v7876_v62  ;;  %v2625_v0 = vadd.f32 %v2618_v25, %v7862_v36  ;;  %v3139_v1 = vrot.slane %v3133_v7, 1 }
 0x2da   : >> { %v3141_v61 = vrot.slane %v3134_v50, 1  ;;  %v2567_v24 = vadd.f32 %v2562_v58, %v7866_v10  ;;  %v3138_v15 = vrot.slane %v3132_v44, 1  ;;  %v2566_v62 = vadd.f32 %v2560_v45, %v7871_v11 }
 0x2db   : >> { %v3120_v17 = vrot.slane %v3113_v16, 1  ;;  %v2578_v39 = vrot.slane %v2572_v26, 1  ;;  %v2577_v36 = vrot.slane %v2571_v29, 1  ;;  %v2591_v11 = vmul.f32 %v7940_v8, %v7926_v3 }
 0x2dc   : >> { %3122 = vrot.lane.b32.xlu2 %v3119_v9, %s5575_s9  ;;  %v3142_v43 = vsel %vm451_vm0, %v3139_v1, %v3141_v61  ;;  %v3140_v4 = vsel %vm451_vm0, %v3138_v15, %v3139_v1  ;;  %v2590_v47 = vmul.f32 %v7955_v56, %v7926_v3  ;;  %v3152_v20 = vstv %s5108_s23  ;;  %s5124_s23 = sld [smem:[#allocation3 + $0x9a]] }
 0x2dd   : >> { %3103 = vrot.lane.b32.xlu1 %v3100_v19, %s5575_s9  ;;  %v3121_v10 = vsel %vm451_vm0, %v3118_v37, %v3120_v17  ;;  %v2581_v32 = vsel %vm451_vm0, %v2578_v39, %v2580_v41  ;;  %v2579_v23 = vsel %vm451_vm0, %v2577_v36, %v2578_v39  ;;  %v2597_v9 = vrot.slane %v2591_v11, 1 }
 0x2de   : >> { %3101 = vrot.lane.b32.xlu0 %v3098_v46, %s5575_s9  ;;  %v2719_v5 = vpop.permute.xlu2 %2718  ;;  %v2586_v51 = vadd.f32 %v2581_v32, %v7919_v59  ;;  %v2585_v2 = vadd.f32 %v2579_v23, %v7930_v12  ;;  %v3155_v3 = vmul.f32 %v7907_v35, %v3152_v20  ;;  %v2596_v19 = vrot.slane %v2590_v47, 1 }
 0x2df   : >> { %v8036_v18 = vadd.f32 %v2719_v5, %v2625_v0  ;;  %v2642_v30 = vpop.permute.xlu1 %2641  ;;  %v3154_v46 = vmul.f32 %v7703_v28, %v3152_v20  ;;  %v3153_v58 = vmul.f32 %v7685_v42, %v3152_v20  ;;  %v2610_v59 = vmul.f32 %v7940_v8, %v7973_v63 }
 0x2e0   : >> { %v8039_v13 = vadd.f32 %v2642_v30, %v2567_v24  ;;  %v2640_v22 = vpop.permute.xlu0 %2639  ;;  %v2598_v12 = vsel %vm451_vm0, %v2596_v19, %v2597_v9  ;;  %v2609_v16 = vmul.f32 %v7955_v56, %v7973_v63  ;;  %v3172_v26 = vstv %s5109_s26  ;;  %s5096_s26 = sld [smem:[#allocation3 + $0x39]] }
 0x2e1   : >> { %v8041_v27 = vadd.f32 %v2640_v22, %v2566_v62  ;;  %v2604_v29 = vadd.f32 %v2598_v12, %v7975_v55  ;;  %v2616_v0 = vrot.slane %v2610_v59, 1  ;;  %v3175_v56 = vmul.f32 %v7907_v35, %v3172_v26 }
 0x2e2   : >> { %v2615_v63 = vrot.slane %v2609_v16, 1  ;;  %v3174_v24 = vmul.f32 %v7703_v28, %v3172_v26  ;;  %v3173_v15 = vmul.f32 %v7685_v42, %v3172_v26  ;;  %v3192_v55 = vstv %s5110_s28  ;;  %s5098_s28 = sld [smem:[#allocation3 + $0x51]] }
 0x2e3   : >> { %v3195_v36 = vmul.f32 %v7907_v35, %v3192_v55  ;;  %v3253_v32 = vstv %s5113_s6  ;;  %v3232_v47 = vstv %s5112_s7  ;;  %v3274_v26 = vstv %s5114_s10  ;;  %s5126_s6 = sld [smem:[#allocation3 + $0xb2]] }
 0x2e4   : >> { %3145 = vrot.lane.b32.xlu2 %v3142_v43, %s5575_s9  ;;  %v3235_v19 = vmul.f32 %v7907_v35, %v3232_v47  ;;  %s5099_s7 = sld [smem:[#allocation3 + $0x5d]] }
 0x2e5   : >> { %3143 = vrot.lane.b32.xlu1 %v3140_v4, %s5575_s9  ;;  %v3194_v4 = vmul.f32 %v7703_v28, %v3192_v55  ;;  %s5101_s10 = sld [smem:[#allocation3 + $0x75]] }
 0x2e6   : >> { %3124 = vrot.lane.b32.xlu0 %v3121_v10, %s5575_s9  ;;  %v2744_v37 = vpop.permute.xlu2 %2743  ;;  %v3193_v10 = vmul.f32 %v7685_v42, %v3192_v55  ;;  %v3242_v16 = vrot.slane %v3235_v19, 1  ;;  %v3256_v55 = vmul.f32 %v7907_v35, %v3253_v32 }
 0x2e7   : >> { %v8059_v41 = vadd.f32 %v2744_v37, %v7915_v40  ;;  %v2667_v54 = vpop.permute.xlu1 %2666  ;;  %v2600_v40 = vsel %vm451_vm0, %v2597_v9, %v2599_v21 }
 0x2e8   : >> { %v8062_v7 = vadd.f32 %v2667_v54, %v2586_v51  ;;  %v2665_v50 = vpop.permute.xlu0 %2664  ;;  %v2605_v38 = vadd.f32 %v2600_v40, %v7969_v52  ;;  %v2617_v52 = vsel %vm451_vm0, %v2615_v63, %v2616_v0 }
 0x2e9   : >> { %v8065_v44 = vadd.f32 %v2665_v50, %v2585_v2  ;;  %v2623_v17 = vadd.f32 %v2617_v52, %v8012_v6  ;;  %v3255_v50 = vmul.f32 %v7703_v28, %v3253_v32  ;;  %v3275_v52 = vmul.f32 %v7685_v42, %v3274_v26 }
 0x2eb   : >> { %v3261_v40 = vrot.slane %v3255_v50, 1 }
 0x2ec   : >> { %3163 = vrot.lane.b32.xlu2 %v3155_v3, %s5575_s9 }
 0x2ed   : >> { %3161 = vrot.lane.b32.xlu1 %v3154_v46, %s5575_s9  ;;  %v3233_v46 = vmul.f32 %v7685_v42, %v3232_v47 }
 0x2ee   : >> { %3159 = vrot.lane.b32.xlu0 %v3153_v58, %s5575_s9  ;;  %v2769_v45 = vpop.permute.xlu2 %2768 }
 0x2ef   : >> { %v8082_v21 = vadd.f32 %v2769_v45, %v7965_v57  ;;  %v2692_v8 = vpop.permute.xlu1 %2691  ;;  %v2619_v57 = vsel %vm451_vm0, %v2616_v0, %v2618_v25 }
 0x2f0   : >> { %v8085_v1 = vadd.f32 %v2692_v8, %v2605_v38  ;;  %v2690_v61 = vpop.permute.xlu0 %2689  ;;  %v2624_v62 = vadd.f32 %v2619_v57, %v8009_v31  ;;  %v2838_v31 = vstv %s8097_s18  ;;  %v3239_v8 = vrot.slane %v3233_v46, 1  ;;  %s5125_s18 = sld [smem:[#allocation3 + $0xa6]] }
 0x2f1   : >> { %v8088_v5 = vadd.f32 %v2690_v61, %v2604_v29  ;;  %v2839_v54 = vmul.f32 %v7685_v42, %v2838_v31  ;;  %v2844_v29 = vstv %s8120_s11  ;;  %s5127_s11 = sld [smem:[#allocation3 + $0xbe]] }
 0x2f4   : >> { %3183 = vrot.lane.b32.xlu2 %v3175_v56, %s5575_s9 }
 0x2f5   : >> { %3181 = vrot.lane.b32.xlu1 %v3174_v24, %s5575_s9  ;;  %v3276_v24 = vmul.f32 %v7703_v28, %v3274_v26 }
 0x2f6   : >> { %3179 = vrot.lane.b32.xlu0 %v3173_v15, %s5575_s9  ;;  %v2794_v30 = vpop.permute.xlu2 %2793  ;;  %v3277_v15 = vmul.f32 %v7907_v35, %v3274_v26  ;;  %v10188_v26 = vld [vmem:[#allocation32_spill] sm:$0xff] }
 0x2f7   : >> { %v8103_v53 = vadd.f32 %v2794_v30, %v8007_v60  ;;  %v2717_v25 = vpop.permute.xlu1 %2716  ;;  %v3212_v60 = vstv %s5111_s25  ;;  %v3282_v30 = vrot.slane %v3276_v24, 1  ;;  %s5100_s25 = sld [smem:[#allocation3 + $0x69]] }
 0x2f8   : >> { %v8106_v39 = vadd.f32 %v2717_v25, %v2624_v62  ;;  %v2715_v22 = vpop.permute.xlu0 %2714  ;;  %v3215_v51 = vmul.f32 %v7907_v35, %v3212_v60  ;;  %v3214_v9 = vmul.f32 %v7703_v28, %v3212_v60  ;;  %v3213_v3 = vmul.f32 %v7685_v42, %v3212_v60 }
 0x2f9   : >> { %v8109_v43 = vadd.f32 %v2715_v22, %v2623_v17  ;;  %v3284_v62 = vrot.slane %v3277_v15, 1  ;;  %v3281_v17 = vrot.slane %v3275_v52, 1 }
 0x2fc   : >> { %3203 = vrot.lane.b32.xlu2 %v3195_v36, %s5575_s9 }
 0x2fd   : >> { %3201 = vrot.lane.b32.xlu1 %v3194_v4, %s5575_s9  ;;  %v3263_v4 = vrot.slane %v3256_v55, 1 }
 0x2fe   : >> { %3199 = vrot.lane.b32.xlu0 %v3193_v10, %s5575_s9  ;;  %v2819_v6 = vpop.permute.xlu2 %2818  ;;  %v3295_v10 = vstv %s5115_s12  ;;  %s5102_s12 = sld [smem:[#allocation3 + $0x81]] }
 0x2ff   : >> { %v8118_v11 = vadd.f32 %v2819_v6, %v8036_v18  ;;  %v2742_v23 = vpop.permute.xlu1 %2741  ;;  %v3254_v18 = vmul.f32 %v7685_v42, %v3253_v32 }
 0x300   : >> { %v8123_v20 = vadd.f32 %v2742_v23, %v8039_v13  ;;  %v2740_v37 = vpop.permute.xlu0 %2739  ;;  %v3234_v13 = vmul.f32 %v7703_v28, %v3232_v47  ;;  %v3283_v23 = vsel %vm451_vm0, %v3281_v17, %v3282_v30  ;;  %v3297_v47 = vmul.f32 %v7703_v28, %v3295_v10 }
 0x301   : >> { %v8130_v2 = vadd.f32 %v2740_v37, %v8041_v27  ;;  %v2841_v27 = vadd.f32 %v2839_v54, %v7759_v49  ;;  %v3260_v58 = vrot.slane %v3254_v18, 1  ;;  %v2846_v49 = vmul.f32 %v7703_v28, %v2844_v29 }
 0x302   : >> { %v3240_v12 = vrot.slane %v3234_v13, 1  ;;  %v3298_v37 = vmul.f32 %v7907_v35, %v3295_v10  ;;  %v3296_v54 = vmul.f32 %v7685_v42, %v3295_v10  ;;  %v2832_v13 = vstv %s5084_s15  ;;  %s5103_s15 = sld [smem:[#allocation3 + $0x8d]] }
 0x303   : >> { %v3262_v63 = vsel %vm451_vm0, %v3260_v58, %v3261_v40 }
 0x304   : >> { %3223 = vrot.lane.b32.xlu2 %v3215_v51, %s5575_s9  ;;  %v3243_v57 = vsel %vm451_vm0, %v3240_v12, %v3242_v16  ;;  %v3264_v51 = vsel %vm451_vm0, %v3261_v40, %v3263_v4  ;;  %v3305_v18 = vrot.slane %v3298_v37, 1  ;;  %v2833_v16 = vmul.f32 %v7685_v42, %v2832_v13 }
 0x305   : >> { %3221 = vrot.lane.b32.xlu1 %v3214_v9, %s5575_s9  ;;  %v3303_v9 = vrot.slane %v3297_v47, 1 }
 0x306   : >> { %3219 = vrot.lane.b32.xlu0 %v3213_v3, %s5575_s9  ;;  %v2876_v59 = vpop.permute.xlu2 %2875  ;;  %v3302_v3 = vrot.slane %v3296_v54, 1 }
 0x307   : >> { %v8143_v45 = vadd.f32 %v2876_v59, %v2841_v27  ;;  %v2767_v38 = vpop.permute.xlu1 %2766  ;;  %v3306_v40 = vsel %vm451_vm0, %v3303_v9, %v3305_v18  ;;  %v2834_v59 = vmul.f32 %v7703_v28, %v2832_v13 }
 0x308   : >> { %v8147_v0 = vadd.f32 %v2767_v38, %v8062_v7  ;;  %v2765_v61 = vpop.permute.xlu0 %2764  ;;  %v3241_v7 = vsel %vm451_vm0, %v3239_v8, %v3240_v12  ;;  %v3304_v12 = vsel %vm451_vm0, %v3302_v3, %v3303_v9  ;;  %v3472_v9 = vstv %s5124_s23  ;;  %s5131_s23 = sld [smem:[#allocation3 + $0xbf]] }
 0x309   : >> { %v8153_v56 = vadd.f32 %v2765_v61, %v8065_v44  ;;  %v2848_v44 = vadd.f32 %v2846_v49, %v7817_v14  ;;  %v3285_v14 = vsel %vm451_vm0, %v3282_v30, %v3284_v62  ;;  %v2836_v38 = vadd.f32 %v2834_v59, %v10188_v26  ;;  %v10189_v62 = vld [vmem:[#allocation34_spill] sm:$0xff] }
 0x30a   : >> { %v2835_v61 = vadd.f32 %v2833_v16, %v7695_v34  ;;  %v3356_v34 = vstv %s5118_s17  ;;  %v8231_v3 = vstv %s5096_s26  ;;  %v3473_v16 = vmul.f32 %v7685_v42, %v3472_v9  ;;  %s5129_s17 = sld [smem:[#allocation3 + $0xa7]] }
 0x30b   : >> { %v3357_v10 = vmul.f32 %v7685_v42, %v3356_v34  ;;  %s8429_s26 = sld [smem:[#allocation5 + $0x2]] }
 0x30c   : >> { %3265 = vrot.lane.b32.xlu2 %v3262_v63, %s5576_s13 }
 0x30d   : >> { %3246 = vrot.lane.b32.xlu1 %v3243_v57, %s5576_s13 }
 0x30e   : >> { %3244 = vrot.lane.b32.xlu0 %v3241_v7, %s5576_s13  ;;  %v2892_v25 = vpop.permute.xlu2 %2891  ;;  %v2845_v7 = vmul.f32 %v7685_v42, %v2844_v29 }
 0x30f   : >> { %v8166_v22 = vadd.f32 %v2892_v25, %v2848_v44  ;;  %v2792_v36 = vpop.permute.xlu1 %2791  ;;  %v2840_v44 = vmul.f32 %v7703_v28, %v2838_v31 }
 0x310   : >> { %v8169_v60 = vadd.f32 %v2792_v36, %v8085_v1  ;;  %v2790_v6 = vpop.permute.xlu0 %2789  ;;  %v3316_v1 = vstv %s5116_s14  ;;  %v2847_v25 = vadd.f32 %v2845_v7, %v10189_v62  ;;  %v2850_v36 = vstv %s5087_s21  ;;  %s5128_s14 = sld [smem:[#allocation3 + $0x9b]] }
 0x311   : >> { %v8172_v32 = vadd.f32 %v2790_v6, %v8088_v5  ;;  %v3317_v27 = vmul.f32 %v7685_v42, %v3316_v1  ;;  %v3319_v57 = vmul.f32 %v7907_v35, %v3316_v1  ;;  %v3318_v52 = vmul.f32 %v7703_v28, %v3316_v1  ;;  %v10190_v1 = vld [vmem:[#allocation33_spill] sm:$0xff]  ;;  %s5130_s21 = sld [smem:[#allocation3 + $0xb3]] }
 0x312   : >> { %v2842_v29 = vadd.f32 %v2840_v44, %v7753_v48  ;;  %v2852_v47 = vmul.f32 %v7703_v28, %v2850_v36  ;;  %v3376_v48 = vstv %s5119_s22  ;;  %s8390_s22 = sld [smem:[#allocation5 + $0x1]] }
 0x314   : >> { %3288 = vrot.lane.b32.xlu2 %v3285_v14, %s5576_s13 }
 0x315   : >> { %3286 = vrot.lane.b32.xlu1 %v3283_v23, %s5576_s13 }
 0x316   : >> { %3267 = vrot.lane.b32.xlu0 %v3264_v51, %s5576_s13  ;;  %v2918_v5 = vpop.permute.xlu2 %2917  ;;  %v2851_v51 = vmul.f32 %v7685_v42, %v2850_v36 }
 0x317   : >> { %v2817_v50 = vpop.permute.xlu1 %2816 }
 0x318   : >> { %v8184_v19 = vadd.f32 %v2817_v50, %v8106_v39  ;;  %v2815_v46 = vpop.permute.xlu0 %2814  ;;  %v3336_v39 = vstv %s5117_s16  ;;  %v2853_v50 = vadd.f32 %v2851_v51, %v7808_v33  ;;  %v8244_v33 = vmul.f32 %v7703_v28, %v8231_v3  ;;  %s5097_s16 = sld [smem:[#allocation3 + $0x45]] }
 0x319   : >> { %v8188_v58 = vadd.f32 %v2815_v46, %v8109_v43  ;;  %v3337_v24 = vmul.f32 %v7685_v42, %v3336_v39  ;;  %v3339_v14 = vmul.f32 %v7907_v35, %v3336_v39  ;;  %v3338_v23 = vmul.f32 %v7703_v28, %v3336_v39 }
 0x31a   : >> { %v3474_v39 = vmul.f32 %v7703_v28, %v3472_v9  ;;  %v8278_v51 = vstv %s5100_s25  ;;  %s5121_s25 = sld [smem:[#allocation3 + $0xa5]] }
 0x31c   : >> { %3323 = vrot.lane.b32.xlu2 %v3317_v27, %s5576_s13  ;;  %v3377_v27 = vmul.f32 %v7685_v42, %v3376_v48 }
 0x31d   : >> { %3309 = vrot.lane.b32.xlu1 %v3306_v40, %s5576_s13  ;;  %v2971_v40 = vmul.f32 %v7907_v35, %v8231_v3 }
 0x31e   : >> { %3307 = vrot.lane.b32.xlu0 %v3304_v12, %s5576_s13  ;;  %v2934_v43 = vpop.permute.xlu2 %2933  ;;  %v3359_v12 = vmul.f32 %v7907_v35, %v3356_v34 }
 0x31f   : >> { %v2864_v8 = vpop.permute.xlu1 %2863 }
 0x320   : >> { %v8199_v49 = vadd.f32 %v2864_v8, %v2836_v38  ;;  %v2862_v63 = vpop.permute.xlu0 %2861  ;;  %v2978_v38 = vrot.slane %v2971_v40, 1  ;;  %v3479_v8 = vrot.slane %v3473_v16, 1  ;;  %v8298_v16 = vld [vmem:[%s5698_s8 + $0x2d8] sm:$0xff] }
 0x321   : >> { %v2867_v15 = vadd.f32 %v2862_v63, %v2835_v61  ;;  %v3480_v61 = vrot.slane %v3474_v39, 1  ;;  %v8250_v63 = vstv %s5098_s28 }
 0x322   : >> { %v8264_v62 = vmul.f32 %v7703_v28, %v8250_v63 }
 0x323   : >> { %v8207_v55 = vadd.f32 %v2918_v5, %v2867_v15  ;;  %v2854_v5 = vadd.f32 %v2852_v47, %v10190_v1  ;;  %v2976_v15 = vrot.slane %v8244_v33, 1 }
 0x324   : >> { %3343 = vrot.lane.b32.xlu2 %v3337_v24, %s5576_s13 }
 0x325   : >> { %3327 = vrot.lane.b32.xlu1 %v3319_v57, %s5576_s13  ;;  %v3497_v57 = vstv %s5125_s18  ;;  %v2979_v7 = vsel %vm451_vm0, %v2976_v15, %v2978_v38  ;;  %s5120_s18 = sld [smem:[#allocation3 + $0x99]] }
 0x326   : >> { %3325 = vrot.lane.b32.xlu0 %v3318_v52, %s5576_s13  ;;  %v2960_v30 = vpop.permute.xlu2 %2959 }
 0x327   : >> { %v2890_v17 = vpop.permute.xlu1 %2889 }
 0x328   : >> { %v8217_v4 = vadd.f32 %v2890_v17, %v2847_v25  ;;  %v2878_v31 = vpop.permute.xlu0 %2877  ;;  %v3481_v17 = vsel %vm451_vm0, %v3479_v8, %v3480_v61 }
 0x329   : >> { %v2882_v6 = vadd.f32 %v2878_v31, %v2842_v29  ;;  %v8269_v29 = vld [vmem:[%s5698_s8 + $0x2d0] sm:$0xff]  ;;  %v3499_v31 = vmul.f32 %v7703_v28, %v3497_v57 }
 0x32a   : >> { %v3498_v36 = vmul.f32 %v8269_v29, %v3497_v57 }
 0x32b   : >> { %v8223_v37 = vadd.f32 %v2934_v43, %v2882_v6  ;;  %v3358_v43 = vmul.f32 %v7703_v28, %v3356_v34  ;;  %v3379_v34 = vmul.f32 %v7907_v35, %v3376_v48  ;;  %v3505_v47 = vrot.slane %v3499_v31, 1 }
 0x32c   : >> { %3363 = vrot.lane.b32.xlu2 %v3357_v10, %s5576_s13  ;;  %v3378_v10 = vmul.f32 %v7703_v28, %v3376_v48  ;;  %v3522_v48 = vstv %s5126_s6  ;;  %s5122_s6 = sld [smem:[#allocation3 + $0xb1]] }
 0x32d   : >> { %3347 = vrot.lane.b32.xlu1 %v3339_v14, %s5576_s13  ;;  %v3475_v14 = vmul.f32 %v7907_v35, %v3472_v9  ;;  %v3524_v39 = vmul.f32 %v8298_v16, %v3522_v48 }
 0x32e   : >> { %3345 = vrot.lane.b32.xlu0 %v3338_v23, %s5576_s13  ;;  %v3083_v54 = vpop.permute.xlu2 %3082  ;;  %v3010_v23 = vrot.slane %v8264_v62, 1 }
 0x32f   : >> { %v2906_v18 = vpop.permute.xlu1 %2905  ;;  %v3482_v9 = vrot.slane %v3475_v14, 1 }
 0x330   : >> { %v8233_v13 = vadd.f32 %v2906_v18, %v2854_v5  ;;  %v2904_v46 = vpop.permute.xlu0 %2903  ;;  %v8285_v18 = vstv %s5099_s7  ;;  %s5123_s7 = sld [smem:[#allocation3 + $0xbd]] }
 0x331   : >> { %v2909_v59 = vadd.f32 %v2904_v46, %v2853_v50  ;;  %v3483_v8 = vsel %vm451_vm0, %v3480_v61, %v3482_v9 }
 0x333   : >> { %v8246_v26 = vadd.f32 %v2960_v30, %v2909_v59  ;;  %v3003_v30 = vmul.f32 %v7685_v42, %v8250_v63 }
 0x334   : >> { %3383 = vrot.lane.b32.xlu2 %v3377_v27, %s5576_s13  ;;  %v3039_v27 = vmul.f32 %v7907_v35, %v8278_v51 }
 0x335   : >> { %3367 = vrot.lane.b32.xlu1 %v3359_v12, %s5576_s13  ;;  %v3009_v42 = vrot.slane %v3003_v30, 1  ;;  %v3523_v12 = vmul.f32 %v8269_v29, %v3522_v48 }
 0x336   : >> { %3365 = vrot.lane.b32.xlu0 %v3358_v43, %s5576_s13  ;;  %v3123_v24 = vpop.permute.xlu2 %3122  ;;  %v8303_v43 = vmul.f32 %v8298_v16, %v8285_v18 }
 0x337   : >> { %v8254_v52 = vpop.permute.xlu1 %2931  ;;  %v3011_v50 = vsel %vm451_vm0, %v3009_v42, %v3010_v23  ;;  %v3529_v30 = vrot.slane %v3523_v12, 1 }
 0x338   : >> { %v2920_v44 = vpop.permute.xlu0 %2919  ;;  %v9739_v61 = vrot.slane %v8303_v43, 1 }
 0x339   : >> { %v2924_v25 = vadd.f32 %v2920_v44, %v8199_v49  ;;  %v3504_v49 = vrot.slane %v3498_v36, 1  ;;  %v8308_v44 = vstv %s5101_s10 }
 0x33b   : >> { %v2983_v6 = vadd.f32 %v2979_v7, %v2924_v25  ;;  %v3506_v59 = vsel %vm451_vm0, %v3504_v49, %v3505_v47  ;;  %v3500_v7 = vmul.f32 %v7907_v35, %v3497_v57  ;;  %v3530_v25 = vrot.slane %v3524_v39, 1 }
 0x33c   : >> { %3484 = vrot.lane.b32.xlu2 %v3481_v17, %s5575_s9  ;;  %v3547_v57 = vstv %s5127_s11 }
 0x33d   : >> { %3387 = vrot.lane.b32.xlu1 %v3379_v34, %s5576_s13  ;;  %v8280_v1 = vadd.f32 %v3083_v54, %v2983_v6  ;;  %v3022_v54 = vmul.f32 %v7907_v35, %v8285_v18  ;;  %v3042_v34 = vadd.f32 %v3039_v27, %v8059_v41  ;;  %v3507_v6 = vrot.slane %v3500_v7, 1 }
 0x33e   : >> { %3385 = vrot.lane.b32.xlu0 %v3378_v10, %s5576_s13  ;;  %v3146_v28 = vpop.permute.xlu2 %3145  ;;  %v3531_v49 = vsel %vm451_vm0, %v3529_v30, %v3530_v25 }
 0x33f   : >> { %v8283_v5 = vpop.permute.xlu1 %2947  ;;  %v3508_v27 = vsel %vm451_vm0, %v3505_v47, %v3507_v6  ;;  %v3572_v47 = vstv %s5128_s14 }
 0x340   : >> { %v2946_v46 = vpop.permute.xlu0 %2945  ;;  %v3574_v30 = vmul.f32 %v8298_v16, %v3572_v47 }
 0x341   : >> { %v2951_v40 = vadd.f32 %v2946_v46, %v8217_v4  ;;  %v3029_v4 = vrot.slane %v3022_v54, 1  ;;  %v3525_v54 = vmul.f32 %v7907_v35, %v3522_v48 }
 0x343   : >> { %v3016_v38 = vadd.f32 %v3011_v50, %v2951_v40  ;;  %v3030_v41 = vsel %vm451_vm0, %v9739_v61, %v3029_v4  ;;  %v3549_v50 = vmul.f32 %v8298_v16, %v3547_v57  ;;  %v3532_v7 = vrot.slane %v3525_v54, 1 }
 0x344   : >> { %3509 = vrot.lane.b32.xlu2 %v3506_v59, %s5575_s9  ;;  %v3622_v61 = vstv %s5130_s21 }
 0x345   : >> { %3488 = vrot.lane.b32.xlu1 %v3482_v9, %s5575_s9  ;;  %v8312_v17 = vadd.f32 %v3123_v24, %v3016_v38  ;;  %v3047_v24 = vmul.f32 %v7907_v35, %v8308_v44  ;;  %v3548_v9 = vmul.f32 %v8269_v29, %v3547_v57  ;;  %v3555_v59 = vrot.slane %v3549_v50, 1 }
 0x346   : >> { %3486 = vrot.lane.b32.xlu0 %v3483_v8, %s5575_s9  ;;  %v3164_v36 = vpop.permute.xlu2 %3163  ;;  %v8337_v38 = vstv %s5102_s12  ;;  %v3597_v50 = vstv %s5129_s17 }
 0x347   : >> { %v8316_v31 = vadd.f32 %v3164_v36, %v3042_v34  ;;  %v8318_v10 = vpop.permute.xlu1 %3080  ;;  %v3050_v40 = vadd.f32 %v3047_v24, %v8082_v21  ;;  %v3573_v34 = vmul.f32 %v8269_v29, %v3572_v47  ;;  %v3533_v36 = vsel %vm451_vm0, %v3530_v25, %v3532_v7 }
 0x348   : >> { %v2962_v14 = vpop.permute.xlu0 %2961  ;;  %v3580_v24 = vrot.slane %v3574_v30, 1  ;;  %v3054_v62 = vmul.f32 %v8298_v16, %v8337_v38 }
 0x349   : >> { %v2966_v42 = vadd.f32 %v2962_v14, %v8233_v13  ;;  %v3554_v13 = vrot.slane %v3548_v9, 1  ;;  %v3579_v14 = vrot.slane %v3573_v34, 1 }
 0x34b   : >> { %v3034_v46 = vadd.f32 %v3030_v41, %v2966_v42  ;;  %v3556_v21 = vsel %vm451_vm0, %v3554_v13, %v3555_v59  ;;  %v8355_v42 = vstv %s5103_s15  ;;  %v3581_v13 = vsel %vm451_vm0, %v3579_v14, %v3580_v24 }
 0x34c   : >> { %3534 = vrot.lane.b32.xlu2 %v3531_v49, %s5575_s9  ;;  %v8357_v49 = vstv %s5097_s16  ;;  %v3063_v54 = vmul.f32 %v7907_v35, %v8355_v42 }
 0x34d   : >> { %3513 = vrot.lane.b32.xlu1 %v3507_v6, %s5575_s9  ;;  %v8334_v12 = vadd.f32 %v3146_v28, %v3034_v46  ;;  %v3055_v28 = vmul.f32 %v7907_v35, %v8337_v38  ;;  %v3550_v6 = vmul.f32 %v7907_v35, %v3547_v57  ;;  %v2986_v25 = vmul.f32 %v8269_v29, %v8357_v49 }
 0x34e   : >> { %3511 = vrot.lane.b32.xlu0 %v3508_v27, %s5575_s9  ;;  %v3184_v39 = vpop.permute.xlu2 %3183 }
 0x34f   : >> { %v8339_v48 = vadd.f32 %v3184_v39, %v3050_v40  ;;  %v8341_v8 = vpop.permute.xlu1 %3103  ;;  %v3058_v41 = vadd.f32 %v3055_v28, %v8103_v53  ;;  %v3557_v27 = vrot.slane %v3550_v6, 1  ;;  %v8372_v40 = vmul.f32 %v8298_v16, %v8357_v49 }
 0x350   : >> { %v8343_v4 = vpop.permute.xlu0 %3101  ;;  %v3598_v39 = vmul.f32 %v8269_v29, %v3597_v50  ;;  %v3037_v28 = vmul.f32 %v8269_v29, %v8278_v51  ;;  %v2992_v34 = vrot.slane %v2986_v25, 1  ;;  %v3066_v6 = vadd.f32 %v3063_v54, %v8118_v11 }
 0x351   : >> { %v3558_v30 = vsel %vm451_vm0, %v3555_v59, %v3557_v27  ;;  %v2937_v11 = vadd.f32 %v8254_v52, %v8143_v45 }
 0x352   : >> { %v3604_v14 = vrot.slane %v3598_v39, 1  ;;  %v3005_v39 = vmul.f32 %v7907_v35, %v8250_v63 }
 0x354   : >> { %3559 = vrot.lane.b32.xlu2 %v3556_v21, %s5575_s9  ;;  %v3038_v21 = vmul.f32 %v8298_v16, %v8278_v51 }
 0x355   : >> { %3538 = vrot.lane.b32.xlu1 %v3532_v7, %s5575_s9  ;;  %v8377_v7 = vmul.f32 %v8298_v16, %v3597_v50 }
 0x356   : >> { %3536 = vrot.lane.b32.xlu0 %v3533_v36, %s5575_s9  ;;  %v3204_v9 = vpop.permute.xlu2 %3203  ;;  %v3575_v36 = vmul.f32 %v7907_v35, %v3572_v47  ;;  %v3041_v59 = vadd.f32 %v3038_v21, %v8123_v20  ;;  %v3040_v47 = vadd.f32 %v3037_v28, %v8130_v2  ;;  %v3623_v2 = vmul.f32 %v8269_v29, %v3622_v61 }
 0x357   : >> { %v8362_v57 = vadd.f32 %v3204_v9, %v3058_v41  ;;  %v8364_v46 = vpop.permute.xlu1 %3143  ;;  %v2993_v41 = vrot.slane %v8372_v40, 1  ;;  %v3605_v9 = vrot.slane %v8377_v7, 1  ;;  %v8408_v21 = vmul.f32 %v8298_v16, %v3622_v61 }
 0x358   : >> { %v8366_v53 = vpop.permute.xlu0 %3124  ;;  %v3046_v28 = vmul.f32 %v8298_v16, %v8308_v44 }
 0x359   : >> { %v2994_v25 = vsel %vm451_vm0, %v2992_v34, %v2993_v41  ;;  %v3606_v52 = vsel %vm451_vm0, %v3604_v14, %v3605_v9  ;;  %v8426_v14 = vstv %s8390_s22 }
 0x35a   : >> { %v2999_v34 = vadd.f32 %v2994_v25, %v2937_v11 }
 0x35c   : >> { %3584 = vrot.lane.b32.xlu2 %v3581_v13, %s5576_s13  ;;  %v3582_v13 = vrot.slane %v3575_v36, 1  ;;  %v3600_v36 = vmul.f32 %v7907_v35, %v3597_v50  ;;  %v3647_v35 = vstv %s5131_s23  ;;  %v2952_v50 = vadd.f32 %v8283_v5, %v8166_v22 }
 0x35d   : >> { %3563 = vrot.lane.b32.xlu1 %v3557_v27, %s5575_s9  ;;  %v3648_v22 = vmul.f32 %v8269_v29, %v3647_v35 }
 0x35e   : >> { %3561 = vrot.lane.b32.xlu0 %v3558_v30, %s5575_s9  ;;  %v3224_v51 = vpop.permute.xlu2 %3223  ;;  %v3583_v63 = vsel %vm451_vm0, %v3580_v24, %v3582_v13  ;;  %v3045_v30 = vmul.f32 %v8269_v29, %v8308_v44  ;;  %s5132_s9 = sshll.u32 %s5565_s30, 7  ;;  %v3049_v44 = vadd.f32 %v3046_v28, %v8147_v0  ;;  %v8455_v28 = vld [vmem:[%s5698_s8 + $0x2e0] sm:$0x3]  ;;  %s3671_s8 = sld [smem:[#allocation5]] }
 0x35f   : >> { %v8400_v27 = vadd.f32 %v3224_v51, %v3066_v6  ;;  %v3162_v54 = vpop.permute.xlu1 %3161  ;;  %v3012_v6 = vrot.slane %v3005_v39, 1  ;;  %v3629_v51 = vrot.slane %v3623_v2, 1  ;;  %s8447_s28 = scalar_lea.vmem [#allocation2], %s5132_s9  ;;  %s308_s30 = sadd.s32 1, %s5565_s30  }
 0x360   : >> { %v8404_v7 = vadd.f32 %v3162_v54, %v3041_v59  ;;  %v3160_v20 = vpop.permute.xlu0 %3159  ;;  %v3630_v59 = vrot.slane %v8408_v21, 1  ;;  %v3607_v54 = vrot.slane %v3600_v36, 1  ;;  %p305_p8 = scmp.ge.s32.totalorder %s308_s30, 10  }
 0x361   : >> { %v8410_v45 = vadd.f32 %v3160_v20, %v3040_v47  ;;  %v3107_v47 = vadd.f32 %v8343_v4, %v2999_v34  ;;  %v3048_v4 = vadd.f32 %v3045_v30, %v8153_v56  ;;  %v3649_v56 = vmul.f32 %v8298_v16, %v3647_v35  ;;  %s8689_s10 = smov (%p305_p8), 0  }
 0x362   : >> { %v3631_v20 = vsel %vm451_vm0, %v3629_v51, %v3630_v59  ;;  %v3625_v34 = vmul.f32 %v8455_v28, %v3622_v61  ;;  %v3654_v30 = vrot.slane %v3648_v22, 1 }
 0x363   : >> { %v3655_v36 = vrot.slane %v3649_v56, 1 }
 0x364   : >> { %3609 = vrot.lane.b32.xlu2 %v3606_v52, %s5576_s13  ;;  %v3053_v52 = vmul.f32 %v8269_v29, %v8337_v38  ;;  %v3057_v38 = vadd.f32 %v3054_v62, %v8169_v60  ;;  %v3062_v60 = vmul.f32 %v8298_v16, %v8355_v42 }
 0x365   : >> { %3588 = vrot.lane.b32.xlu1 %v3582_v13, %s5576_s13  ;;  %v3013_v13 = vsel %vm451_vm0, %v3010_v23, %v3012_v6  ;;  %v3608_v23 = vsel %vm451_vm0, %v3605_v9, %v3607_v54  ;;  %v8463_v6 = vstv %s8429_s26 }
 0x366   : >> { %3586 = vrot.lane.b32.xlu0 %v3583_v63, %s5576_s13  ;;  %v3266_v24 = vpop.permute.xlu2 %3265  ;;  %v3017_v5 = vadd.f32 %v3013_v13, %v2952_v50  ;;  %v3056_v61 = vadd.f32 %v3053_v52, %v8172_v32  ;;  %v3650_v13 = vmul.f32 %v8455_v28, %v3647_v35 }
 0x367   : >> { %v3271_v11 = vadd.f32 %v3266_v24, %v3107_v47  ;;  %v3182_v25 = vpop.permute.xlu1 %3181  ;;  %v3632_v24 = vrot.slane %v3625_v34, 1  ;;  %v8506_v34 = vstv %s3671_s8 }
 0x368   : >> { %v8437_v39 = vadd.f32 %v3182_v25, %v3049_v44  ;;  %v3180_v0 = vpop.permute.xlu0 %3179  ;;  %v3129_v63 = vadd.f32 %v8366_v53, %v3017_v5  ;;  %v3656_v25 = vsel %vm451_vm0, %v3654_v30, %v3655_v36  ;;  %v2988_v5 = vmul.f32 %v8455_v28, %v8357_v49 }
 0x369   : >> { %v3682_v2 = vadd.f32 %v8426_v14, %v3271_v11  ;;  %v8441_v21 = vadd.f32 %v3180_v0, %v3048_v4  ;;  %v2969_v4 = vmul.f32 %v8269_v29, %v8231_v3  ;;  %v3633_v32 = vsel %vm451_vm0, %v3630_v59, %v3632_v24 }
 0x36a   : >> { %v3657_v59 = vrot.slane %v3650_v13, 1 }
 0x36b   : >> { %5135 = vst.msk [vmem:[%s8447_s28 + $0x10] sm:$0xff] %vm3677_vm1, %v3682_v2  ;;  %v2975_v0 = vrot.slane %v2969_v4, 1 }
 0x36c   : >> { %3634 = vrot.lane.b32.xlu2 %v3631_v20, %s5576_s13  ;;  %v3065_v20 = vadd.f32 %v3062_v60, %v8184_v19 }
 0x36d   : >> { %3613 = vrot.lane.b32.xlu1 %v3607_v54, %s5576_s13  ;;  %v3061_v54 = vmul.f32 %v8269_v29, %v8355_v42  ;;  %v2977_v62 = vsel %vm451_vm0, %v2975_v0, %v2976_v15 }
 0x36e   : >> { %3611 = vrot.lane.b32.xlu0 %v3608_v23, %s5576_s13  ;;  %v3289_v9 = vpop.permute.xlu2 %3288  ;;  %v3658_v23 = vsel %vm451_vm0, %v3655_v36, %v3657_v59  ;;  %v2982_v19 = vadd.f32 %v2977_v62, %v8207_v55  ;;  %v3020_v36 = vmul.f32 %v8269_v29, %v8285_v18 }
 0x36f   : >> { %v3293_v51 = vadd.f32 %v3289_v9, %v3129_v63  ;;  %v3202_v47 = vpop.permute.xlu1 %3201  ;;  %v3064_v22 = vadd.f32 %v3061_v54, %v8188_v58  ;;  %v2995_v58 = vrot.slane %v2988_v5, 1 }
 0x370   : >> { %v8467_v44 = vadd.f32 %v3202_v47, %v3057_v38  ;;  %v3200_v53 = vpop.permute.xlu0 %3199  ;;  %v3086_v33 = vadd.f32 %v8318_v10, %v2982_v19 }
 0x371   : >> { %v3691_v50 = vadd.f32 %v8463_v6, %v3293_v51  ;;  %v8470_v11 = vadd.f32 %v3200_v53, %v3056_v61  ;;  %v2996_v55 = vsel %vm451_vm0, %v2993_v41, %v2995_v58 }
 0x372   : >> { %v3000_v10 = vadd.f32 %v2996_v55, %v8223_v37 }
 0x373   : >> { %5140 = vst.msk [vmem:[%s8447_s28 + $0x28] sm:$0xff] %vm3677_vm1, %v3691_v50 }
 0x374   : >> { %3659 = vrot.lane.b32.xlu2 %v3656_v25, %s5576_s13  ;;  %v3108_v40 = vadd.f32 %v8341_v8, %v3000_v10 }
 0x375   : >> { %3638 = vrot.lane.b32.xlu1 %v3632_v24, %s5576_s13  ;;  %v10191_v24 = vrot.slane %v8303_v43, 1 }
 0x376   : >> { %3636 = vrot.lane.b32.xlu0 %v3633_v32, %s5576_s13  ;;  %v8486_v3 = vpop.permute.xlu2 %3323 }
 0x377   : >> { %v3222_v2 = vpop.permute.xlu1 %3221 }
 0x378   : >> { %v8490_v56 = vadd.f32 %v3222_v2, %v3065_v20  ;;  %v3220_v42 = vpop.permute.xlu0 %3219 }
 0x379   : >> { %v8492_v35 = vadd.f32 %v3220_v42, %v3064_v22 }
 0x37d   : >> { %3663 = vrot.lane.b32.xlu1 %v3657_v59, %s5576_s13  ;;  %v3396_v59 = vstv %s5120_s18 }
 0x37e   : >> { %3661 = vrot.lane.b32.xlu0 %v3658_v23, %s5576_s13  ;;  %v8503_v52 = vpop.permute.xlu2 %3343  ;;  %s5141_s13 = sld [smem:[#allocation5 + $0x3]]  ;;  %v3397_v5 = vmul.f32 %v8269_v29, %v3396_v59  ;;  %v8559_v23 = vmul.f32 %v8298_v16, %v3396_v59 }
 0x37f   : >> { %v3247_v15 = vpop.permute.xlu1 %3246 }
 0x380   : >> { %v3251_v49 = vadd.f32 %v3247_v15, %v8280_v1  ;;  %v3245_v63 = vpop.permute.xlu0 %3244  ;;  %v3026_v1 = vrot.slane %v3020_v36, 1  ;;  %v3403_v58 = vrot.slane %v3397_v5, 1  ;;  %v8564_v15 = vstv %s5121_s25 }
 0x381   : >> { %v3250_v30 = vadd.f32 %v3245_v63, %v3086_v33  ;;  %v3404_v33 = vrot.slane %v8559_v23, 1  ;;  %v3332_v63 = vadd.f32 %v8486_v3, %v8410_v45  ;;  %v3416_v36 = vmul.f32 %v8269_v29, %v8564_v15 }
 0x382   : >> { %v3674_v9 = vadd.f32 %v8506_v34, %v3251_v49  ;;  %v3028_v53 = vsel %vm451_vm0, %v3026_v1, %v10191_v24 }
 0x383   : >> { %v3673_v38 = vadd.f32 %v8506_v34, %v3250_v30  ;;  %v3033_v8 = vadd.f32 %v3028_v53, %v8246_v26  ;;  %v3405_v55 = vsel %vm451_vm0, %v3403_v58, %v3404_v33  ;;  %v3422_v1 = vrot.slane %v3416_v36, 1 }
 0x384   : >> { %3679 = vst.msk [vmem:[%s8447_s28 + $0x8] sm:$0xff] %vm3677_vm1, %v3674_v9  ;;  %v8538_v4 = vstv %s5141_s13  ;;  %v8577_v9 = vmul.f32 %v8298_v16, %v8564_v15  ;;  %v3411_v10 = vadd.f32 %v3405_v55, %v3332_v63 }
 0x385   : >> { %3678 = vst.msk [vmem:[%s8447_s28] sm:$0xff] %vm3677_vm1, %v3673_v38 }
 0x386   : >> { %v8521_v51 = vpop.permute.xlu2 %3363  ;;  %v3423_v45 = vrot.slane %v8577_v9, 1 }
 0x387   : >> { %v3287_v41 = vpop.permute.xlu1 %3286 }
 0x388   : >> { %v3292_v18 = vadd.f32 %v3287_v41, %v8312_v17  ;;  %v3268_v47 = vpop.permute.xlu0 %3267  ;;  %v3149_v17 = vadd.f32 %v8364_v46, %v3033_v8  ;;  %v3424_v24 = vsel %vm451_vm0, %v3422_v1, %v3423_v45 }
 0x389   : >> { %v3272_v61 = vadd.f32 %v3268_v47, %v3108_v40  ;;  %v8582_v40 = vstv %s5122_s6 }
 0x38a   : >> { %v3690_v37 = vadd.f32 %v8463_v6, %v3292_v18  ;;  %v3352_v18 = vadd.f32 %v8503_v52, %v8441_v21  ;;  %v3435_v53 = vmul.f32 %v8269_v29, %v8582_v40 }
 0x38b   : >> { %v3683_v50 = vadd.f32 %v8426_v14, %v3272_v61 }
 0x38c   : >> { %5139 = vst.msk [vmem:[%s8447_s28 + $0x20] sm:$0xff] %vm3677_vm1, %v3690_v37  ;;  %v8593_v37 = vmul.f32 %v8298_v16, %v8582_v40  ;;  %v3441_v21 = vrot.slane %v3435_v53, 1 }
 0x38d   : >> { %5136 = vst.msk [vmem:[%s8447_s28 + $0x18] sm:$0xff] %vm3677_vm1, %v3683_v50 }
 0x38e   : >> { %v8535_v25 = vpop.permute.xlu2 %3383  ;;  %v3442_v52 = vrot.slane %v8593_v37, 1 }
 0x38f   : >> { %v3310_v43 = vpop.permute.xlu1 %3309  ;;  %v3392_v1 = vadd.f32 %v8535_v25, %v8492_v35 }
 0x390   : >> { %v3314_v60 = vadd.f32 %v3310_v43, %v8334_v12  ;;  %v3308_v32 = vpop.permute.xlu0 %3307 }
 0x391   : >> { %v3313_v54 = vadd.f32 %v3308_v32, %v3149_v17  ;;  %v3430_v17 = vadd.f32 %v3424_v24, %v3352_v18 }
 0x392   : >> { %v3699_v13 = vadd.f32 %v8538_v4, %v3314_v60  ;;  %v8599_v60 = vstv %s5123_s7 }
 0x393   : >> { %v3698_v0 = vadd.f32 %v8538_v4, %v3313_v54  ;;  %v3372_v54 = vadd.f32 %v8521_v51, %v8470_v11  ;;  %v3454_v5 = vmul.f32 %v8269_v29, %v8599_v60  ;;  %v8610_v58 = vmul.f32 %v8298_v16, %v8599_v60 }
 0x394   : >> { %5144 = vst.msk [vmem:[%s8447_s28 + $0x38] sm:$0xff] %vm3677_vm1, %v3699_v13 }
 0x395   : >> { %5143 = vst.msk [vmem:[%s8447_s28 + $0x30] sm:$0xff] %vm3677_vm1, %v3698_v0  ;;  %v3460_v11 = vrot.slane %v3454_v5, 1  ;;  %v3461_v51 = vrot.slane %v8610_v58, 1 }
 0x396   : >> { %v3485_v26 = vpop.permute.xlu2 %3484 }
 0x397   : >> { %v8547_v20 = vpop.permute.xlu1 %3327  ;;  %v3493_v3 = vadd.f32 %v3485_v26, %v3411_v10  ;;  %v3443_v26 = vsel %vm451_vm0, %v3441_v21, %v3442_v52  ;;  %v3462_v16 = vsel %vm451_vm0, %v3460_v11, %v3461_v51 }
 0x398   : >> { %v8549_v2 = vpop.permute.xlu0 %3325  ;;  %v3449_v55 = vadd.f32 %v3443_v26, %v3372_v54  ;;  %v3468_v24 = vadd.f32 %v3462_v16, %v3392_v1  ;;  %v3334_v25 = vadd.f32 %v8547_v20, %v8316_v31 }
 0x39e   : >> { %v3510_v46 = vpop.permute.xlu2 %3509 }
 0x39f   : >> { %v8551_v22 = vpop.permute.xlu1 %3347  ;;  %v3518_v43 = vadd.f32 %v3510_v46, %v3430_v17 }
 0x3a0   : >> { %v8553_v12 = vpop.permute.xlu0 %3345 }
 0x3a6   : >> { %v3535_v42 = vpop.permute.xlu2 %3534 }
 0x3a7   : >> { %v8555_v62 = vpop.permute.xlu1 %3367  ;;  %v3543_v36 = vadd.f32 %v3535_v42, %v3449_v55 }
 0x3a8   : >> { %v8561_v19 = vpop.permute.xlu0 %3365 }
 0x3ae   : >> { %v3560_v49 = vpop.permute.xlu2 %3559 }
 0x3af   : >> { %v8568_v30 = vpop.permute.xlu1 %3387  ;;  %v3568_v42 = vadd.f32 %v3560_v49, %v3468_v24  ;;  %v3418_v49 = vmul.f32 %v8455_v28, %v8564_v15 }
 0x3b0   : >> { %v8579_v38 = vpop.permute.xlu0 %3385 }
 0x3b1   : >> { %v3425_v31 = vrot.slane %v3418_v49, 1 }
 0x3b6   : >> { %v3585_v41 = vpop.permute.xlu2 %3584 }
 0x3b7   : >> { %v3593_v47 = vadd.f32 %v3585_v41, %v3493_v3  ;;  %v3489_v61 = vpop.permute.xlu1 %3488 }
 0x3b8   : >> { %v3487_v50 = vpop.permute.xlu0 %3486 }
 0x3b9   : >> { %v3706_v8 = vadd.f32 %v8506_v34, %v3593_v47  ;;  %v3399_v47 = vmul.f32 %v8455_v28, %v3396_v59 }
 0x3bb   : >> { %5146 = vst.msk [vmem:[%s8447_s28 + $0x3f] sm:$0xfe] %vm3711_vm2, %v3706_v8  ;;  %v3406_v53 = vrot.slane %v3399_v47, 1 }
 0x3bd   : >> { %v3407_v59 = vsel %vm451_vm0, %v3404_v33, %v3406_v53  ;;  %v3413_v54 = vadd.f32 %v3406_v53, %v3334_v25  ;;  %v3353_v33 = vadd.f32 %v8553_v12, %v8437_v39 }
 0x3be   : >> { %v3610_v32 = vpop.permute.xlu2 %3609 }
 0x3bf   : >> { %v3618_v13 = vadd.f32 %v3610_v32, %v3518_v43  ;;  %v3514_v0 = vpop.permute.xlu1 %3513  ;;  %v3333_v43 = vadd.f32 %v8549_v2, %v8404_v7  ;;  %v3495_v26 = vadd.f32 %v3489_v61, %v3413_v54  ;;  %v3354_v7 = vadd.f32 %v8551_v22, %v8339_v48 }
 0x3c0   : >> { %v3512_v46 = vpop.permute.xlu0 %3511  ;;  %v3437_v61 = vmul.f32 %v8455_v28, %v8582_v40 }
 0x3c1   : >> { %v3718_v63 = vadd.f32 %v8426_v14, %v3618_v13  ;;  %v3412_v13 = vadd.f32 %v3407_v59, %v3333_v43  ;;  %v3432_v11 = vadd.f32 %v3425_v31, %v3354_v7 }
 0x3c2   : >> { %v3444_v22 = vrot.slane %v3437_v61, 1 }
 0x3c3   : >> { %5151 = vst.msk [vmem:[%s8447_s28 + $0x4f] sm:$0xfe] %vm3711_vm2, %v3718_v63  ;;  %v3494_v20 = vadd.f32 %v3487_v50, %v3412_v13  ;;  %v3426_v63 = vsel %vm451_vm0, %v3423_v45, %v3425_v31  ;;  %v3520_v39 = vadd.f32 %v3514_v0, %v3432_v11  ;;  %v3374_v45 = vadd.f32 %v8555_v62, %v8362_v57 }
 0x3c4   : >> { %v3431_v48 = vadd.f32 %v3426_v63, %v3353_v33  ;;  %v3445_v1 = vsel %vm451_vm0, %v3442_v52, %v3444_v22  ;;  %v3456_v0 = vmul.f32 %v8455_v28, %v8599_v60  ;;  %v3394_v52 = vadd.f32 %v8568_v30, %v8400_v27 }
 0x3c5   : >> { %v3451_v16 = vadd.f32 %v3444_v22, %v3374_v45 }
 0x3c6   : >> { %v3635_v10 = vpop.permute.xlu2 %3634  ;;  %v3519_v12 = vadd.f32 %v3512_v46, %v3431_v48  ;;  %v3463_v62 = vrot.slane %v3456_v0, 1 }
 0x3c7   : >> { %v3643_v29 = vadd.f32 %v3635_v10, %v3543_v36  ;;  %v3539_v3 = vpop.permute.xlu1 %3538 }
 0x3c8   : >> { %v3537_v41 = vpop.permute.xlu0 %3536  ;;  %v3464_v47 = vsel %vm451_vm0, %v3461_v51, %v3463_v62  ;;  %v3470_v24 = vadd.f32 %v3463_v62, %v3394_v52 }
 0x3c9   : >> { %v3728_v18 = vadd.f32 %v8463_v6, %v3643_v29 }
 0x3cb   : >> { %5156 = vst.msk [vmem:[%s8447_s28 + $0x5f] sm:$0xfe] %vm3711_vm2, %v3728_v18 }
 0x3ce   : >> { %v3660_v8 = vpop.permute.xlu2 %3659 }
 0x3cf   : >> { %v3668_v17 = vadd.f32 %v3660_v8, %v3568_v42  ;;  %v3564_v35 = vpop.permute.xlu1 %3563 }
 0x3d0   : >> { %v3562_v21 = vpop.permute.xlu0 %3561  ;;  %v3570_v30 = vadd.f32 %v3564_v35, %v3470_v24 }
 0x3d1   : >> { %v3738_v32 = vadd.f32 %v8538_v4, %v3668_v17 }
 0x3d3   : >> { %5161 = vst.msk [vmem:[%s8447_s28 + $0x6f] sm:$0xfe] %vm3711_vm2, %v3738_v32 }
 0x3d7   : >> { %v3589_v5 = vpop.permute.xlu1 %3588 }
 0x3d8   : >> { %v3595_v2 = vadd.f32 %v3589_v5, %v3495_v26  ;;  %v3587_v23 = vpop.permute.xlu0 %3586 }
 0x3d9   : >> { %v3594_v15 = vadd.f32 %v3587_v23, %v3494_v20 }
 0x3da   : >> { %v3708_v50 = vadd.f32 %v8506_v34, %v3595_v2 }
 0x3db   : >> { %v3707_v55 = vadd.f32 %v8506_v34, %v3594_v15  ;;  %v3373_v34 = vadd.f32 %v8561_v19, %v8467_v44  ;;  %v3545_v44 = vadd.f32 %v3539_v3, %v3451_v16 }
 0x3dc   : >> { %5148 = vst.msk [vmem:[%s8447_s28 + $0x4f] sm:$0x1] %vm3714_vm3, %v3708_v50 }
 0x3dd   : >> { %5147 = vst.msk [vmem:[%s8447_s28 + $0x47] sm:$0xff] %vm3677_vm1, %v3707_v55  ;;  %v3450_v57 = vadd.f32 %v3445_v1, %v3373_v34 }
 0x3df   : >> { %v3614_v9 = vpop.permute.xlu1 %3613  ;;  %v3544_v19 = vadd.f32 %v3537_v41, %v3450_v57 }
 0x3e0   : >> { %v3620_v40 = vadd.f32 %v3614_v9, %v3520_v39  ;;  %v3612_v36 = vpop.permute.xlu0 %3611 }
 0x3e1   : >> { %v3619_v10 = vadd.f32 %v3612_v36, %v3519_v12 }
 0x3e2   : >> { %v3720_v29 = vadd.f32 %v8426_v14, %v3620_v40 }
 0x3e3   : >> { %v3719_v46 = vadd.f32 %v8426_v14, %v3619_v10  ;;  %v3393_v14 = vadd.f32 %v8579_v38, %v8490_v56 }
 0x3e4   : >> { %5153 = vst.msk [vmem:[%s8447_s28 + $0x5f] sm:$0x1] %vm3714_vm3, %v3720_v29 }
 0x3e5   : >> { %5152 = vst.msk [vmem:[%s8447_s28 + $0x57] sm:$0xff] %vm3677_vm1, %v3719_v46  ;;  %v3469_v27 = vadd.f32 %v3464_v47, %v3393_v14 }
 0x3e7   : >> { %v3639_v37 = vpop.permute.xlu1 %3638  ;;  %v3569_v42 = vadd.f32 %v3562_v21, %v3469_v27 }
 0x3e8   : >> { %v3645_v28 = vadd.f32 %v3639_v37, %v3545_v44  ;;  %v3637_v60 = vpop.permute.xlu0 %3636 }
 0x3e9   : >> { %v3644_v18 = vadd.f32 %v3637_v60, %v3544_v19 }
 0x3ea   : >> { %v3730_v3 = vadd.f32 %v8463_v6, %v3645_v28 }
 0x3eb   : >> { %v3729_v41 = vadd.f32 %v8463_v6, %v3644_v18 }
 0x3ec   : >> { %5158 = vst.msk [vmem:[%s8447_s28 + $0x6f] sm:$0x1] %vm3714_vm3, %v3730_v3 }
 0x3ed   : >> { %5157 = vst.msk [vmem:[%s8447_s28 + $0x67] sm:$0xff] %vm3677_vm1, %v3729_v41 }
 0x3ef   : >> { %v3664_v56 = vpop.permute.xlu1 %3663 }
 0x3f0   : >> { %v3670_v38 = vadd.f32 %v3664_v56, %v3570_v30  ;;  %v3662_v53 = vpop.permute.xlu0 %3661 }
 0x3f1   : >> { %v3669_v58 = vadd.f32 %v3662_v53, %v3569_v42  ;;  %307 = sbr.rel (!%p305_p8) target bundleno = 35 (0x23), region = 145 }
 0x3f2   : >> { %v3740_v8 = vadd.f32 %v8538_v4, %v3670_v38 }
 0x3f3   : >> { %v3739_v51 = vadd.f32 %v8538_v4, %v3669_v58 }
 0x3f4   : >> { %5163 = vst.msk [vmem:[%s8447_s28 + $0x7f] sm:$0x1] %vm3714_vm3, %v3740_v8 }
 0x3f5   : >> { %5162 = vst.msk [vmem:[%s8447_s28 + $0x77] sm:$0xff] %vm3677_vm1, %v3739_v51 }
 0x3f6 LB: >> { %s3756_s11 = sld [smem:[#allocation7]]  ;;  %s5164_s14 = sshll.u32 %s5569_s10, 7  ;;  %vm4504_vm4 = vcmask 523520   ;;  %s5569_s10 = sphi %s8689_s10, %s3751_s10  }
 0x3f7   : >> { %s5171_s12 = sld [smem:[#allocation7 + $0x1]]  ;;  %s8695_s21 = scalar_lea.vmem [#allocation2], %s5164_s14 }
 0x3f8   : >> { %s5178_s15 = sld [smem:[#allocation7 + $0x2]] }
 0x3f9   : >> { %s5185_s16 = sld [smem:[#allocation7 + $0x3]] }
 0x3fa   : >> { %s5192_s17 = sld [smem:[#allocation7 + $0x10]] }
 0x3fb   : >> { %s5203_s29 = sld [smem:[#allocation7 + $0x11]] }
 0x3fc   : >> { %v8698_v6 = vld [vmem:[%s8695_s21 + $0x40] sm:$0xff]  ;;  %v8701_v4 = vld [vmem:[%s8695_s21 + $0x48] sm:$0xff]  ;;  %v8704_v17 = vld [vmem:[%s8695_s21 + $0x50] sm:$0xff]  ;;  %v8709_v25 = vstv %s3756_s11  ;;  %s8711_s30 = sld [smem:[#allocation7 + $0x12]] }
 0x3fd   : >> { %v8707_v35 = vld [vmem:[%s8695_s21 + $0x58] sm:$0xff]  ;;  %v8714_v21 = vld [vmem:[%s8695_s21 + $0x60] sm:$0xff]  ;;  %v8717_v43 = vld [vmem:[%s8695_s21 + $0x68] sm:$0xff]  ;;  %v8719_v32 = vstv %s5171_s12  ;;  %s8721_s22 = sld [smem:[#allocation7 + $0x13]]  ;;  %v4174_v59 = vmul.f32 %v8698_v6, %v8709_v25  ;;  %v4175_v49 = vmul.f32 %v8701_v4, %v8709_v25 }
 0x3fe   : >> { %v8728_v54 = vld [vmem:[%s8695_s21 + $0x70] sm:$0xff]  ;;  %v8730_v13 = vstv %s5178_s15  ;;  %v4186_v26 = vmul.f32 %v8704_v17, %v8719_v32  ;;  %v4187_v31 = vmul.f32 %v8707_v35, %v8719_v32  ;;  %v8737_v20 = vld [vmem:[%s8695_s21 + $0x78] sm:$0xff]  ;;  %v8740_v5 = vld [vmem:[%s8695_s21 + $0xc0] sm:$0xff]  ;;  %s8742_s23 = sld [smem:[#allocation8]] }
 0x3ff   : >> { %10192 = vst [vmem:[#allocation142_spill] sm:$0xff] %v8730_v13  ;;  %v8744_v7 = vstv %s5185_s16  ;;  %v4206_v2 = vmul.f32 %v8714_v21, %v8730_v13  ;;  %v4207_v23 = vmul.f32 %v8717_v43, %v8730_v13  ;;  %v8751_v33 = vld [vmem:[%s8695_s21 + $0xc8] sm:$0xff]  ;;  %s8753_s9 = sld [smem:[#allocation7 + $0x4]]  ;;  %v8760_v55 = vld [vmem:[%s8695_s21 + $0xd0] sm:$0xff]  ;;  %v8763_v11 = vld [vmem:[%s8695_s21 + $0xd8] sm:$0xff] }
 0x400   : >> { %10193 = vst [vmem:[#allocation143_spill] sm:$0xff] %v8744_v7  ;;  %v8755_v15 = vstv %s5192_s17  ;;  %v4188_v63 = vadd.f32 %v4186_v26, %v4174_v59  ;;  %v4189_v61 = vadd.f32 %v4187_v31, %v4175_v49  ;;  %v4226_v50 = vmul.f32 %v8728_v54, %v8744_v7  ;;  %s5172_s26 = sld [smem:[#allocation7 + $0x5]]  ;;  %v8772_v12 = vld [vmem:[%s8695_s21 + $0xe0] sm:$0xff]  ;;  %v8775_v9 = vld [vmem:[%s8695_s21 + $0xe8] sm:$0xff]  ;;  %v8783_v10 = vld [vmem:[%s8695_s21 + $0xf0] sm:$0xff] }
 0x401   : >> { %10194 = vst [vmem:[#allocation144_spill] sm:$0xff] %v8755_v15  ;;  %v8765_v48 = vstv %s5203_s29  ;;  %v4227_v39 = vmul.f32 %v8737_v20, %v8744_v7  ;;  %v4246_v22 = vmul.f32 %v8740_v5, %v8755_v15  ;;  %s5179_s28 = sld [smem:[#allocation7 + $0x6]]  ;;  %v4247_v34 = vmul.f32 %v8751_v33, %v8755_v15  ;;  %v8786_v1 = vld [vmem:[%s8695_s21 + $0xf8] sm:$0xff] }
 0x402   : >> { %10195 = vst [vmem:[#allocation145_spill] sm:$0xff] %v8765_v48  ;;  %v8778_v45 = vstv %s8711_s30  ;;  %v4208_v40 = vadd.f32 %v4206_v2, %v4188_v63  ;;  %v4209_v36 = vadd.f32 %v4207_v23, %v4189_v61  ;;  %s5186_s8 = sld [smem:[#allocation7 + $0x7]]  ;;  %v4274_v29 = vmul.f32 %v8760_v55, %v8765_v48 }
 0x403   : >> { %10196 = vst [vmem:[#allocation146_spill] sm:$0xff] %v8778_v45  ;;  %v8789_v0 = vstv %s8721_s22  ;;  %v4275_v46 = vmul.f32 %v8763_v11, %v8765_v48  ;;  %s5193_s13 = sld [smem:[#allocation7 + $0x14]]  ;;  %v4310_v44 = vmul.f32 %v8772_v12, %v8778_v45  ;;  %v4311_v62 = vmul.f32 %v8775_v9, %v8778_v45  ;;  %s5577_s22 = smov 32  }
 0x404   : >> { %10197 = vst [vmem:[#allocation147_spill] sm:$0xff] %v8789_v0  ;;  %v4228_v16 = vadd.f32 %v4226_v50, %v4208_v40  ;;  %v4229_v57 = vadd.f32 %v4227_v39, %v4209_v36  ;;  %s5204_s18 = sld [smem:[#allocation7 + $0x15]]  ;;  %v4346_v19 = vmul.f32 %v8783_v10, %v8789_v0  ;;  %v4347_v37 = vmul.f32 %v8786_v1, %v8789_v0 }
 0x405   : >> { %v8804_v52 = vstv %s8742_s23  ;;  %v8807_v28 = vstv %s8753_s9  ;;  %s5215_s25 = sld [smem:[#allocation7 + $0x16]] }
 0x406   : >> { %10198 = vst [vmem:[#allocation148_spill] sm:$0xff] %v8807_v28  ;;  %v4248_v60 = vadd.f32 %v4246_v22, %v4228_v16  ;;  %v4249_v14 = vadd.f32 %v4247_v34, %v4229_v57  ;;  %v8809_v18 = vstv %s5172_s26  ;;  %s5226_s6 = sld [smem:[#allocation7 + $0x17]]  ;;  %v4176_v47 = vmul.f32 %v8698_v6, %v8807_v28 }
 0x407   : >> { %10199 = vst [vmem:[#allocation149_spill] sm:$0xff] %v8809_v18  ;;  %v8813_v3 = vstv %s5179_s28  ;;  %v4177_v41 = vmul.f32 %v8701_v4, %v8807_v28  ;;  %v4190_v24 = vmul.f32 %v8704_v17, %v8809_v18  ;;  %v4191_v27 = vmul.f32 %v8707_v35, %v8809_v18  ;;  %s8821_s7 = sld [smem:[#allocation8 + $0x1]] }
 0x408   : >> { %10200 = vst [vmem:[#allocation150_spill] sm:$0xff] %v8813_v3  ;;  %v4276_v30 = vadd.f32 %v4274_v29, %v4248_v60  ;;  %v4277_v42 = vadd.f32 %v4275_v46, %v4249_v14  ;;  %v8823_v56 = vstv %s5186_s8  ;;  %v4210_v38 = vmul.f32 %v8714_v21, %v8813_v3  ;;  %s8827_s11 = sld [smem:[#allocation7 + $0xc]] }
 0x409   : >> { %10201 = vst [vmem:[#allocation151_spill] sm:$0xff] %v8823_v56  ;;  %v8829_v53 = vstv %s5193_s13  ;;  %v4192_v58 = vadd.f32 %v4190_v24, %v4176_v47  ;;  %v4193_v8 = vadd.f32 %v4191_v27, %v4177_v41  ;;  %v4211_v51 = vmul.f32 %v8717_v43, %v8813_v3  ;;  %s8833_s12 = sld [smem:[#allocation7 + $0xd]] }
 0x40a   : >> { %10202 = vst [vmem:[#allocation152_spill] sm:$0xff] %v8829_v53  ;;  %v4312_v59 = vadd.f32 %v4310_v44, %v4276_v30  ;;  %v4313_v49 = vadd.f32 %v4311_v62, %v4277_v42  ;;  %v8835_v26 = vstv %s5204_s18  ;;  %v4230_v31 = vmul.f32 %v8728_v54, %v8823_v56  ;;  %s8839_s14 = sld [smem:[#allocation7 + $0xe]] }
 0x40b   : >> { %10203 = vst [vmem:[#allocation153_spill] sm:$0xff] %v8835_v26  ;;  %v8841_v2 = vstv %s5215_s25  ;;  %v4212_v23 = vadd.f32 %v4210_v38, %v4192_v58  ;;  %v4213_v63 = vadd.f32 %v4211_v51, %v4193_v8  ;;  %v4231_v61 = vmul.f32 %v8737_v20, %v8823_v56  ;;  %s8845_s15 = sld [smem:[#allocation7 + $0xf]] }
 0x40c   : >> { %10204 = vst [vmem:[#allocation154_spill] sm:$0xff] %v8841_v2  ;;  %v4348_v50 = vadd.f32 %v4346_v19, %v4312_v59  ;;  %v4349_v39 = vadd.f32 %v4347_v37, %v4313_v49  ;;  %v8847_v22 = vstv %s5226_s6  ;;  %v4250_v40 = vmul.f32 %v8740_v5, %v8829_v53  ;;  %s5195_s16 = sld [smem:[#allocation7 + $0x1c]] }
 0x40d   : >> { %10205 = vst [vmem:[#allocation155_spill] sm:$0xff] %v8847_v22  ;;  %v4232_v36 = vadd.f32 %v4230_v31, %v4212_v23  ;;  %v4233_v34 = vadd.f32 %v4231_v61, %v4213_v63  ;;  %v4251_v29 = vmul.f32 %v8751_v33, %v8829_v53  ;;  %v4278_v46 = vmul.f32 %v8760_v55, %v8835_v26  ;;  %s5206_s17 = sld [smem:[#allocation7 + $0x1d]] }
 0x40e   : >> { %v4494_v16 = vadd.f32 %v8804_v52, %v4348_v50  ;;  %v4495_v57 = vadd.f32 %v8804_v52, %v4349_v39  ;;  %v4279_v44 = vmul.f32 %v8763_v11, %v8835_v26  ;;  %v4314_v62 = vmul.f32 %v8772_v12, %v8841_v2  ;;  %s5217_s29 = sld [smem:[#allocation7 + $0x1e]] }
 0x40f   : >> { %v4252_v19 = vadd.f32 %v4250_v40, %v4232_v36  ;;  %v4253_v37 = vadd.f32 %v4251_v29, %v4233_v34  ;;  %v4315_v60 = vmul.f32 %v8775_v9, %v8841_v2  ;;  %v4350_v14 = vmul.f32 %v8783_v10, %v8847_v22  ;;  %s5228_s30 = sld [smem:[#allocation7 + $0x1f]] }
 0x410   : >> { %4498 = vrot.lane.b32.xlu0 %v4494_v16, %s5577_s22  ;;  %v4351_v47 = vmul.f32 %v8786_v1, %v8847_v22  ;;  %v8869_v41 = vstv %s8821_s7  ;;  %v8872_v24 = vstv %s8827_s11  ;;  %v8875_v27 = vstv %s8833_s12  ;;  %s5317_s23 = sld [smem:[#allocation8 + $0x3]] }
 0x411   : >> { %10206 = vst [vmem:[#allocation156_spill] sm:$0xff] %v8872_v24  ;;  %v4280_v30 = vadd.f32 %v4278_v46, %v4252_v19  ;;  %v4281_v42 = vadd.f32 %v4279_v44, %v4253_v37  ;;  %v8878_v38 = vstv %s8839_s14  ;;  %v8881_v58 = vstv %s8845_s15  ;;  %s8883_s9 = sld [smem:[#allocation7 + $0x20]] }
 0x412   : >> { %10207 = vst [vmem:[#allocation157_spill] sm:$0xff] %v8875_v27  ;;  %v8885_v8 = vstv %s5195_s16  ;;  %v4180_v51 = vmul.f32 %v8698_v6, %v8872_v24  ;;  %v4198_v59 = vmul.f32 %v8704_v17, %v8875_v27  ;;  %v4218_v49 = vmul.f32 %v8714_v21, %v8878_v38  ;;  %s8893_s26 = sld [smem:[#allocation7 + $0x21]] }
 0x413   : >> { %10208 = vst [vmem:[#allocation158_spill] sm:$0xff] %v8878_v38  ;;  %v4316_v31 = vadd.f32 %v4314_v62, %v4280_v30  ;;  %v4317_v23 = vadd.f32 %v4315_v60, %v4281_v42  ;;  %v8895_v63 = vstv %s5206_s17  ;;  %v4238_v61 = vmul.f32 %v8728_v54, %v8881_v58  ;;  %s8899_s28 = sld [smem:[#allocation7 + $0x22]] }
 0x414   : >> { %10209 = vst [vmem:[#allocation159_spill] sm:$0xff] %v8881_v58  ;;  %v8901_v50 = vstv %s5217_s29  ;;  %v4200_v39 = vadd.f32 %v4198_v59, %v4180_v51  ;;  %v4258_v40 = vmul.f32 %v8740_v5, %v8885_v8  ;;  %v4286_v36 = vmul.f32 %v8760_v55, %v8895_v63  ;;  %s8907_s8 = sld [smem:[#allocation7 + $0x23]] }
 0x415   : >> { %10210 = vst [vmem:[#allocation160_spill] sm:$0xff] %v8885_v8  ;;  %v4352_v34 = vadd.f32 %v4350_v14, %v4316_v31  ;;  %v4353_v29 = vadd.f32 %v4351_v47, %v4317_v23  ;;  %v8909_v46 = vstv %s5228_s30  ;;  %v4322_v16 = vmul.f32 %v8772_v12, %v8901_v50  ;;  %s5236_s13 = sld [smem:[#allocation7 + $0x30]] }
 0x416   : >> { %10211 = vst [vmem:[#allocation161_spill] sm:$0xff] %v8895_v63  ;;  %v4220_v44 = vadd.f32 %v4218_v49, %v4200_v39  ;;  %v4358_v62 = vmul.f32 %v8783_v10, %v8909_v46  ;;  %v8915_v19 = vstv %s5317_s23  ;;  %v4181_v37 = vmul.f32 %v8701_v4, %v8872_v24  ;;  %s8919_s18 = sld [smem:[#allocation7 + $0x31]] }
 0x417   : >> { %10212 = vst [vmem:[#allocation162_spill] sm:$0xff] %v8901_v50  ;;  %v4509_v60 = vadd.f32 %v8869_v41, %v4352_v34  ;;  %v4510_v14 = vadd.f32 %v8869_v41, %v4353_v29  ;;  %v4199_v47 = vmul.f32 %v8707_v35, %v8875_v27  ;;  %v4219_v30 = vmul.f32 %v8717_v43, %v8878_v38  ;;  %s8927_s25 = sld [smem:[#allocation7 + $0x32]] }
 0x418   : >> { %10213 = vst [vmem:[#allocation163_spill] sm:$0xff] %v8909_v46  ;;  %4500 = vrot.lane.b32.xlu0 %v4495_v57, %s5577_s22  ;;  %v4240_v42 = vadd.f32 %v4238_v61, %v4220_v44  ;;  %v4239_v51 = vmul.f32 %v8737_v20, %v8881_v58  ;;  %v4259_v59 = vmul.f32 %v8751_v33, %v8885_v8  ;;  %s8936_s6 = sld [smem:[#allocation7 + $0x33]]  ;;  %v8946_v61 = vstv %s8883_s9  ;;  %v8982_v58 = vld [vmem:[%s8695_s21 + $0x178] sm:$0xff] }
 0x419   : >> { %10214 = vst [vmem:[#allocation164_spill] sm:$0xff] %v8915_v19  ;;  %v4287_v49 = vmul.f32 %v8763_v11, %v8895_v63  ;;  %4513 = vrot.lane.b32.xlu1 %v4509_v60, %s5577_s22  ;;  %v4201_v31 = vadd.f32 %v4199_v47, %v4181_v37  ;;  %v4323_v57 = vmul.f32 %v8775_v9, %v8901_v50  ;;  %s8948_s7 = sld [smem:[#allocation7 + $0x8]]  ;;  %v8951_v34 = vstv %s8893_s26  ;;  %v8960_v37 = vld [vmem:[%s8695_s21 + $0x148] sm:$0xff] }
 0x41a   : >> { %v8943_v23 = vmul.f32 %v8786_v1, %v8909_v46  ;;  %v4260_v39 = vadd.f32 %v4258_v40, %v4240_v42  ;;  %v8954_v29 = vstv %s8899_s28  ;;  %v8957_v44 = vstv %s8907_s8  ;;  %s5173_s11 = sld [smem:[#allocation7 + $0x9]]  ;;  %v8969_v42 = vld [vmem:[%s8695_s21 + $0x158] sm:$0xff]  ;;  %v8972_v50 = vld [vmem:[%s8695_s21 + $0x168] sm:$0xff] }
 0x41b   : >> { %v4221_v60 = vadd.f32 %v4219_v30, %v4201_v31  ;;  %v8962_v47 = vstv %s5236_s13  ;;  %v4263_v46 = vmul.f32 %v8751_v33, %v8946_v61  ;;  %v4291_v40 = vmul.f32 %v8763_v11, %v8951_v34  ;;  %s5180_s12 = sld [smem:[#allocation7 + $0xa]] }
 0x41c   : >> { %v4288_v63 = vadd.f32 %v4286_v36, %v4260_v39  ;;  %v8975_v8 = vstv %s8919_s18  ;;  %v4327_v30 = vmul.f32 %v8775_v9, %v8954_v29  ;;  %v4363_v31 = vmul.f32 %v8786_v1, %v8957_v44  ;;  %s5187_s14 = sld [smem:[#allocation7 + $0xb]] }
 0x41d   : >> { %10215 = vst [vmem:[#allocation165_spill] sm:$0xff] %v8975_v8  ;;  %v4241_v38 = vadd.f32 %v4239_v51, %v4221_v60  ;;  %v8985_v27 = vstv %s8927_s25  ;;  %v4293_v24 = vadd.f32 %v4291_v40, %v4263_v46  ;;  %v4383_v22 = vmul.f32 %v8960_v37, %v8962_v47  ;;  %s5194_s15 = sld [smem:[#allocation7 + $0x18]] }
 0x41e   : >> { %10216 = vst [vmem:[#allocation166_spill] sm:$0xff] %v8985_v27  ;;  %v4324_v36 = vadd.f32 %v4322_v16, %v4288_v63  ;;  %v8990_v39 = vstv %s8936_s6  ;;  %v4403_v2 = vmul.f32 %v8969_v42, %v8975_v8  ;;  %v4423_v26 = vmul.f32 %v8972_v50, %v8985_v27  ;;  %s5205_s16 = sld [smem:[#allocation7 + $0x19]] }
 0x41f   : >> { %10217 = vst [vmem:[#allocation167_spill] sm:$0xff] %v8990_v39  ;;  %v4261_v53 = vadd.f32 %v4259_v59, %v4241_v38  ;;  %v4329_v56 = vadd.f32 %v4327_v30, %v4293_v24  ;;  %v4443_v51 = vmul.f32 %v8982_v58, %v8990_v39  ;;  %v8999_v46 = vstv %s8948_s7  ;;  %s5216_s17 = sld [smem:[#allocation7 + $0x1a]] }
 0x420   : >> { %10218 = vst [vmem:[#allocation168_spill] sm:$0xff] %v8999_v46  ;;  %v4360_v60 = vadd.f32 %v4358_v62, %v4324_v36  ;;  %v9001_v40 = vstv %s5173_s11  ;;  %s5227_s29 = sld [smem:[#allocation7 + $0x1b]]  ;;  %v4178_v63 = vmul.f32 %v8698_v6, %v8999_v46  ;;  %v4179_v16 = vmul.f32 %v8701_v4, %v8999_v46 }
 0x421   : >> { %10219 = vst [vmem:[#allocation169_spill] sm:$0xff] %v9001_v40  ;;  %4515 = vrot.lane.b32.xlu1 %v4510_v14, %s5577_s22  ;;  %v4289_v38 = vadd.f32 %v4287_v49, %v4261_v53  ;;  %v4365_v24 = vadd.f32 %v4363_v31, %v4329_v56  ;;  %v9008_v59 = vstv %s5180_s12  ;;  %v4194_v30 = vmul.f32 %v8704_v17, %v9001_v40  ;;  %s9012_s30 = sld [smem:[#allocation8 + $0x2]] }
 0x422   : >> { %10220 = vst [vmem:[#allocation170_spill] sm:$0xff] %v9008_v59  ;;  %v4537_v62 = vadd.f32 %v8915_v19, %v4360_v60  ;;  %v9015_v36 = vstv %s5187_s14  ;;  %v4195_v6 = vmul.f32 %v8707_v35, %v9001_v40  ;;  %v4214_v4 = vmul.f32 %v8714_v21, %v9008_v59  ;;  %s9021_s23 = sld [smem:[#allocation7 + $0x24]] }
 0x423   : >> { %10221 = vst [vmem:[#allocation171_spill] sm:$0xff] %v9015_v36  ;;  %v4325_v56 = vadd.f32 %v4323_v57, %v4289_v38  ;;  %v4385_v53 = vadd.f32 %v4383_v22, %v4365_v24  ;;  %v9023_v14 = vstv %s5194_s15  ;;  %v4196_v49 = vadd.f32 %v4194_v30, %v4178_v63  ;;  %s9025_s9 = sld [smem:[#allocation7 + $0x25]] }
 0x424   : >> { %10222 = vst [vmem:[#allocation172_spill] sm:$0xff] %v9023_v14  ;;  %4541 = vrot.lane.b32.xlu0 %v4537_v62, %s5577_s22  ;;  %v9028_v17 = vstv %s5205_s16  ;;  %v4197_v31 = vadd.f32 %v4195_v6, %v4179_v16  ;;  %v4215_v35 = vmul.f32 %v8717_v43, %v9008_v59  ;;  %v4234_v21 = vmul.f32 %v8728_v54, %v9015_v36  ;;  %s9034_s26 = sld [smem:[#allocation7 + $0x26]] }
 0x425   : >> { %10223 = vst [vmem:[#allocation173_spill] sm:$0xff] %v9028_v17  ;;  %v4361_v22 = vadd.f32 %v8943_v23, %v4325_v56  ;;  %v4405_v57 = vadd.f32 %v4403_v2, %v4385_v53  ;;  %v9037_v60 = vstv %s5216_s17  ;;  %v4216_v63 = vadd.f32 %v4214_v4, %v4196_v49  ;;  %s9039_s28 = sld [smem:[#allocation7 + $0x27]] }
 0x426   : >> { %10224 = vst [vmem:[#allocation174_spill] sm:$0xff] %v9037_v60  ;;  %v9041_v38 = vstv %s5227_s29  ;;  %v4217_v24 = vadd.f32 %v4215_v35, %v4197_v31  ;;  %v4235_v16 = vmul.f32 %v8737_v20, %v9015_v36  ;;  %v4254_v43 = vmul.f32 %v8740_v5, %v9023_v14  ;;  %s5237_s8 = sld [smem:[#allocation7 + $0x34]] }
 0x427   : >> { %10225 = vst [vmem:[#allocation175_spill] sm:$0xff] %v9041_v38  ;;  %v4538_v54 = vadd.f32 %v8915_v19, %v4361_v22  ;;  %v4425_v30 = vadd.f32 %v4423_v26, %v4405_v57  ;;  %v4236_v23 = vadd.f32 %v4234_v21, %v4216_v63  ;;  %v4255_v2 = vmul.f32 %v8751_v33, %v9023_v14  ;;  %s5244_s13 = sld [smem:[#allocation7 + $0x35]] }
 0x428   : >> { %v4237_v62 = vadd.f32 %v4235_v16, %v4217_v24  ;;  %v4282_v6 = vmul.f32 %v8760_v55, %v9028_v17  ;;  %v4283_v20 = vmul.f32 %v8763_v11, %v9028_v17  ;;  %s9054_s18 = sld [smem:[#allocation7 + $0x36]]  ;;  %v4318_v56 = vmul.f32 %v8772_v12, %v9037_v60 }
 0x429   : >> { %4543 = vrot.lane.b32.xlu1 %v4538_v54, %s5577_s22  ;;  %v4445_v26 = vadd.f32 %v4443_v51, %v4425_v30  ;;  %v4256_v4 = vadd.f32 %v4254_v43, %v4236_v23  ;;  %v4319_v53 = vmul.f32 %v8775_v9, %v9037_v60  ;;  %s9061_s25 = sld [smem:[#allocation7 + $0x37]]  ;;  %v4354_v31 = vmul.f32 %v8783_v10, %v9041_v38  ;;  %v9089_v30 = vld [vmem:[%s8695_s21 + $0x140] sm:$0xff] }
 0x42a   : >> { %v4257_v49 = vadd.f32 %v4255_v2, %v4237_v62  ;;  %v4355_v35 = vmul.f32 %v8786_v1, %v9041_v38  ;;  %v9068_v21 = vstv %s9021_s23  ;;  %s9070_s6 = sld [smem:[#allocation7 + $0x28]]  ;;  %v9074_v57 = vstv %s9025_s9  ;;  %v9114_v60 = vld [vmem:[%s8695_s21 + $0x160] sm:$0xff] }
 0x42b   : >> { %10226 = vst [vmem:[#allocation176_spill] sm:$0xff] %v9068_v21  ;;  %v4585_v51 = vadd.f32 %v8804_v52, %v4445_v26  ;;  %v4284_v22 = vadd.f32 %v4282_v6, %v4256_v4  ;;  %v9077_v63 = vstv %s9034_s26  ;;  %s9079_s7 = sld [smem:[#allocation7 + $0x29]]  ;;  %v9082_v16 = vstv %s9039_s28 }
 0x42c   : >> { %10227 = vst [vmem:[#allocation177_spill] sm:$0xff] %v9074_v57  ;;  %v4285_v24 = vadd.f32 %v4283_v20, %v4257_v49  ;;  %v9084_v43 = vstv %s5237_s8  ;;  %v4264_v54 = vmul.f32 %v8740_v5, %v9068_v21  ;;  %s9091_s11 = sld [smem:[#allocation7 + $0x2a]]  ;;  %v4294_v62 = vmul.f32 %v8760_v55, %v9074_v57  ;;  %v9101_v20 = vld [vmem:[%s8695_s21 + $0x150] sm:$0xff] }
 0x42d   : >> { %10228 = vst [vmem:[#allocation178_spill] sm:$0xff] %v9077_v63  ;;  %4590 = vrot.lane.b32.xlu0 %v4585_v51, %s5577_s22  ;;  %v4320_v23 = vadd.f32 %v4318_v56, %v4284_v22  ;;  %v9094_v2 = vstv %s5244_s13  ;;  %v4330_v6 = vmul.f32 %v8772_v12, %v9077_v63  ;;  %s5231_s12 = sld [smem:[#allocation7 + $0x2b]]  ;;  %v9104_v4 = vstv %s9012_s30 }
 0x42e   : >> { %10229 = vst [vmem:[#allocation179_spill] sm:$0xff] %v9082_v16  ;;  %v4321_v26 = vadd.f32 %v4319_v53, %v4285_v24  ;;  %v9107_v49 = vstv %s9054_s18  ;;  %s5238_s14 = sld [smem:[#allocation7 + $0x38]]  ;;  %v4296_v51 = vadd.f32 %v4294_v62, %v4264_v54  ;;  %v4366_v22 = vmul.f32 %v8783_v10, %v9082_v16 }
 0x42f   : >> { %10230 = vst [vmem:[#allocation180_spill] sm:$0xff] %v9084_v43  ;;  %v4356_v56 = vadd.f32 %v4354_v31, %v4320_v23  ;;  %v4386_v38 = vmul.f32 %v9089_v30, %v9084_v43  ;;  %s5245_s15 = sld [smem:[#allocation7 + $0x39]]  ;;  %v9117_v24 = vstv %s9061_s25  ;;  %v4406_v3 = vmul.f32 %v9101_v20, %v9094_v2 }
 0x430   : >> { %10231 = vst [vmem:[#allocation181_spill] sm:$0xff] %v9094_v2  ;;  %v4357_v53 = vadd.f32 %v4355_v35, %v4321_v26  ;;  %v9122_v18 = vstv %s9070_s6  ;;  %s5252_s16 = sld [smem:[#allocation7 + $0x3a]]  ;;  %v4332_v54 = vadd.f32 %v4330_v6, %v4296_v51  ;;  %v4426_v35 = vmul.f32 %v9114_v60, %v9107_v49  ;;  %v9135_v26 = vld [vmem:[%s8695_s21 + $0x170] sm:$0xff] }
 0x431   : >> { %10232 = vst [vmem:[#allocation182_spill] sm:$0xff] %v9107_v49  ;;  %v4523_v31 = vadd.f32 %v9104_v4, %v4356_v56  ;;  %v9126_v23 = vstv %s9079_s7  ;;  %s9128_s17 = sld [smem:[#allocation7 + $0x3b]]  ;;  %v4266_v62 = vmul.f32 %v8740_v5, %v9122_v18  ;;  %v4267_v6 = vmul.f32 %v8751_v33, %v9122_v18 }
 0x432   : >> { %10233 = vst [vmem:[#allocation183_spill] sm:$0xff] %v9117_v24  ;;  %v9138_v17 = vstv %s9091_s11  ;;  %v4298_v14 = vmul.f32 %v8760_v55, %v9126_v23  ;;  %s9144_s29 = sld [smem:[#allocation7 + $0x2c]]  ;;  %v4368_v56 = vadd.f32 %v4366_v22, %v4332_v54  ;;  %v4299_v36 = vmul.f32 %v8763_v11, %v9126_v23 }
 0x433   : >> { %10234 = vst [vmem:[#allocation184_spill] sm:$0xff] %v9122_v18  ;;  %4527 = vrot.lane.b32.xlu2 %v4523_v31, %s5577_s22  ;;  %v9147_v51 = vstv %s5231_s12  ;;  %v4334_v28 = vmul.f32 %v8772_v12, %v9138_v17  ;;  %s9153_s30 = sld [smem:[#allocation7 + $0x2d]]  ;;  %v4335_v31 = vmul.f32 %v8775_v9, %v9138_v17  ;;  %v4446_v54 = vmul.f32 %v9135_v26, %v9117_v24 }
 0x434   : >> { %10235 = vst [vmem:[#allocation185_spill] sm:$0xff] %v9126_v23  ;;  %v9155_v59 = vstv %s5238_s14  ;;  %v4300_v40 = vadd.f32 %v4298_v14, %v4266_v62  ;;  %v4370_v18 = vmul.f32 %v8783_v10, %v9147_v51  ;;  %s5221_s23 = sld [smem:[#allocation7 + $0x2e]]  ;;  %v4388_v22 = vadd.f32 %v4386_v38, %v4368_v56 }
 0x435   : >> { %10236 = vst [vmem:[#allocation186_spill] sm:$0xff] %v9138_v17  ;;  %v9163_v46 = vstv %s5245_s15  ;;  %v4301_v23 = vadd.f32 %v4299_v36, %v4267_v6  ;;  %s5232_s9 = sld [smem:[#allocation7 + $0x2f]]  ;;  %v4390_v14 = vmul.f32 %v9089_v30, %v9155_v59  ;;  %v4371_v62 = vmul.f32 %v8786_v1, %v9147_v51 }
 0x436   : >> { %10237 = vst [vmem:[#allocation187_spill] sm:$0xff] %v9147_v51  ;;  %v9165_v0 = vstv %s5252_s16  ;;  %v4336_v45 = vadd.f32 %v4334_v28, %v4300_v40  ;;  %s9171_s26 = sld [smem:[#allocation7 + $0x3c]]  ;;  %v4524_v38 = vadd.f32 %v9104_v4, %v4357_v53  ;;  %v4408_v56 = vadd.f32 %v4406_v3, %v4388_v22 }
 0x437   : >> { %10238 = vst [vmem:[#allocation188_spill] sm:$0xff] %v9155_v59  ;;  %v4410_v36 = vmul.f32 %v9101_v20, %v9163_v46  ;;  %v4337_v6 = vadd.f32 %v4335_v31, %v4301_v23  ;;  %s9176_s28 = sld [smem:[#allocation7 + $0x3d]]  ;;  %v9179_v28 = vstv %s9128_s17  ;;  %v4430_v17 = vmul.f32 %v9114_v60, %v9165_v0 }
 0x438   : >> { %10239 = vst [vmem:[#allocation189_spill] sm:$0xff] %v9163_v46  ;;  %v4372_v40 = vadd.f32 %v4370_v18, %v4336_v45  ;;  %v4391_v51 = vmul.f32 %v8960_v37, %v9155_v59  ;;  %s5253_s8 = sld [smem:[#allocation7 + $0x3e]]  ;;  %v4428_v48 = vadd.f32 %v4426_v35, %v4408_v56  ;;  %v4411_v3 = vmul.f32 %v8969_v42, %v9163_v46 }
 0x439   : >> { %10240 = vst [vmem:[#allocation190_spill] sm:$0xff] %v9165_v0  ;;  %v4373_v53 = vadd.f32 %v4371_v62, %v4337_v6  ;;  %v4431_v23 = vmul.f32 %v8972_v50, %v9165_v0  ;;  %v9190_v22 = vstv %s9144_s29  ;;  %v9193_v45 = vstv %s9153_s30  ;;  %s5260_s13 = sld [smem:[#allocation7 + $0x3f]] }
 0x43a   : >> { %10241 = vst [vmem:[#allocation191_spill] sm:$0xff] %v9179_v28  ;;  %v4392_v31 = vadd.f32 %v4390_v14, %v4372_v40  ;;  %v9195_v18 = vstv %s5221_s23  ;;  %v4448_v15 = vadd.f32 %v4446_v54, %v4428_v48  ;;  %v4269_v56 = vmul.f32 %v8751_v33, %v9190_v22  ;;  %s9470_s25 = sld [smem:[#allocation8]] }
 0x43b   : >> { %10242 = vst [vmem:[#allocation192_spill] sm:$0xff] %v9190_v22  ;;  %4529 = vrot.lane.b32.xlu2 %v4524_v38, %s5577_s22  ;;  %v4393_v35 = vadd.f32 %v4391_v51, %v4373_v53  ;;  %v9198_v62 = vstv %s5232_s9  ;;  %v4450_v14 = vmul.f32 %v9135_v26, %v9179_v28  ;;  %v4303_v40 = vmul.f32 %v8763_v11, %v9193_v45  ;;  %s9644_s6 = sld [smem:[#allocation8 + $0x3]] }
 0x43c   : >> { %10243 = vst [vmem:[#allocation193_spill] sm:$0xff] %v9193_v45  ;;  %v4412_v6 = vadd.f32 %v4410_v36, %v4392_v31  ;;  %v4339_v0 = vmul.f32 %v8775_v9, %v9195_v18  ;;  %v4598_v48 = vadd.f32 %v8869_v41, %v4448_v15  ;;  %v4451_v51 = vmul.f32 %v8982_v58, %v9179_v28 }
 0x43d   : >> { %10244 = vst [vmem:[#allocation194_spill] sm:$0xff] %v9195_v18  ;;  %v4413_v54 = vadd.f32 %v4411_v3, %v4393_v35  ;;  %v9212_v38 = vstv %s9171_s26  ;;  %v4305_v46 = vadd.f32 %v4303_v40, %v4269_v56  ;;  %v4375_v36 = vmul.f32 %v8786_v1, %v9198_v62 }
 0x43e   : >> { %10245 = vst [vmem:[#allocation195_spill] sm:$0xff] %v9198_v62  ;;  %v4432_v53 = vadd.f32 %v4430_v17, %v4412_v6  ;;  %4602 = vrot.lane.b32.xlu1 %v4598_v48, %s5577_s22  ;;  %v9218_v59 = vstv %s9176_s28  ;;  %v9220_v7 = vstv %s5253_s8  ;;  %v4395_v3 = vmul.f32 %v8960_v37, %v9212_v38 }
 0x43f   : >> { %10246 = vst [vmem:[#allocation196_spill] sm:$0xff] %v9212_v38  ;;  %v4433_v31 = vadd.f32 %v4431_v23, %v4413_v54  ;;  %v4341_v15 = vadd.f32 %v4339_v0, %v4305_v46  ;;  %v4262_v35 = vmul.f32 %v8740_v5, %v8946_v61  ;;  %v4290_v56 = vmul.f32 %v8760_v55, %v8951_v34 }
 0x440   : >> { %10247 = vst [vmem:[#allocation197_spill] sm:$0xff] %v9218_v59  ;;  %v4452_v13 = vadd.f32 %v4450_v14, %v4432_v53  ;;  %v4326_v6 = vmul.f32 %v8772_v12, %v8954_v29  ;;  %v9231_v40 = vstv %s5260_s13  ;;  %v4415_v0 = vmul.f32 %v8969_v42, %v9218_v59 }
 0x441   : >> { %10248 = vst [vmem:[#allocation198_spill] sm:$0xff] %v9220_v7  ;;  %v4453_v17 = vadd.f32 %v4451_v51, %v4433_v31  ;;  %v4377_v48 = vadd.f32 %v4375_v36, %v4341_v15  ;;  %v4435_v14 = vmul.f32 %v8972_v50, %v9220_v7  ;;  %v4292_v54 = vadd.f32 %v4290_v56, %v4262_v35 }
 0x442   : >> { %v4612_v23 = vadd.f32 %v9104_v4, %v4452_v13  ;;  %10249 = vst [vmem:[#allocation199_spill] sm:$0xff] %v9231_v40  ;;  %v4362_v51 = vmul.f32 %v8783_v10, %v8957_v44  ;;  %v4265_v13 = vmul.f32 %v8751_v33, %v9068_v21  ;;  %v4295_v36 = vmul.f32 %v8763_v11, %v9074_v57 }
 0x443   : >> { %v4613_v46 = vadd.f32 %v9104_v4, %v4453_v17  ;;  %v4397_v53 = vadd.f32 %v4395_v3, %v4377_v48  ;;  %v4331_v31 = vmul.f32 %v8775_v9, %v9077_v63  ;;  %v4455_v15 = vmul.f32 %v8982_v58, %v9231_v40  ;;  %v10268_v63 = vld [vmem:[#allocation152_spill] sm:$0xff] }
 0x444   : >> { %4616 = vrot.lane.b32.xlu0 %v4612_v23, %s5577_s22  ;;  %v4328_v17 = vadd.f32 %v4326_v6, %v4292_v54  ;;  %v4382_v35 = vmul.f32 %v9089_v30, %v8962_v47  ;;  %v4402_v3 = vmul.f32 %v9101_v20, %v8975_v8  ;;  %v4297_v23 = vadd.f32 %v4295_v36, %v4265_v13  ;;  %v10271_v8 = vld [vmem:[#allocation155_spill] sm:$0xff] }
 0x445   : >> { %v4417_v56 = vadd.f32 %v4415_v0, %v4397_v53  ;;  %v4367_v33 = vmul.f32 %v8786_v1, %v9082_v16  ;;  %v4268_v9 = vmul.f32 %v8740_v5, %v9190_v22  ;;  %v4302_v6 = vmul.f32 %v8760_v55, %v9193_v45  ;;  %v10266_v45 = vld [vmem:[#allocation175_spill] sm:$0xff] }
 0x446   : >> { %4618 = vrot.lane.b32.xlu1 %v4613_v46, %s5577_s22  ;;  %v4364_v11 = vadd.f32 %v4362_v51, %v4328_v17  ;;  %v4338_v48 = vmul.f32 %v8772_v12, %v9195_v18  ;;  %v4333_v54 = vadd.f32 %v4331_v31, %v4297_v23  ;;  %v4387_v53 = vmul.f32 %v8960_v37, %v9084_v43 }
 0x447   : >> { %v4437_v0 = vadd.f32 %v4435_v14, %v4417_v56  ;;  %v4422_v1 = vmul.f32 %v9114_v60, %v8985_v27  ;;  %v4304_v46 = vadd.f32 %v4302_v6, %v4268_v9  ;;  %v4374_v51 = vmul.f32 %v8783_v10, %v9198_v62  ;;  %v10265_v62 = vld [vmem:[#allocation174_spill] sm:$0xff]  ;;  %v9392_v27 = vld [vmem:[%s8695_s21 + $0xa8] sm:$0xff] }
 0x448   : >> { %v4384_v13 = vadd.f32 %v4382_v35, %v4364_v11  ;;  %v4369_v36 = vadd.f32 %v4367_v33, %v4333_v54  ;;  %v4407_v55 = vmul.f32 %v8969_v42, %v9094_v2  ;;  %v4442_v12 = vmul.f32 %v9135_v26, %v8990_v39  ;;  %v10267_v2 = vld [vmem:[#allocation151_spill] sm:$0xff] }
 0x449   : >> { %v4457_v5 = vadd.f32 %v4455_v15, %v4437_v0  ;;  %v4340_v14 = vadd.f32 %v4338_v48, %v4304_v46  ;;  %v4394_v37 = vmul.f32 %v9089_v30, %v9212_v38  ;;  %v4427_v56 = vmul.f32 %v8972_v50, %v9107_v49  ;;  %v9298_v46 = vld [vmem:[%s8695_s21 + $0x20] sm:$0xff] }
 0x44a   : >> { %v4404_v17 = vadd.f32 %v4402_v3, %v4384_v13  ;;  %v4389_v35 = vadd.f32 %v4387_v53, %v4369_v36  ;;  %v4447_v3 = vmul.f32 %v8982_v58, %v9117_v24  ;;  %v4414_v30 = vmul.f32 %v9101_v20, %v9218_v59  ;;  %v9292_v13 = vld [vmem:[%s8695_s21] sm:$0xff]  ;;  %v9308_v36 = vld [vmem:[%s8695_s21 + $0x30] sm:$0xff]  ;;  %v9358_v59 = vld [vmem:[%s8695_s21 + $0x28] sm:$0xff] }
 0x44b   : >> { %v4627_v31 = vadd.f32 %v8915_v19, %v4457_v5  ;;  %v4376_v15 = vadd.f32 %v4374_v51, %v4340_v14  ;;  %v4434_v48 = vmul.f32 %v9114_v60, %v9220_v7  ;;  %v4454_v54 = vmul.f32 %v9135_v26, %v9231_v40  ;;  %v10250_v51 = vld [vmem:[#allocation142_spill] sm:$0xff]  ;;  %v10262_v40 = vld [vmem:[#allocation173_spill] sm:$0xff] }
 0x44c   : >> { %v4424_v10 = vadd.f32 %v4422_v1, %v4404_v17  ;;  %v4409_v23 = vadd.f32 %v4407_v55, %v4389_v35  ;;  %v9295_v1 = vld [vmem:[%s8695_s21 + $0x10] sm:$0xff]  ;;  %v3758_v60 = vmul.f32 %v8709_v25, %v9292_v13  ;;  %v3806_v5 = vmul.f32 %v9298_v46, %v10250_v51  ;;  %v9311_v55 = vld [vmem:[%s8695_s21 + $0x80] sm:$0xff]  ;;  %v9365_v24 = vld [vmem:[%s8695_s21 + $0x38] sm:$0xff] }
 0x44d   : >> { %4632 = vrot.lane.b32.xlu0 %v4627_v31, %s5577_s22  ;;  %v4396_v33 = vadd.f32 %v4394_v37, %v4376_v15  ;;  %v3778_v26 = vmul.f32 %v9295_v1, %v8719_v32  ;;  %v9316_v37 = vld [vmem:[%s8695_s21 + $0x90] sm:$0xff]  ;;  %v3840_v43 = vmul.f32 %v9308_v36, %v10267_v2  ;;  %v3869_v57 = vmul.f32 %v9311_v55, %v10268_v63 }
 0x44e   : >> { %v4444_v42 = vadd.f32 %v4442_v12, %v4424_v10  ;;  %v4429_v11 = vadd.f32 %v4427_v56, %v4409_v23  ;;  %v10251_v12 = vld [vmem:[#allocation143_spill] sm:$0xff]  ;;  %v10252_v35 = vld [vmem:[#allocation144_spill] sm:$0xff]  ;;  %v9321_v10 = vld [vmem:[%s8695_s21 + $0xa0] sm:$0xff]  ;;  %v3919_v7 = vmul.f32 %v9316_v37, %v10262_v40 }
 0x44f   : >> { %v4416_v6 = vadd.f32 %v4414_v30, %v4396_v33  ;;  %v3780_v17 = vadd.f32 %v3778_v26, %v3758_v60  ;;  %v3834_v14 = vmul.f32 %v9308_v36, %v10251_v12  ;;  %v3863_v56 = vmul.f32 %v9311_v55, %v10252_v35  ;;  %v10253_v23 = vld [vmem:[#allocation145_spill] sm:$0xff]  ;;  %v10254_v30 = vld [vmem:[#allocation146_spill] sm:$0xff] }
 0x450   : >> { %v4584_v9 = vadd.f32 %v8804_v52, %v4444_v42  ;;  %v4449_v50 = vadd.f32 %v4447_v3, %v4429_v11  ;;  %v3907_v42 = vmul.f32 %v9316_v37, %v10253_v23  ;;  %v9326_v3 = vld [vmem:[%s8695_s21 + $0xb0] sm:$0xff]  ;;  %v3959_v11 = vmul.f32 %v9321_v10, %v10254_v30 }
 0x451   : >> { %v4436_v0 = vadd.f32 %v4434_v48, %v4416_v6  ;;  %v3808_v31 = vadd.f32 %v3806_v5, %v3780_v17  ;;  %v10256_v48 = vld [vmem:[#allocation168_spill] sm:$0xff]  ;;  %v10259_v5 = vld [vmem:[#allocation171_spill] sm:$0xff]  ;;  %v3971_v18 = vmul.f32 %v9321_v10, %v10265_v62  ;;  %v4023_v22 = vmul.f32 %v9326_v3, %v10266_v45 }
 0x452   : >> { %4588 = vrot.lane.b32.xlu2 %v4584_v9, %s5577_s22  ;;  %v4599_v58 = vadd.f32 %v8869_v41, %v4449_v50  ;;  %v10255_v9 = vld [vmem:[#allocation147_spill] sm:$0xff]  ;;  %v3846_v17 = vmul.f32 %v9308_v36, %v10259_v5 }
 0x453   : >> { %v4456_v20 = vadd.f32 %v4454_v54, %v4436_v0  ;;  %v3836_v15 = vadd.f32 %v3834_v14, %v3808_v31  ;;  %v4011_v50 = vmul.f32 %v9326_v3, %v10255_v9  ;;  %v10257_v0 = vld [vmem:[#allocation169_spill] sm:$0xff]  ;;  %v10260_v14 = vld [vmem:[#allocation148_spill] sm:$0xff] }
 0x454   : >> { %v3790_v54 = vmul.f32 %v9295_v1, %v10257_v0  ;;  %v3762_v31 = vmul.f32 %v10260_v14, %v9292_v13 }
 0x455   : >> { %v4626_v53 = vadd.f32 %v8915_v19, %v4456_v20  ;;  %v3865_v33 = vadd.f32 %v3863_v56, %v3836_v15  ;;  %v10258_v20 = vld [vmem:[#allocation170_spill] sm:$0xff]  ;;  %v9344_v56 = vld [vmem:[%s8695_s21 + $0x8] sm:$0xff]  ;;  %v9347_v15 = vld [vmem:[%s8695_s21 + $0x18] sm:$0xff] }
 0x456   : >> { %v10269_v19 = vld [vmem:[#allocation153_spill] sm:$0xff] }
 0x457   : >> { %v3909_v6 = vadd.f32 %v3907_v42, %v3865_v33  ;;  %v10261_v42 = vld [vmem:[#allocation172_spill] sm:$0xff]  ;;  %v3913_v21 = vmul.f32 %v9316_v37, %v10269_v19 }
 0x458   : >> { %v3875_v33 = vmul.f32 %v9311_v55, %v10261_v42 }
 0x459   : >> { %v3961_v60 = vadd.f32 %v3959_v11, %v3909_v6  ;;  %v10263_v11 = vld [vmem:[#allocation149_spill] sm:$0xff] }
 0x45a   : >> { %4604 = vrot.lane.b32.xlu2 %v4599_v58, %s5577_s22  ;;  %v3766_v58 = vmul.f32 %v10256_v48, %v9292_v13  ;;  %v3784_v6 = vmul.f32 %v9295_v1, %v10263_v11 }
 0x45b   : >> { %v4013_v38 = vadd.f32 %v4011_v50, %v3961_v60  ;;  %v3759_v50 = vmul.f32 %v8709_v25, %v9344_v56  ;;  %v9377_v60 = vld [vmem:[%s8695_s21 + $0x88] sm:$0xff]  ;;  %v3835_v25 = vmul.f32 %v9365_v24, %v10251_v12  ;;  %v3791_v12 = vmul.f32 %v9347_v15, %v10257_v0 }
 0x45c   : >> { %v3792_v26 = vadd.f32 %v3790_v54, %v3766_v58  ;;  %v10264_v58 = vld [vmem:[#allocation150_spill] sm:$0xff]  ;;  %v3786_v49 = vadd.f32 %v3784_v6, %v3762_v31  ;;  %v3807_v31 = vmul.f32 %v9358_v59, %v10250_v51  ;;  %v3767_v51 = vmul.f32 %v10256_v48, %v9344_v56 }
 0x45d   : >> { %v3812_v54 = vmul.f32 %v9298_v46, %v10264_v58  ;;  %v3847_v0 = vmul.f32 %v9365_v24, %v10259_v5 }
 0x45f   : >> { %v3814_v6 = vadd.f32 %v3812_v54, %v3786_v49  ;;  %v3864_v49 = vmul.f32 %v9377_v60, %v10252_v35  ;;  %v3960_v35 = vmul.f32 %v9392_v27, %v10254_v30 }
 0x461   : >> { %v3842_v54 = vadd.f32 %v3840_v43, %v3814_v6  ;;  %v3763_v6 = vmul.f32 %v10260_v14, %v9344_v56 }
 0x462   : >> { %4630 = vrot.lane.b32.xlu2 %v4626_v53, %s5577_s22  ;;  %v3818_v53 = vmul.f32 %v9298_v46, %v10258_v20  ;;  %s5353_s22 = sshll.u32 %s5569_s10, 5  ;;  %s3751_s10 = sadd.s32 1, %s5569_s10  }
 0x463   : >> { %s9368_s18 = scalar_lea.vmem %s5684_s24, %s5353_s22  ;;  %v3871_v48 = vadd.f32 %v3869_v57, %v3842_v54  ;;  %p3748_p9 = scmp.ge.s32.totalorder %s3751_s10, 8  }
 0x464   : >> { %v3820_v28 = vadd.f32 %v3818_v53, %v3792_v26  ;;  %v3779_v53 = vmul.f32 %v9347_v15, %v8719_v32  ;;  %v4461_v26 = vadd.f32 %v8804_v52, %v4013_v38  ;;  %v9389_v32 = vld [vmem:[%s8695_s21 + $0x98] sm:$0xff]  ;;  %v10270_v38 = vld [vmem:[#allocation154_spill] sm:$0xff] }
 0x465   : >> { %v3915_v30 = vadd.f32 %v3913_v21, %v3871_v48  ;;  %v3920_v21 = vmul.f32 %v9389_v32, %v10262_v40  ;;  %v3914_v40 = vmul.f32 %v9389_v32, %v10269_v19  ;;  %v10274_v48 = vld [vmem:[#allocation158_spill] sm:$0xff] }
 0x466   : >> { %v3848_v16 = vadd.f32 %v3846_v17, %v3820_v28  ;;  %v3781_v39 = vadd.f32 %v3779_v53, %v3759_v50  ;;  %4466 = vst.msk [vmem:[%s9368_s18] sm:$0xff] %vm3677_vm1, %v4461_v26  ;;  %v3965_v17 = vmul.f32 %v9321_v10, %v10270_v38  ;;  %v3819_v53 = vmul.f32 %v9358_v59, %v10258_v20 }
 0x468   : >> { %v3877_v28 = vadd.f32 %v3875_v33, %v3848_v16  ;;  %v3809_v50 = vadd.f32 %v3807_v31, %v3781_v39  ;;  %v4017_v16 = vmul.f32 %v9326_v3, %v10271_v8  ;;  %v3908_v33 = vmul.f32 %v9389_v32, %v10253_v23  ;;  %v9413_v39 = vld [vmem:[%s8695_s21 + $0xb8] sm:$0xff] }
 0x469   : >> { %v3793_v31 = vadd.f32 %v3791_v12, %v3767_v51  ;;  %v3785_v23 = vmul.f32 %v9347_v15, %v10263_v11  ;;  %v3967_v54 = vadd.f32 %v3965_v17, %v3915_v30 }
 0x46a   : >> { %v3921_v26 = vadd.f32 %v3919_v7, %v3877_v28  ;;  %v3837_v43 = vadd.f32 %v3835_v25, %v3809_v50  ;;  %v3876_v7 = vmul.f32 %v9377_v60, %v10261_v42  ;;  %v3813_v25 = vmul.f32 %v9358_v59, %v10264_v58 }
 0x46b   : >> { %v3821_v57 = vadd.f32 %v3819_v53, %v3793_v31  ;;  %v3787_v5 = vadd.f32 %v3785_v23, %v3763_v6  ;;  %v3841_v42 = vmul.f32 %v9365_v24, %v10267_v2  ;;  %v3972_v58 = vmul.f32 %v9392_v27, %v10265_v62  ;;  %v10272_v2 = vld [vmem:[#allocation156_spill] sm:$0xff] }
 0x46c   : >> { %v3973_v20 = vadd.f32 %v3971_v18, %v3921_v26  ;;  %v3866_v28 = vadd.f32 %v3864_v49, %v3837_v43  ;;  %v4012_v18 = vmul.f32 %v9413_v39, %v10255_v9  ;;  %v3870_v49 = vmul.f32 %v9377_v60, %v10268_v63 }
 0x46d   : >> { %v3849_v50 = vadd.f32 %v3847_v0, %v3821_v57  ;;  %v4019_v9 = vadd.f32 %v4017_v16, %v3967_v54  ;;  %v3770_v17 = vmul.f32 %v10272_v2, %v9292_v13  ;;  %v3824_v63 = vmul.f32 %v9298_v46, %v10274_v48 }
 0x46e   : >> { %v4025_v51 = vadd.f32 %v4023_v22, %v3973_v20  ;;  %v3910_v14 = vadd.f32 %v3908_v33, %v3866_v28  ;;  %v3815_v22 = vadd.f32 %v3813_v25, %v3787_v5  ;;  %v10273_v33 = vld [vmem:[#allocation157_spill] sm:$0xff]  ;;  %v4024_v13 = vmul.f32 %v9413_v39, %v10266_v45  ;;  %v10275_v20 = vld [vmem:[#allocation159_spill] sm:$0xff]  ;;  %v10276_v45 = vld [vmem:[#allocation160_spill] sm:$0xff] }
 0x46f   : >> { %v3878_v53 = vadd.f32 %v3876_v7, %v3849_v50  ;;  %v3796_v62 = vmul.f32 %v9295_v1, %v10273_v33  ;;  %v4470_v16 = vadd.f32 %v8869_v41, %v4019_v9  ;;  %v3966_v0 = vmul.f32 %v9392_v27, %v10270_v38  ;;  %v10277_v25 = vld [vmem:[#allocation161_spill] sm:$0xff]  ;;  %v9477_v5 = vld [vmem:[%s8695_s21 + $0x100] sm:$0xff] }
 0x470   : >> { %v4478_v11 = vadd.f32 %v9104_v4, %v4025_v51  ;;  %v3962_v12 = vadd.f32 %v3960_v35, %v3910_v14  ;;  %v3843_v26 = vadd.f32 %v3841_v42, %v3815_v22  ;;  %v3852_v1 = vmul.f32 %v9308_v36, %v10275_v20  ;;  %v9485_v22 = vld [vmem:[%s8695_s21 + $0x110] sm:$0xff] }
 0x471   : >> { %v3922_v43 = vadd.f32 %v3920_v21, %v3878_v53  ;;  %v3798_v19 = vadd.f32 %v3796_v62, %v3770_v17  ;;  %5301 = vst.msk [vmem:[%s9368_s18 + $0x100] sm:$0xff] %vm3677_vm1, %v4470_v16  ;;  %v4018_v23 = vmul.f32 %v9413_v39, %v10271_v8  ;;  %v3881_v30 = vmul.f32 %v9311_v55, %v10276_v45 }
 0x472   : >> { %5305 = vst.msk [vmem:[%s9368_s18 + $0x200] sm:$0xff] %vm3677_vm1, %v4478_v11  ;;  %v4014_v35 = vadd.f32 %v4012_v18, %v3962_v12  ;;  %v3872_v31 = vadd.f32 %v3870_v49, %v3843_v26  ;;  %v3887_v36 = vmul.f32 %v9311_v55, %v8946_v61  ;;  %v3931_v57 = vmul.f32 %v9316_v37, %v8951_v34  ;;  %v10278_v11 = vld [vmem:[#allocation162_spill] sm:$0xff]  ;;  %v10279_v26 = vld [vmem:[#allocation163_spill] sm:$0xff] }
 0x473   : >> { %v3974_v6 = vadd.f32 %v3972_v58, %v3922_v43  ;;  %v3826_v28 = vadd.f32 %v3824_v63, %v3798_v19  ;;  %v3925_v8 = vmul.f32 %v9316_v37, %v10277_v25  ;;  %v3983_v51 = vmul.f32 %v9321_v10, %v8954_v29  ;;  %v10280_v63 = vld [vmem:[#allocation165_spill] sm:$0xff] }
 0x474   : >> { %v4462_v46 = vadd.f32 %v8804_v52, %v4014_v35  ;;  %v3916_v38 = vadd.f32 %v3914_v40, %v3872_v31  ;;  %v4035_v18 = vmul.f32 %v9326_v3, %v8957_v44  ;;  %v3933_v14 = vadd.f32 %v3931_v57, %v3887_v36  ;;  %v9506_v35 = vld [vmem:[%s8695_s21 + $0x130] sm:$0xff] }
 0x475   : >> { %v4026_v52 = vadd.f32 %v4024_v13, %v3974_v6  ;;  %v3854_v54 = vadd.f32 %v3852_v1, %v3826_v28  ;;  %v3771_v50 = vmul.f32 %v10272_v2, %v9344_v56  ;;  %v3977_v58 = vmul.f32 %v9321_v10, %v10278_v11  ;;  %v9494_v2 = vld [vmem:[%s8695_s21 + $0x120] sm:$0xff]  ;;  %v9521_v6 = vld [vmem:[%s8695_s21 + $0x108] sm:$0xff] }
 0x476   : >> { %4467 = vst.msk [vmem:[%s9368_s18 + $0x8] sm:$0xff] %vm3677_vm1, %v4462_v46  ;;  %v3968_v42 = vadd.f32 %v3966_v0, %v3916_v38  ;;  %v3797_v49 = vmul.f32 %v9347_v15, %v10273_v33  ;;  %v3825_v9 = vmul.f32 %v9358_v59, %v10274_v48  ;;  %v3985_v17 = vadd.f32 %v3983_v51, %v3933_v14  ;;  %v10281_v13 = vld [vmem:[#allocation166_spill] sm:$0xff] }
 0x477   : >> { %v4479_v21 = vadd.f32 %v9104_v4, %v4026_v52  ;;  %v3883_v53 = vadd.f32 %v3881_v30, %v3854_v54  ;;  %v4064_v56 = vmul.f32 %v9477_v5, %v8962_v47  ;;  %v4029_v40 = vmul.f32 %v9326_v3, %v10279_v26  ;;  %v9535_v52 = vld [vmem:[%s8695_s21 + $0x118] sm:$0xff]  ;;  %v10284_v54 = vld [vmem:[#allocation164_spill] sm:$0xff] }
 0x478   : >> { %v4020_v12 = vadd.f32 %v4018_v23, %v3968_v42  ;;  %v3799_v62 = vadd.f32 %v3797_v49, %v3771_v50  ;;  %v3853_v15 = vmul.f32 %v9365_v24, %v10275_v20  ;;  %v4037_v48 = vadd.f32 %v4035_v18, %v3985_v17  ;;  %v10283_v18 = vld [vmem:[#allocation176_spill] sm:$0xff] }
 0x479   : >> { %5306 = vst.msk [vmem:[%s9368_s18 + $0x208] sm:$0xff] %vm3677_vm1, %v4479_v21  ;;  %v3927_v33 = vadd.f32 %v3925_v8, %v3883_v53  ;;  %v4092_v16 = vmul.f32 %v9485_v22, %v10280_v63  ;;  %v4120_v31 = vmul.f32 %v9494_v2, %v10281_v13  ;;  %v3882_v24 = vmul.f32 %v9377_v60, %v10276_v45  ;;  %v10282_v45 = vld [vmem:[#allocation167_spill] sm:$0xff] }
 0x47a   : >> { %v4471_v59 = vadd.f32 %v8869_v41, %v4020_v12  ;;  %v3827_v0 = vadd.f32 %v3825_v9, %v3799_v62  ;;  %v3888_v41 = vmul.f32 %v9377_v60, %v8946_v61  ;;  %v4066_v1 = vadd.f32 %v4064_v56, %v4037_v48  ;;  %v9547_v21 = vld [vmem:[%s8695_s21 + $0x128] sm:$0xff]  ;;  %v10286_v12 = vld [vmem:[#allocation178_spill] sm:$0xff]  ;;  %v10288_v48 = vld [vmem:[#allocation180_spill] sm:$0xff] }
 0x47b   : >> { %v3979_v20 = vadd.f32 %v3977_v58, %v3927_v33  ;;  %v3984_v46 = vmul.f32 %v9392_v27, %v8954_v29  ;;  %v4551_v23 = vstv %s9470_s25  ;;  %v4148_v61 = vmul.f32 %v9506_v35, %v10282_v45  ;;  %v10285_v58 = vld [vmem:[#allocation177_spill] sm:$0xff] }
 0x47c   : >> { %v3855_v30 = vadd.f32 %v3853_v15, %v3827_v0  ;;  %v3926_v38 = vmul.f32 %v9389_v32, %v10277_v25  ;;  %5302 = vst.msk [vmem:[%s9368_s18 + $0x108] sm:$0xff] %vm3677_vm1, %v4471_v59  ;;  %v4094_v36 = vadd.f32 %v4092_v16, %v4066_v1  ;;  %v4036_v29 = vmul.f32 %v9413_v39, %v8957_v44  ;;  %v10287_v15 = vld [vmem:[#allocation179_spill] sm:$0xff] }
 0x47d   : >> { %v3978_v25 = vmul.f32 %v9392_v27, %v10278_v11  ;;  %v4065_v51 = vmul.f32 %v9521_v6, %v8962_v47  ;;  %v3892_v42 = vmul.f32 %v9377_v60, %v10283_v18  ;;  %v3938_v49 = vmul.f32 %v9389_v32, %v10285_v58 }
 0x47e   : >> { %v3884_v8 = vadd.f32 %v3882_v24, %v3855_v30  ;;  %v4122_v50 = vadd.f32 %v4120_v31, %v4094_v36  ;;  %v4030_v11 = vmul.f32 %v9413_v39, %v10279_v26  ;;  %v4093_v47 = vmul.f32 %v9535_v52, %v10280_v63  ;;  %v10290_v36 = vld [vmem:[#allocation182_spill] sm:$0xff] }
 0x47f   : >> { %v3990_v53 = vmul.f32 %v9392_v27, %v10286_v12  ;;  %v3940_v62 = vadd.f32 %v3938_v49, %v3892_v42  ;;  %v4042_v59 = vmul.f32 %v9413_v39, %v10287_v15  ;;  %v4121_v26 = vmul.f32 %v9547_v21, %v10281_v13  ;;  %v10294_v49 = vld [vmem:[#allocation186_spill] sm:$0xff] }
 0x480   : >> { %v3928_v9 = vadd.f32 %v3926_v38, %v3884_v8  ;;  %v4150_v17 = vadd.f32 %v4148_v61, %v4122_v50  ;;  %v4071_v63 = vmul.f32 %v9521_v6, %v10288_v48  ;;  %v3891_v16 = vmul.f32 %v9311_v55, %v10283_v18  ;;  %v10291_v8 = vld [vmem:[#allocation184_spill] sm:$0xff] }
 0x481   : >> { %v3992_v24 = vadd.f32 %v3990_v53, %v3940_v62  ;;  %v4126_v62 = vmul.f32 %v9494_v2, %v10290_v36 }
 0x482   : >> { %v4499_v7 = vpop.permute.xlu0 %4498  ;;  %v3980_v33 = vadd.f32 %v3978_v25, %v3928_v9  ;;  %v4552_v31 = vadd.f32 %v4551_v23, %v4150_v17  ;;  %v3895_v25 = vmul.f32 %v9311_v55, %v10291_v8  ;;  %v3995_v9 = vmul.f32 %v9321_v10, %v10294_v49 }
 0x483   : >> { %4505 = vst.msk [vmem:[%s9368_s18] sm:$0xff] %vm4504_vm4, %v4499_v7  ;;  %v3932_v7 = vmul.f32 %v9389_v32, %v8951_v34  ;;  %v4031_v34 = vadd.f32 %v4029_v40, %v3979_v20  ;;  %v9560_v40 = vld [vmem:[%s8695_s21 + $0x138] sm:$0xff]  ;;  %s9578_s21 = sld [smem:[#allocation8 + $0x1]]  ;;  %v4044_v30 = vadd.f32 %v4042_v59, %v3992_v24 }
 0x484   : >> { %v4149_v13 = vmul.f32 %v9560_v40, %v10282_v45  ;;  %v10289_v20 = vld [vmem:[#allocation181_spill] sm:$0xff]  ;;  %5322 = vst.msk [vmem:[%s9368_s18 + $0x10] sm:$0xff] %vm3677_vm1, %v4552_v31 }
 0x485   : >> { %v3934_v57 = vadd.f32 %v3932_v7, %v3888_v41  ;;  %v4486_v14 = vadd.f32 %v10284_v54, %v4031_v34  ;;  %v3937_v41 = vmul.f32 %v9316_v37, %v10285_v58  ;;  %v4099_v1 = vmul.f32 %v9535_v52, %v10289_v20 }
 0x486   : >> { %v3989_v7 = vmul.f32 %v9321_v10, %v10286_v12  ;;  %v4073_v18 = vadd.f32 %v4071_v63, %v4044_v30  ;;  %v4098_v58 = vmul.f32 %v9485_v22, %v10289_v20 }
 0x487   : >> { %v3986_v44 = vadd.f32 %v3984_v46, %v3934_v57  ;;  %5309 = vst.msk [vmem:[%s9368_s18 + $0x300] sm:$0xff] %vm3677_vm1, %v4486_v14  ;;  %v3939_v38 = vadd.f32 %v3937_v41, %v3891_v16  ;;  %v4127_v57 = vmul.f32 %v9547_v21, %v10290_v36  ;;  %v10292_v14 = vld [vmem:[#allocation185_spill] sm:$0xff] }
 0x488   : >> { %v3943_v50 = vmul.f32 %v9316_v37, %v10292_v14  ;;  %v4101_v53 = vadd.f32 %v4099_v1, %v4073_v18  ;;  %v10298_v41 = vld [vmem:[#allocation193_spill] sm:$0xff] }
 0x489   : >> { %v4038_v56 = vadd.f32 %v4036_v29, %v3986_v44  ;;  %v4070_v29 = vmul.f32 %v9477_v5, %v10288_v48  ;;  %v3991_v42 = vadd.f32 %v3989_v7, %v3939_v38  ;;  %v10300_v7 = vld [vmem:[#allocation189_spill] sm:$0xff] }
 0x48a   : >> { %v4501_v43 = vpop.permute.xlu0 %4500  ;;  %v4129_v16 = vadd.f32 %v4127_v57, %v4101_v53 }
 0x48b   : >> { %v4514_v19 = vpop.permute.xlu1 %4513  ;;  %4506 = vst.msk [vmem:[%s9368_s18 + $0x8] sm:$0xff] %vm4504_vm4, %v4501_v43  ;;  %v4067_v0 = vadd.f32 %v4065_v51, %v4038_v56  ;;  %v3945_v56 = vadd.f32 %v3943_v50, %v3895_v25  ;;  %v10303_v25 = vld [vmem:[#allocation191_spill] sm:$0xff] }
 0x48c   : >> { %5312 = vst.msk [vmem:[%s9368_s18 + $0x100] sm:$0xff] %vm4504_vm4, %v4514_v19  ;;  %v4032_v19 = vadd.f32 %v4030_v11, %v3980_v33  ;;  %v10295_v11 = vld [vmem:[#allocation187_spill] sm:$0xff]  ;;  %v10297_v33 = vld [vmem:[#allocation192_spill] sm:$0xff] }
 0x48d   : >> { %v4528_v28 = vpop.permute.xlu2 %4527  ;;  %v4095_v61 = vadd.f32 %v4093_v47, %v4067_v0  ;;  %v4047_v47 = vmul.f32 %v9326_v3, %v10295_v11  ;;  %v3997_v31 = vadd.f32 %v3995_v9, %v3945_v56  ;;  %v4559_v0 = vstv %s9578_s21  ;;  %v10305_v9 = vld [vmem:[#allocation197_spill] sm:$0xff] }
 0x48e   : >> { %5315 = vst.msk [vmem:[%s9368_s18 + $0x200] sm:$0xff] %vm4504_vm4, %v4528_v28  ;;  %v4041_v28 = vmul.f32 %v9326_v3, %v10287_v15  ;;  %v4487_v34 = vadd.f32 %v10284_v54, %v4032_v19  ;;  %v10293_v54 = vld [vmem:[#allocation183_spill] sm:$0xff]  ;;  %v10296_v15 = vld [vmem:[#allocation188_spill] sm:$0xff]  ;;  %v3949_v19 = vmul.f32 %v9316_v37, %v10298_v41  ;;  %v3950_v56 = vmul.f32 %v9389_v32, %v10298_v41 }
 0x48f   : >> { %v4123_v51 = vadd.f32 %v4121_v26, %v4095_v61  ;;  %v4155_v44 = vmul.f32 %v9560_v40, %v10293_v54  ;;  %v4076_v59 = vmul.f32 %v9477_v5, %v10296_v15  ;;  %v3899_v26 = vmul.f32 %v9311_v55, %v10297_v33  ;;  %v10301_v61 = vld [vmem:[#allocation190_spill] sm:$0xff] }
 0x490   : >> { %5310 = vst.msk [vmem:[%s9368_s18 + $0x308] sm:$0xff] %vm3677_vm1, %v4487_v34  ;;  %v4043_v17 = vadd.f32 %v4041_v28, %v3991_v42  ;;  %v4154_v24 = vmul.f32 %v9506_v35, %v10293_v54  ;;  %v4049_v1 = vadd.f32 %v4047_v47, %v3997_v31  ;;  %v4132_v30 = vmul.f32 %v9494_v2, %v10301_v61  ;;  %v10302_v28 = vld [vmem:[#allocation195_spill] sm:$0xff]  ;;  %v10304_v42 = vld [vmem:[#allocation196_spill] sm:$0xff] }
 0x491   : >> { %v4151_v12 = vadd.f32 %v4149_v13, %v4123_v51  ;;  %v10299_v13 = vld [vmem:[#allocation194_spill] sm:$0xff]  ;;  %v4157_v55 = vadd.f32 %v4155_v44, %v4129_v16  ;;  %v3951_v38 = vadd.f32 %v3949_v19, %v3899_v26  ;;  %v4053_v37 = vmul.f32 %v9326_v3, %v10302_v28 }
 0x492   : >> { %v4001_v20 = vmul.f32 %v9321_v10, %v10299_v13  ;;  %v4078_v57 = vadd.f32 %v4076_v59, %v4049_v1  ;;  %v4160_v51 = vmul.f32 %v9506_v35, %v10303_v25  ;;  %v4082_v3 = vmul.f32 %v9477_v5, %v10304_v42  ;;  %v10306_v59 = vld [vmem:[#allocation198_spill] sm:$0xff] }
 0x493   : >> { %v4516_v43 = vpop.permute.xlu1 %4515  ;;  %v4553_v63 = vadd.f32 %v4551_v23, %v4151_v12  ;;  %v4561_v34 = vadd.f32 %v4559_v0, %v4157_v55  ;;  %v4048_v44 = vmul.f32 %v9413_v39, %v10295_v11  ;;  %v4110_v47 = vmul.f32 %v9485_v22, %v10305_v9 }
 0x494   : >> { %5313 = vst.msk [vmem:[%s9368_s18 + $0x108] sm:$0xff] %vm4504_vm4, %v4516_v43  ;;  %v4072_v43 = vadd.f32 %v4070_v29, %v4043_v17  ;;  %v3944_v29 = vmul.f32 %v9389_v32, %v10292_v14  ;;  %v4003_v18 = vadd.f32 %v4001_v20, %v3951_v38  ;;  %v4077_v12 = vmul.f32 %v9521_v6, %v10296_v15 }
 0x495   : >> { %v4530_v46 = vpop.permute.xlu2 %4529  ;;  %5323 = vst.msk [vmem:[%s9368_s18 + $0x18] sm:$0xff] %vm3677_vm1, %v4553_v63  ;;  %v3900_v5 = vmul.f32 %v9377_v60, %v10297_v33  ;;  %v4138_v11 = vmul.f32 %v9494_v2, %v10306_v59  ;;  %v4002_v15 = vmul.f32 %v9392_v27, %v10299_v13  ;;  %v4054_v32 = vmul.f32 %v9413_v39, %v10302_v28  ;;  %v10307_v63 = vld [vmem:[#allocation199_spill] sm:$0xff] }
 0x496   : >> { %5316 = vst.msk [vmem:[%s9368_s18 + $0x208] sm:$0xff] %vm4504_vm4, %v4530_v46  ;;  %v4542_v45 = vpop.permute.xlu0 %4541  ;;  %v4100_v23 = vadd.f32 %v4098_v58, %v4072_v43  ;;  %v4104_v46 = vmul.f32 %v9485_v22, %v10300_v7  ;;  %v4055_v58 = vadd.f32 %v4053_v37, %v4003_v18  ;;  %v4105_v22 = vmul.f32 %v9535_v52, %v10300_v7 }
 0x497   : >> { %5318 = vst.msk [vmem:[%s9368_s18 + $0x300] sm:$0xff] %vm4504_vm4, %v4542_v45  ;;  %v3896_v45 = vmul.f32 %v9377_v60, %v10291_v8  ;;  %v3996_v8 = vmul.f32 %v9392_v27, %v10294_v49  ;;  %v3952_v26 = vadd.f32 %v3950_v56, %v3900_v5  ;;  %v4166_v16 = vmul.f32 %v9506_v35, %v10307_v63 }
 0x498   : >> { %v4128_v36 = vadd.f32 %v4126_v62, %v4100_v23  ;;  %5328 = vst.msk [vmem:[%s9368_s18 + $0x118] sm:$0xff] %vm3677_vm1, %v4561_v34  ;;  %v4106_v54 = vadd.f32 %v4104_v46, %v4078_v57  ;;  %v4084_v62 = vadd.f32 %v4082_v3, %v4055_v58  ;;  %v4133_v2 = vmul.f32 %v9547_v21, %v10301_v61 }
 0x499   : >> { %v3946_v14 = vadd.f32 %v3944_v29, %v3896_v45  ;;  %v4083_v27 = vmul.f32 %v9521_v6, %v10304_v42  ;;  %v4161_v35 = vmul.f32 %v9560_v40, %v10303_v25  ;;  %v4111_v13 = vmul.f32 %v9535_v52, %v10305_v9 }
 0x49a   : >> { %v4156_v50 = vadd.f32 %v4154_v24, %v4128_v36  ;;  %v4134_v53 = vadd.f32 %v4132_v30, %v4106_v54  ;;  %v4575_v24 = vstv %s9644_s6  ;;  %v4139_v6 = vmul.f32 %v9547_v21, %v10306_v59 }
 0x49b   : >> { %v4544_v48 = vpop.permute.xlu1 %4543  ;;  %v3998_v17 = vadd.f32 %v3996_v8, %v3946_v14  ;;  %v4167_v30 = vmul.f32 %v9560_v40, %v10307_v63 }
 0x49c   : >> { %5319 = vst.msk [vmem:[%s9368_s18 + $0x308] sm:$0xff] %vm4504_vm4, %v4544_v48  ;;  %v4560_v49 = vadd.f32 %v4559_v0, %v4156_v50  ;;  %v4162_v60 = vadd.f32 %v4160_v51, %v4134_v53  ;;  %v4112_v48 = vadd.f32 %v4110_v47, %v4084_v62  ;;  %v4004_v0 = vadd.f32 %v4002_v15, %v3952_v26 }
 0x49d   : >> { %v4050_v33 = vadd.f32 %v4048_v44, %v3998_v17 }
 0x49e   : >> { %5327 = vst.msk [vmem:[%s9368_s18 + $0x110] sm:$0xff] %vm3677_vm1, %v4560_v49  ;;  %v4568_v43 = vadd.f32 %v9104_v4, %v4162_v60  ;;  %v4140_v41 = vadd.f32 %v4138_v11, %v4112_v48  ;;  %v4056_v19 = vadd.f32 %v4054_v32, %v4004_v0 }
 0x49f   : >> { %v4591_v10 = vpop.permute.xlu0 %4590  ;;  %v4079_v31 = vadd.f32 %v4077_v12, %v4050_v33 }
 0x4a0   : >> { %5340 = vst.msk [vmem:[%s9368_s18 + $0x18] sm:$0xff] %vm4504_vm4, %v4591_v10  ;;  %v4168_v20 = vadd.f32 %v4166_v16, %v4140_v41  ;;  %v4085_v23 = vadd.f32 %v4083_v27, %v4056_v19 }
 0x4a1   : >> { %5332 = vst.msk [vmem:[%s9368_s18 + $0x210] sm:$0xff] %vm3677_vm1, %v4568_v43  ;;  %v4107_v39 = vadd.f32 %v4105_v22, %v4079_v31 }
 0x4a2   : >> { %v4576_v1 = vadd.f32 %v4575_v24, %v4168_v20  ;;  %v4113_v61 = vadd.f32 %v4111_v13, %v4085_v23 }
 0x4a3   : >> { %v4135_v55 = vadd.f32 %v4133_v2, %v4107_v39 }
 0x4a4   : >> { %5337 = vst.msk [vmem:[%s9368_s18 + $0x310] sm:$0xff] %vm3677_vm1, %v4576_v1  ;;  %v4141_v38 = vadd.f32 %v4139_v6, %v4113_v61 }
 0x4a5   : >> { %v4163_v46 = vadd.f32 %v4161_v35, %v4135_v55 }
 0x4a6   : >> { %v4169_v28 = vadd.f32 %v4167_v30, %v4141_v38 }
 0x4a7   : >> { %v4569_v52 = vadd.f32 %v9104_v4, %v4163_v46 }
 0x4a8   : >> { %v4577_v37 = vadd.f32 %v4575_v24, %v4169_v28 }
 0x4a9   : >> { %5333 = vst.msk [vmem:[%s9368_s18 + $0x218] sm:$0xff] %vm3677_vm1, %v4569_v52 }
 0x4aa   : >> { %5338 = vst.msk [vmem:[%s9368_s18 + $0x318] sm:$0xff] %vm3677_vm1, %v4577_v37 }
 0x4ac   : >> { %v4589_v7 = vpop.permute.xlu2 %4588 }
 0x4ad   : >> { %5339 = vst.msk [vmem:[%s9368_s18 + $0x10] sm:$0xff] %vm4504_vm4, %v4589_v7 }
 0x4b0   : >> { %v4603_v21 = vpop.permute.xlu1 %4602 }
 0x4b1   : >> { %5342 = vst.msk [vmem:[%s9368_s18 + $0x110] sm:$0xff] %vm4504_vm4, %v4603_v21 }
 0x4b4   : >> { %v4605_v45 = vpop.permute.xlu2 %4604 }
 0x4b5   : >> { %5343 = vst.msk [vmem:[%s9368_s18 + $0x118] sm:$0xff] %vm4504_vm4, %v4605_v45 }
 0x4b6   : >> { %v4617_v40 = vpop.permute.xlu0 %4616 }
 0x4b7   : >> { %5345 = vst.msk [vmem:[%s9368_s18 + $0x210] sm:$0xff] %vm4504_vm4, %v4617_v40 }
 0x4b8   : >> { %v4619_v10 = vpop.permute.xlu1 %4618 }
 0x4b9   : >> { %5346 = vst.msk [vmem:[%s9368_s18 + $0x218] sm:$0xff] %vm4504_vm4, %v4619_v10 }
 0x4bc   : >> { %v4631_v4 = vpop.permute.xlu2 %4630  ;;  %3750 = sbr.rel (!%p3748_p9) target bundleno = 1014 (0x3f6), region = 156 }
 0x4bd   : >> { %5348 = vst.msk [vmem:[%s9368_s18 + $0x310] sm:$0xff] %vm4504_vm4, %v4631_v4 }
 0x4bf   : >> { %v4633_v34 = vpop.permute.xlu0 %4632 }
 0x4c0   : >> { %5349 = vst.msk [vmem:[%s9368_s18 + $0x318] sm:$0xff] %vm4504_vm4, %v4633_v34 }
 0x4c1 PF: > { %s18_s20 = sadd.s32 1, %s5561_s20   ;;  %s10308_s18 = smov %s5557_s19 }
 0x4c2   : > { %p15_p10 = scmp.ge.s32.totalorder %s18_s20, 4   ;;  %s10309_s19 = smov %s10311_s27 }
 0x4c4   :  { %17 = sbr.rel (!%p15_p10) target bundleno = 4 (0x4), region = 167 }
 0x4c9   :  { %4670 = vsyncpa [#allocation4], 1 }
 0x4ca   :  { %4672 = vsyncpa [#allocation4 + $0x1], 1 }
 0x4cb   :  { %4673 = vsyncpa [#allocation6], 1 }
 0x4cc   :  { %4674 = vsyncpa [#allocation9], 1 }

</bundles_post_ra>
